<compile_context>
chip_gen: v5e
topology: v5e:2x2
jax: 0.10.0
libtpu: 0.0.40
codegen_flags: <defaults>
</compile_context>

<pallas_src>
import functools

import jax
import jax.numpy as jnp
from jax.experimental import pallas as pl
from jax.experimental.pallas import tpu as pltpu


# ------------------------------ Pallas kernels ------------------------------

def _conv_kernel(x_ref, w_ref, b_ref, *rest, n_taps, kw, wp, mo,
                 relu_in, relu_out, has_skip):
    """Fused im2col conv GEMM on a flattened, zero-padded input.

    x_ref:  (1, Rp, Cin)  bf16, rows = flattened (H_pad * W_pad) (+ slack rows)
    w_ref:  (n_taps, Cin, Cout) bf16
    b_ref:  (1, Cout) f32
    skip_ref (optional): (1, Mo, Cout) residual (padded-width layout)
    o_ref:  (1, Mo, Cout)
    """
    if has_skip:
        skip_ref, o_ref = rest
    else:
        (o_ref,) = rest

    x = x_ref[0]                                   # (Rp, Cin)
    if relu_in:
        x = jnp.maximum(x, 0)                      # applied once, not per tap

    cout = o_ref.shape[-1]
    acc = jnp.zeros((mo, cout), jnp.float32)
    for t in range(n_taps):                        # static unroll over taps
        shift = (t // kw) * wp + (t % kw)
        xs = x[shift:shift + mo, :]                # row-shifted window
        acc = acc + jnp.dot(xs, w_ref[t], preferred_element_type=jnp.float32)

    acc = acc + b_ref[...]
    if has_skip:
        acc = acc + skip_ref[0].astype(jnp.float32)
    if relu_out:
        acc = jnp.maximum(acc, 0.0)
    o_ref[0] = acc.astype(o_ref.dtype)


def _conv_call(x_pad, w_taps, b2, kh, kw, relu_in=False, relu_out=False,
               skip=None, out_dtype=jnp.bfloat16):
    """'Valid' kh x kw stride-1 conv on an already zero-padded NHWC input."""
    N, Hp, Wp, Cin = x_pad.shape
    n_taps, _, Cout = w_taps.shape
    Ho, Wo = Hp - kh + 1, Wp - kw + 1
    Mo = Ho * Wp                        # rows computed (Wp - Wo junk cols kept)
    Rp = Hp * Wp + (kw - 1)             # slack rows keep all tap slices in-bounds

    xf = x_pad.reshape(N, Hp * Wp, Cin)
    if kw > 1:
        xf = jnp.pad(xf, ((0, 0), (0, kw - 1), (0, 0)))

    args = [xf, w_taps, b2]
    in_specs = [
        pl.BlockSpec((1, Rp, Cin), lambda n: (n, 0, 0)),
        pl.BlockSpec((n_taps, Cin, Cout), lambda n: (0, 0, 0)),
        pl.BlockSpec((1, Cout), lambda n: (0, 0)),
    ]
    if skip is not None:
        skip_f = jnp.pad(skip, ((0, 0), (0, 0), (0, Wp - Wo), (0, 0)))
        args.append(skip_f.reshape(N, Mo, Cout))
        in_specs.append(pl.BlockSpec((1, Mo, Cout), lambda n: (n, 0, 0)))

    kernel = functools.partial(
        _conv_kernel, n_taps=n_taps, kw=kw, wp=Wp, mo=Mo,
        relu_in=relu_in, relu_out=relu_out, has_skip=skip is not None)

    out = pl.pallas_call(
        kernel,
        out_shape=jax.ShapeDtypeStruct((N, Mo, Cout), out_dtype),
        grid_spec=pltpu.PrefetchScalarGridSpec(
            num_scalar_prefetch=0,
            grid=(N,),
            in_specs=in_specs,
            out_specs=pl.BlockSpec((1, Mo, Cout), lambda n: (n, 0, 0)),
        ),
        compiler_params=pltpu.CompilerParams(
            dimension_semantics=("parallel",),
            vmem_limit_bytes=32 * 1024 * 1024),
    )(*args)
    # Drop the junk columns that come from computing at padded width.
    return out.reshape(N, Ho, Wp, Cout)[:, :, :Wo, :]


_TM = 256   # row tile for the quantizer (M is padded up to a multiple of this)


def _quantize_kernel(f_ref, e_ref, esq_ref, et_ref, q_ref, d_ref):
    f = f_ref[...].astype(jnp.float32)                        # (TM, D)
    # |f|^2 term dropped: it does not change the argmin.
    dist = esq_ref[...] - 2.0 * jnp.dot(f, e_ref[...],
                                        preferred_element_type=jnp.float32)
    minval = jnp.min(dist, axis=1, keepdims=True)
    n_pad = dist.shape[1]
    lane = jax.lax.broadcasted_iota(jnp.int32, dist.shape, 1)
    first = jnp.min(jnp.where(dist <= minval, lane, n_pad), axis=1, keepdims=True)
    onehot = (lane == first).astype(jnp.float32)              # (TM, Ep)
    q = jnp.dot(onehot, et_ref[...], preferred_element_type=jnp.float32)
    d = q - f
    d_ref[...] = jnp.sum(d * d, axis=1, keepdims=True)        # per-row sq-err
    q_ref[...] = q.astype(q_ref.dtype)


def quantize(x, qp):
    """x: (N, h, w, D) channels-last.  Returns (quantized, diff[1])."""
    shape = x.shape
    D = shape[-1]
    M = x.size // D
    Mp = ((M + _TM - 1) // _TM) * _TM
    flat = x.reshape(M, D)
    if Mp > M:
        flat = jnp.pad(flat, ((0, Mp - M), (0, 0)))
    Ep = qp['embed_pad'].shape[1]

    q, rowsq = pl.pallas_call(
        _quantize_kernel,
        out_shape=(jax.ShapeDtypeStruct((Mp, D), x.dtype),
                   jax.ShapeDtypeStruct((Mp, 1), jnp.float32)),
        grid_spec=pltpu.PrefetchScalarGridSpec(
            num_scalar_prefetch=0,
            grid=(Mp // _TM,),
            in_specs=[
                pl.BlockSpec((_TM, D), lambda i: (i, 0)),
                pl.BlockSpec((D, Ep), lambda i: (0, 0)),
                pl.BlockSpec((1, Ep), lambda i: (0, 0)),
                pl.BlockSpec((Ep, D), lambda i: (0, 0)),
            ],
            out_specs=[pl.BlockSpec((_TM, D), lambda i: (i, 0)),
                       pl.BlockSpec((_TM, 1), lambda i: (i, 0))],
        ),
        compiler_params=pltpu.CompilerParams(
            dimension_semantics=("parallel",),
            vmem_limit_bytes=32 * 1024 * 1024),
    )(flat, qp['embed_pad'], qp['esq_pad'], qp['embedT_pad'])

    diff = jnp.sum(rowsq[:M]) / float(M * D)
    # TODO(synk): EMA codebook / cluster-size buffer updates (training-only) omitted.
    return q[:M].reshape(shape), diff[None]


# --------------------------- conv building blocks ---------------------------

def conv3x3(x, w, b, relu_in=False, relu_out=False, skip=None):
    xp = jnp.pad(x, ((0, 0), (1, 1), (1, 1), (0, 0)))
    return _conv_call(xp, w, b, 3, 3, relu_in, relu_out, skip)


def conv1x1(x, w, b, relu_in=False, relu_out=False, skip=None):
    return _conv_call(x, w, b, 1, 1, relu_in, relu_out, skip)


def conv4x4_s2(x, w, b, relu_out=False):
    # 4x4 stride-2 pad-1 conv == 2x2 stride-1 conv over the 4 input parity
    # phases stacked along channels (no strided slicing inside the kernel).
    xp = jnp.pad(x, ((0, 0), (1, 1), (1, 1), (0, 0)))
    phases = [xp[:, ry::2, rx::2, :] for ry in (0, 1) for rx in (0, 1)]
    xph = jnp.concatenate(phases, axis=-1)
    return _conv_call(xph, w, b, 2, 2, relu_out=relu_out)


def conv_transpose4x4_s2(x, w, b4, relu_in=False):
    # ConvTranspose2d(k=4, s=2, p=1) == a 3x3 stride-1 conv on the 1-padded
    # input producing all four output parity phases (channels = 4*Cout),
    # followed by a pixel-shuffle interleave.  No dilated zeros are multiplied.
    N, H, W, _ = x.shape
    cout = b4.shape[1] // 4
    xp = jnp.pad(x, ((0, 0), (1, 1), (1, 1), (0, 0)))
    y = _conv_call(xp, w, b4, 3, 3, relu_in=relu_in)          # (N, H, W, 4*Cout)
    y = y.reshape(N, H, W, 2, 2, cout)
    y = jnp.transpose(y, (0, 1, 3, 2, 4, 5)).reshape(N, 2 * H, 2 * W, cout)
    return y


# ------------------------------ model blocks -------------------------------

def res_block(x, p, trailing_relu):
    h = conv3x3(x, p['c1_w'], p['c1_b'], relu_in=True)          # ReLU -> 3x3
    # ReLU -> 1x1 with fused residual add (+ optional trailing ReLU of the
    # surrounding encoder/decoder block).
    return conv1x1(h, p['c2_w'], p['c2_b'], relu_in=True, skip=x,
                   relu_out=trailing_relu)


def encoder_s2(x, p):
    # Encoder(stride=2): Conv4x4/s2 -> ReLU -> Conv3x3 -> ResBlocks -> ReLU
    h = conv4x4_s2(x, p['c0_w'], p['c0_b'], relu_out=True)
    h = conv3x3(h, p['c1_w'], p['c1_b'])
    n = len(p['res'])
    for i, rp in enumerate(p['res']):
        h = res_block(h, rp, trailing_relu=(i == n - 1))
    if n == 0:
        h = jnp.maximum(h, 0)
    return h


def decoder_s2(x, p):
    # Decoder(stride=2): Conv3x3 -> ResBlocks -> ReLU -> ConvTranspose4x4/s2
    h = conv3x3(x, p['c0_w'], p['c0_b'])
    n = len(p['res'])
    for i, rp in enumerate(p['res']):
        h = res_block(h, rp, trailing_relu=(i == n - 1))
    if n == 0:
        h = jnp.maximum(h, 0)
    return conv_transpose4x4_s2(h, p['ct_w'], p['ct_b'])


def vqvae2_forward(params, x_nchw):
    x = jnp.transpose(x_nchw, (0, 2, 3, 1)).astype(jnp.bfloat16)   # NCHW -> NHWC

    # ---- encode ----
    enc_b = encoder_s2(x, params['enc_b'])                  # (N, H/2, W/2, C)
    enc_t = encoder_s2(enc_b, params['enc_t'])              # (N, H/4, W/4, C)

    qt_in = conv1x1(enc_t, params['qconv_t_w'], params['qconv_t_b'])
    quant_t, diff_t = quantize(qt_in, params['quant_t'])

    dec_t = decoder_s2(quant_t, params['dec_t'])            # (N, H/2, W/2, D)
    cat_b = jnp.concatenate([dec_t, enc_b], axis=-1)
    qb_in = conv1x1(cat_b, params['qconv_b_w'], params['qconv_b_b'])
    quant_b, diff_b = quantize(qb_in, params['quant_b'])

    # ---- decode ----
    up_t = conv_transpose4x4_s2(quant_t, params['up_w'], params['up_b'])
    quant = jnp.concatenate([up_t, quant_b], axis=-1)
    dec = decoder_s2(quant, params['dec'])                  # (N, H, W, in_channel)

    dec = jnp.transpose(dec, (0, 3, 1, 2)).astype(jnp.float32)
    return dec, (diff_t + diff_b).astype(jnp.float32)


# ------------------ parameter construction & pre-transforms -----------------

def _rand_conv(key, cin, cout, k, scale=0.05):
    k1, k2 = jax.random.split(key)
    return (jax.random.normal(k1, (cout, cin, k, k), jnp.float32) * scale,
            jax.random.normal(k2, (cout,), jnp.float32) * scale)


def _rand_convT(key, cin, cout, k, scale=0.05):
    k1, k2 = jax.random.split(key)
    return (jax.random.normal(k1, (cin, cout, k, k), jnp.float32) * scale,
            jax.random.normal(k2, (cout,), jnp.float32) * scale)


def _prep_conv(w, b):
    # PyTorch (Cout, Cin, kh, kw) -> (kh*kw taps, Cin, Cout) bf16, bias (1,Cout) f32
    cout, cin, kh, kw = w.shape
    wt = jnp.transpose(w, (2, 3, 1, 0)).reshape(kh * kw, cin, cout)
    return wt.astype(jnp.bfloat16), b.reshape(1, cout).astype(jnp.float32)


def _prep_conv4x4_s2(w, b):
    # 4x4 stride-2 conv -> 2x2 taps over 4 phase-stacked input channel groups.
    cout, cin, _, _ = w.shape
    wt = jnp.transpose(w, (2, 3, 1, 0))            # (ky, kx, ci, co)
    wt = wt.reshape(2, 2, 2, 2, cin, cout)         # (a, ry, b, rx, ci, co)
    wt = jnp.transpose(wt, (0, 2, 1, 3, 4, 5))     # (a, b, ry, rx, ci, co)
    wt = wt.reshape(4, 4 * cin, cout)
    return wt.astype(jnp.bfloat16), b.reshape(1, cout).astype(jnp.float32)


def _prep_convT4x4_s2(w, b):
    # ConvTranspose (Cin, Cout, 4, 4) -> merged 3x3 taps producing 4*Cout phases.
    cin, cout, _, _ = w.shape
    wf = jnp.transpose(w[:, :, ::-1, ::-1], (2, 3, 0, 1))   # flipped (ky,kx,ci,co)
    w3 = jnp.zeros((3, 3, cin, 4, cout), jnp.float32)
    for ty in range(3):
        for tx in range(3):
            for py in range(2):
                for px in range(2):
                    ay, ax = ty - py, tx - px
                    if 0 <= ay <= 1 and 0 <= ax <= 1:
                        w3 = w3.at[ty, tx, :, py * 2 + px, :].set(
                            wf[2 * ay + py, 2 * ax + px])
    w3 = w3.reshape(9, cin, 4 * cout)
    b4 = jnp.tile(b, 4).reshape(1, 4 * cout)
    return w3.astype(jnp.bfloat16), b4.astype(jnp.float32)


def _prep_codebook(embed):
    d, e = embed.shape
    ep = ((e + 127) // 128) * 128          # pad codebook to full 128-lane width
    esq = jnp.sum(embed * embed, axis=0, keepdims=True)
    return {
        'embed_pad': jnp.pad(embed, ((0, 0), (0, ep - e))).astype(jnp.float32),
        'esq_pad': jnp.pad(esq, ((0, 0), (0, ep - e)),
                           constant_values=1e30).astype(jnp.float32),
        'embedT_pad': jnp.pad(embed.T, ((0, ep - e), (0, 0))).astype(jnp.float32),
    }


def _res_p(key, ch, res_ch):
    k1, k2 = jax.random.split(key)
    w1, b1 = _rand_conv(k1, ch, res_ch, 3)
    w2, b2 = _rand_conv(k2, res_ch, ch, 1)
    c1w, c1b = _prep_conv(w1, b1)
    c2w, c2b = _prep_conv(w2, b2)
    return {'c1_w': c1w, 'c1_b': c1b, 'c2_w': c2w, 'c2_b': c2b}


def _encoder_p(key, cin, ch, n_res, res_ch):
    keys = jax.random.split(key, 2 + n_res)
    w0, b0 = _rand_conv(keys[0], cin, ch // 2, 4)
    w1, b1 = _rand_conv(keys[1], ch // 2, ch, 3)
    c0w, c0b = _prep_conv4x4_s2(w0, b0)
    c1w, c1b = _prep_conv(w1, b1)
    return {'c0_w': c0w, 'c0_b': c0b, 'c1_w': c1w, 'c1_b': c1b,
            'res': [_res_p(keys[2 + i], ch, res_ch) for i in range(n_res)]}


def _decoder_p(key, cin, cout, ch, n_res, res_ch):
    keys = jax.random.split(key, 2 + n_res)
    w0, b0 = _rand_conv(keys[0], cin, ch, 3)
    wt, bt = _rand_convT(keys[1], ch, cout, 4)
    c0w, c0b = _prep_conv(w0, b0)
    ctw, ctb = _prep_convT4x4_s2(wt, bt)
    return {'c0_w': c0w, 'c0_b': c0b, 'ct_w': ctw, 'ct_b': ctb,
            'res': [_res_p(keys[2 + i], ch, res_ch) for i in range(n_res)]}


def init_params(key, in_channel=3, channel=32, n_res_block=2, n_res_channel=8,
                embed_dim=16, n_embed=64):
    ks = jax.random.split(key, 9)
    p = {}
    p['enc_b'] = _encoder_p(ks[0], in_channel, channel, n_res_block, n_res_channel)
    p['enc_t'] = _encoder_p(ks[1], channel, channel, n_res_block, n_res_channel)
    wqt, bqt = _rand_conv(ks[2], channel, embed_dim, 1)
    p['qconv_t_w'], p['qconv_t_b'] = _prep_conv(wqt, bqt)
    p['quant_t'] = _prep_codebook(
        jax.random.normal(ks[3], (embed_dim, n_embed), jnp.float32))
    p['dec_t'] = _decoder_p(ks[4], embed_dim, embed_dim, channel,
                            n_res_block, n_res_channel)
    wqb, bqb = _rand_conv(ks[5], embed_dim + channel, embed_dim, 1)
    p['qconv_b_w'], p['qconv_b_b'] = _prep_conv(wqb, bqb)
    p['quant_b'] = _prep_codebook(
        jax.random.normal(ks[6], (embed_dim, n_embed), jnp.float32))
    wu, bu = _rand_convT(ks[7], embed_dim, embed_dim, 4)
    p['up_w'], p['up_b'] = _prep_convT4x4_s2(wu, bu)
    p['dec'] = _decoder_p(ks[8], embed_dim + embed_dim, in_channel, channel,
                          n_res_block, n_res_channel)
    return p


# ----------------------------------- main -----------------------------------

if __name__ == "__main__":
    key = jax.random.PRNGKey(0)
    pkey, xkey = jax.random.split(key)
    params = init_params(pkey)            # weights pre-transformed once, here
    x = jax.random.normal(xkey, (2, 3, 16, 16), jnp.float32)   # NCHW input

    dec, diff = jax.jit(vqvae2_forward)(params, x)
    jax.block_until_ready((dec, diff))

    assert dec.shape == (2, 3, 16, 16), dec.shape
    assert diff.shape == (1,), diff.shape
    assert bool(jnp.all(jnp.isfinite(dec))) and bool(jnp.isfinite(diff[0]))
    print("KERNEL_OK")
</pallas_src>

<mosaic_0001>
module attributes {stable_mosaic.version = 11 : i64} {
  func.func @_conv_kernel(%arg0: i32, %arg1: memref<1x82x12xbf16, #tpu.memory_space<vmem>>, %arg2: memref<4x12x16xbf16, #tpu.memory_space<vmem>>, %arg3: memref<1x16xf32, #tpu.memory_space<vmem>>, %arg4: memref<1x72x16xbf16, #tpu.memory_space<vmem>>) attributes {dimension_semantics = [#tpu.dimension_semantics<parallel>], iteration_bounds = array<i64: 2>, scalar_prefetch = 0 : i64, scratch_operands = 0 : i64, tpu.core_type = #tpu.core_type<tc>, window_params = [{transform_indices = @transform_0, window_bounds = array<i64: 1, 82, 12>}, {pipeline_mode = #tpu.pipeline_mode<synchronous>, transform_indices = @transform_1, window_bounds = array<i64: 4, 12, 16>}, {pipeline_mode = #tpu.pipeline_mode<synchronous>, transform_indices = @transform_2, window_bounds = array<i64: 1, 16>}, {transform_indices = @transform_3, window_bounds = array<i64: 1, 72, 16>}]} {
    %c0 = arith.constant 0 : index
    %c0_0 = arith.constant 0 : index
    %c0_1 = arith.constant 0 : index
    %0 = vector.load %arg1[%c0, %c0_0, %c0_1] : memref<1x82x12xbf16, #tpu.memory_space<vmem>>, vector<1x82x12xbf16>
    %1 = vector.shape_cast %0 : vector<1x82x12xbf16> to vector<82x12xbf16>
    %cst = arith.constant 0.000000e+00 : f32
    %2 = vector.broadcast %cst : f32 to vector<72x16xf32>
    %3 = vector.extract_strided_slice %1 {offsets = [0, 0], sizes = [72, 12], strides = [1, 1]} : vector<82x12xbf16> to vector<72x12xbf16>
    %c0_2 = arith.constant 0 : index
    %c0_3 = arith.constant 0 : index
    %c0_4 = arith.constant 0 : index
    %4 = vector.load %arg2[%c0_2, %c0_3, %c0_4] : memref<4x12x16xbf16, #tpu.memory_space<vmem>>, vector<1x12x16xbf16>
    %5 = vector.shape_cast %4 : vector<1x12x16xbf16> to vector<12x16xbf16>
    %cst_5 = arith.constant dense<0.000000e+00> : vector<72x16xf32>
    %6 = tpu.matmul %3, %5, %cst_5 {dimension_numbers = #tpu.dot_dimension_numbers<[1], [0], [0], [1], [0, 0, 1, 1], [], []>} : vector<72x12xbf16>, vector<12x16xbf16>, vector<72x16xf32> -> vector<72x16xf32>
    %7 = arith.addf %2, %6 : vector<72x16xf32>
    %8 = vector.extract_strided_slice %1 {offsets = [1, 0], sizes = [72, 12], strides = [1, 1]} : vector<82x12xbf16> to vector<72x12xbf16>
    %c1 = arith.constant 1 : index
    %c0_6 = arith.constant 0 : index
    %c0_7 = arith.constant 0 : index
    %9 = vector.load %arg2[%c1, %c0_6, %c0_7] : memref<4x12x16xbf16, #tpu.memory_space<vmem>>, vector<1x12x16xbf16>
    %10 = vector.shape_cast %9 : vector<1x12x16xbf16> to vector<12x16xbf16>
    %cst_8 = arith.constant dense<0.000000e+00> : vector<72x16xf32>
    %11 = tpu.matmul %8, %10, %cst_8 {dimension_numbers = #tpu.dot_dimension_numbers<[1], [0], [0], [1], [0, 0, 1, 1], [], []>} : vector<72x12xbf16>, vector<12x16xbf16>, vector<72x16xf32> -> vector<72x16xf32>
    %12 = arith.addf %7, %11 : vector<72x16xf32>
    %13 = vector.extract_strided_slice %1 {offsets = [9, 0], sizes = [72, 12], strides = [1, 1]} : vector<82x12xbf16> to vector<72x12xbf16>
    %c2 = arith.constant 2 : index
    %c0_9 = arith.constant 0 : index
    %c0_10 = arith.constant 0 : index
    %14 = vector.load %arg2[%c2, %c0_9, %c0_10] : memref<4x12x16xbf16, #tpu.memory_space<vmem>>, vector<1x12x16xbf16>
    %15 = vector.shape_cast %14 : vector<1x12x16xbf16> to vector<12x16xbf16>
    %cst_11 = arith.constant dense<0.000000e+00> : vector<72x16xf32>
    %16 = tpu.matmul %13, %15, %cst_11 {dimension_numbers = #tpu.dot_dimension_numbers<[1], [0], [0], [1], [0, 0, 1, 1], [], []>} : vector<72x12xbf16>, vector<12x16xbf16>, vector<72x16xf32> -> vector<72x16xf32>
    %17 = arith.addf %12, %16 : vector<72x16xf32>
    %18 = vector.extract_strided_slice %1 {offsets = [10, 0], sizes = [72, 12], strides = [1, 1]} : vector<82x12xbf16> to vector<72x12xbf16>
    %c3 = arith.constant 3 : index
    %c0_12 = arith.constant 0 : index
    %c0_13 = arith.constant 0 : index
    %19 = vector.load %arg2[%c3, %c0_12, %c0_13] : memref<4x12x16xbf16, #tpu.memory_space<vmem>>, vector<1x12x16xbf16>
    %20 = vector.shape_cast %19 : vector<1x12x16xbf16> to vector<12x16xbf16>
    %cst_14 = arith.constant dense<0.000000e+00> : vector<72x16xf32>
    %21 = tpu.matmul %18, %20, %cst_14 {dimension_numbers = #tpu.dot_dimension_numbers<[1], [0], [0], [1], [0, 0, 1, 1], [], []>} : vector<72x12xbf16>, vector<12x16xbf16>, vector<72x16xf32> -> vector<72x16xf32>
    %22 = arith.addf %17, %21 : vector<72x16xf32>
    %c0_15 = arith.constant 0 : index
    %c0_16 = arith.constant 0 : index
    %23 = vector.load %arg3[%c0_15, %c0_16] : memref<1x16xf32, #tpu.memory_space<vmem>>, vector<1x16xf32>
    %24 = vector.broadcast %23 : vector<1x16xf32> to vector<72x16xf32>
    %25 = arith.addf %22, %24 : vector<72x16xf32>
    %cst_17 = arith.constant 0.000000e+00 : f32
    %26 = vector.broadcast %cst_17 : f32 to vector<72x16xf32>
    %27 = arith.maximumf %25, %26 : vector<72x16xf32>
    %28 = arith.truncf %27 : vector<72x16xf32> to vector<72x16xbf16>
    %c0_18 = arith.constant 0 : index
    %c0_19 = arith.constant 0 : index
    %c0_20 = arith.constant 0 : index
    %29 = vector.load %arg4[%c0_18, %c0_19, %c0_20] : memref<1x72x16xbf16, #tpu.memory_space<vmem>>, vector<1x72x16xbf16>
    %30 = vector.shape_cast %29 : vector<1x72x16xbf16> to vector<72x16xbf16>
    %31 = vector.shape_cast %28 : vector<72x16xbf16> to vector<1x72x16xbf16>
    tpu.vector_store %arg4[%c0_18, %c0_19, %c0_20], %31 {strides = array<i32>} : memref<1x72x16xbf16, #tpu.memory_space<vmem>>, vector<1x72x16xbf16>,
    return
  }
  func.func @transform_0(%arg0: i32) -> (i32, i32, i32) {
    %c0_i32 = arith.constant 0 : i32
    %c0_i32_0 = arith.constant 0 : i32
    %c0_i32_1 = arith.constant 0 : i32
    return %arg0, %c0_i32, %c0_i32_0 : i32, i32, i32
  }
  func.func @transform_1(%arg0: i32) -> (i32, i32, i32) {
    %c0_i32 = arith.constant 0 : i32
    %c0_i32_0 = arith.constant 0 : i32
    %c0_i32_1 = arith.constant 0 : i32
    %c0_i32_2 = arith.constant 0 : i32
    return %c0_i32, %c0_i32_0, %c0_i32_1 : i32, i32, i32
  }
  func.func @transform_2(%arg0: i32) -> (i32, i32) {
    %c0_i32 = arith.constant 0 : i32
    %c0_i32_0 = arith.constant 0 : i32
    %c0_i32_1 = arith.constant 0 : i32
    return %c0_i32, %c0_i32_0 : i32, i32
  }
  func.func @transform_3(%arg0: i32) -> (i32, i32, i32) {
    %c0_i32 = arith.constant 0 : i32
    %c0_i32_0 = arith.constant 0 : i32
    %c0_i32_1 = arith.constant 0 : i32
    return %arg0, %c0_i32, %c0_i32_0 : i32, i32, i32
  }
}

module attributes {stable_mosaic.version = 11 : i64} {
  func.func @_conv_kernel(%arg0: i32, %arg1: memref<1x102x16xbf16, #tpu.memory_space<vmem>>, %arg2: memref<9x16x32xbf16, #tpu.memory_space<vmem>>, %arg3: memref<1x32xf32, #tpu.memory_space<vmem>>, %arg4: memref<1x80x32xbf16, #tpu.memory_space<vmem>>) attributes {dimension_semantics = [#tpu.dimension_semantics<parallel>], iteration_bounds = array<i64: 2>, scalar_prefetch = 0 : i64, scratch_operands = 0 : i64, tpu.core_type = #tpu.core_type<tc>, window_params = [{transform_indices = @transform_0, window_bounds = array<i64: 1, 102, 16>}, {pipeline_mode = #tpu.pipeline_mode<synchronous>, transform_indices = @transform_1, window_bounds = array<i64: 9, 16, 32>}, {pipeline_mode = #tpu.pipeline_mode<synchronous>, transform_indices = @transform_2, window_bounds = array<i64: 1, 32>}, {transform_indices = @transform_3, window_bounds = array<i64: 1, 80, 32>}]} {
    %c0 = arith.constant 0 : index
    %c0_0 = arith.constant 0 : index
    %c0_1 = arith.constant 0 : index
    %0 = vector.load %arg1[%c0, %c0_0, %c0_1] : memref<1x102x16xbf16, #tpu.memory_space<vmem>>, vector<1x102x16xbf16>
    %1 = vector.shape_cast %0 : vector<1x102x16xbf16> to vector<102x16xbf16>
    %cst = arith.constant 0.000000e+00 : f32
    %2 = vector.broadcast %cst : f32 to vector<80x32xf32>
    %3 = vector.extract_strided_slice %1 {offsets = [0, 0], sizes = [80, 16], strides = [1, 1]} : vector<102x16xbf16> to vector<80x16xbf16>
    %c0_2 = arith.constant 0 : index
    %c0_3 = arith.constant 0 : index
    %c0_4 = arith.constant 0 : index
    %4 = vector.load %arg2[%c0_2, %c0_3, %c0_4] : memref<9x16x32xbf16, #tpu.memory_space<vmem>>, vector<1x16x32xbf16>
    %5 = vector.shape_cast %4 : vector<1x16x32xbf16> to vector<16x32xbf16>
    %cst_5 = arith.constant dense<0.000000e+00> : vector<80x32xf32>
    %6 = tpu.matmul %3, %5, %cst_5 {dimension_numbers = #tpu.dot_dimension_numbers<[1], [0], [0], [1], [0, 0, 1, 1], [], []>} : vector<80x16xbf16>, vector<16x32xbf16>, vector<80x32xf32> -> vector<80x32xf32>
    %7 = arith.addf %2, %6 : vector<80x32xf32>
    %8 = vector.extract_strided_slice %1 {offsets = [1, 0], sizes = [80, 16], strides = [1, 1]} : vector<102x16xbf16> to vector<80x16xbf16>
    %c1 = arith.constant 1 : index
    %c0_6 = arith.constant 0 : index
    %c0_7 = arith.constant 0 : index
    %9 = vector.load %arg2[%c1, %c0_6, %c0_7] : memref<9x16x32xbf16, #tpu.memory_space<vmem>>, vector<1x16x32xbf16>
    %10 = vector.shape_cast %9 : vector<1x16x32xbf16> to vector<16x32xbf16>
    %cst_8 = arith.constant dense<0.000000e+00> : vector<80x32xf32>
    %11 = tpu.matmul %8, %10, %cst_8 {dimension_numbers = #tpu.dot_dimension_numbers<[1], [0], [0], [1], [0, 0, 1, 1], [], []>} : vector<80x16xbf16>, vector<16x32xbf16>, vector<80x32xf32> -> vector<80x32xf32>
    %12 = arith.addf %7, %11 : vector<80x32xf32>
    %13 = vector.extract_strided_slice %1 {offsets = [2, 0], sizes = [80, 16], strides = [1, 1]} : vector<102x16xbf16> to vector<80x16xbf16>
    %c2 = arith.constant 2 : index
    %c0_9 = arith.constant 0 : index
    %c0_10 = arith.constant 0 : index
    %14 = vector.load %arg2[%c2, %c0_9, %c0_10] : memref<9x16x32xbf16, #tpu.memory_space<vmem>>, vector<1x16x32xbf16>
    %15 = vector.shape_cast %14 : vector<1x16x32xbf16> to vector<16x32xbf16>
    %cst_11 = arith.constant dense<0.000000e+00> : vector<80x32xf32>
    %16 = tpu.matmul %13, %15, %cst_11 {dimension_numbers = #tpu.dot_dimension_numbers<[1], [0], [0], [1], [0, 0, 1, 1], [], []>} : vector<80x16xbf16>, vector<16x32xbf16>, vector<80x32xf32> -> vector<80x32xf32>
    %17 = arith.addf %12, %16 : vector<80x32xf32>
    %18 = vector.extract_strided_slice %1 {offsets = [10, 0], sizes = [80, 16], strides = [1, 1]} : vector<102x16xbf16> to vector<80x16xbf16>
    %c3 = arith.constant 3 : index
    %c0_12 = arith.constant 0 : index
    %c0_13 = arith.constant 0 : index
    %19 = vector.load %arg2[%c3, %c0_12, %c0_13] : memref<9x16x32xbf16, #tpu.memory_space<vmem>>, vector<1x16x32xbf16>
    %20 = vector.shape_cast %19 : vector<1x16x32xbf16> to vector<16x32xbf16>
    %cst_14 = arith.constant dense<0.000000e+00> : vector<80x32xf32>
    %21 = tpu.matmul %18, %20, %cst_14 {dimension_numbers = #tpu.dot_dimension_numbers<[1], [0], [0], [1], [0, 0, 1, 1], [], []>} : vector<80x16xbf16>, vector<16x32xbf16>, vector<80x32xf32> -> vector<80x32xf32>
    %22 = arith.addf %17, %21 : vector<80x32xf32>
    %23 = vector.extract_strided_slice %1 {offsets = [11, 0], sizes = [80, 16], strides = [1, 1]} : vector<102x16xbf16> to vector<80x16xbf16>
    %c4 = arith.constant 4 : index
    %c0_15 = arith.constant 0 : index
    %c0_16 = arith.constant 0 : index
    %24 = vector.load %arg2[%c4, %c0_15, %c0_16] : memref<9x16x32xbf16, #tpu.memory_space<vmem>>, vector<1x16x32xbf16>
    %25 = vector.shape_cast %24 : vector<1x16x32xbf16> to vector<16x32xbf16>
    %cst_17 = arith.constant dense<0.000000e+00> : vector<80x32xf32>
    %26 = tpu.matmul %23, %25, %cst_17 {dimension_numbers = #tpu.dot_dimension_numbers<[1], [0], [0], [1], [0, 0, 1, 1], [], []>} : vector<80x16xbf16>, vector<16x32xbf16>, vector<80x32xf32> -> vector<80x32xf32>
    %27 = arith.addf %22, %26 : vector<80x32xf32>
    %28 = vector.extract_strided_slice %1 {offsets = [12, 0], sizes = [80, 16], strides = [1, 1]} : vector<102x16xbf16> to vector<80x16xbf16>
    %c5 = arith.constant 5 : index
    %c0_18 = arith.constant 0 : index
    %c0_19 = arith.constant 0 : index
    %29 = vector.load %arg2[%c5, %c0_18, %c0_19] : memref<9x16x32xbf16, #tpu.memory_space<vmem>>, vector<1x16x32xbf16>
    %30 = vector.shape_cast %29 : vector<1x16x32xbf16> to vector<16x32xbf16>
    %cst_20 = arith.constant dense<0.000000e+00> : vector<80x32xf32>
    %31 = tpu.matmul %28, %30, %cst_20 {dimension_numbers = #tpu.dot_dimension_numbers<[1], [0], [0], [1], [0, 0, 1, 1], [], []>} : vector<80x16xbf16>, vector<16x32xbf16>, vector<80x32xf32> -> vector<80x32xf32>
    %32 = arith.addf %27, %31 : vector<80x32xf32>
    %33 = vector.extract_strided_slice %1 {offsets = [20, 0], sizes = [80, 16], strides = [1, 1]} : vector<102x16xbf16> to vector<80x16xbf16>
    %c6 = arith.constant 6 : index
    %c0_21 = arith.constant 0 : index
    %c0_22 = arith.constant 0 : index
    %34 = vector.load %arg2[%c6, %c0_21, %c0_22] : memref<9x16x32xbf16, #tpu.memory_space<vmem>>, vector<1x16x32xbf16>
    %35 = vector.shape_cast %34 : vector<1x16x32xbf16> to vector<16x32xbf16>
    %cst_23 = arith.constant dense<0.000000e+00> : vector<80x32xf32>
    %36 = tpu.matmul %33, %35, %cst_23 {dimension_numbers = #tpu.dot_dimension_numbers<[1], [0], [0], [1], [0, 0, 1, 1], [], []>} : vector<80x16xbf16>, vector<16x32xbf16>, vector<80x32xf32> -> vector<80x32xf32>
    %37 = arith.addf %32, %36 : vector<80x32xf32>
    %38 = vector.extract_strided_slice %1 {offsets = [21, 0], sizes = [80, 16], strides = [1, 1]} : vector<102x16xbf16> to vector<80x16xbf16>
    %c7 = arith.constant 7 : index
    %c0_24 = arith.constant 0 : index
    %c0_25 = arith.constant 0 : index
    %39 = vector.load %arg2[%c7, %c0_24, %c0_25] : memref<9x16x32xbf16, #tpu.memory_space<vmem>>, vector<1x16x32xbf16>
    %40 = vector.shape_cast %39 : vector<1x16x32xbf16> to vector<16x32xbf16>
    %cst_26 = arith.constant dense<0.000000e+00> : vector<80x32xf32>
    %41 = tpu.matmul %38, %40, %cst_26 {dimension_numbers = #tpu.dot_dimension_numbers<[1], [0], [0], [1], [0, 0, 1, 1], [], []>} : vector<80x16xbf16>, vector<16x32xbf16>, vector<80x32xf32> -> vector<80x32xf32>
    %42 = arith.addf %37, %41 : vector<80x32xf32>
    %43 = vector.extract_strided_slice %1 {offsets = [22, 0], sizes = [80, 16], strides = [1, 1]} : vector<102x16xbf16> to vector<80x16xbf16>
    %c8 = arith.constant 8 : index
    %c0_27 = arith.constant 0 : index
    %c0_28 = arith.constant 0 : index
    %44 = vector.load %arg2[%c8, %c0_27, %c0_28] : memref<9x16x32xbf16, #tpu.memory_space<vmem>>, vector<1x16x32xbf16>
    %45 = vector.shape_cast %44 : vector<1x16x32xbf16> to vector<16x32xbf16>
    %cst_29 = arith.constant dense<0.000000e+00> : vector<80x32xf32>
    %46 = tpu.matmul %43, %45, %cst_29 {dimension_numbers = #tpu.dot_dimension_numbers<[1], [0], [0], [1], [0, 0, 1, 1], [], []>} : vector<80x16xbf16>, vector<16x32xbf16>, vector<80x32xf32> -> vector<80x32xf32>
    %47 = arith.addf %42, %46 : vector<80x32xf32>
    %c0_30 = arith.constant 0 : index
    %c0_31 = arith.constant 0 : index
    %48 = vector.load %arg3[%c0_30, %c0_31] : memref<1x32xf32, #tpu.memory_space<vmem>>, vector<1x32xf32>
    %49 = vector.broadcast %48 : vector<1x32xf32> to vector<80x32xf32>
    %50 = arith.addf %47, %49 : vector<80x32xf32>
    %51 = arith.truncf %50 : vector<80x32xf32> to vector<80x32xbf16>
    %c0_32 = arith.constant 0 : index
    %c0_33 = arith.constant 0 : index
    %c0_34 = arith.constant 0 : index
    %52 = vector.load %arg4[%c0_32, %c0_33, %c0_34] : memref<1x80x32xbf16, #tpu.memory_space<vmem>>, vector<1x80x32xbf16>
    %53 = vector.shape_cast %52 : vector<1x80x32xbf16> to vector<80x32xbf16>
    %54 = vector.shape_cast %51 : vector<80x32xbf16> to vector<1x80x32xbf16>
    tpu.vector_store %arg4[%c0_32, %c0_33, %c0_34], %54 {strides = array<i32>} : memref<1x80x32xbf16, #tpu.memory_space<vmem>>, vector<1x80x32xbf16>,
    return
  }
  func.func @transform_0(%arg0: i32) -> (i32, i32, i32) {
    %c0_i32 = arith.constant 0 : i32
    %c0_i32_0 = arith.constant 0 : i32
    %c0_i32_1 = arith.constant 0 : i32
    return %arg0, %c0_i32, %c0_i32_0 : i32, i32, i32
  }
  func.func @transform_1(%arg0: i32) -> (i32, i32, i32) {
    %c0_i32 = arith.constant 0 : i32
    %c0_i32_0 = arith.constant 0 : i32
    %c0_i32_1 = arith.constant 0 : i32
    %c0_i32_2 = arith.constant 0 : i32
    return %c0_i32, %c0_i32_0, %c0_i32_1 : i32, i32, i32
  }
  func.func @transform_2(%arg0: i32) -> (i32, i32) {
    %c0_i32 = arith.constant 0 : i32
    %c0_i32_0 = arith.constant 0 : i32
    %c0_i32_1 = arith.constant 0 : i32
    return %c0_i32, %c0_i32_0 : i32, i32
  }
  func.func @transform_3(%arg0: i32) -> (i32, i32, i32) {
    %c0_i32 = arith.constant 0 : i32
    %c0_i32_0 = arith.constant 0 : i32
    %c0_i32_1 = arith.constant 0 : i32
    return %arg0, %c0_i32, %c0_i32_0 : i32, i32, i32
  }
}

module attributes {stable_mosaic.version = 11 : i64} {
  func.func @_conv_kernel(%arg0: i32, %arg1: memref<1x102x32xbf16, #tpu.memory_space<vmem>>, %arg2: memref<9x32x8xbf16, #tpu.memory_space<vmem>>, %arg3: memref<1x8xf32, #tpu.memory_space<vmem>>, %arg4: memref<1x80x8xbf16, #tpu.memory_space<vmem>>) attributes {dimension_semantics = [#tpu.dimension_semantics<parallel>], iteration_bounds = array<i64: 2>, scalar_prefetch = 0 : i64, scratch_operands = 0 : i64, tpu.core_type = #tpu.core_type<tc>, window_params = [{transform_indices = @transform_0, window_bounds = array<i64: 1, 102, 32>}, {pipeline_mode = #tpu.pipeline_mode<synchronous>, transform_indices = @transform_1, window_bounds = array<i64: 9, 32, 8>}, {pipeline_mode = #tpu.pipeline_mode<synchronous>, transform_indices = @transform_2, window_bounds = array<i64: 1, 8>}, {transform_indices = @transform_3, window_bounds = array<i64: 1, 80, 8>}]} {
    %c0 = arith.constant 0 : index
    %c0_0 = arith.constant 0 : index
    %c0_1 = arith.constant 0 : index
    %0 = vector.load %arg1[%c0, %c0_0, %c0_1] : memref<1x102x32xbf16, #tpu.memory_space<vmem>>, vector<1x102x32xbf16>
    %1 = vector.shape_cast %0 : vector<1x102x32xbf16> to vector<102x32xbf16>
    %cst = arith.constant 0.000000e+00 : bf16
    %2 = vector.broadcast %cst : bf16 to vector<102x32xbf16>
    %3 = arith.maximumf %1, %2 : vector<102x32xbf16>
    %cst_2 = arith.constant 0.000000e+00 : f32
    %4 = vector.broadcast %cst_2 : f32 to vector<80x8xf32>
    %5 = vector.extract_strided_slice %3 {offsets = [0, 0], sizes = [80, 32], strides = [1, 1]} : vector<102x32xbf16> to vector<80x32xbf16>
    %c0_3 = arith.constant 0 : index
    %c0_4 = arith.constant 0 : index
    %c0_5 = arith.constant 0 : index
    %6 = vector.load %arg2[%c0_3, %c0_4, %c0_5] : memref<9x32x8xbf16, #tpu.memory_space<vmem>>, vector<1x32x8xbf16>
    %7 = vector.shape_cast %6 : vector<1x32x8xbf16> to vector<32x8xbf16>
    %cst_6 = arith.constant dense<0.000000e+00> : vector<80x8xf32>
    %8 = tpu.matmul %5, %7, %cst_6 {dimension_numbers = #tpu.dot_dimension_numbers<[1], [0], [0], [1], [0, 0, 1, 1], [], []>} : vector<80x32xbf16>, vector<32x8xbf16>, vector<80x8xf32> -> vector<80x8xf32>
    %9 = arith.addf %4, %8 : vector<80x8xf32>
    %10 = vector.extract_strided_slice %3 {offsets = [1, 0], sizes = [80, 32], strides = [1, 1]} : vector<102x32xbf16> to vector<80x32xbf16>
    %c1 = arith.constant 1 : index
    %c0_7 = arith.constant 0 : index
    %c0_8 = arith.constant 0 : index
    %11 = vector.load %arg2[%c1, %c0_7, %c0_8] : memref<9x32x8xbf16, #tpu.memory_space<vmem>>, vector<1x32x8xbf16>
    %12 = vector.shape_cast %11 : vector<1x32x8xbf16> to vector<32x8xbf16>
    %cst_9 = arith.constant dense<0.000000e+00> : vector<80x8xf32>
    %13 = tpu.matmul %10, %12, %cst_9 {dimension_numbers = #tpu.dot_dimension_numbers<[1], [0], [0], [1], [0, 0, 1, 1], [], []>} : vector<80x32xbf16>, vector<32x8xbf16>, vector<80x8xf32> -> vector<80x8xf32>
    %14 = arith.addf %9, %13 : vector<80x8xf32>
    %15 = vector.extract_strided_slice %3 {offsets = [2, 0], sizes = [80, 32], strides = [1, 1]} : vector<102x32xbf16> to vector<80x32xbf16>
    %c2 = arith.constant 2 : index
    %c0_10 = arith.constant 0 : index
    %c0_11 = arith.constant 0 : index
    %16 = vector.load %arg2[%c2, %c0_10, %c0_11] : memref<9x32x8xbf16, #tpu.memory_space<vmem>>, vector<1x32x8xbf16>
    %17 = vector.shape_cast %16 : vector<1x32x8xbf16> to vector<32x8xbf16>
    %cst_12 = arith.constant dense<0.000000e+00> : vector<80x8xf32>
    %18 = tpu.matmul %15, %17, %cst_12 {dimension_numbers = #tpu.dot_dimension_numbers<[1], [0], [0], [1], [0, 0, 1, 1], [], []>} : vector<80x32xbf16>, vector<32x8xbf16>, vector<80x8xf32> -> vector<80x8xf32>
    %19 = arith.addf %14, %18 : vector<80x8xf32>
    %20 = vector.extract_strided_slice %3 {offsets = [10, 0], sizes = [80, 32], strides = [1, 1]} : vector<102x32xbf16> to vector<80x32xbf16>
    %c3 = arith.constant 3 : index
    %c0_13 = arith.constant 0 : index
    %c0_14 = arith.constant 0 : index
    %21 = vector.load %arg2[%c3, %c0_13, %c0_14] : memref<9x32x8xbf16, #tpu.memory_space<vmem>>, vector<1x32x8xbf16>
    %22 = vector.shape_cast %21 : vector<1x32x8xbf16> to vector<32x8xbf16>
    %cst_15 = arith.constant dense<0.000000e+00> : vector<80x8xf32>
    %23 = tpu.matmul %20, %22, %cst_15 {dimension_numbers = #tpu.dot_dimension_numbers<[1], [0], [0], [1], [0, 0, 1, 1], [], []>} : vector<80x32xbf16>, vector<32x8xbf16>, vector<80x8xf32> -> vector<80x8xf32>
    %24 = arith.addf %19, %23 : vector<80x8xf32>
    %25 = vector.extract_strided_slice %3 {offsets = [11, 0], sizes = [80, 32], strides = [1, 1]} : vector<102x32xbf16> to vector<80x32xbf16>
    %c4 = arith.constant 4 : index
    %c0_16 = arith.constant 0 : index
    %c0_17 = arith.constant 0 : index
    %26 = vector.load %arg2[%c4, %c0_16, %c0_17] : memref<9x32x8xbf16, #tpu.memory_space<vmem>>, vector<1x32x8xbf16>
    %27 = vector.shape_cast %26 : vector<1x32x8xbf16> to vector<32x8xbf16>
    %cst_18 = arith.constant dense<0.000000e+00> : vector<80x8xf32>
    %28 = tpu.matmul %25, %27, %cst_18 {dimension_numbers = #tpu.dot_dimension_numbers<[1], [0], [0], [1], [0, 0, 1, 1], [], []>} : vector<80x32xbf16>, vector<32x8xbf16>, vector<80x8xf32> -> vector<80x8xf32>
    %29 = arith.addf %24, %28 : vector<80x8xf32>
    %30 = vector.extract_strided_slice %3 {offsets = [12, 0], sizes = [80, 32], strides = [1, 1]} : vector<102x32xbf16> to vector<80x32xbf16>
    %c5 = arith.constant 5 : index
    %c0_19 = arith.constant 0 : index
    %c0_20 = arith.constant 0 : index
    %31 = vector.load %arg2[%c5, %c0_19, %c0_20] : memref<9x32x8xbf16, #tpu.memory_space<vmem>>, vector<1x32x8xbf16>
    %32 = vector.shape_cast %31 : vector<1x32x8xbf16> to vector<32x8xbf16>
    %cst_21 = arith.constant dense<0.000000e+00> : vector<80x8xf32>
    %33 = tpu.matmul %30, %32, %cst_21 {dimension_numbers = #tpu.dot_dimension_numbers<[1], [0], [0], [1], [0, 0, 1, 1], [], []>} : vector<80x32xbf16>, vector<32x8xbf16>, vector<80x8xf32> -> vector<80x8xf32>
    %34 = arith.addf %29, %33 : vector<80x8xf32>
    %35 = vector.extract_strided_slice %3 {offsets = [20, 0], sizes = [80, 32], strides = [1, 1]} : vector<102x32xbf16> to vector<80x32xbf16>
    %c6 = arith.constant 6 : index
    %c0_22 = arith.constant 0 : index
    %c0_23 = arith.constant 0 : index
    %36 = vector.load %arg2[%c6, %c0_22, %c0_23] : memref<9x32x8xbf16, #tpu.memory_space<vmem>>, vector<1x32x8xbf16>
    %37 = vector.shape_cast %36 : vector<1x32x8xbf16> to vector<32x8xbf16>
    %cst_24 = arith.constant dense<0.000000e+00> : vector<80x8xf32>
    %38 = tpu.matmul %35, %37, %cst_24 {dimension_numbers = #tpu.dot_dimension_numbers<[1], [0], [0], [1], [0, 0, 1, 1], [], []>} : vector<80x32xbf16>, vector<32x8xbf16>, vector<80x8xf32> -> vector<80x8xf32>
    %39 = arith.addf %34, %38 : vector<80x8xf32>
    %40 = vector.extract_strided_slice %3 {offsets = [21, 0], sizes = [80, 32], strides = [1, 1]} : vector<102x32xbf16> to vector<80x32xbf16>
    %c7 = arith.constant 7 : index
    %c0_25 = arith.constant 0 : index
    %c0_26 = arith.constant 0 : index
    %41 = vector.load %arg2[%c7, %c0_25, %c0_26] : memref<9x32x8xbf16, #tpu.memory_space<vmem>>, vector<1x32x8xbf16>
    %42 = vector.shape_cast %41 : vector<1x32x8xbf16> to vector<32x8xbf16>
    %cst_27 = arith.constant dense<0.000000e+00> : vector<80x8xf32>
    %43 = tpu.matmul %40, %42, %cst_27 {dimension_numbers = #tpu.dot_dimension_numbers<[1], [0], [0], [1], [0, 0, 1, 1], [], []>} : vector<80x32xbf16>, vector<32x8xbf16>, vector<80x8xf32> -> vector<80x8xf32>
    %44 = arith.addf %39, %43 : vector<80x8xf32>
    %45 = vector.extract_strided_slice %3 {offsets = [22, 0], sizes = [80, 32], strides = [1, 1]} : vector<102x32xbf16> to vector<80x32xbf16>
    %c8 = arith.constant 8 : index
    %c0_28 = arith.constant 0 : index
    %c0_29 = arith.constant 0 : index
    %46 = vector.load %arg2[%c8, %c0_28, %c0_29] : memref<9x32x8xbf16, #tpu.memory_space<vmem>>, vector<1x32x8xbf16>
    %47 = vector.shape_cast %46 : vector<1x32x8xbf16> to vector<32x8xbf16>
    %cst_30 = arith.constant dense<0.000000e+00> : vector<80x8xf32>
    %48 = tpu.matmul %45, %47, %cst_30 {dimension_numbers = #tpu.dot_dimension_numbers<[1], [0], [0], [1], [0, 0, 1, 1], [], []>} : vector<80x32xbf16>, vector<32x8xbf16>, vector<80x8xf32> -> vector<80x8xf32>
    %49 = arith.addf %44, %48 : vector<80x8xf32>
    %c0_31 = arith.constant 0 : index
    %c0_32 = arith.constant 0 : index
    %50 = vector.load %arg3[%c0_31, %c0_32] : memref<1x8xf32, #tpu.memory_space<vmem>>, vector<1x8xf32>
    %51 = vector.broadcast %50 : vector<1x8xf32> to vector<80x8xf32>
    %52 = arith.addf %49, %51 : vector<80x8xf32>
    %53 = arith.truncf %52 : vector<80x8xf32> to vector<80x8xbf16>
    %c0_33 = arith.constant 0 : index
    %c0_34 = arith.constant 0 : index
    %c0_35 = arith.constant 0 : index
    %54 = vector.load %arg4[%c0_33, %c0_34, %c0_35] : memref<1x80x8xbf16, #tpu.memory_space<vmem>>, vector<1x80x8xbf16>
    %55 = vector.shape_cast %54 : vector<1x80x8xbf16> to vector<80x8xbf16>
    %56 = vector.shape_cast %53 : vector<80x8xbf16> to vector<1x80x8xbf16>
    tpu.vector_store %arg4[%c0_33, %c0_34, %c0_35], %56 {strides = array<i32>} : memref<1x80x8xbf16, #tpu.memory_space<vmem>>, vector<1x80x8xbf16>,
    return
  }
  func.func @transform_0(%arg0: i32) -> (i32, i32, i32) {
    %c0_i32 = arith.constant 0 : i32
    %c0_i32_0 = arith.constant 0 : i32
    %c0_i32_1 = arith.constant 0 : i32
    return %arg0, %c0_i32, %c0_i32_0 : i32, i32, i32
  }
  func.func @transform_1(%arg0: i32) -> (i32, i32, i32) {
    %c0_i32 = arith.constant 0 : i32
    %c0_i32_0 = arith.constant 0 : i32
    %c0_i32_1 = arith.constant 0 : i32
    %c0_i32_2 = arith.constant 0 : i32
    return %c0_i32, %c0_i32_0, %c0_i32_1 : i32, i32, i32
  }
  func.func @transform_2(%arg0: i32) -> (i32, i32) {
    %c0_i32 = arith.constant 0 : i32
    %c0_i32_0 = arith.constant 0 : i32
    %c0_i32_1 = arith.constant 0 : i32
    return %c0_i32, %c0_i32_0 : i32, i32
  }
  func.func @transform_3(%arg0: i32) -> (i32, i32, i32) {
    %c0_i32 = arith.constant 0 : i32
    %c0_i32_0 = arith.constant 0 : i32
    %c0_i32_1 = arith.constant 0 : i32
    return %arg0, %c0_i32, %c0_i32_0 : i32, i32, i32
  }
}

module attributes {stable_mosaic.version = 11 : i64} {
  func.func @_conv_kernel(%arg0: i32, %arg1: memref<1x64x8xbf16, #tpu.memory_space<vmem>>, %arg2: memref<1x8x32xbf16, #tpu.memory_space<vmem>>, %arg3: memref<1x32xf32, #tpu.memory_space<vmem>>, %arg4: memref<1x64x32xbf16, #tpu.memory_space<vmem>>, %arg5: memref<1x64x32xbf16, #tpu.memory_space<vmem>>) attributes {dimension_semantics = [#tpu.dimension_semantics<parallel>], iteration_bounds = array<i64: 2>, scalar_prefetch = 0 : i64, scratch_operands = 0 : i64, tpu.core_type = #tpu.core_type<tc>, window_params = [{transform_indices = @transform_0, window_bounds = array<i64: 1, 64, 8>}, {pipeline_mode = #tpu.pipeline_mode<synchronous>, transform_indices = @transform_1, window_bounds = array<i64: 1, 8, 32>}, {pipeline_mode = #tpu.pipeline_mode<synchronous>, transform_indices = @transform_2, window_bounds = array<i64: 1, 32>}, {transform_indices = @transform_3, window_bounds = array<i64: 1, 64, 32>}, {transform_indices = @transform_4, window_bounds = array<i64: 1, 64, 32>}]} {
    %c0 = arith.constant 0 : index
    %c0_0 = arith.constant 0 : index
    %c0_1 = arith.constant 0 : index
    %0 = vector.load %arg1[%c0, %c0_0, %c0_1] : memref<1x64x8xbf16, #tpu.memory_space<vmem>>, vector<1x64x8xbf16>
    %1 = vector.shape_cast %0 : vector<1x64x8xbf16> to vector<64x8xbf16>
    %cst = arith.constant 0.000000e+00 : bf16
    %2 = vector.broadcast %cst : bf16 to vector<64x8xbf16>
    %3 = arith.maximumf %1, %2 : vector<64x8xbf16>
    %cst_2 = arith.constant 0.000000e+00 : f32
    %4 = vector.broadcast %cst_2 : f32 to vector<64x32xf32>
    %c0_3 = arith.constant 0 : index
    %c0_4 = arith.constant 0 : index
    %c0_5 = arith.constant 0 : index
    %5 = vector.load %arg2[%c0_3, %c0_4, %c0_5] : memref<1x8x32xbf16, #tpu.memory_space<vmem>>, vector<1x8x32xbf16>
    %6 = vector.shape_cast %5 : vector<1x8x32xbf16> to vector<8x32xbf16>
    %cst_6 = arith.constant dense<0.000000e+00> : vector<64x32xf32>
    %7 = tpu.matmul %3, %6, %cst_6 {dimension_numbers = #tpu.dot_dimension_numbers<[1], [0], [0], [1], [0, 0, 1, 1], [], []>} : vector<64x8xbf16>, vector<8x32xbf16>, vector<64x32xf32> -> vector<64x32xf32>
    %8 = arith.addf %4, %7 : vector<64x32xf32>
    %c0_7 = arith.constant 0 : index
    %c0_8 = arith.constant 0 : index
    %9 = vector.load %arg3[%c0_7, %c0_8] : memref<1x32xf32, #tpu.memory_space<vmem>>, vector<1x32xf32>
    %10 = vector.broadcast %9 : vector<1x32xf32> to vector<64x32xf32>
    %11 = arith.addf %8, %10 : vector<64x32xf32>
    %c0_9 = arith.constant 0 : index
    %c0_10 = arith.constant 0 : index
    %c0_11 = arith.constant 0 : index
    %12 = vector.load %arg4[%c0_9, %c0_10, %c0_11] : memref<1x64x32xbf16, #tpu.memory_space<vmem>>, vector<1x64x32xbf16>
    %13 = vector.shape_cast %12 : vector<1x64x32xbf16> to vector<64x32xbf16>
    %14 = arith.extf %13 : vector<64x32xbf16> to vector<64x32xf32>
    %15 = arith.addf %11, %14 : vector<64x32xf32>
    %16 = arith.truncf %15 : vector<64x32xf32> to vector<64x32xbf16>
    %c0_12 = arith.constant 0 : index
    %c0_13 = arith.constant 0 : index
    %c0_14 = arith.constant 0 : index
    %17 = vector.load %arg5[%c0_12, %c0_13, %c0_14] : memref<1x64x32xbf16, #tpu.memory_space<vmem>>, vector<1x64x32xbf16>
    %18 = vector.shape_cast %17 : vector<1x64x32xbf16> to vector<64x32xbf16>
    %19 = vector.shape_cast %16 : vector<64x32xbf16> to vector<1x64x32xbf16>
    tpu.vector_store %arg5[%c0_12, %c0_13, %c0_14], %19 {strides = array<i32>} : memref<1x64x32xbf16, #tpu.memory_space<vmem>>, vector<1x64x32xbf16>,
    return
  }
  func.func @transform_0(%arg0: i32) -> (i32, i32, i32) {
    %c0_i32 = arith.constant 0 : i32
    %c0_i32_0 = arith.constant 0 : i32
    %c0_i32_1 = arith.constant 0 : i32
    return %arg0, %c0_i32, %c0_i32_0 : i32, i32, i32
  }
  func.func @transform_1(%arg0: i32) -> (i32, i32, i32) {
    %c0_i32 = arith.constant 0 : i32
    %c0_i32_0 = arith.constant 0 : i32
    %c0_i32_1 = arith.constant 0 : i32
    %c0_i32_2 = arith.constant 0 : i32
    return %c0_i32, %c0_i32_0, %c0_i32_1 : i32, i32, i32
  }
  func.func @transform_2(%arg0: i32) -> (i32, i32) {
    %c0_i32 = arith.constant 0 : i32
    %c0_i32_0 = arith.constant 0 : i32
    %c0_i32_1 = arith.constant 0 : i32
    return %c0_i32, %c0_i32_0 : i32, i32
  }
  func.func @transform_3(%arg0: i32) -> (i32, i32, i32) {
    %c0_i32 = arith.constant 0 : i32
    %c0_i32_0 = arith.constant 0 : i32
    %c0_i32_1 = arith.constant 0 : i32
    return %arg0, %c0_i32, %c0_i32_0 : i32, i32, i32
  }
  func.func @transform_4(%arg0: i32) -> (i32, i32, i32) {
    %c0_i32 = arith.constant 0 : i32
    %c0_i32_0 = arith.constant 0 : i32
    %c0_i32_1 = arith.constant 0 : i32
    return %arg0, %c0_i32, %c0_i32_0 : i32, i32, i32
  }
}

module attributes {stable_mosaic.version = 11 : i64} {
  func.func @_conv_kernel(%arg0: i32, %arg1: memref<1x64x8xbf16, #tpu.memory_space<vmem>>, %arg2: memref<1x8x32xbf16, #tpu.memory_space<vmem>>, %arg3: memref<1x32xf32, #tpu.memory_space<vmem>>, %arg4: memref<1x64x32xbf16, #tpu.memory_space<vmem>>, %arg5: memref<1x64x32xbf16, #tpu.memory_space<vmem>>) attributes {dimension_semantics = [#tpu.dimension_semantics<parallel>], iteration_bounds = array<i64: 2>, scalar_prefetch = 0 : i64, scratch_operands = 0 : i64, tpu.core_type = #tpu.core_type<tc>, window_params = [{transform_indices = @transform_0, window_bounds = array<i64: 1, 64, 8>}, {pipeline_mode = #tpu.pipeline_mode<synchronous>, transform_indices = @transform_1, window_bounds = array<i64: 1, 8, 32>}, {pipeline_mode = #tpu.pipeline_mode<synchronous>, transform_indices = @transform_2, window_bounds = array<i64: 1, 32>}, {transform_indices = @transform_3, window_bounds = array<i64: 1, 64, 32>}, {transform_indices = @transform_4, window_bounds = array<i64: 1, 64, 32>}]} {
    %c0 = arith.constant 0 : index
    %c0_0 = arith.constant 0 : index
    %c0_1 = arith.constant 0 : index
    %0 = vector.load %arg1[%c0, %c0_0, %c0_1] : memref<1x64x8xbf16, #tpu.memory_space<vmem>>, vector<1x64x8xbf16>
    %1 = vector.shape_cast %0 : vector<1x64x8xbf16> to vector<64x8xbf16>
    %cst = arith.constant 0.000000e+00 : bf16
    %2 = vector.broadcast %cst : bf16 to vector<64x8xbf16>
    %3 = arith.maximumf %1, %2 : vector<64x8xbf16>
    %cst_2 = arith.constant 0.000000e+00 : f32
    %4 = vector.broadcast %cst_2 : f32 to vector<64x32xf32>
    %c0_3 = arith.constant 0 : index
    %c0_4 = arith.constant 0 : index
    %c0_5 = arith.constant 0 : index
    %5 = vector.load %arg2[%c0_3, %c0_4, %c0_5] : memref<1x8x32xbf16, #tpu.memory_space<vmem>>, vector<1x8x32xbf16>
    %6 = vector.shape_cast %5 : vector<1x8x32xbf16> to vector<8x32xbf16>
    %cst_6 = arith.constant dense<0.000000e+00> : vector<64x32xf32>
    %7 = tpu.matmul %3, %6, %cst_6 {dimension_numbers = #tpu.dot_dimension_numbers<[1], [0], [0], [1], [0, 0, 1, 1], [], []>} : vector<64x8xbf16>, vector<8x32xbf16>, vector<64x32xf32> -> vector<64x32xf32>
    %8 = arith.addf %4, %7 : vector<64x32xf32>
    %c0_7 = arith.constant 0 : index
    %c0_8 = arith.constant 0 : index
    %9 = vector.load %arg3[%c0_7, %c0_8] : memref<1x32xf32, #tpu.memory_space<vmem>>, vector<1x32xf32>
    %10 = vector.broadcast %9 : vector<1x32xf32> to vector<64x32xf32>
    %11 = arith.addf %8, %10 : vector<64x32xf32>
    %c0_9 = arith.constant 0 : index
    %c0_10 = arith.constant 0 : index
    %c0_11 = arith.constant 0 : index
    %12 = vector.load %arg4[%c0_9, %c0_10, %c0_11] : memref<1x64x32xbf16, #tpu.memory_space<vmem>>, vector<1x64x32xbf16>
    %13 = vector.shape_cast %12 : vector<1x64x32xbf16> to vector<64x32xbf16>
    %14 = arith.extf %13 : vector<64x32xbf16> to vector<64x32xf32>
    %15 = arith.addf %11, %14 : vector<64x32xf32>
    %cst_12 = arith.constant 0.000000e+00 : f32
    %16 = vector.broadcast %cst_12 : f32 to vector<64x32xf32>
    %17 = arith.maximumf %15, %16 : vector<64x32xf32>
    %18 = arith.truncf %17 : vector<64x32xf32> to vector<64x32xbf16>
    %c0_13 = arith.constant 0 : index
    %c0_14 = arith.constant 0 : index
    %c0_15 = arith.constant 0 : index
    %19 = vector.load %arg5[%c0_13, %c0_14, %c0_15] : memref<1x64x32xbf16, #tpu.memory_space<vmem>>, vector<1x64x32xbf16>
    %20 = vector.shape_cast %19 : vector<1x64x32xbf16> to vector<64x32xbf16>
    %21 = vector.shape_cast %18 : vector<64x32xbf16> to vector<1x64x32xbf16>
    tpu.vector_store %arg5[%c0_13, %c0_14, %c0_15], %21 {strides = array<i32>} : memref<1x64x32xbf16, #tpu.memory_space<vmem>>, vector<1x64x32xbf16>,
    return
  }
  func.func @transform_0(%arg0: i32) -> (i32, i32, i32) {
    %c0_i32 = arith.constant 0 : i32
    %c0_i32_0 = arith.constant 0 : i32
    %c0_i32_1 = arith.constant 0 : i32
    return %arg0, %c0_i32, %c0_i32_0 : i32, i32, i32
  }
  func.func @transform_1(%arg0: i32) -> (i32, i32, i32) {
    %c0_i32 = arith.constant 0 : i32
    %c0_i32_0 = arith.constant 0 : i32
    %c0_i32_1 = arith.constant 0 : i32
    %c0_i32_2 = arith.constant 0 : i32
    return %c0_i32, %c0_i32_0, %c0_i32_1 : i32, i32, i32
  }
  func.func @transform_2(%arg0: i32) -> (i32, i32) {
    %c0_i32 = arith.constant 0 : i32
    %c0_i32_0 = arith.constant 0 : i32
    %c0_i32_1 = arith.constant 0 : i32
    return %c0_i32, %c0_i32_0 : i32, i32
  }
  func.func @transform_3(%arg0: i32) -> (i32, i32, i32) {
    %c0_i32 = arith.constant 0 : i32
    %c0_i32_0 = arith.constant 0 : i32
    %c0_i32_1 = arith.constant 0 : i32
    return %arg0, %c0_i32, %c0_i32_0 : i32, i32, i32
  }
  func.func @transform_4(%arg0: i32) -> (i32, i32, i32) {
    %c0_i32 = arith.constant 0 : i32
    %c0_i32_0 = arith.constant 0 : i32
    %c0_i32_1 = arith.constant 0 : i32
    return %arg0, %c0_i32, %c0_i32_0 : i32, i32, i32
  }
}

module attributes {stable_mosaic.version = 11 : i64} {
  func.func @_conv_kernel(%arg0: i32, %arg1: memref<1x26x128xbf16, #tpu.memory_space<vmem>>, %arg2: memref<4x128x16xbf16, #tpu.memory_space<vmem>>, %arg3: memref<1x16xf32, #tpu.memory_space<vmem>>, %arg4: memref<1x20x16xbf16, #tpu.memory_space<vmem>>) attributes {dimension_semantics = [#tpu.dimension_semantics<parallel>], iteration_bounds = array<i64: 2>, scalar_prefetch = 0 : i64, scratch_operands = 0 : i64, tpu.core_type = #tpu.core_type<tc>, window_params = [{transform_indices = @transform_0, window_bounds = array<i64: 1, 26, 128>}, {pipeline_mode = #tpu.pipeline_mode<synchronous>, transform_indices = @transform_1, window_bounds = array<i64: 4, 128, 16>}, {pipeline_mode = #tpu.pipeline_mode<synchronous>, transform_indices = @transform_2, window_bounds = array<i64: 1, 16>}, {transform_indices = @transform_3, window_bounds = array<i64: 1, 20, 16>}]} {
    %c0 = arith.constant 0 : index
    %c0_0 = arith.constant 0 : index
    %c0_1 = arith.constant 0 : index
    %0 = vector.load %arg1[%c0, %c0_0, %c0_1] : memref<1x26x128xbf16, #tpu.memory_space<vmem>>, vector<1x26x128xbf16>
    %1 = vector.shape_cast %0 : vector<1x26x128xbf16> to vector<26x128xbf16>
    %cst = arith.constant 0.000000e+00 : f32
    %2 = vector.broadcast %cst : f32 to vector<20x16xf32>
    %3 = vector.extract_strided_slice %1 {offsets = [0, 0], sizes = [20, 128], strides = [1, 1]} : vector<26x128xbf16> to vector<20x128xbf16>
    %c0_2 = arith.constant 0 : index
    %c0_3 = arith.constant 0 : index
    %c0_4 = arith.constant 0 : index
    %4 = vector.load %arg2[%c0_2, %c0_3, %c0_4] : memref<4x128x16xbf16, #tpu.memory_space<vmem>>, vector<1x128x16xbf16>
    %5 = vector.shape_cast %4 : vector<1x128x16xbf16> to vector<128x16xbf16>
    %cst_5 = arith.constant dense<0.000000e+00> : vector<20x16xf32>
    %6 = tpu.matmul %3, %5, %cst_5 {dimension_numbers = #tpu.dot_dimension_numbers<[1], [0], [0], [1], [0, 0, 1, 1], [], []>} : vector<20x128xbf16>, vector<128x16xbf16>, vector<20x16xf32> -> vector<20x16xf32>
    %7 = arith.addf %2, %6 : vector<20x16xf32>
    %8 = vector.extract_strided_slice %1 {offsets = [1, 0], sizes = [20, 128], strides = [1, 1]} : vector<26x128xbf16> to vector<20x128xbf16>
    %c1 = arith.constant 1 : index
    %c0_6 = arith.constant 0 : index
    %c0_7 = arith.constant 0 : index
    %9 = vector.load %arg2[%c1, %c0_6, %c0_7] : memref<4x128x16xbf16, #tpu.memory_space<vmem>>, vector<1x128x16xbf16>
    %10 = vector.shape_cast %9 : vector<1x128x16xbf16> to vector<128x16xbf16>
    %cst_8 = arith.constant dense<0.000000e+00> : vector<20x16xf32>
    %11 = tpu.matmul %8, %10, %cst_8 {dimension_numbers = #tpu.dot_dimension_numbers<[1], [0], [0], [1], [0, 0, 1, 1], [], []>} : vector<20x128xbf16>, vector<128x16xbf16>, vector<20x16xf32> -> vector<20x16xf32>
    %12 = arith.addf %7, %11 : vector<20x16xf32>
    %13 = vector.extract_strided_slice %1 {offsets = [5, 0], sizes = [20, 128], strides = [1, 1]} : vector<26x128xbf16> to vector<20x128xbf16>
    %c2 = arith.constant 2 : index
    %c0_9 = arith.constant 0 : index
    %c0_10 = arith.constant 0 : index
    %14 = vector.load %arg2[%c2, %c0_9, %c0_10] : memref<4x128x16xbf16, #tpu.memory_space<vmem>>, vector<1x128x16xbf16>
    %15 = vector.shape_cast %14 : vector<1x128x16xbf16> to vector<128x16xbf16>
    %cst_11 = arith.constant dense<0.000000e+00> : vector<20x16xf32>
    %16 = tpu.matmul %13, %15, %cst_11 {dimension_numbers = #tpu.dot_dimension_numbers<[1], [0], [0], [1], [0, 0, 1, 1], [], []>} : vector<20x128xbf16>, vector<128x16xbf16>, vector<20x16xf32> -> vector<20x16xf32>
    %17 = arith.addf %12, %16 : vector<20x16xf32>
    %18 = vector.extract_strided_slice %1 {offsets = [6, 0], sizes = [20, 128], strides = [1, 1]} : vector<26x128xbf16> to vector<20x128xbf16>
    %c3 = arith.constant 3 : index
    %c0_12 = arith.constant 0 : index
    %c0_13 = arith.constant 0 : index
    %19 = vector.load %arg2[%c3, %c0_12, %c0_13] : memref<4x128x16xbf16, #tpu.memory_space<vmem>>, vector<1x128x16xbf16>
    %20 = vector.shape_cast %19 : vector<1x128x16xbf16> to vector<128x16xbf16>
    %cst_14 = arith.constant dense<0.000000e+00> : vector<20x16xf32>
    %21 = tpu.matmul %18, %20, %cst_14 {dimension_numbers = #tpu.dot_dimension_numbers<[1], [0], [0], [1], [0, 0, 1, 1], [], []>} : vector<20x128xbf16>, vector<128x16xbf16>, vector<20x16xf32> -> vector<20x16xf32>
    %22 = arith.addf %17, %21 : vector<20x16xf32>
    %c0_15 = arith.constant 0 : index
    %c0_16 = arith.constant 0 : index
    %23 = vector.load %arg3[%c0_15, %c0_16] : memref<1x16xf32, #tpu.memory_space<vmem>>, vector<1x16xf32>
    %24 = vector.broadcast %23 : vector<1x16xf32> to vector<20x16xf32>
    %25 = arith.addf %22, %24 : vector<20x16xf32>
    %cst_17 = arith.constant 0.000000e+00 : f32
    %26 = vector.broadcast %cst_17 : f32 to vector<20x16xf32>
    %27 = arith.maximumf %25, %26 : vector<20x16xf32>
    %28 = arith.truncf %27 : vector<20x16xf32> to vector<20x16xbf16>
    %c0_18 = arith.constant 0 : index
    %c0_19 = arith.constant 0 : index
    %c0_20 = arith.constant 0 : index
    %29 = vector.load %arg4[%c0_18, %c0_19, %c0_20] : memref<1x20x16xbf16, #tpu.memory_space<vmem>>, vector<1x20x16xbf16>
    %30 = vector.shape_cast %29 : vector<1x20x16xbf16> to vector<20x16xbf16>
    %31 = vector.shape_cast %28 : vector<20x16xbf16> to vector<1x20x16xbf16>
    tpu.vector_store %arg4[%c0_18, %c0_19, %c0_20], %31 {strides = array<i32>} : memref<1x20x16xbf16, #tpu.memory_space<vmem>>, vector<1x20x16xbf16>,
    return
  }
  func.func @transform_0(%arg0: i32) -> (i32, i32, i32) {
    %c0_i32 = arith.constant 0 : i32
    %c0_i32_0 = arith.constant 0 : i32
    %c0_i32_1 = arith.constant 0 : i32
    return %arg0, %c0_i32, %c0_i32_0 : i32, i32, i32
  }
  func.func @transform_1(%arg0: i32) -> (i32, i32, i32) {
    %c0_i32 = arith.constant 0 : i32
    %c0_i32_0 = arith.constant 0 : i32
    %c0_i32_1 = arith.constant 0 : i32
    %c0_i32_2 = arith.constant 0 : i32
    return %c0_i32, %c0_i32_0, %c0_i32_1 : i32, i32, i32
  }
  func.func @transform_2(%arg0: i32) -> (i32, i32) {
    %c0_i32 = arith.constant 0 : i32
    %c0_i32_0 = arith.constant 0 : i32
    %c0_i32_1 = arith.constant 0 : i32
    return %c0_i32, %c0_i32_0 : i32, i32
  }
  func.func @transform_3(%arg0: i32) -> (i32, i32, i32) {
    %c0_i32 = arith.constant 0 : i32
    %c0_i32_0 = arith.constant 0 : i32
    %c0_i32_1 = arith.constant 0 : i32
    return %arg0, %c0_i32, %c0_i32_0 : i32, i32, i32
  }
}

module attributes {stable_mosaic.version = 11 : i64} {
  func.func @_conv_kernel(%arg0: i32, %arg1: memref<1x38x16xbf16, #tpu.memory_space<vmem>>, %arg2: memref<9x16x32xbf16, #tpu.memory_space<vmem>>, %arg3: memref<1x32xf32, #tpu.memory_space<vmem>>, %arg4: memref<1x24x32xbf16, #tpu.memory_space<vmem>>) attributes {dimension_semantics = [#tpu.dimension_semantics<parallel>], iteration_bounds = array<i64: 2>, scalar_prefetch = 0 : i64, scratch_operands = 0 : i64, tpu.core_type = #tpu.core_type<tc>, window_params = [{transform_indices = @transform_0, window_bounds = array<i64: 1, 38, 16>}, {pipeline_mode = #tpu.pipeline_mode<synchronous>, transform_indices = @transform_1, window_bounds = array<i64: 9, 16, 32>}, {pipeline_mode = #tpu.pipeline_mode<synchronous>, transform_indices = @transform_2, window_bounds = array<i64: 1, 32>}, {transform_indices = @transform_3, window_bounds = array<i64: 1, 24, 32>}]} {
    %c0 = arith.constant 0 : index
    %c0_0 = arith.constant 0 : index
    %c0_1 = arith.constant 0 : index
    %0 = vector.load %arg1[%c0, %c0_0, %c0_1] : memref<1x38x16xbf16, #tpu.memory_space<vmem>>, vector<1x38x16xbf16>
    %1 = vector.shape_cast %0 : vector<1x38x16xbf16> to vector<38x16xbf16>
    %cst = arith.constant 0.000000e+00 : f32
    %2 = vector.broadcast %cst : f32 to vector<24x32xf32>
    %3 = vector.extract_strided_slice %1 {offsets = [0, 0], sizes = [24, 16], strides = [1, 1]} : vector<38x16xbf16> to vector<24x16xbf16>
    %c0_2 = arith.constant 0 : index
    %c0_3 = arith.constant 0 : index
    %c0_4 = arith.constant 0 : index
    %4 = vector.load %arg2[%c0_2, %c0_3, %c0_4] : memref<9x16x32xbf16, #tpu.memory_space<vmem>>, vector<1x16x32xbf16>
    %5 = vector.shape_cast %4 : vector<1x16x32xbf16> to vector<16x32xbf16>
    %cst_5 = arith.constant dense<0.000000e+00> : vector<24x32xf32>
    %6 = tpu.matmul %3, %5, %cst_5 {dimension_numbers = #tpu.dot_dimension_numbers<[1], [0], [0], [1], [0, 0, 1, 1], [], []>} : vector<24x16xbf16>, vector<16x32xbf16>, vector<24x32xf32> -> vector<24x32xf32>
    %7 = arith.addf %2, %6 : vector<24x32xf32>
    %8 = vector.extract_strided_slice %1 {offsets = [1, 0], sizes = [24, 16], strides = [1, 1]} : vector<38x16xbf16> to vector<24x16xbf16>
    %c1 = arith.constant 1 : index
    %c0_6 = arith.constant 0 : index
    %c0_7 = arith.constant 0 : index
    %9 = vector.load %arg2[%c1, %c0_6, %c0_7] : memref<9x16x32xbf16, #tpu.memory_space<vmem>>, vector<1x16x32xbf16>
    %10 = vector.shape_cast %9 : vector<1x16x32xbf16> to vector<16x32xbf16>
    %cst_8 = arith.constant dense<0.000000e+00> : vector<24x32xf32>
    %11 = tpu.matmul %8, %10, %cst_8 {dimension_numbers = #tpu.dot_dimension_numbers<[1], [0], [0], [1], [0, 0, 1, 1], [], []>} : vector<24x16xbf16>, vector<16x32xbf16>, vector<24x32xf32> -> vector<24x32xf32>
    %12 = arith.addf %7, %11 : vector<24x32xf32>
    %13 = vector.extract_strided_slice %1 {offsets = [2, 0], sizes = [24, 16], strides = [1, 1]} : vector<38x16xbf16> to vector<24x16xbf16>
    %c2 = arith.constant 2 : index
    %c0_9 = arith.constant 0 : index
    %c0_10 = arith.constant 0 : index
    %14 = vector.load %arg2[%c2, %c0_9, %c0_10] : memref<9x16x32xbf16, #tpu.memory_space<vmem>>, vector<1x16x32xbf16>
    %15 = vector.shape_cast %14 : vector<1x16x32xbf16> to vector<16x32xbf16>
    %cst_11 = arith.constant dense<0.000000e+00> : vector<24x32xf32>
    %16 = tpu.matmul %13, %15, %cst_11 {dimension_numbers = #tpu.dot_dimension_numbers<[1], [0], [0], [1], [0, 0, 1, 1], [], []>} : vector<24x16xbf16>, vector<16x32xbf16>, vector<24x32xf32> -> vector<24x32xf32>
    %17 = arith.addf %12, %16 : vector<24x32xf32>
    %18 = vector.extract_strided_slice %1 {offsets = [6, 0], sizes = [24, 16], strides = [1, 1]} : vector<38x16xbf16> to vector<24x16xbf16>
    %c3 = arith.constant 3 : index
    %c0_12 = arith.constant 0 : index
    %c0_13 = arith.constant 0 : index
    %19 = vector.load %arg2[%c3, %c0_12, %c0_13] : memref<9x16x32xbf16, #tpu.memory_space<vmem>>, vector<1x16x32xbf16>
    %20 = vector.shape_cast %19 : vector<1x16x32xbf16> to vector<16x32xbf16>
    %cst_14 = arith.constant dense<0.000000e+00> : vector<24x32xf32>
    %21 = tpu.matmul %18, %20, %cst_14 {dimension_numbers = #tpu.dot_dimension_numbers<[1], [0], [0], [1], [0, 0, 1, 1], [], []>} : vector<24x16xbf16>, vector<16x32xbf16>, vector<24x32xf32> -> vector<24x32xf32>
    %22 = arith.addf %17, %21 : vector<24x32xf32>
    %23 = vector.extract_strided_slice %1 {offsets = [7, 0], sizes = [24, 16], strides = [1, 1]} : vector<38x16xbf16> to vector<24x16xbf16>
    %c4 = arith.constant 4 : index
    %c0_15 = arith.constant 0 : index
    %c0_16 = arith.constant 0 : index
    %24 = vector.load %arg2[%c4, %c0_15, %c0_16] : memref<9x16x32xbf16, #tpu.memory_space<vmem>>, vector<1x16x32xbf16>
    %25 = vector.shape_cast %24 : vector<1x16x32xbf16> to vector<16x32xbf16>
    %cst_17 = arith.constant dense<0.000000e+00> : vector<24x32xf32>
    %26 = tpu.matmul %23, %25, %cst_17 {dimension_numbers = #tpu.dot_dimension_numbers<[1], [0], [0], [1], [0, 0, 1, 1], [], []>} : vector<24x16xbf16>, vector<16x32xbf16>, vector<24x32xf32> -> vector<24x32xf32>
    %27 = arith.addf %22, %26 : vector<24x32xf32>
    %28 = vector.extract_strided_slice %1 {offsets = [8, 0], sizes = [24, 16], strides = [1, 1]} : vector<38x16xbf16> to vector<24x16xbf16>
    %c5 = arith.constant 5 : index
    %c0_18 = arith.constant 0 : index
    %c0_19 = arith.constant 0 : index
    %29 = vector.load %arg2[%c5, %c0_18, %c0_19] : memref<9x16x32xbf16, #tpu.memory_space<vmem>>, vector<1x16x32xbf16>
    %30 = vector.shape_cast %29 : vector<1x16x32xbf16> to vector<16x32xbf16>
    %cst_20 = arith.constant dense<0.000000e+00> : vector<24x32xf32>
    %31 = tpu.matmul %28, %30, %cst_20 {dimension_numbers = #tpu.dot_dimension_numbers<[1], [0], [0], [1], [0, 0, 1, 1], [], []>} : vector<24x16xbf16>, vector<16x32xbf16>, vector<24x32xf32> -> vector<24x32xf32>
    %32 = arith.addf %27, %31 : vector<24x32xf32>
    %33 = vector.extract_strided_slice %1 {offsets = [12, 0], sizes = [24, 16], strides = [1, 1]} : vector<38x16xbf16> to vector<24x16xbf16>
    %c6 = arith.constant 6 : index
    %c0_21 = arith.constant 0 : index
    %c0_22 = arith.constant 0 : index
    %34 = vector.load %arg2[%c6, %c0_21, %c0_22] : memref<9x16x32xbf16, #tpu.memory_space<vmem>>, vector<1x16x32xbf16>
    %35 = vector.shape_cast %34 : vector<1x16x32xbf16> to vector<16x32xbf16>
    %cst_23 = arith.constant dense<0.000000e+00> : vector<24x32xf32>
    %36 = tpu.matmul %33, %35, %cst_23 {dimension_numbers = #tpu.dot_dimension_numbers<[1], [0], [0], [1], [0, 0, 1, 1], [], []>} : vector<24x16xbf16>, vector<16x32xbf16>, vector<24x32xf32> -> vector<24x32xf32>
    %37 = arith.addf %32, %36 : vector<24x32xf32>
    %38 = vector.extract_strided_slice %1 {offsets = [13, 0], sizes = [24, 16], strides = [1, 1]} : vector<38x16xbf16> to vector<24x16xbf16>
    %c7 = arith.constant 7 : index
    %c0_24 = arith.constant 0 : index
    %c0_25 = arith.constant 0 : index
    %39 = vector.load %arg2[%c7, %c0_24, %c0_25] : memref<9x16x32xbf16, #tpu.memory_space<vmem>>, vector<1x16x32xbf16>
    %40 = vector.shape_cast %39 : vector<1x16x32xbf16> to vector<16x32xbf16>
    %cst_26 = arith.constant dense<0.000000e+00> : vector<24x32xf32>
    %41 = tpu.matmul %38, %40, %cst_26 {dimension_numbers = #tpu.dot_dimension_numbers<[1], [0], [0], [1], [0, 0, 1, 1], [], []>} : vector<24x16xbf16>, vector<16x32xbf16>, vector<24x32xf32> -> vector<24x32xf32>
    %42 = arith.addf %37, %41 : vector<24x32xf32>
    %43 = vector.extract_strided_slice %1 {offsets = [14, 0], sizes = [24, 16], strides = [1, 1]} : vector<38x16xbf16> to vector<24x16xbf16>
    %c8 = arith.constant 8 : index
    %c0_27 = arith.constant 0 : index
    %c0_28 = arith.constant 0 : index
    %44 = vector.load %arg2[%c8, %c0_27, %c0_28] : memref<9x16x32xbf16, #tpu.memory_space<vmem>>, vector<1x16x32xbf16>
    %45 = vector.shape_cast %44 : vector<1x16x32xbf16> to vector<16x32xbf16>
    %cst_29 = arith.constant dense<0.000000e+00> : vector<24x32xf32>
    %46 = tpu.matmul %43, %45, %cst_29 {dimension_numbers = #tpu.dot_dimension_numbers<[1], [0], [0], [1], [0, 0, 1, 1], [], []>} : vector<24x16xbf16>, vector<16x32xbf16>, vector<24x32xf32> -> vector<24x32xf32>
    %47 = arith.addf %42, %46 : vector<24x32xf32>
    %c0_30 = arith.constant 0 : index
    %c0_31 = arith.constant 0 : index
    %48 = vector.load %arg3[%c0_30, %c0_31] : memref<1x32xf32, #tpu.memory_space<vmem>>, vector<1x32xf32>
    %49 = vector.broadcast %48 : vector<1x32xf32> to vector<24x32xf32>
    %50 = arith.addf %47, %49 : vector<24x32xf32>
    %51 = arith.truncf %50 : vector<24x32xf32> to vector<24x32xbf16>
    %c0_32 = arith.constant 0 : index
    %c0_33 = arith.constant 0 : index
    %c0_34 = arith.constant 0 : index
    %52 = vector.load %arg4[%c0_32, %c0_33, %c0_34] : memref<1x24x32xbf16, #tpu.memory_space<vmem>>, vector<1x24x32xbf16>
    %53 = vector.shape_cast %52 : vector<1x24x32xbf16> to vector<24x32xbf16>
    %54 = vector.shape_cast %51 : vector<24x32xbf16> to vector<1x24x32xbf16>
    tpu.vector_store %arg4[%c0_32, %c0_33, %c0_34], %54 {strides = array<i32>} : memref<1x24x32xbf16, #tpu.memory_space<vmem>>, vector<1x24x32xbf16>,
    return
  }
  func.func @transform_0(%arg0: i32) -> (i32, i32, i32) {
    %c0_i32 = arith.constant 0 : i32
    %c0_i32_0 = arith.constant 0 : i32
    %c0_i32_1 = arith.constant 0 : i32
    return %arg0, %c0_i32, %c0_i32_0 : i32, i32, i32
  }
  func.func @transform_1(%arg0: i32) -> (i32, i32, i32) {
    %c0_i32 = arith.constant 0 : i32
    %c0_i32_0 = arith.constant 0 : i32
    %c0_i32_1 = arith.constant 0 : i32
    %c0_i32_2 = arith.constant 0 : i32
    return %c0_i32, %c0_i32_0, %c0_i32_1 : i32, i32, i32
  }
  func.func @transform_2(%arg0: i32) -> (i32, i32) {
    %c0_i32 = arith.constant 0 : i32
    %c0_i32_0 = arith.constant 0 : i32
    %c0_i32_1 = arith.constant 0 : i32
    return %c0_i32, %c0_i32_0 : i32, i32
  }
  func.func @transform_3(%arg0: i32) -> (i32, i32, i32) {
    %c0_i32 = arith.constant 0 : i32
    %c0_i32_0 = arith.constant 0 : i32
    %c0_i32_1 = arith.constant 0 : i32
    return %arg0, %c0_i32, %c0_i32_0 : i32, i32, i32
  }
}

module attributes {stable_mosaic.version = 11 : i64} {
  func.func @_conv_kernel(%arg0: i32, %arg1: memref<1x38x32xbf16, #tpu.memory_space<vmem>>, %arg2: memref<9x32x8xbf16, #tpu.memory_space<vmem>>, %arg3: memref<1x8xf32, #tpu.memory_space<vmem>>, %arg4: memref<1x24x8xbf16, #tpu.memory_space<vmem>>) attributes {dimension_semantics = [#tpu.dimension_semantics<parallel>], iteration_bounds = array<i64: 2>, scalar_prefetch = 0 : i64, scratch_operands = 0 : i64, tpu.core_type = #tpu.core_type<tc>, window_params = [{transform_indices = @transform_0, window_bounds = array<i64: 1, 38, 32>}, {pipeline_mode = #tpu.pipeline_mode<synchronous>, transform_indices = @transform_1, window_bounds = array<i64: 9, 32, 8>}, {pipeline_mode = #tpu.pipeline_mode<synchronous>, transform_indices = @transform_2, window_bounds = array<i64: 1, 8>}, {transform_indices = @transform_3, window_bounds = array<i64: 1, 24, 8>}]} {
    %c0 = arith.constant 0 : index
    %c0_0 = arith.constant 0 : index
    %c0_1 = arith.constant 0 : index
    %0 = vector.load %arg1[%c0, %c0_0, %c0_1] : memref<1x38x32xbf16, #tpu.memory_space<vmem>>, vector<1x38x32xbf16>
    %1 = vector.shape_cast %0 : vector<1x38x32xbf16> to vector<38x32xbf16>
    %cst = arith.constant 0.000000e+00 : bf16
    %2 = vector.broadcast %cst : bf16 to vector<38x32xbf16>
    %3 = arith.maximumf %1, %2 : vector<38x32xbf16>
    %cst_2 = arith.constant 0.000000e+00 : f32
    %4 = vector.broadcast %cst_2 : f32 to vector<24x8xf32>
    %5 = vector.extract_strided_slice %3 {offsets = [0, 0], sizes = [24, 32], strides = [1, 1]} : vector<38x32xbf16> to vector<24x32xbf16>
    %c0_3 = arith.constant 0 : index
    %c0_4 = arith.constant 0 : index
    %c0_5 = arith.constant 0 : index
    %6 = vector.load %arg2[%c0_3, %c0_4, %c0_5] : memref<9x32x8xbf16, #tpu.memory_space<vmem>>, vector<1x32x8xbf16>
    %7 = vector.shape_cast %6 : vector<1x32x8xbf16> to vector<32x8xbf16>
    %cst_6 = arith.constant dense<0.000000e+00> : vector<24x8xf32>
    %8 = tpu.matmul %5, %7, %cst_6 {dimension_numbers = #tpu.dot_dimension_numbers<[1], [0], [0], [1], [0, 0, 1, 1], [], []>} : vector<24x32xbf16>, vector<32x8xbf16>, vector<24x8xf32> -> vector<24x8xf32>
    %9 = arith.addf %4, %8 : vector<24x8xf32>
    %10 = vector.extract_strided_slice %3 {offsets = [1, 0], sizes = [24, 32], strides = [1, 1]} : vector<38x32xbf16> to vector<24x32xbf16>
    %c1 = arith.constant 1 : index
    %c0_7 = arith.constant 0 : index
    %c0_8 = arith.constant 0 : index
    %11 = vector.load %arg2[%c1, %c0_7, %c0_8] : memref<9x32x8xbf16, #tpu.memory_space<vmem>>, vector<1x32x8xbf16>
    %12 = vector.shape_cast %11 : vector<1x32x8xbf16> to vector<32x8xbf16>
    %cst_9 = arith.constant dense<0.000000e+00> : vector<24x8xf32>
    %13 = tpu.matmul %10, %12, %cst_9 {dimension_numbers = #tpu.dot_dimension_numbers<[1], [0], [0], [1], [0, 0, 1, 1], [], []>} : vector<24x32xbf16>, vector<32x8xbf16>, vector<24x8xf32> -> vector<24x8xf32>
    %14 = arith.addf %9, %13 : vector<24x8xf32>
    %15 = vector.extract_strided_slice %3 {offsets = [2, 0], sizes = [24, 32], strides = [1, 1]} : vector<38x32xbf16> to vector<24x32xbf16>
    %c2 = arith.constant 2 : index
    %c0_10 = arith.constant 0 : index
    %c0_11 = arith.constant 0 : index
    %16 = vector.load %arg2[%c2, %c0_10, %c0_11] : memref<9x32x8xbf16, #tpu.memory_space<vmem>>, vector<1x32x8xbf16>
    %17 = vector.shape_cast %16 : vector<1x32x8xbf16> to vector<32x8xbf16>
    %cst_12 = arith.constant dense<0.000000e+00> : vector<24x8xf32>
    %18 = tpu.matmul %15, %17, %cst_12 {dimension_numbers = #tpu.dot_dimension_numbers<[1], [0], [0], [1], [0, 0, 1, 1], [], []>} : vector<24x32xbf16>, vector<32x8xbf16>, vector<24x8xf32> -> vector<24x8xf32>
    %19 = arith.addf %14, %18 : vector<24x8xf32>
    %20 = vector.extract_strided_slice %3 {offsets = [6, 0], sizes = [24, 32], strides = [1, 1]} : vector<38x32xbf16> to vector<24x32xbf16>
    %c3 = arith.constant 3 : index
    %c0_13 = arith.constant 0 : index
    %c0_14 = arith.constant 0 : index
    %21 = vector.load %arg2[%c3, %c0_13, %c0_14] : memref<9x32x8xbf16, #tpu.memory_space<vmem>>, vector<1x32x8xbf16>
    %22 = vector.shape_cast %21 : vector<1x32x8xbf16> to vector<32x8xbf16>
    %cst_15 = arith.constant dense<0.000000e+00> : vector<24x8xf32>
    %23 = tpu.matmul %20, %22, %cst_15 {dimension_numbers = #tpu.dot_dimension_numbers<[1], [0], [0], [1], [0, 0, 1, 1], [], []>} : vector<24x32xbf16>, vector<32x8xbf16>, vector<24x8xf32> -> vector<24x8xf32>
    %24 = arith.addf %19, %23 : vector<24x8xf32>
    %25 = vector.extract_strided_slice %3 {offsets = [7, 0], sizes = [24, 32], strides = [1, 1]} : vector<38x32xbf16> to vector<24x32xbf16>
    %c4 = arith.constant 4 : index
    %c0_16 = arith.constant 0 : index
    %c0_17 = arith.constant 0 : index
    %26 = vector.load %arg2[%c4, %c0_16, %c0_17] : memref<9x32x8xbf16, #tpu.memory_space<vmem>>, vector<1x32x8xbf16>
    %27 = vector.shape_cast %26 : vector<1x32x8xbf16> to vector<32x8xbf16>
    %cst_18 = arith.constant dense<0.000000e+00> : vector<24x8xf32>
    %28 = tpu.matmul %25, %27, %cst_18 {dimension_numbers = #tpu.dot_dimension_numbers<[1], [0], [0], [1], [0, 0, 1, 1], [], []>} : vector<24x32xbf16>, vector<32x8xbf16>, vector<24x8xf32> -> vector<24x8xf32>
    %29 = arith.addf %24, %28 : vector<24x8xf32>
    %30 = vector.extract_strided_slice %3 {offsets = [8, 0], sizes = [24, 32], strides = [1, 1]} : vector<38x32xbf16> to vector<24x32xbf16>
    %c5 = arith.constant 5 : index
    %c0_19 = arith.constant 0 : index
    %c0_20 = arith.constant 0 : index
    %31 = vector.load %arg2[%c5, %c0_19, %c0_20] : memref<9x32x8xbf16, #tpu.memory_space<vmem>>, vector<1x32x8xbf16>
    %32 = vector.shape_cast %31 : vector<1x32x8xbf16> to vector<32x8xbf16>
    %cst_21 = arith.constant dense<0.000000e+00> : vector<24x8xf32>
    %33 = tpu.matmul %30, %32, %cst_21 {dimension_numbers = #tpu.dot_dimension_numbers<[1], [0], [0], [1], [0, 0, 1, 1], [], []>} : vector<24x32xbf16>, vector<32x8xbf16>, vector<24x8xf32> -> vector<24x8xf32>
    %34 = arith.addf %29, %33 : vector<24x8xf32>
    %35 = vector.extract_strided_slice %3 {offsets = [12, 0], sizes = [24, 32], strides = [1, 1]} : vector<38x32xbf16> to vector<24x32xbf16>
    %c6 = arith.constant 6 : index
    %c0_22 = arith.constant 0 : index
    %c0_23 = arith.constant 0 : index
    %36 = vector.load %arg2[%c6, %c0_22, %c0_23] : memref<9x32x8xbf16, #tpu.memory_space<vmem>>, vector<1x32x8xbf16>
    %37 = vector.shape_cast %36 : vector<1x32x8xbf16> to vector<32x8xbf16>
    %cst_24 = arith.constant dense<0.000000e+00> : vector<24x8xf32>
    %38 = tpu.matmul %35, %37, %cst_24 {dimension_numbers = #tpu.dot_dimension_numbers<[1], [0], [0], [1], [0, 0, 1, 1], [], []>} : vector<24x32xbf16>, vector<32x8xbf16>, vector<24x8xf32> -> vector<24x8xf32>
    %39 = arith.addf %34, %38 : vector<24x8xf32>
    %40 = vector.extract_strided_slice %3 {offsets = [13, 0], sizes = [24, 32], strides = [1, 1]} : vector<38x32xbf16> to vector<24x32xbf16>
    %c7 = arith.constant 7 : index
    %c0_25 = arith.constant 0 : index
    %c0_26 = arith.constant 0 : index
    %41 = vector.load %arg2[%c7, %c0_25, %c0_26] : memref<9x32x8xbf16, #tpu.memory_space<vmem>>, vector<1x32x8xbf16>
    %42 = vector.shape_cast %41 : vector<1x32x8xbf16> to vector<32x8xbf16>
    %cst_27 = arith.constant dense<0.000000e+00> : vector<24x8xf32>
    %43 = tpu.matmul %40, %42, %cst_27 {dimension_numbers = #tpu.dot_dimension_numbers<[1], [0], [0], [1], [0, 0, 1, 1], [], []>} : vector<24x32xbf16>, vector<32x8xbf16>, vector<24x8xf32> -> vector<24x8xf32>
    %44 = arith.addf %39, %43 : vector<24x8xf32>
    %45 = vector.extract_strided_slice %3 {offsets = [14, 0], sizes = [24, 32], strides = [1, 1]} : vector<38x32xbf16> to vector<24x32xbf16>
    %c8 = arith.constant 8 : index
    %c0_28 = arith.constant 0 : index
    %c0_29 = arith.constant 0 : index
    %46 = vector.load %arg2[%c8, %c0_28, %c0_29] : memref<9x32x8xbf16, #tpu.memory_space<vmem>>, vector<1x32x8xbf16>
    %47 = vector.shape_cast %46 : vector<1x32x8xbf16> to vector<32x8xbf16>
    %cst_30 = arith.constant dense<0.000000e+00> : vector<24x8xf32>
    %48 = tpu.matmul %45, %47, %cst_30 {dimension_numbers = #tpu.dot_dimension_numbers<[1], [0], [0], [1], [0, 0, 1, 1], [], []>} : vector<24x32xbf16>, vector<32x8xbf16>, vector<24x8xf32> -> vector<24x8xf32>
    %49 = arith.addf %44, %48 : vector<24x8xf32>
    %c0_31 = arith.constant 0 : index
    %c0_32 = arith.constant 0 : index
    %50 = vector.load %arg3[%c0_31, %c0_32] : memref<1x8xf32, #tpu.memory_space<vmem>>, vector<1x8xf32>
    %51 = vector.broadcast %50 : vector<1x8xf32> to vector<24x8xf32>
    %52 = arith.addf %49, %51 : vector<24x8xf32>
    %53 = arith.truncf %52 : vector<24x8xf32> to vector<24x8xbf16>
    %c0_33 = arith.constant 0 : index
    %c0_34 = arith.constant 0 : index
    %c0_35 = arith.constant 0 : index
    %54 = vector.load %arg4[%c0_33, %c0_34, %c0_35] : memref<1x24x8xbf16, #tpu.memory_space<vmem>>, vector<1x24x8xbf16>
    %55 = vector.shape_cast %54 : vector<1x24x8xbf16> to vector<24x8xbf16>
    %56 = vector.shape_cast %53 : vector<24x8xbf16> to vector<1x24x8xbf16>
    tpu.vector_store %arg4[%c0_33, %c0_34, %c0_35], %56 {strides = array<i32>} : memref<1x24x8xbf16, #tpu.memory_space<vmem>>, vector<1x24x8xbf16>,
    return
  }
  func.func @transform_0(%arg0: i32) -> (i32, i32, i32) {
    %c0_i32 = arith.constant 0 : i32
    %c0_i32_0 = arith.constant 0 : i32
    %c0_i32_1 = arith.constant 0 : i32
    return %arg0, %c0_i32, %c0_i32_0 : i32, i32, i32
  }
  func.func @transform_1(%arg0: i32) -> (i32, i32, i32) {
    %c0_i32 = arith.constant 0 : i32
    %c0_i32_0 = arith.constant 0 : i32
    %c0_i32_1 = arith.constant 0 : i32
    %c0_i32_2 = arith.constant 0 : i32
    return %c0_i32, %c0_i32_0, %c0_i32_1 : i32, i32, i32
  }
  func.func @transform_2(%arg0: i32) -> (i32, i32) {
    %c0_i32 = arith.constant 0 : i32
    %c0_i32_0 = arith.constant 0 : i32
    %c0_i32_1 = arith.constant 0 : i32
    return %c0_i32, %c0_i32_0 : i32, i32
  }
  func.func @transform_3(%arg0: i32) -> (i32, i32, i32) {
    %c0_i32 = arith.constant 0 : i32
    %c0_i32_0 = arith.constant 0 : i32
    %c0_i32_1 = arith.constant 0 : i32
    return %arg0, %c0_i32, %c0_i32_0 : i32, i32, i32
  }
}

module attributes {stable_mosaic.version = 11 : i64} {
  func.func @_conv_kernel(%arg0: i32, %arg1: memref<1x16x8xbf16, #tpu.memory_space<vmem>>, %arg2: memref<1x8x32xbf16, #tpu.memory_space<vmem>>, %arg3: memref<1x32xf32, #tpu.memory_space<vmem>>, %arg4: memref<1x16x32xbf16, #tpu.memory_space<vmem>>, %arg5: memref<1x16x32xbf16, #tpu.memory_space<vmem>>) attributes {dimension_semantics = [#tpu.dimension_semantics<parallel>], iteration_bounds = array<i64: 2>, scalar_prefetch = 0 : i64, scratch_operands = 0 : i64, tpu.core_type = #tpu.core_type<tc>, window_params = [{transform_indices = @transform_0, window_bounds = array<i64: 1, 16, 8>}, {pipeline_mode = #tpu.pipeline_mode<synchronous>, transform_indices = @transform_1, window_bounds = array<i64: 1, 8, 32>}, {pipeline_mode = #tpu.pipeline_mode<synchronous>, transform_indices = @transform_2, window_bounds = array<i64: 1, 32>}, {transform_indices = @transform_3, window_bounds = array<i64: 1, 16, 32>}, {transform_indices = @transform_4, window_bounds = array<i64: 1, 16, 32>}]} {
    %c0 = arith.constant 0 : index
    %c0_0 = arith.constant 0 : index
    %c0_1 = arith.constant 0 : index
    %0 = vector.load %arg1[%c0, %c0_0, %c0_1] : memref<1x16x8xbf16, #tpu.memory_space<vmem>>, vector<1x16x8xbf16>
    %1 = vector.shape_cast %0 : vector<1x16x8xbf16> to vector<16x8xbf16>
    %cst = arith.constant 0.000000e+00 : bf16
    %2 = vector.broadcast %cst : bf16 to vector<16x8xbf16>
    %3 = arith.maximumf %1, %2 : vector<16x8xbf16>
    %cst_2 = arith.constant 0.000000e+00 : f32
    %4 = vector.broadcast %cst_2 : f32 to vector<16x32xf32>
    %c0_3 = arith.constant 0 : index
    %c0_4 = arith.constant 0 : index
    %c0_5 = arith.constant 0 : index
    %5 = vector.load %arg2[%c0_3, %c0_4, %c0_5] : memref<1x8x32xbf16, #tpu.memory_space<vmem>>, vector<1x8x32xbf16>
    %6 = vector.shape_cast %5 : vector<1x8x32xbf16> to vector<8x32xbf16>
    %cst_6 = arith.constant dense<0.000000e+00> : vector<16x32xf32>
    %7 = tpu.matmul %3, %6, %cst_6 {dimension_numbers = #tpu.dot_dimension_numbers<[1], [0], [0], [1], [0, 0, 1, 1], [], []>} : vector<16x8xbf16>, vector<8x32xbf16>, vector<16x32xf32> -> vector<16x32xf32>
    %8 = arith.addf %4, %7 : vector<16x32xf32>
    %c0_7 = arith.constant 0 : index
    %c0_8 = arith.constant 0 : index
    %9 = vector.load %arg3[%c0_7, %c0_8] : memref<1x32xf32, #tpu.memory_space<vmem>>, vector<1x32xf32>
    %10 = vector.broadcast %9 : vector<1x32xf32> to vector<16x32xf32>
    %11 = arith.addf %8, %10 : vector<16x32xf32>
    %c0_9 = arith.constant 0 : index
    %c0_10 = arith.constant 0 : index
    %c0_11 = arith.constant 0 : index
    %12 = vector.load %arg4[%c0_9, %c0_10, %c0_11] : memref<1x16x32xbf16, #tpu.memory_space<vmem>>, vector<1x16x32xbf16>
    %13 = vector.shape_cast %12 : vector<1x16x32xbf16> to vector<16x32xbf16>
    %14 = arith.extf %13 : vector<16x32xbf16> to vector<16x32xf32>
    %15 = arith.addf %11, %14 : vector<16x32xf32>
    %16 = arith.truncf %15 : vector<16x32xf32> to vector<16x32xbf16>
    %c0_12 = arith.constant 0 : index
    %c0_13 = arith.constant 0 : index
    %c0_14 = arith.constant 0 : index
    %17 = vector.load %arg5[%c0_12, %c0_13, %c0_14] : memref<1x16x32xbf16, #tpu.memory_space<vmem>>, vector<1x16x32xbf16>
    %18 = vector.shape_cast %17 : vector<1x16x32xbf16> to vector<16x32xbf16>
    %19 = vector.shape_cast %16 : vector<16x32xbf16> to vector<1x16x32xbf16>
    tpu.vector_store %arg5[%c0_12, %c0_13, %c0_14], %19 {strides = array<i32>} : memref<1x16x32xbf16, #tpu.memory_space<vmem>>, vector<1x16x32xbf16>,
    return
  }
  func.func @transform_0(%arg0: i32) -> (i32, i32, i32) {
    %c0_i32 = arith.constant 0 : i32
    %c0_i32_0 = arith.constant 0 : i32
    %c0_i32_1 = arith.constant 0 : i32
    return %arg0, %c0_i32, %c0_i32_0 : i32, i32, i32
  }
  func.func @transform_1(%arg0: i32) -> (i32, i32, i32) {
    %c0_i32 = arith.constant 0 : i32
    %c0_i32_0 = arith.constant 0 : i32
    %c0_i32_1 = arith.constant 0 : i32
    %c0_i32_2 = arith.constant 0 : i32
    return %c0_i32, %c0_i32_0, %c0_i32_1 : i32, i32, i32
  }
  func.func @transform_2(%arg0: i32) -> (i32, i32) {
    %c0_i32 = arith.constant 0 : i32
    %c0_i32_0 = arith.constant 0 : i32
    %c0_i32_1 = arith.constant 0 : i32
    return %c0_i32, %c0_i32_0 : i32, i32
  }
  func.func @transform_3(%arg0: i32) -> (i32, i32, i32) {
    %c0_i32 = arith.constant 0 : i32
    %c0_i32_0 = arith.constant 0 : i32
    %c0_i32_1 = arith.constant 0 : i32
    return %arg0, %c0_i32, %c0_i32_0 : i32, i32, i32
  }
  func.func @transform_4(%arg0: i32) -> (i32, i32, i32) {
    %c0_i32 = arith.constant 0 : i32
    %c0_i32_0 = arith.constant 0 : i32
    %c0_i32_1 = arith.constant 0 : i32
    return %arg0, %c0_i32, %c0_i32_0 : i32, i32, i32
  }
}

module attributes {stable_mosaic.version = 11 : i64} {
  func.func @_conv_kernel(%arg0: i32, %arg1: memref<1x16x8xbf16, #tpu.memory_space<vmem>>, %arg2: memref<1x8x32xbf16, #tpu.memory_space<vmem>>, %arg3: memref<1x32xf32, #tpu.memory_space<vmem>>, %arg4: memref<1x16x32xbf16, #tpu.memory_space<vmem>>, %arg5: memref<1x16x32xbf16, #tpu.memory_space<vmem>>) attributes {dimension_semantics = [#tpu.dimension_semantics<parallel>], iteration_bounds = array<i64: 2>, scalar_prefetch = 0 : i64, scratch_operands = 0 : i64, tpu.core_type = #tpu.core_type<tc>, window_params = [{transform_indices = @transform_0, window_bounds = array<i64: 1, 16, 8>}, {pipeline_mode = #tpu.pipeline_mode<synchronous>, transform_indices = @transform_1, window_bounds = array<i64: 1, 8, 32>}, {pipeline_mode = #tpu.pipeline_mode<synchronous>, transform_indices = @transform_2, window_bounds = array<i64: 1, 32>}, {transform_indices = @transform_3, window_bounds = array<i64: 1, 16, 32>}, {transform_indices = @transform_4, window_bounds = array<i64: 1, 16, 32>}]} {
    %c0 = arith.constant 0 : index
    %c0_0 = arith.constant 0 : index
    %c0_1 = arith.constant 0 : index
    %0 = vector.load %arg1[%c0, %c0_0, %c0_1] : memref<1x16x8xbf16, #tpu.memory_space<vmem>>, vector<1x16x8xbf16>
    %1 = vector.shape_cast %0 : vector<1x16x8xbf16> to vector<16x8xbf16>
    %cst = arith.constant 0.000000e+00 : bf16
    %2 = vector.broadcast %cst : bf16 to vector<16x8xbf16>
    %3 = arith.maximumf %1, %2 : vector<16x8xbf16>
    %cst_2 = arith.constant 0.000000e+00 : f32
    %4 = vector.broadcast %cst_2 : f32 to vector<16x32xf32>
    %c0_3 = arith.constant 0 : index
    %c0_4 = arith.constant 0 : index
    %c0_5 = arith.constant 0 : index
    %5 = vector.load %arg2[%c0_3, %c0_4, %c0_5] : memref<1x8x32xbf16, #tpu.memory_space<vmem>>, vector<1x8x32xbf16>
    %6 = vector.shape_cast %5 : vector<1x8x32xbf16> to vector<8x32xbf16>
    %cst_6 = arith.constant dense<0.000000e+00> : vector<16x32xf32>
    %7 = tpu.matmul %3, %6, %cst_6 {dimension_numbers = #tpu.dot_dimension_numbers<[1], [0], [0], [1], [0, 0, 1, 1], [], []>} : vector<16x8xbf16>, vector<8x32xbf16>, vector<16x32xf32> -> vector<16x32xf32>
    %8 = arith.addf %4, %7 : vector<16x32xf32>
    %c0_7 = arith.constant 0 : index
    %c0_8 = arith.constant 0 : index
    %9 = vector.load %arg3[%c0_7, %c0_8] : memref<1x32xf32, #tpu.memory_space<vmem>>, vector<1x32xf32>
    %10 = vector.broadcast %9 : vector<1x32xf32> to vector<16x32xf32>
    %11 = arith.addf %8, %10 : vector<16x32xf32>
    %c0_9 = arith.constant 0 : index
    %c0_10 = arith.constant 0 : index
    %c0_11 = arith.constant 0 : index
    %12 = vector.load %arg4[%c0_9, %c0_10, %c0_11] : memref<1x16x32xbf16, #tpu.memory_space<vmem>>, vector<1x16x32xbf16>
    %13 = vector.shape_cast %12 : vector<1x16x32xbf16> to vector<16x32xbf16>
    %14 = arith.extf %13 : vector<16x32xbf16> to vector<16x32xf32>
    %15 = arith.addf %11, %14 : vector<16x32xf32>
    %cst_12 = arith.constant 0.000000e+00 : f32
    %16 = vector.broadcast %cst_12 : f32 to vector<16x32xf32>
    %17 = arith.maximumf %15, %16 : vector<16x32xf32>
    %18 = arith.truncf %17 : vector<16x32xf32> to vector<16x32xbf16>
    %c0_13 = arith.constant 0 : index
    %c0_14 = arith.constant 0 : index
    %c0_15 = arith.constant 0 : index
    %19 = vector.load %arg5[%c0_13, %c0_14, %c0_15] : memref<1x16x32xbf16, #tpu.memory_space<vmem>>, vector<1x16x32xbf16>
    %20 = vector.shape_cast %19 : vector<1x16x32xbf16> to vector<16x32xbf16>
    %21 = vector.shape_cast %18 : vector<16x32xbf16> to vector<1x16x32xbf16>
    tpu.vector_store %arg5[%c0_13, %c0_14, %c0_15], %21 {strides = array<i32>} : memref<1x16x32xbf16, #tpu.memory_space<vmem>>, vector<1x16x32xbf16>,
    return
  }
  func.func @transform_0(%arg0: i32) -> (i32, i32, i32) {
    %c0_i32 = arith.constant 0 : i32
    %c0_i32_0 = arith.constant 0 : i32
    %c0_i32_1 = arith.constant 0 : i32
    return %arg0, %c0_i32, %c0_i32_0 : i32, i32, i32
  }
  func.func @transform_1(%arg0: i32) -> (i32, i32, i32) {
    %c0_i32 = arith.constant 0 : i32
    %c0_i32_0 = arith.constant 0 : i32
    %c0_i32_1 = arith.constant 0 : i32
    %c0_i32_2 = arith.constant 0 : i32
    return %c0_i32, %c0_i32_0, %c0_i32_1 : i32, i32, i32
  }
  func.func @transform_2(%arg0: i32) -> (i32, i32) {
    %c0_i32 = arith.constant 0 : i32
    %c0_i32_0 = arith.constant 0 : i32
    %c0_i32_1 = arith.constant 0 : i32
    return %c0_i32, %c0_i32_0 : i32, i32
  }
  func.func @transform_3(%arg0: i32) -> (i32, i32, i32) {
    %c0_i32 = arith.constant 0 : i32
    %c0_i32_0 = arith.constant 0 : i32
    %c0_i32_1 = arith.constant 0 : i32
    return %arg0, %c0_i32, %c0_i32_0 : i32, i32, i32
  }
  func.func @transform_4(%arg0: i32) -> (i32, i32, i32) {
    %c0_i32 = arith.constant 0 : i32
    %c0_i32_0 = arith.constant 0 : i32
    %c0_i32_1 = arith.constant 0 : i32
    return %arg0, %c0_i32, %c0_i32_0 : i32, i32, i32
  }
}

module attributes {stable_mosaic.version = 11 : i64} {
  func.func @_conv_kernel(%arg0: i32, %arg1: memref<1x16x32xbf16, #tpu.memory_space<vmem>>, %arg2: memref<1x32x16xbf16, #tpu.memory_space<vmem>>, %arg3: memref<1x16xf32, #tpu.memory_space<vmem>>, %arg4: memref<1x16x16xbf16, #tpu.memory_space<vmem>>) attributes {dimension_semantics = [#tpu.dimension_semantics<parallel>], iteration_bounds = array<i64: 2>, scalar_prefetch = 0 : i64, scratch_operands = 0 : i64, tpu.core_type = #tpu.core_type<tc>, window_params = [{transform_indices = @transform_0, window_bounds = array<i64: 1, 16, 32>}, {pipeline_mode = #tpu.pipeline_mode<synchronous>, transform_indices = @transform_1, window_bounds = array<i64: 1, 32, 16>}, {pipeline_mode = #tpu.pipeline_mode<synchronous>, transform_indices = @transform_2, window_bounds = array<i64: 1, 16>}, {transform_indices = @transform_3, window_bounds = array<i64: 1, 16, 16>}]} {
    %c0 = arith.constant 0 : index
    %c0_0 = arith.constant 0 : index
    %c0_1 = arith.constant 0 : index
    %0 = vector.load %arg1[%c0, %c0_0, %c0_1] : memref<1x16x32xbf16, #tpu.memory_space<vmem>>, vector<1x16x32xbf16>
    %1 = vector.shape_cast %0 : vector<1x16x32xbf16> to vector<16x32xbf16>
    %cst = arith.constant 0.000000e+00 : f32
    %2 = vector.broadcast %cst : f32 to vector<16x16xf32>
    %c0_2 = arith.constant 0 : index
    %c0_3 = arith.constant 0 : index
    %c0_4 = arith.constant 0 : index
    %3 = vector.load %arg2[%c0_2, %c0_3, %c0_4] : memref<1x32x16xbf16, #tpu.memory_space<vmem>>, vector<1x32x16xbf16>
    %4 = vector.shape_cast %3 : vector<1x32x16xbf16> to vector<32x16xbf16>
    %cst_5 = arith.constant dense<0.000000e+00> : vector<16x16xf32>
    %5 = tpu.matmul %1, %4, %cst_5 {dimension_numbers = #tpu.dot_dimension_numbers<[1], [0], [0], [1], [0, 0, 1, 1], [], []>} : vector<16x32xbf16>, vector<32x16xbf16>, vector<16x16xf32> -> vector<16x16xf32>
    %6 = arith.addf %2, %5 : vector<16x16xf32>
    %c0_6 = arith.constant 0 : index
    %c0_7 = arith.constant 0 : index
    %7 = vector.load %arg3[%c0_6, %c0_7] : memref<1x16xf32, #tpu.memory_space<vmem>>, vector<1x16xf32>
    %8 = vector.broadcast %7 : vector<1x16xf32> to vector<16x16xf32>
    %9 = arith.addf %6, %8 : vector<16x16xf32>
    %10 = arith.truncf %9 : vector<16x16xf32> to vector<16x16xbf16>
    %c0_8 = arith.constant 0 : index
    %c0_9 = arith.constant 0 : index
    %c0_10 = arith.constant 0 : index
    %11 = vector.load %arg4[%c0_8, %c0_9, %c0_10] : memref<1x16x16xbf16, #tpu.memory_space<vmem>>, vector<1x16x16xbf16>
    %12 = vector.shape_cast %11 : vector<1x16x16xbf16> to vector<16x16xbf16>
    %13 = vector.shape_cast %10 : vector<16x16xbf16> to vector<1x16x16xbf16>
    tpu.vector_store %arg4[%c0_8, %c0_9, %c0_10], %13 {strides = array<i32>} : memref<1x16x16xbf16, #tpu.memory_space<vmem>>, vector<1x16x16xbf16>,
    return
  }
  func.func @transform_0(%arg0: i32) -> (i32, i32, i32) {
    %c0_i32 = arith.constant 0 : i32
    %c0_i32_0 = arith.constant 0 : i32
    %c0_i32_1 = arith.constant 0 : i32
    return %arg0, %c0_i32, %c0_i32_0 : i32, i32, i32
  }
  func.func @transform_1(%arg0: i32) -> (i32, i32, i32) {
    %c0_i32 = arith.constant 0 : i32
    %c0_i32_0 = arith.constant 0 : i32
    %c0_i32_1 = arith.constant 0 : i32
    %c0_i32_2 = arith.constant 0 : i32
    return %c0_i32, %c0_i32_0, %c0_i32_1 : i32, i32, i32
  }
  func.func @transform_2(%arg0: i32) -> (i32, i32) {
    %c0_i32 = arith.constant 0 : i32
    %c0_i32_0 = arith.constant 0 : i32
    %c0_i32_1 = arith.constant 0 : i32
    return %c0_i32, %c0_i32_0 : i32, i32
  }
  func.func @transform_3(%arg0: i32) -> (i32, i32, i32) {
    %c0_i32 = arith.constant 0 : i32
    %c0_i32_0 = arith.constant 0 : i32
    %c0_i32_1 = arith.constant 0 : i32
    return %arg0, %c0_i32, %c0_i32_0 : i32, i32, i32
  }
}

module attributes {stable_mosaic.version = 11 : i64} {
  func.func @_quantize_kernel(%arg0: i32, %arg1: memref<256x16xbf16, #tpu.memory_space<vmem>>, %arg2: memref<16x128xf32, #tpu.memory_space<vmem>>, %arg3: memref<1x128xf32, #tpu.memory_space<vmem>>, %arg4: memref<128x16xf32, #tpu.memory_space<vmem>>, %arg5: memref<256x16xbf16, #tpu.memory_space<vmem>>, %arg6: memref<256x1xf32, #tpu.memory_space<vmem>>) attributes {dimension_semantics = [#tpu.dimension_semantics<parallel>], iteration_bounds = array<i64: 1>, scalar_prefetch = 0 : i64, scratch_operands = 0 : i64, tpu.core_type = #tpu.core_type<tc>, window_params = [{transform_indices = @transform_0, window_bounds = array<i64: 256, 16>}, {pipeline_mode = #tpu.pipeline_mode<synchronous>, transform_indices = @transform_1, window_bounds = array<i64: 16, 128>}, {pipeline_mode = #tpu.pipeline_mode<synchronous>, transform_indices = @transform_2, window_bounds = array<i64: 1, 128>}, {pipeline_mode = #tpu.pipeline_mode<synchronous>, transform_indices = @transform_3, window_bounds = array<i64: 128, 16>}, {transform_indices = @transform_4, window_bounds = array<i64: 256, 16>}, {transform_indices = @transform_5, window_bounds = array<i64: 256, 1>}]} {
    %c0 = arith.constant 0 : index
    %c0_0 = arith.constant 0 : index
    %0 = vector.load %arg1[%c0, %c0_0] : memref<256x16xbf16, #tpu.memory_space<vmem>>, vector<256x16xbf16>
    %1 = arith.extf %0 : vector<256x16xbf16> to vector<256x16xf32>
    %c0_1 = arith.constant 0 : index
    %c0_2 = arith.constant 0 : index
    %2 = vector.load %arg3[%c0_1, %c0_2] : memref<1x128xf32, #tpu.memory_space<vmem>>, vector<1x128xf32>
    %c0_3 = arith.constant 0 : index
    %c0_4 = arith.constant 0 : index
    %3 = vector.load %arg2[%c0_3, %c0_4] : memref<16x128xf32, #tpu.memory_space<vmem>>, vector<16x128xf32>
    %cst = arith.constant dense<0.000000e+00> : vector<256x128xf32>
    %4 = tpu.matmul %1, %3, %cst {dimension_numbers = #tpu.dot_dimension_numbers<[1], [0], [0], [1], [0, 0, 1, 1], [], []>} : vector<256x16xf32>, vector<16x128xf32>, vector<256x128xf32> -> vector<256x128xf32>
    %cst_5 = arith.constant 2.000000e+00 : f32
    %5 = vector.broadcast %cst_5 : f32 to vector<256x128xf32>
    %6 = arith.mulf %5, %4 : vector<256x128xf32>
    %7 = vector.broadcast %2 : vector<1x128xf32> to vector<256x128xf32>
    %8 = arith.subf %7, %6 : vector<256x128xf32>
    %cst_6 = arith.constant dense<0x7F800000> : vector<256xf32>
    %9 = vector.multi_reduction <minimumf>, %8, %cst_6 [1] : vector<256x128xf32> to vector<256xf32>
    %10 = vector.shape_cast %9 : vector<256xf32> to vector<256x1xf32>
    %11 = tpu.iota {dimensions = array<i32: 1>} : vector<256x128xi32>
    %12 = vector.broadcast %10 : vector<256x1xf32> to vector<256x128xf32>
    %13 = arith.cmpf ole, %8, %12 : vector<256x128xf32>
    %c128_i32 = arith.constant 128 : i32
    %14 = vector.broadcast %c128_i32 : i32 to vector<256x128xi32>
    %15 = arith.select %13, %11, %14 : vector<256x128xi1>, vector<256x128xi32>
    %cst_7 = arith.constant dense<2147483647> : vector<256xi32>
    %16 = vector.multi_reduction <minsi>, %15, %cst_7 [1] : vector<256x128xi32> to vector<256xi32>
    %17 = vector.shape_cast %16 : vector<256xi32> to vector<256x1xi32>
    %18 = vector.broadcast %17 : vector<256x1xi32> to vector<256x128xi32>
    %19 = arith.cmpi eq, %11, %18 : vector<256x128xi32>
    %20 = arith.extui %19 : vector<256x128xi1> to vector<256x128xi32>
    %21 = arith.sitofp %20 : vector<256x128xi32> to vector<256x128xf32>
    %c0_8 = arith.constant 0 : index
    %c0_9 = arith.constant 0 : index
    %22 = vector.load %arg4[%c0_8, %c0_9] : memref<128x16xf32, #tpu.memory_space<vmem>>, vector<128x16xf32>
    %cst_10 = arith.constant dense<0.000000e+00> : vector<256x16xf32>
    %23 = tpu.matmul %21, %22, %cst_10 {dimension_numbers = #tpu.dot_dimension_numbers<[1], [0], [0], [1], [0, 0, 1, 1], [], []>} : vector<256x128xf32>, vector<128x16xf32>, vector<256x16xf32> -> vector<256x16xf32>
    %24 = arith.subf %23, %1 : vector<256x16xf32>
    %25 = arith.mulf %24, %24 : vector<256x16xf32>
    %cst_11 = arith.constant dense<0.000000e+00> : vector<256xf32>
    %26 = vector.multi_reduction <add>, %25, %cst_11 [1] : vector<256x16xf32> to vector<256xf32>
    %27 = vector.shape_cast %26 : vector<256xf32> to vector<256x1xf32>
    %c0_12 = arith.constant 0 : index
    %c0_13 = arith.constant 0 : index
    %28 = vector.load %arg6[%c0_12, %c0_13] : memref<256x1xf32, #tpu.memory_space<vmem>>, vector<256x1xf32>
    tpu.vector_store %arg6[%c0_12, %c0_13], %27 {strides = array<i32>} : memref<256x1xf32, #tpu.memory_space<vmem>>, vector<256x1xf32>,
    %29 = arith.truncf %23 : vector<256x16xf32> to vector<256x16xbf16>
    %c0_14 = arith.constant 0 : index
    %c0_15 = arith.constant 0 : index
    %30 = vector.load %arg5[%c0_14, %c0_15] : memref<256x16xbf16, #tpu.memory_space<vmem>>, vector<256x16xbf16>
    tpu.vector_store %arg5[%c0_14, %c0_15], %29 {strides = array<i32>} : memref<256x16xbf16, #tpu.memory_space<vmem>>, vector<256x16xbf16>,
    return
  }
  func.func @transform_0(%arg0: i32) -> (i32, i32) {
    %c0_i32 = arith.constant 0 : i32
    %c0_i32_0 = arith.constant 0 : i32
    return %arg0, %c0_i32 : i32, i32
  }
  func.func @transform_1(%arg0: i32) -> (i32, i32) {
    %c0_i32 = arith.constant 0 : i32
    %c0_i32_0 = arith.constant 0 : i32
    %c0_i32_1 = arith.constant 0 : i32
    return %c0_i32, %c0_i32_0 : i32, i32
  }
  func.func @transform_2(%arg0: i32) -> (i32, i32) {
    %c0_i32 = arith.constant 0 : i32
    %c0_i32_0 = arith.constant 0 : i32
    %c0_i32_1 = arith.constant 0 : i32
    return %c0_i32, %c0_i32_0 : i32, i32
  }
  func.func @transform_3(%arg0: i32) -> (i32, i32) {
    %c0_i32 = arith.constant 0 : i32
    %c0_i32_0 = arith.constant 0 : i32
    %c0_i32_1 = arith.constant 0 : i32
    return %c0_i32, %c0_i32_0 : i32, i32
  }
  func.func @transform_4(%arg0: i32) -> (i32, i32) {
    %c0_i32 = arith.constant 0 : i32
    %c0_i32_0 = arith.constant 0 : i32
    return %arg0, %c0_i32 : i32, i32
  }
  func.func @transform_5(%arg0: i32) -> (i32, i32) {
    %c0_i32 = arith.constant 0 : i32
    %c0_i32_0 = arith.constant 0 : i32
    return %arg0, %c0_i32 : i32, i32
  }
}

module attributes {stable_mosaic.version = 11 : i64} {
  func.func @_conv_kernel(%arg0: i32, %arg1: memref<1x38x32xbf16, #tpu.memory_space<vmem>>, %arg2: memref<9x32x64xbf16, #tpu.memory_space<vmem>>, %arg3: memref<1x64xf32, #tpu.memory_space<vmem>>, %arg4: memref<1x24x64xbf16, #tpu.memory_space<vmem>>) attributes {dimension_semantics = [#tpu.dimension_semantics<parallel>], iteration_bounds = array<i64: 2>, scalar_prefetch = 0 : i64, scratch_operands = 0 : i64, tpu.core_type = #tpu.core_type<tc>, window_params = [{transform_indices = @transform_0, window_bounds = array<i64: 1, 38, 32>}, {pipeline_mode = #tpu.pipeline_mode<synchronous>, transform_indices = @transform_1, window_bounds = array<i64: 9, 32, 64>}, {pipeline_mode = #tpu.pipeline_mode<synchronous>, transform_indices = @transform_2, window_bounds = array<i64: 1, 64>}, {transform_indices = @transform_3, window_bounds = array<i64: 1, 24, 64>}]} {
    %c0 = arith.constant 0 : index
    %c0_0 = arith.constant 0 : index
    %c0_1 = arith.constant 0 : index
    %0 = vector.load %arg1[%c0, %c0_0, %c0_1] : memref<1x38x32xbf16, #tpu.memory_space<vmem>>, vector<1x38x32xbf16>
    %1 = vector.shape_cast %0 : vector<1x38x32xbf16> to vector<38x32xbf16>
    %cst = arith.constant 0.000000e+00 : f32
    %2 = vector.broadcast %cst : f32 to vector<24x64xf32>
    %3 = vector.extract_strided_slice %1 {offsets = [0, 0], sizes = [24, 32], strides = [1, 1]} : vector<38x32xbf16> to vector<24x32xbf16>
    %c0_2 = arith.constant 0 : index
    %c0_3 = arith.constant 0 : index
    %c0_4 = arith.constant 0 : index
    %4 = vector.load %arg2[%c0_2, %c0_3, %c0_4] : memref<9x32x64xbf16, #tpu.memory_space<vmem>>, vector<1x32x64xbf16>
    %5 = vector.shape_cast %4 : vector<1x32x64xbf16> to vector<32x64xbf16>
    %cst_5 = arith.constant dense<0.000000e+00> : vector<24x64xf32>
    %6 = tpu.matmul %3, %5, %cst_5 {dimension_numbers = #tpu.dot_dimension_numbers<[1], [0], [0], [1], [0, 0, 1, 1], [], []>} : vector<24x32xbf16>, vector<32x64xbf16>, vector<24x64xf32> -> vector<24x64xf32>
    %7 = arith.addf %2, %6 : vector<24x64xf32>
    %8 = vector.extract_strided_slice %1 {offsets = [1, 0], sizes = [24, 32], strides = [1, 1]} : vector<38x32xbf16> to vector<24x32xbf16>
    %c1 = arith.constant 1 : index
    %c0_6 = arith.constant 0 : index
    %c0_7 = arith.constant 0 : index
    %9 = vector.load %arg2[%c1, %c0_6, %c0_7] : memref<9x32x64xbf16, #tpu.memory_space<vmem>>, vector<1x32x64xbf16>
    %10 = vector.shape_cast %9 : vector<1x32x64xbf16> to vector<32x64xbf16>
    %cst_8 = arith.constant dense<0.000000e+00> : vector<24x64xf32>
    %11 = tpu.matmul %8, %10, %cst_8 {dimension_numbers = #tpu.dot_dimension_numbers<[1], [0], [0], [1], [0, 0, 1, 1], [], []>} : vector<24x32xbf16>, vector<32x64xbf16>, vector<24x64xf32> -> vector<24x64xf32>
    %12 = arith.addf %7, %11 : vector<24x64xf32>
    %13 = vector.extract_strided_slice %1 {offsets = [2, 0], sizes = [24, 32], strides = [1, 1]} : vector<38x32xbf16> to vector<24x32xbf16>
    %c2 = arith.constant 2 : index
    %c0_9 = arith.constant 0 : index
    %c0_10 = arith.constant 0 : index
    %14 = vector.load %arg2[%c2, %c0_9, %c0_10] : memref<9x32x64xbf16, #tpu.memory_space<vmem>>, vector<1x32x64xbf16>
    %15 = vector.shape_cast %14 : vector<1x32x64xbf16> to vector<32x64xbf16>
    %cst_11 = arith.constant dense<0.000000e+00> : vector<24x64xf32>
    %16 = tpu.matmul %13, %15, %cst_11 {dimension_numbers = #tpu.dot_dimension_numbers<[1], [0], [0], [1], [0, 0, 1, 1], [], []>} : vector<24x32xbf16>, vector<32x64xbf16>, vector<24x64xf32> -> vector<24x64xf32>
    %17 = arith.addf %12, %16 : vector<24x64xf32>
    %18 = vector.extract_strided_slice %1 {offsets = [6, 0], sizes = [24, 32], strides = [1, 1]} : vector<38x32xbf16> to vector<24x32xbf16>
    %c3 = arith.constant 3 : index
    %c0_12 = arith.constant 0 : index
    %c0_13 = arith.constant 0 : index
    %19 = vector.load %arg2[%c3, %c0_12, %c0_13] : memref<9x32x64xbf16, #tpu.memory_space<vmem>>, vector<1x32x64xbf16>
    %20 = vector.shape_cast %19 : vector<1x32x64xbf16> to vector<32x64xbf16>
    %cst_14 = arith.constant dense<0.000000e+00> : vector<24x64xf32>
    %21 = tpu.matmul %18, %20, %cst_14 {dimension_numbers = #tpu.dot_dimension_numbers<[1], [0], [0], [1], [0, 0, 1, 1], [], []>} : vector<24x32xbf16>, vector<32x64xbf16>, vector<24x64xf32> -> vector<24x64xf32>
    %22 = arith.addf %17, %21 : vector<24x64xf32>
    %23 = vector.extract_strided_slice %1 {offsets = [7, 0], sizes = [24, 32], strides = [1, 1]} : vector<38x32xbf16> to vector<24x32xbf16>
    %c4 = arith.constant 4 : index
    %c0_15 = arith.constant 0 : index
    %c0_16 = arith.constant 0 : index
    %24 = vector.load %arg2[%c4, %c0_15, %c0_16] : memref<9x32x64xbf16, #tpu.memory_space<vmem>>, vector<1x32x64xbf16>
    %25 = vector.shape_cast %24 : vector<1x32x64xbf16> to vector<32x64xbf16>
    %cst_17 = arith.constant dense<0.000000e+00> : vector<24x64xf32>
    %26 = tpu.matmul %23, %25, %cst_17 {dimension_numbers = #tpu.dot_dimension_numbers<[1], [0], [0], [1], [0, 0, 1, 1], [], []>} : vector<24x32xbf16>, vector<32x64xbf16>, vector<24x64xf32> -> vector<24x64xf32>
    %27 = arith.addf %22, %26 : vector<24x64xf32>
    %28 = vector.extract_strided_slice %1 {offsets = [8, 0], sizes = [24, 32], strides = [1, 1]} : vector<38x32xbf16> to vector<24x32xbf16>
    %c5 = arith.constant 5 : index
    %c0_18 = arith.constant 0 : index
    %c0_19 = arith.constant 0 : index
    %29 = vector.load %arg2[%c5, %c0_18, %c0_19] : memref<9x32x64xbf16, #tpu.memory_space<vmem>>, vector<1x32x64xbf16>
    %30 = vector.shape_cast %29 : vector<1x32x64xbf16> to vector<32x64xbf16>
    %cst_20 = arith.constant dense<0.000000e+00> : vector<24x64xf32>
    %31 = tpu.matmul %28, %30, %cst_20 {dimension_numbers = #tpu.dot_dimension_numbers<[1], [0], [0], [1], [0, 0, 1, 1], [], []>} : vector<24x32xbf16>, vector<32x64xbf16>, vector<24x64xf32> -> vector<24x64xf32>
    %32 = arith.addf %27, %31 : vector<24x64xf32>
    %33 = vector.extract_strided_slice %1 {offsets = [12, 0], sizes = [24, 32], strides = [1, 1]} : vector<38x32xbf16> to vector<24x32xbf16>
    %c6 = arith.constant 6 : index
    %c0_21 = arith.constant 0 : index
    %c0_22 = arith.constant 0 : index
    %34 = vector.load %arg2[%c6, %c0_21, %c0_22] : memref<9x32x64xbf16, #tpu.memory_space<vmem>>, vector<1x32x64xbf16>
    %35 = vector.shape_cast %34 : vector<1x32x64xbf16> to vector<32x64xbf16>
    %cst_23 = arith.constant dense<0.000000e+00> : vector<24x64xf32>
    %36 = tpu.matmul %33, %35, %cst_23 {dimension_numbers = #tpu.dot_dimension_numbers<[1], [0], [0], [1], [0, 0, 1, 1], [], []>} : vector<24x32xbf16>, vector<32x64xbf16>, vector<24x64xf32> -> vector<24x64xf32>
    %37 = arith.addf %32, %36 : vector<24x64xf32>
    %38 = vector.extract_strided_slice %1 {offsets = [13, 0], sizes = [24, 32], strides = [1, 1]} : vector<38x32xbf16> to vector<24x32xbf16>
    %c7 = arith.constant 7 : index
    %c0_24 = arith.constant 0 : index
    %c0_25 = arith.constant 0 : index
    %39 = vector.load %arg2[%c7, %c0_24, %c0_25] : memref<9x32x64xbf16, #tpu.memory_space<vmem>>, vector<1x32x64xbf16>
    %40 = vector.shape_cast %39 : vector<1x32x64xbf16> to vector<32x64xbf16>
    %cst_26 = arith.constant dense<0.000000e+00> : vector<24x64xf32>
    %41 = tpu.matmul %38, %40, %cst_26 {dimension_numbers = #tpu.dot_dimension_numbers<[1], [0], [0], [1], [0, 0, 1, 1], [], []>} : vector<24x32xbf16>, vector<32x64xbf16>, vector<24x64xf32> -> vector<24x64xf32>
    %42 = arith.addf %37, %41 : vector<24x64xf32>
    %43 = vector.extract_strided_slice %1 {offsets = [14, 0], sizes = [24, 32], strides = [1, 1]} : vector<38x32xbf16> to vector<24x32xbf16>
    %c8 = arith.constant 8 : index
    %c0_27 = arith.constant 0 : index
    %c0_28 = arith.constant 0 : index
    %44 = vector.load %arg2[%c8, %c0_27, %c0_28] : memref<9x32x64xbf16, #tpu.memory_space<vmem>>, vector<1x32x64xbf16>
    %45 = vector.shape_cast %44 : vector<1x32x64xbf16> to vector<32x64xbf16>
    %cst_29 = arith.constant dense<0.000000e+00> : vector<24x64xf32>
    %46 = tpu.matmul %43, %45, %cst_29 {dimension_numbers = #tpu.dot_dimension_numbers<[1], [0], [0], [1], [0, 0, 1, 1], [], []>} : vector<24x32xbf16>, vector<32x64xbf16>, vector<24x64xf32> -> vector<24x64xf32>
    %47 = arith.addf %42, %46 : vector<24x64xf32>
    %c0_30 = arith.constant 0 : index
    %c0_31 = arith.constant 0 : index
    %48 = vector.load %arg3[%c0_30, %c0_31] : memref<1x64xf32, #tpu.memory_space<vmem>>, vector<1x64xf32>
    %49 = vector.broadcast %48 : vector<1x64xf32> to vector<24x64xf32>
    %50 = arith.addf %47, %49 : vector<24x64xf32>
    %51 = arith.truncf %50 : vector<24x64xf32> to vector<24x64xbf16>
    %c0_32 = arith.constant 0 : index
    %c0_33 = arith.constant 0 : index
    %c0_34 = arith.constant 0 : index
    %52 = vector.load %arg4[%c0_32, %c0_33, %c0_34] : memref<1x24x64xbf16, #tpu.memory_space<vmem>>, vector<1x24x64xbf16>
    %53 = vector.shape_cast %52 : vector<1x24x64xbf16> to vector<24x64xbf16>
    %54 = vector.shape_cast %51 : vector<24x64xbf16> to vector<1x24x64xbf16>
    tpu.vector_store %arg4[%c0_32, %c0_33, %c0_34], %54 {strides = array<i32>} : memref<1x24x64xbf16, #tpu.memory_space<vmem>>, vector<1x24x64xbf16>,
    return
  }
  func.func @transform_0(%arg0: i32) -> (i32, i32, i32) {
    %c0_i32 = arith.constant 0 : i32
    %c0_i32_0 = arith.constant 0 : i32
    %c0_i32_1 = arith.constant 0 : i32
    return %arg0, %c0_i32, %c0_i32_0 : i32, i32, i32
  }
  func.func @transform_1(%arg0: i32) -> (i32, i32, i32) {
    %c0_i32 = arith.constant 0 : i32
    %c0_i32_0 = arith.constant 0 : i32
    %c0_i32_1 = arith.constant 0 : i32
    %c0_i32_2 = arith.constant 0 : i32
    return %c0_i32, %c0_i32_0, %c0_i32_1 : i32, i32, i32
  }
  func.func @transform_2(%arg0: i32) -> (i32, i32) {
    %c0_i32 = arith.constant 0 : i32
    %c0_i32_0 = arith.constant 0 : i32
    %c0_i32_1 = arith.constant 0 : i32
    return %c0_i32, %c0_i32_0 : i32, i32
  }
  func.func @transform_3(%arg0: i32) -> (i32, i32, i32) {
    %c0_i32 = arith.constant 0 : i32
    %c0_i32_0 = arith.constant 0 : i32
    %c0_i32_1 = arith.constant 0 : i32
    return %arg0, %c0_i32, %c0_i32_0 : i32, i32, i32
  }
}

module attributes {stable_mosaic.version = 11 : i64} {
  func.func @_conv_kernel(%arg0: i32, %arg1: memref<1x64x48xbf16, #tpu.memory_space<vmem>>, %arg2: memref<1x48x16xbf16, #tpu.memory_space<vmem>>, %arg3: memref<1x16xf32, #tpu.memory_space<vmem>>, %arg4: memref<1x64x16xbf16, #tpu.memory_space<vmem>>) attributes {dimension_semantics = [#tpu.dimension_semantics<parallel>], iteration_bounds = array<i64: 2>, scalar_prefetch = 0 : i64, scratch_operands = 0 : i64, tpu.core_type = #tpu.core_type<tc>, window_params = [{transform_indices = @transform_0, window_bounds = array<i64: 1, 64, 48>}, {pipeline_mode = #tpu.pipeline_mode<synchronous>, transform_indices = @transform_1, window_bounds = array<i64: 1, 48, 16>}, {pipeline_mode = #tpu.pipeline_mode<synchronous>, transform_indices = @transform_2, window_bounds = array<i64: 1, 16>}, {transform_indices = @transform_3, window_bounds = array<i64: 1, 64, 16>}]} {
    %c0 = arith.constant 0 : index
    %c0_0 = arith.constant 0 : index
    %c0_1 = arith.constant 0 : index
    %0 = vector.load %arg1[%c0, %c0_0, %c0_1] : memref<1x64x48xbf16, #tpu.memory_space<vmem>>, vector<1x64x48xbf16>
    %1 = vector.shape_cast %0 : vector<1x64x48xbf16> to vector<64x48xbf16>
    %cst = arith.constant 0.000000e+00 : f32
    %2 = vector.broadcast %cst : f32 to vector<64x16xf32>
    %c0_2 = arith.constant 0 : index
    %c0_3 = arith.constant 0 : index
    %c0_4 = arith.constant 0 : index
    %3 = vector.load %arg2[%c0_2, %c0_3, %c0_4] : memref<1x48x16xbf16, #tpu.memory_space<vmem>>, vector<1x48x16xbf16>
    %4 = vector.shape_cast %3 : vector<1x48x16xbf16> to vector<48x16xbf16>
    %cst_5 = arith.constant dense<0.000000e+00> : vector<64x16xf32>
    %5 = tpu.matmul %1, %4, %cst_5 {dimension_numbers = #tpu.dot_dimension_numbers<[1], [0], [0], [1], [0, 0, 1, 1], [], []>} : vector<64x48xbf16>, vector<48x16xbf16>, vector<64x16xf32> -> vector<64x16xf32>
    %6 = arith.addf %2, %5 : vector<64x16xf32>
    %c0_6 = arith.constant 0 : index
    %c0_7 = arith.constant 0 : index
    %7 = vector.load %arg3[%c0_6, %c0_7] : memref<1x16xf32, #tpu.memory_space<vmem>>, vector<1x16xf32>
    %8 = vector.broadcast %7 : vector<1x16xf32> to vector<64x16xf32>
    %9 = arith.addf %6, %8 : vector<64x16xf32>
    %10 = arith.truncf %9 : vector<64x16xf32> to vector<64x16xbf16>
    %c0_8 = arith.constant 0 : index
    %c0_9 = arith.constant 0 : index
    %c0_10 = arith.constant 0 : index
    %11 = vector.load %arg4[%c0_8, %c0_9, %c0_10] : memref<1x64x16xbf16, #tpu.memory_space<vmem>>, vector<1x64x16xbf16>
    %12 = vector.shape_cast %11 : vector<1x64x16xbf16> to vector<64x16xbf16>
    %13 = vector.shape_cast %10 : vector<64x16xbf16> to vector<1x64x16xbf16>
    tpu.vector_store %arg4[%c0_8, %c0_9, %c0_10], %13 {strides = array<i32>} : memref<1x64x16xbf16, #tpu.memory_space<vmem>>, vector<1x64x16xbf16>,
    return
  }
  func.func @transform_0(%arg0: i32) -> (i32, i32, i32) {
    %c0_i32 = arith.constant 0 : i32
    %c0_i32_0 = arith.constant 0 : i32
    %c0_i32_1 = arith.constant 0 : i32
    return %arg0, %c0_i32, %c0_i32_0 : i32, i32, i32
  }
  func.func @transform_1(%arg0: i32) -> (i32, i32, i32) {
    %c0_i32 = arith.constant 0 : i32
    %c0_i32_0 = arith.constant 0 : i32
    %c0_i32_1 = arith.constant 0 : i32
    %c0_i32_2 = arith.constant 0 : i32
    return %c0_i32, %c0_i32_0, %c0_i32_1 : i32, i32, i32
  }
  func.func @transform_2(%arg0: i32) -> (i32, i32) {
    %c0_i32 = arith.constant 0 : i32
    %c0_i32_0 = arith.constant 0 : i32
    %c0_i32_1 = arith.constant 0 : i32
    return %c0_i32, %c0_i32_0 : i32, i32
  }
  func.func @transform_3(%arg0: i32) -> (i32, i32, i32) {
    %c0_i32 = arith.constant 0 : i32
    %c0_i32_0 = arith.constant 0 : i32
    %c0_i32_1 = arith.constant 0 : i32
    return %arg0, %c0_i32, %c0_i32_0 : i32, i32, i32
  }
}

module attributes {stable_mosaic.version = 11 : i64} {
  func.func @_conv_kernel(%arg0: i32, %arg1: memref<1x38x16xbf16, #tpu.memory_space<vmem>>, %arg2: memref<9x16x64xbf16, #tpu.memory_space<vmem>>, %arg3: memref<1x64xf32, #tpu.memory_space<vmem>>, %arg4: memref<1x24x64xbf16, #tpu.memory_space<vmem>>) attributes {dimension_semantics = [#tpu.dimension_semantics<parallel>], iteration_bounds = array<i64: 2>, scalar_prefetch = 0 : i64, scratch_operands = 0 : i64, tpu.core_type = #tpu.core_type<tc>, window_params = [{transform_indices = @transform_0, window_bounds = array<i64: 1, 38, 16>}, {pipeline_mode = #tpu.pipeline_mode<synchronous>, transform_indices = @transform_1, window_bounds = array<i64: 9, 16, 64>}, {pipeline_mode = #tpu.pipeline_mode<synchronous>, transform_indices = @transform_2, window_bounds = array<i64: 1, 64>}, {transform_indices = @transform_3, window_bounds = array<i64: 1, 24, 64>}]} {
    %c0 = arith.constant 0 : index
    %c0_0 = arith.constant 0 : index
    %c0_1 = arith.constant 0 : index
    %0 = vector.load %arg1[%c0, %c0_0, %c0_1] : memref<1x38x16xbf16, #tpu.memory_space<vmem>>, vector<1x38x16xbf16>
    %1 = vector.shape_cast %0 : vector<1x38x16xbf16> to vector<38x16xbf16>
    %cst = arith.constant 0.000000e+00 : f32
    %2 = vector.broadcast %cst : f32 to vector<24x64xf32>
    %3 = vector.extract_strided_slice %1 {offsets = [0, 0], sizes = [24, 16], strides = [1, 1]} : vector<38x16xbf16> to vector<24x16xbf16>
    %c0_2 = arith.constant 0 : index
    %c0_3 = arith.constant 0 : index
    %c0_4 = arith.constant 0 : index
    %4 = vector.load %arg2[%c0_2, %c0_3, %c0_4] : memref<9x16x64xbf16, #tpu.memory_space<vmem>>, vector<1x16x64xbf16>
    %5 = vector.shape_cast %4 : vector<1x16x64xbf16> to vector<16x64xbf16>
    %cst_5 = arith.constant dense<0.000000e+00> : vector<24x64xf32>
    %6 = tpu.matmul %3, %5, %cst_5 {dimension_numbers = #tpu.dot_dimension_numbers<[1], [0], [0], [1], [0, 0, 1, 1], [], []>} : vector<24x16xbf16>, vector<16x64xbf16>, vector<24x64xf32> -> vector<24x64xf32>
    %7 = arith.addf %2, %6 : vector<24x64xf32>
    %8 = vector.extract_strided_slice %1 {offsets = [1, 0], sizes = [24, 16], strides = [1, 1]} : vector<38x16xbf16> to vector<24x16xbf16>
    %c1 = arith.constant 1 : index
    %c0_6 = arith.constant 0 : index
    %c0_7 = arith.constant 0 : index
    %9 = vector.load %arg2[%c1, %c0_6, %c0_7] : memref<9x16x64xbf16, #tpu.memory_space<vmem>>, vector<1x16x64xbf16>
    %10 = vector.shape_cast %9 : vector<1x16x64xbf16> to vector<16x64xbf16>
    %cst_8 = arith.constant dense<0.000000e+00> : vector<24x64xf32>
    %11 = tpu.matmul %8, %10, %cst_8 {dimension_numbers = #tpu.dot_dimension_numbers<[1], [0], [0], [1], [0, 0, 1, 1], [], []>} : vector<24x16xbf16>, vector<16x64xbf16>, vector<24x64xf32> -> vector<24x64xf32>
    %12 = arith.addf %7, %11 : vector<24x64xf32>
    %13 = vector.extract_strided_slice %1 {offsets = [2, 0], sizes = [24, 16], strides = [1, 1]} : vector<38x16xbf16> to vector<24x16xbf16>
    %c2 = arith.constant 2 : index
    %c0_9 = arith.constant 0 : index
    %c0_10 = arith.constant 0 : index
    %14 = vector.load %arg2[%c2, %c0_9, %c0_10] : memref<9x16x64xbf16, #tpu.memory_space<vmem>>, vector<1x16x64xbf16>
    %15 = vector.shape_cast %14 : vector<1x16x64xbf16> to vector<16x64xbf16>
    %cst_11 = arith.constant dense<0.000000e+00> : vector<24x64xf32>
    %16 = tpu.matmul %13, %15, %cst_11 {dimension_numbers = #tpu.dot_dimension_numbers<[1], [0], [0], [1], [0, 0, 1, 1], [], []>} : vector<24x16xbf16>, vector<16x64xbf16>, vector<24x64xf32> -> vector<24x64xf32>
    %17 = arith.addf %12, %16 : vector<24x64xf32>
    %18 = vector.extract_strided_slice %1 {offsets = [6, 0], sizes = [24, 16], strides = [1, 1]} : vector<38x16xbf16> to vector<24x16xbf16>
    %c3 = arith.constant 3 : index
    %c0_12 = arith.constant 0 : index
    %c0_13 = arith.constant 0 : index
    %19 = vector.load %arg2[%c3, %c0_12, %c0_13] : memref<9x16x64xbf16, #tpu.memory_space<vmem>>, vector<1x16x64xbf16>
    %20 = vector.shape_cast %19 : vector<1x16x64xbf16> to vector<16x64xbf16>
    %cst_14 = arith.constant dense<0.000000e+00> : vector<24x64xf32>
    %21 = tpu.matmul %18, %20, %cst_14 {dimension_numbers = #tpu.dot_dimension_numbers<[1], [0], [0], [1], [0, 0, 1, 1], [], []>} : vector<24x16xbf16>, vector<16x64xbf16>, vector<24x64xf32> -> vector<24x64xf32>
    %22 = arith.addf %17, %21 : vector<24x64xf32>
    %23 = vector.extract_strided_slice %1 {offsets = [7, 0], sizes = [24, 16], strides = [1, 1]} : vector<38x16xbf16> to vector<24x16xbf16>
    %c4 = arith.constant 4 : index
    %c0_15 = arith.constant 0 : index
    %c0_16 = arith.constant 0 : index
    %24 = vector.load %arg2[%c4, %c0_15, %c0_16] : memref<9x16x64xbf16, #tpu.memory_space<vmem>>, vector<1x16x64xbf16>
    %25 = vector.shape_cast %24 : vector<1x16x64xbf16> to vector<16x64xbf16>
    %cst_17 = arith.constant dense<0.000000e+00> : vector<24x64xf32>
    %26 = tpu.matmul %23, %25, %cst_17 {dimension_numbers = #tpu.dot_dimension_numbers<[1], [0], [0], [1], [0, 0, 1, 1], [], []>} : vector<24x16xbf16>, vector<16x64xbf16>, vector<24x64xf32> -> vector<24x64xf32>
    %27 = arith.addf %22, %26 : vector<24x64xf32>
    %28 = vector.extract_strided_slice %1 {offsets = [8, 0], sizes = [24, 16], strides = [1, 1]} : vector<38x16xbf16> to vector<24x16xbf16>
    %c5 = arith.constant 5 : index
    %c0_18 = arith.constant 0 : index
    %c0_19 = arith.constant 0 : index
    %29 = vector.load %arg2[%c5, %c0_18, %c0_19] : memref<9x16x64xbf16, #tpu.memory_space<vmem>>, vector<1x16x64xbf16>
    %30 = vector.shape_cast %29 : vector<1x16x64xbf16> to vector<16x64xbf16>
    %cst_20 = arith.constant dense<0.000000e+00> : vector<24x64xf32>
    %31 = tpu.matmul %28, %30, %cst_20 {dimension_numbers = #tpu.dot_dimension_numbers<[1], [0], [0], [1], [0, 0, 1, 1], [], []>} : vector<24x16xbf16>, vector<16x64xbf16>, vector<24x64xf32> -> vector<24x64xf32>
    %32 = arith.addf %27, %31 : vector<24x64xf32>
    %33 = vector.extract_strided_slice %1 {offsets = [12, 0], sizes = [24, 16], strides = [1, 1]} : vector<38x16xbf16> to vector<24x16xbf16>
    %c6 = arith.constant 6 : index
    %c0_21 = arith.constant 0 : index
    %c0_22 = arith.constant 0 : index
    %34 = vector.load %arg2[%c6, %c0_21, %c0_22] : memref<9x16x64xbf16, #tpu.memory_space<vmem>>, vector<1x16x64xbf16>
    %35 = vector.shape_cast %34 : vector<1x16x64xbf16> to vector<16x64xbf16>
    %cst_23 = arith.constant dense<0.000000e+00> : vector<24x64xf32>
    %36 = tpu.matmul %33, %35, %cst_23 {dimension_numbers = #tpu.dot_dimension_numbers<[1], [0], [0], [1], [0, 0, 1, 1], [], []>} : vector<24x16xbf16>, vector<16x64xbf16>, vector<24x64xf32> -> vector<24x64xf32>
    %37 = arith.addf %32, %36 : vector<24x64xf32>
    %38 = vector.extract_strided_slice %1 {offsets = [13, 0], sizes = [24, 16], strides = [1, 1]} : vector<38x16xbf16> to vector<24x16xbf16>
    %c7 = arith.constant 7 : index
    %c0_24 = arith.constant 0 : index
    %c0_25 = arith.constant 0 : index
    %39 = vector.load %arg2[%c7, %c0_24, %c0_25] : memref<9x16x64xbf16, #tpu.memory_space<vmem>>, vector<1x16x64xbf16>
    %40 = vector.shape_cast %39 : vector<1x16x64xbf16> to vector<16x64xbf16>
    %cst_26 = arith.constant dense<0.000000e+00> : vector<24x64xf32>
    %41 = tpu.matmul %38, %40, %cst_26 {dimension_numbers = #tpu.dot_dimension_numbers<[1], [0], [0], [1], [0, 0, 1, 1], [], []>} : vector<24x16xbf16>, vector<16x64xbf16>, vector<24x64xf32> -> vector<24x64xf32>
    %42 = arith.addf %37, %41 : vector<24x64xf32>
    %43 = vector.extract_strided_slice %1 {offsets = [14, 0], sizes = [24, 16], strides = [1, 1]} : vector<38x16xbf16> to vector<24x16xbf16>
    %c8 = arith.constant 8 : index
    %c0_27 = arith.constant 0 : index
    %c0_28 = arith.constant 0 : index
    %44 = vector.load %arg2[%c8, %c0_27, %c0_28] : memref<9x16x64xbf16, #tpu.memory_space<vmem>>, vector<1x16x64xbf16>
    %45 = vector.shape_cast %44 : vector<1x16x64xbf16> to vector<16x64xbf16>
    %cst_29 = arith.constant dense<0.000000e+00> : vector<24x64xf32>
    %46 = tpu.matmul %43, %45, %cst_29 {dimension_numbers = #tpu.dot_dimension_numbers<[1], [0], [0], [1], [0, 0, 1, 1], [], []>} : vector<24x16xbf16>, vector<16x64xbf16>, vector<24x64xf32> -> vector<24x64xf32>
    %47 = arith.addf %42, %46 : vector<24x64xf32>
    %c0_30 = arith.constant 0 : index
    %c0_31 = arith.constant 0 : index
    %48 = vector.load %arg3[%c0_30, %c0_31] : memref<1x64xf32, #tpu.memory_space<vmem>>, vector<1x64xf32>
    %49 = vector.broadcast %48 : vector<1x64xf32> to vector<24x64xf32>
    %50 = arith.addf %47, %49 : vector<24x64xf32>
    %51 = arith.truncf %50 : vector<24x64xf32> to vector<24x64xbf16>
    %c0_32 = arith.constant 0 : index
    %c0_33 = arith.constant 0 : index
    %c0_34 = arith.constant 0 : index
    %52 = vector.load %arg4[%c0_32, %c0_33, %c0_34] : memref<1x24x64xbf16, #tpu.memory_space<vmem>>, vector<1x24x64xbf16>
    %53 = vector.shape_cast %52 : vector<1x24x64xbf16> to vector<24x64xbf16>
    %54 = vector.shape_cast %51 : vector<24x64xbf16> to vector<1x24x64xbf16>
    tpu.vector_store %arg4[%c0_32, %c0_33, %c0_34], %54 {strides = array<i32>} : memref<1x24x64xbf16, #tpu.memory_space<vmem>>, vector<1x24x64xbf16>,
    return
  }
  func.func @transform_0(%arg0: i32) -> (i32, i32, i32) {
    %c0_i32 = arith.constant 0 : i32
    %c0_i32_0 = arith.constant 0 : i32
    %c0_i32_1 = arith.constant 0 : i32
    return %arg0, %c0_i32, %c0_i32_0 : i32, i32, i32
  }
  func.func @transform_1(%arg0: i32) -> (i32, i32, i32) {
    %c0_i32 = arith.constant 0 : i32
    %c0_i32_0 = arith.constant 0 : i32
    %c0_i32_1 = arith.constant 0 : i32
    %c0_i32_2 = arith.constant 0 : i32
    return %c0_i32, %c0_i32_0, %c0_i32_1 : i32, i32, i32
  }
  func.func @transform_2(%arg0: i32) -> (i32, i32) {
    %c0_i32 = arith.constant 0 : i32
    %c0_i32_0 = arith.constant 0 : i32
    %c0_i32_1 = arith.constant 0 : i32
    return %c0_i32, %c0_i32_0 : i32, i32
  }
  func.func @transform_3(%arg0: i32) -> (i32, i32, i32) {
    %c0_i32 = arith.constant 0 : i32
    %c0_i32_0 = arith.constant 0 : i32
    %c0_i32_1 = arith.constant 0 : i32
    return %arg0, %c0_i32, %c0_i32_0 : i32, i32, i32
  }
}

module attributes {stable_mosaic.version = 11 : i64} {
  func.func @_conv_kernel(%arg0: i32, %arg1: memref<1x102x32xbf16, #tpu.memory_space<vmem>>, %arg2: memref<9x32x32xbf16, #tpu.memory_space<vmem>>, %arg3: memref<1x32xf32, #tpu.memory_space<vmem>>, %arg4: memref<1x80x32xbf16, #tpu.memory_space<vmem>>) attributes {dimension_semantics = [#tpu.dimension_semantics<parallel>], iteration_bounds = array<i64: 2>, scalar_prefetch = 0 : i64, scratch_operands = 0 : i64, tpu.core_type = #tpu.core_type<tc>, window_params = [{transform_indices = @transform_0, window_bounds = array<i64: 1, 102, 32>}, {pipeline_mode = #tpu.pipeline_mode<synchronous>, transform_indices = @transform_1, window_bounds = array<i64: 9, 32, 32>}, {pipeline_mode = #tpu.pipeline_mode<synchronous>, transform_indices = @transform_2, window_bounds = array<i64: 1, 32>}, {transform_indices = @transform_3, window_bounds = array<i64: 1, 80, 32>}]} {
    %c0 = arith.constant 0 : index
    %c0_0 = arith.constant 0 : index
    %c0_1 = arith.constant 0 : index
    %0 = vector.load %arg1[%c0, %c0_0, %c0_1] : memref<1x102x32xbf16, #tpu.memory_space<vmem>>, vector<1x102x32xbf16>
    %1 = vector.shape_cast %0 : vector<1x102x32xbf16> to vector<102x32xbf16>
    %cst = arith.constant 0.000000e+00 : f32
    %2 = vector.broadcast %cst : f32 to vector<80x32xf32>
    %3 = vector.extract_strided_slice %1 {offsets = [0, 0], sizes = [80, 32], strides = [1, 1]} : vector<102x32xbf16> to vector<80x32xbf16>
    %c0_2 = arith.constant 0 : index
    %c0_3 = arith.constant 0 : index
    %c0_4 = arith.constant 0 : index
    %4 = vector.load %arg2[%c0_2, %c0_3, %c0_4] : memref<9x32x32xbf16, #tpu.memory_space<vmem>>, vector<1x32x32xbf16>
    %5 = vector.shape_cast %4 : vector<1x32x32xbf16> to vector<32x32xbf16>
    %cst_5 = arith.constant dense<0.000000e+00> : vector<80x32xf32>
    %6 = tpu.matmul %3, %5, %cst_5 {dimension_numbers = #tpu.dot_dimension_numbers<[1], [0], [0], [1], [0, 0, 1, 1], [], []>} : vector<80x32xbf16>, vector<32x32xbf16>, vector<80x32xf32> -> vector<80x32xf32>
    %7 = arith.addf %2, %6 : vector<80x32xf32>
    %8 = vector.extract_strided_slice %1 {offsets = [1, 0], sizes = [80, 32], strides = [1, 1]} : vector<102x32xbf16> to vector<80x32xbf16>
    %c1 = arith.constant 1 : index
    %c0_6 = arith.constant 0 : index
    %c0_7 = arith.constant 0 : index
    %9 = vector.load %arg2[%c1, %c0_6, %c0_7] : memref<9x32x32xbf16, #tpu.memory_space<vmem>>, vector<1x32x32xbf16>
    %10 = vector.shape_cast %9 : vector<1x32x32xbf16> to vector<32x32xbf16>
    %cst_8 = arith.constant dense<0.000000e+00> : vector<80x32xf32>
    %11 = tpu.matmul %8, %10, %cst_8 {dimension_numbers = #tpu.dot_dimension_numbers<[1], [0], [0], [1], [0, 0, 1, 1], [], []>} : vector<80x32xbf16>, vector<32x32xbf16>, vector<80x32xf32> -> vector<80x32xf32>
    %12 = arith.addf %7, %11 : vector<80x32xf32>
    %13 = vector.extract_strided_slice %1 {offsets = [2, 0], sizes = [80, 32], strides = [1, 1]} : vector<102x32xbf16> to vector<80x32xbf16>
    %c2 = arith.constant 2 : index
    %c0_9 = arith.constant 0 : index
    %c0_10 = arith.constant 0 : index
    %14 = vector.load %arg2[%c2, %c0_9, %c0_10] : memref<9x32x32xbf16, #tpu.memory_space<vmem>>, vector<1x32x32xbf16>
    %15 = vector.shape_cast %14 : vector<1x32x32xbf16> to vector<32x32xbf16>
    %cst_11 = arith.constant dense<0.000000e+00> : vector<80x32xf32>
    %16 = tpu.matmul %13, %15, %cst_11 {dimension_numbers = #tpu.dot_dimension_numbers<[1], [0], [0], [1], [0, 0, 1, 1], [], []>} : vector<80x32xbf16>, vector<32x32xbf16>, vector<80x32xf32> -> vector<80x32xf32>
    %17 = arith.addf %12, %16 : vector<80x32xf32>
    %18 = vector.extract_strided_slice %1 {offsets = [10, 0], sizes = [80, 32], strides = [1, 1]} : vector<102x32xbf16> to vector<80x32xbf16>
    %c3 = arith.constant 3 : index
    %c0_12 = arith.constant 0 : index
    %c0_13 = arith.constant 0 : index
    %19 = vector.load %arg2[%c3, %c0_12, %c0_13] : memref<9x32x32xbf16, #tpu.memory_space<vmem>>, vector<1x32x32xbf16>
    %20 = vector.shape_cast %19 : vector<1x32x32xbf16> to vector<32x32xbf16>
    %cst_14 = arith.constant dense<0.000000e+00> : vector<80x32xf32>
    %21 = tpu.matmul %18, %20, %cst_14 {dimension_numbers = #tpu.dot_dimension_numbers<[1], [0], [0], [1], [0, 0, 1, 1], [], []>} : vector<80x32xbf16>, vector<32x32xbf16>, vector<80x32xf32> -> vector<80x32xf32>
    %22 = arith.addf %17, %21 : vector<80x32xf32>
    %23 = vector.extract_strided_slice %1 {offsets = [11, 0], sizes = [80, 32], strides = [1, 1]} : vector<102x32xbf16> to vector<80x32xbf16>
    %c4 = arith.constant 4 : index
    %c0_15 = arith.constant 0 : index
    %c0_16 = arith.constant 0 : index
    %24 = vector.load %arg2[%c4, %c0_15, %c0_16] : memref<9x32x32xbf16, #tpu.memory_space<vmem>>, vector<1x32x32xbf16>
    %25 = vector.shape_cast %24 : vector<1x32x32xbf16> to vector<32x32xbf16>
    %cst_17 = arith.constant dense<0.000000e+00> : vector<80x32xf32>
    %26 = tpu.matmul %23, %25, %cst_17 {dimension_numbers = #tpu.dot_dimension_numbers<[1], [0], [0], [1], [0, 0, 1, 1], [], []>} : vector<80x32xbf16>, vector<32x32xbf16>, vector<80x32xf32> -> vector<80x32xf32>
    %27 = arith.addf %22, %26 : vector<80x32xf32>
    %28 = vector.extract_strided_slice %1 {offsets = [12, 0], sizes = [80, 32], strides = [1, 1]} : vector<102x32xbf16> to vector<80x32xbf16>
    %c5 = arith.constant 5 : index
    %c0_18 = arith.constant 0 : index
    %c0_19 = arith.constant 0 : index
    %29 = vector.load %arg2[%c5, %c0_18, %c0_19] : memref<9x32x32xbf16, #tpu.memory_space<vmem>>, vector<1x32x32xbf16>
    %30 = vector.shape_cast %29 : vector<1x32x32xbf16> to vector<32x32xbf16>
    %cst_20 = arith.constant dense<0.000000e+00> : vector<80x32xf32>
    %31 = tpu.matmul %28, %30, %cst_20 {dimension_numbers = #tpu.dot_dimension_numbers<[1], [0], [0], [1], [0, 0, 1, 1], [], []>} : vector<80x32xbf16>, vector<32x32xbf16>, vector<80x32xf32> -> vector<80x32xf32>
    %32 = arith.addf %27, %31 : vector<80x32xf32>
    %33 = vector.extract_strided_slice %1 {offsets = [20, 0], sizes = [80, 32], strides = [1, 1]} : vector<102x32xbf16> to vector<80x32xbf16>
    %c6 = arith.constant 6 : index
    %c0_21 = arith.constant 0 : index
    %c0_22 = arith.constant 0 : index
    %34 = vector.load %arg2[%c6, %c0_21, %c0_22] : memref<9x32x32xbf16, #tpu.memory_space<vmem>>, vector<1x32x32xbf16>
    %35 = vector.shape_cast %34 : vector<1x32x32xbf16> to vector<32x32xbf16>
    %cst_23 = arith.constant dense<0.000000e+00> : vector<80x32xf32>
    %36 = tpu.matmul %33, %35, %cst_23 {dimension_numbers = #tpu.dot_dimension_numbers<[1], [0], [0], [1], [0, 0, 1, 1], [], []>} : vector<80x32xbf16>, vector<32x32xbf16>, vector<80x32xf32> -> vector<80x32xf32>
    %37 = arith.addf %32, %36 : vector<80x32xf32>
    %38 = vector.extract_strided_slice %1 {offsets = [21, 0], sizes = [80, 32], strides = [1, 1]} : vector<102x32xbf16> to vector<80x32xbf16>
    %c7 = arith.constant 7 : index
    %c0_24 = arith.constant 0 : index
    %c0_25 = arith.constant 0 : index
    %39 = vector.load %arg2[%c7, %c0_24, %c0_25] : memref<9x32x32xbf16, #tpu.memory_space<vmem>>, vector<1x32x32xbf16>
    %40 = vector.shape_cast %39 : vector<1x32x32xbf16> to vector<32x32xbf16>
    %cst_26 = arith.constant dense<0.000000e+00> : vector<80x32xf32>
    %41 = tpu.matmul %38, %40, %cst_26 {dimension_numbers = #tpu.dot_dimension_numbers<[1], [0], [0], [1], [0, 0, 1, 1], [], []>} : vector<80x32xbf16>, vector<32x32xbf16>, vector<80x32xf32> -> vector<80x32xf32>
    %42 = arith.addf %37, %41 : vector<80x32xf32>
    %43 = vector.extract_strided_slice %1 {offsets = [22, 0], sizes = [80, 32], strides = [1, 1]} : vector<102x32xbf16> to vector<80x32xbf16>
    %c8 = arith.constant 8 : index
    %c0_27 = arith.constant 0 : index
    %c0_28 = arith.constant 0 : index
    %44 = vector.load %arg2[%c8, %c0_27, %c0_28] : memref<9x32x32xbf16, #tpu.memory_space<vmem>>, vector<1x32x32xbf16>
    %45 = vector.shape_cast %44 : vector<1x32x32xbf16> to vector<32x32xbf16>
    %cst_29 = arith.constant dense<0.000000e+00> : vector<80x32xf32>
    %46 = tpu.matmul %43, %45, %cst_29 {dimension_numbers = #tpu.dot_dimension_numbers<[1], [0], [0], [1], [0, 0, 1, 1], [], []>} : vector<80x32xbf16>, vector<32x32xbf16>, vector<80x32xf32> -> vector<80x32xf32>
    %47 = arith.addf %42, %46 : vector<80x32xf32>
    %c0_30 = arith.constant 0 : index
    %c0_31 = arith.constant 0 : index
    %48 = vector.load %arg3[%c0_30, %c0_31] : memref<1x32xf32, #tpu.memory_space<vmem>>, vector<1x32xf32>
    %49 = vector.broadcast %48 : vector<1x32xf32> to vector<80x32xf32>
    %50 = arith.addf %47, %49 : vector<80x32xf32>
    %51 = arith.truncf %50 : vector<80x32xf32> to vector<80x32xbf16>
    %c0_32 = arith.constant 0 : index
    %c0_33 = arith.constant 0 : index
    %c0_34 = arith.constant 0 : index
    %52 = vector.load %arg4[%c0_32, %c0_33, %c0_34] : memref<1x80x32xbf16, #tpu.memory_space<vmem>>, vector<1x80x32xbf16>
    %53 = vector.shape_cast %52 : vector<1x80x32xbf16> to vector<80x32xbf16>
    %54 = vector.shape_cast %51 : vector<80x32xbf16> to vector<1x80x32xbf16>
    tpu.vector_store %arg4[%c0_32, %c0_33, %c0_34], %54 {strides = array<i32>} : memref<1x80x32xbf16, #tpu.memory_space<vmem>>, vector<1x80x32xbf16>,
    return
  }
  func.func @transform_0(%arg0: i32) -> (i32, i32, i32) {
    %c0_i32 = arith.constant 0 : i32
    %c0_i32_0 = arith.constant 0 : i32
    %c0_i32_1 = arith.constant 0 : i32
    return %arg0, %c0_i32, %c0_i32_0 : i32, i32, i32
  }
  func.func @transform_1(%arg0: i32) -> (i32, i32, i32) {
    %c0_i32 = arith.constant 0 : i32
    %c0_i32_0 = arith.constant 0 : i32
    %c0_i32_1 = arith.constant 0 : i32
    %c0_i32_2 = arith.constant 0 : i32
    return %c0_i32, %c0_i32_0, %c0_i32_1 : i32, i32, i32
  }
  func.func @transform_2(%arg0: i32) -> (i32, i32) {
    %c0_i32 = arith.constant 0 : i32
    %c0_i32_0 = arith.constant 0 : i32
    %c0_i32_1 = arith.constant 0 : i32
    return %c0_i32, %c0_i32_0 : i32, i32
  }
  func.func @transform_3(%arg0: i32) -> (i32, i32, i32) {
    %c0_i32 = arith.constant 0 : i32
    %c0_i32_0 = arith.constant 0 : i32
    %c0_i32_1 = arith.constant 0 : i32
    return %arg0, %c0_i32, %c0_i32_0 : i32, i32, i32
  }
}

module attributes {stable_mosaic.version = 11 : i64} {
  func.func @_conv_kernel(%arg0: i32, %arg1: memref<1x102x32xbf16, #tpu.memory_space<vmem>>, %arg2: memref<9x32x12xbf16, #tpu.memory_space<vmem>>, %arg3: memref<1x12xf32, #tpu.memory_space<vmem>>, %arg4: memref<1x80x12xbf16, #tpu.memory_space<vmem>>) attributes {dimension_semantics = [#tpu.dimension_semantics<parallel>], iteration_bounds = array<i64: 2>, scalar_prefetch = 0 : i64, scratch_operands = 0 : i64, tpu.core_type = #tpu.core_type<tc>, window_params = [{transform_indices = @transform_0, window_bounds = array<i64: 1, 102, 32>}, {pipeline_mode = #tpu.pipeline_mode<synchronous>, transform_indices = @transform_1, window_bounds = array<i64: 9, 32, 12>}, {pipeline_mode = #tpu.pipeline_mode<synchronous>, transform_indices = @transform_2, window_bounds = array<i64: 1, 12>}, {transform_indices = @transform_3, window_bounds = array<i64: 1, 80, 12>}]} {
    %c0 = arith.constant 0 : index
    %c0_0 = arith.constant 0 : index
    %c0_1 = arith.constant 0 : index
    %0 = vector.load %arg1[%c0, %c0_0, %c0_1] : memref<1x102x32xbf16, #tpu.memory_space<vmem>>, vector<1x102x32xbf16>
    %1 = vector.shape_cast %0 : vector<1x102x32xbf16> to vector<102x32xbf16>
    %cst = arith.constant 0.000000e+00 : f32
    %2 = vector.broadcast %cst : f32 to vector<80x12xf32>
    %3 = vector.extract_strided_slice %1 {offsets = [0, 0], sizes = [80, 32], strides = [1, 1]} : vector<102x32xbf16> to vector<80x32xbf16>
    %c0_2 = arith.constant 0 : index
    %c0_3 = arith.constant 0 : index
    %c0_4 = arith.constant 0 : index
    %4 = vector.load %arg2[%c0_2, %c0_3, %c0_4] : memref<9x32x12xbf16, #tpu.memory_space<vmem>>, vector<1x32x12xbf16>
    %5 = vector.shape_cast %4 : vector<1x32x12xbf16> to vector<32x12xbf16>
    %cst_5 = arith.constant dense<0.000000e+00> : vector<80x12xf32>
    %6 = tpu.matmul %3, %5, %cst_5 {dimension_numbers = #tpu.dot_dimension_numbers<[1], [0], [0], [1], [0, 0, 1, 1], [], []>} : vector<80x32xbf16>, vector<32x12xbf16>, vector<80x12xf32> -> vector<80x12xf32>
    %7 = arith.addf %2, %6 : vector<80x12xf32>
    %8 = vector.extract_strided_slice %1 {offsets = [1, 0], sizes = [80, 32], strides = [1, 1]} : vector<102x32xbf16> to vector<80x32xbf16>
    %c1 = arith.constant 1 : index
    %c0_6 = arith.constant 0 : index
    %c0_7 = arith.constant 0 : index
    %9 = vector.load %arg2[%c1, %c0_6, %c0_7] : memref<9x32x12xbf16, #tpu.memory_space<vmem>>, vector<1x32x12xbf16>
    %10 = vector.shape_cast %9 : vector<1x32x12xbf16> to vector<32x12xbf16>
    %cst_8 = arith.constant dense<0.000000e+00> : vector<80x12xf32>
    %11 = tpu.matmul %8, %10, %cst_8 {dimension_numbers = #tpu.dot_dimension_numbers<[1], [0], [0], [1], [0, 0, 1, 1], [], []>} : vector<80x32xbf16>, vector<32x12xbf16>, vector<80x12xf32> -> vector<80x12xf32>
    %12 = arith.addf %7, %11 : vector<80x12xf32>
    %13 = vector.extract_strided_slice %1 {offsets = [2, 0], sizes = [80, 32], strides = [1, 1]} : vector<102x32xbf16> to vector<80x32xbf16>
    %c2 = arith.constant 2 : index
    %c0_9 = arith.constant 0 : index
    %c0_10 = arith.constant 0 : index
    %14 = vector.load %arg2[%c2, %c0_9, %c0_10] : memref<9x32x12xbf16, #tpu.memory_space<vmem>>, vector<1x32x12xbf16>
    %15 = vector.shape_cast %14 : vector<1x32x12xbf16> to vector<32x12xbf16>
    %cst_11 = arith.constant dense<0.000000e+00> : vector<80x12xf32>
    %16 = tpu.matmul %13, %15, %cst_11 {dimension_numbers = #tpu.dot_dimension_numbers<[1], [0], [0], [1], [0, 0, 1, 1], [], []>} : vector<80x32xbf16>, vector<32x12xbf16>, vector<80x12xf32> -> vector<80x12xf32>
    %17 = arith.addf %12, %16 : vector<80x12xf32>
    %18 = vector.extract_strided_slice %1 {offsets = [10, 0], sizes = [80, 32], strides = [1, 1]} : vector<102x32xbf16> to vector<80x32xbf16>
    %c3 = arith.constant 3 : index
    %c0_12 = arith.constant 0 : index
    %c0_13 = arith.constant 0 : index
    %19 = vector.load %arg2[%c3, %c0_12, %c0_13] : memref<9x32x12xbf16, #tpu.memory_space<vmem>>, vector<1x32x12xbf16>
    %20 = vector.shape_cast %19 : vector<1x32x12xbf16> to vector<32x12xbf16>
    %cst_14 = arith.constant dense<0.000000e+00> : vector<80x12xf32>
    %21 = tpu.matmul %18, %20, %cst_14 {dimension_numbers = #tpu.dot_dimension_numbers<[1], [0], [0], [1], [0, 0, 1, 1], [], []>} : vector<80x32xbf16>, vector<32x12xbf16>, vector<80x12xf32> -> vector<80x12xf32>
    %22 = arith.addf %17, %21 : vector<80x12xf32>
    %23 = vector.extract_strided_slice %1 {offsets = [11, 0], sizes = [80, 32], strides = [1, 1]} : vector<102x32xbf16> to vector<80x32xbf16>
    %c4 = arith.constant 4 : index
    %c0_15 = arith.constant 0 : index
    %c0_16 = arith.constant 0 : index
    %24 = vector.load %arg2[%c4, %c0_15, %c0_16] : memref<9x32x12xbf16, #tpu.memory_space<vmem>>, vector<1x32x12xbf16>
    %25 = vector.shape_cast %24 : vector<1x32x12xbf16> to vector<32x12xbf16>
    %cst_17 = arith.constant dense<0.000000e+00> : vector<80x12xf32>
    %26 = tpu.matmul %23, %25, %cst_17 {dimension_numbers = #tpu.dot_dimension_numbers<[1], [0], [0], [1], [0, 0, 1, 1], [], []>} : vector<80x32xbf16>, vector<32x12xbf16>, vector<80x12xf32> -> vector<80x12xf32>
    %27 = arith.addf %22, %26 : vector<80x12xf32>
    %28 = vector.extract_strided_slice %1 {offsets = [12, 0], sizes = [80, 32], strides = [1, 1]} : vector<102x32xbf16> to vector<80x32xbf16>
    %c5 = arith.constant 5 : index
    %c0_18 = arith.constant 0 : index
    %c0_19 = arith.constant 0 : index
    %29 = vector.load %arg2[%c5, %c0_18, %c0_19] : memref<9x32x12xbf16, #tpu.memory_space<vmem>>, vector<1x32x12xbf16>
    %30 = vector.shape_cast %29 : vector<1x32x12xbf16> to vector<32x12xbf16>
    %cst_20 = arith.constant dense<0.000000e+00> : vector<80x12xf32>
    %31 = tpu.matmul %28, %30, %cst_20 {dimension_numbers = #tpu.dot_dimension_numbers<[1], [0], [0], [1], [0, 0, 1, 1], [], []>} : vector<80x32xbf16>, vector<32x12xbf16>, vector<80x12xf32> -> vector<80x12xf32>
    %32 = arith.addf %27, %31 : vector<80x12xf32>
    %33 = vector.extract_strided_slice %1 {offsets = [20, 0], sizes = [80, 32], strides = [1, 1]} : vector<102x32xbf16> to vector<80x32xbf16>
    %c6 = arith.constant 6 : index
    %c0_21 = arith.constant 0 : index
    %c0_22 = arith.constant 0 : index
    %34 = vector.load %arg2[%c6, %c0_21, %c0_22] : memref<9x32x12xbf16, #tpu.memory_space<vmem>>, vector<1x32x12xbf16>
    %35 = vector.shape_cast %34 : vector<1x32x12xbf16> to vector<32x12xbf16>
    %cst_23 = arith.constant dense<0.000000e+00> : vector<80x12xf32>
    %36 = tpu.matmul %33, %35, %cst_23 {dimension_numbers = #tpu.dot_dimension_numbers<[1], [0], [0], [1], [0, 0, 1, 1], [], []>} : vector<80x32xbf16>, vector<32x12xbf16>, vector<80x12xf32> -> vector<80x12xf32>
    %37 = arith.addf %32, %36 : vector<80x12xf32>
    %38 = vector.extract_strided_slice %1 {offsets = [21, 0], sizes = [80, 32], strides = [1, 1]} : vector<102x32xbf16> to vector<80x32xbf16>
    %c7 = arith.constant 7 : index
    %c0_24 = arith.constant 0 : index
    %c0_25 = arith.constant 0 : index
    %39 = vector.load %arg2[%c7, %c0_24, %c0_25] : memref<9x32x12xbf16, #tpu.memory_space<vmem>>, vector<1x32x12xbf16>
    %40 = vector.shape_cast %39 : vector<1x32x12xbf16> to vector<32x12xbf16>
    %cst_26 = arith.constant dense<0.000000e+00> : vector<80x12xf32>
    %41 = tpu.matmul %38, %40, %cst_26 {dimension_numbers = #tpu.dot_dimension_numbers<[1], [0], [0], [1], [0, 0, 1, 1], [], []>} : vector<80x32xbf16>, vector<32x12xbf16>, vector<80x12xf32> -> vector<80x12xf32>
    %42 = arith.addf %37, %41 : vector<80x12xf32>
    %43 = vector.extract_strided_slice %1 {offsets = [22, 0], sizes = [80, 32], strides = [1, 1]} : vector<102x32xbf16> to vector<80x32xbf16>
    %c8 = arith.constant 8 : index
    %c0_27 = arith.constant 0 : index
    %c0_28 = arith.constant 0 : index
    %44 = vector.load %arg2[%c8, %c0_27, %c0_28] : memref<9x32x12xbf16, #tpu.memory_space<vmem>>, vector<1x32x12xbf16>
    %45 = vector.shape_cast %44 : vector<1x32x12xbf16> to vector<32x12xbf16>
    %cst_29 = arith.constant dense<0.000000e+00> : vector<80x12xf32>
    %46 = tpu.matmul %43, %45, %cst_29 {dimension_numbers = #tpu.dot_dimension_numbers<[1], [0], [0], [1], [0, 0, 1, 1], [], []>} : vector<80x32xbf16>, vector<32x12xbf16>, vector<80x12xf32> -> vector<80x12xf32>
    %47 = arith.addf %42, %46 : vector<80x12xf32>
    %c0_30 = arith.constant 0 : index
    %c0_31 = arith.constant 0 : index
    %48 = vector.load %arg3[%c0_30, %c0_31] : memref<1x12xf32, #tpu.memory_space<vmem>>, vector<1x12xf32>
    %49 = vector.broadcast %48 : vector<1x12xf32> to vector<80x12xf32>
    %50 = arith.addf %47, %49 : vector<80x12xf32>
    %51 = arith.truncf %50 : vector<80x12xf32> to vector<80x12xbf16>
    %c0_32 = arith.constant 0 : index
    %c0_33 = arith.constant 0 : index
    %c0_34 = arith.constant 0 : index
    %52 = vector.load %arg4[%c0_32, %c0_33, %c0_34] : memref<1x80x12xbf16, #tpu.memory_space<vmem>>, vector<1x80x12xbf16>
    %53 = vector.shape_cast %52 : vector<1x80x12xbf16> to vector<80x12xbf16>
    %54 = vector.shape_cast %51 : vector<80x12xbf16> to vector<1x80x12xbf16>
    tpu.vector_store %arg4[%c0_32, %c0_33, %c0_34], %54 {strides = array<i32>} : memref<1x80x12xbf16, #tpu.memory_space<vmem>>, vector<1x80x12xbf16>,
    return
  }
  func.func @transform_0(%arg0: i32) -> (i32, i32, i32) {
    %c0_i32 = arith.constant 0 : i32
    %c0_i32_0 = arith.constant 0 : i32
    %c0_i32_1 = arith.constant 0 : i32
    return %arg0, %c0_i32, %c0_i32_0 : i32, i32, i32
  }
  func.func @transform_1(%arg0: i32) -> (i32, i32, i32) {
    %c0_i32 = arith.constant 0 : i32
    %c0_i32_0 = arith.constant 0 : i32
    %c0_i32_1 = arith.constant 0 : i32
    %c0_i32_2 = arith.constant 0 : i32
    return %c0_i32, %c0_i32_0, %c0_i32_1 : i32, i32, i32
  }
  func.func @transform_2(%arg0: i32) -> (i32, i32) {
    %c0_i32 = arith.constant 0 : i32
    %c0_i32_0 = arith.constant 0 : i32
    %c0_i32_1 = arith.constant 0 : i32
    return %c0_i32, %c0_i32_0 : i32, i32
  }
  func.func @transform_3(%arg0: i32) -> (i32, i32, i32) {
    %c0_i32 = arith.constant 0 : i32
    %c0_i32_0 = arith.constant 0 : i32
    %c0_i32_1 = arith.constant 0 : i32
    return %arg0, %c0_i32, %c0_i32_0 : i32, i32, i32
  }
}

</mosaic_0001>

<bundles_post_ra>
// kernel: vqvae2_forward.29
= control target key start
LH: loop header
LB: loop body
LE: loop exit
PB: predicated region body
PF: predicated region fallthrough
CT: control target
= control target key end

     0   :  { %s798_s12 = smov 0   ;;  %s925_s0 = inlined_call_operand.vmem [shape: bf16[2,82,12], index: 0, kind: input, shape index: {}]   ;;  %s926_s1 = inlined_call_operand.vmem [shape: bf16[4,12,16], index: 1, kind: input, shape index: {}]   ;;  %s927_s2 = inlined_call_operand.vmem [shape: f32[1,16], index: 2, kind: input, shape index: {}]   ;;  %s928_s3 = inlined_call_operand.vmem [shape: bf16[2,72,16], index: 3, kind: output, shape index: {}]  }
   0x1 LB: > { %s652_s13 = sadd.s32 4294967295, %s776_s12   ;;  %p656_p0 = scmp.ge.s32.totalorder %s776_s12, 1  ;;  %s776_s12 = sphi %s798_s12, %s13_s12  }
   0x2   : > { %p137_p1 = scmp.lt.s32.totalorder %s776_s12, 3 }
   0x4   : > { %p138_p2 = pnand %p656_p0, %p137_p1 }
   0x5   : > { %p161_p3 = scmp.lt.s32.totalorder (!%p138_p2), %s652_s13, 1 }
   0x6   : > { %141 = sbr.rel (%p138_p2) target bundleno = 233 (0xe9), region = 32 }
   0xb   : > { %v672_v0 = vld [vmem:[%s926_s1] sm:$0xf]  ;;  %v703_v1 = vld [vmem:[%s926_s1] sm:$0x30]  ;;  %vm274_vm0 = vcmask 1045504   ;;  %s930_s13 = smov (!%p161_p3, %s652_s13), 1 }
   0xc   : > { %v673_v2 = vor.u32 %v703_v1, %v672_v0  ;;  %v694_v3 = vld [vmem:[%s926_s1 + $0x18] sm:$0xf]  ;;  %v706_v4 = vld [vmem:[%s926_s1 + $0x18] sm:$0x30]  ;;  %v663_v5 = vld [vmem:[%s926_s1 + $0x8] sm:$0xf] }
   0xd   : > { %v695_v6 = vor.u32 %v706_v4, %v694_v3  ;;  %v704_v7 = vld [vmem:[%s926_s1 + $0x8] sm:$0x30]  ;;  %v683_v10 = vld [vmem:[%s926_s1 + $0x10] sm:$0xf]  ;;  %v705_v11 = vld [vmem:[%s926_s1 + $0x10] sm:$0x30] }
   0xe   : > { %v329_v8 = vsel %vm274_vm0, %v673_v2, 0  ;;  %v664_v9 = vor.u32 %v704_v7, %v663_v5  ;;  %s759_s30 = smul.u32 44, %s930_s13  ;;  %v684_v13 = vor.u32 %v705_v11, %v683_v10  ;;  %vm258_vm1 = vcmask 97280  }
   0xf   : > { %338 = vmatpush.bf16.msra.mxu1 %v329_v8  ;;  %v512_v12 = vsel %vm274_vm0, %v695_v6, 0  ;;  %vm481_vm2 = vcmask 1046528   ;;  %vm213_vm3 = vsmask.f32 7424  ;;  %s760_s9 = smul.u32 36, %s930_s13  ;;  %vm587_vm4 = vcmask 125952  }
  0x10   : > { %521 = vmatpush.bf16.msra.mxu3 %v512_v12  ;;  %v276_v14 = vsel %vm274_vm0, %v664_v9, 0  ;;  %s839_s6 = scalar_lea.vmem %s925_s0, %s759_s30  ;;  %v434_v15 = vsel %vm274_vm0, %v684_v13, 0 }
  0x11   : > { %285 = vmatpush.bf16.msra.mxu0 %v276_v14  ;;  %v708_v16 = vld [vmem:[%s839_s6] sm:$0xff]   ;;  %v755_v18 = vld [vmem:[%s839_s6 + $0xc] sm:$0xff]   ;;  %443 = vmatpush.bf16.msra.mxu2 %v434_v15  ;;  %v756_v37 = vld [vmem:[%s839_s6 + $0x14] sm:$0xff]   ;;  %s894_s14 = scalar_lea.vmem %s928_s3, %s760_s9 }
  0x12   : > { %v753_v17 = vld [vmem:[%s839_s6 + $0x4] sm:$0xff]   ;;  %v215_v19 = vshrl.u32 %v708_v16, 16  ;;  %v217_v20 = vshll.u32 %v708_v16, 16  ;;  %674 = vmatmul.msk.bf16.vlgmr.msra.gmra.mxu1 %vm258_vm1, %v708_v16  ;;  %v483_v23 = vrot.slane %v755_v18, 1  ;;  %v382_v28 = vshll.u32 %v755_v18, 16  ;;  %v728_v38 = vld [vmem:[%s839_s6 + $0x10] sm:$0xff]  }
  0x13   : > { %v727_v21 = vld [vmem:[%s839_s6 + $0x8] sm:$0xff]   ;;  %v482_v22 = vrot.slane %v753_v17, 1  ;;  %v375_v26 = vshrl.u32 %v753_v17, 16  ;;  %v377_v27 = vshll.u32 %v753_v17, 16  ;;  %v230_v40 = vshll.u32 %v728_v38, 16  ;;  %v729_v49 = vld [vmem:[%s839_s6 + $0x18] sm:$0xff]  }
  0x14   : > { %v222_v24 = vshll.u32 %v727_v21, 16  ;;  %v219_v25 = vrot.slane %v217_v20, 1  ;;  %v384_v33 = vrot.slane %v382_v28, 1  ;;  %v226_v39 = vshrl.u32 %v727_v21, 16  ;;  %v730_v50 = vld [vmem:[%s839_s6 + $0x20] sm:$0xff]  }
  0x15   : > { %v484_v29 = vsel %vm481_vm2, %v482_v22, %v483_v23  ;;  %v379_v32 = vrot.slane %v377_v27, 1  ;;  %v485_v41 = vrot.slane %v756_v37, 1  ;;  %v386_v42 = vshrl.u32 %v755_v18, 16  ;;  %v757_v4 = vld [vmem:[%s839_s6 + $0x24] sm:$0xf] }
  0x16   : > { %v224_v30 = vrot.slane %v222_v24, 1  ;;  %v220_v31 = vor.u32 %v219_v25, %v215_v19  ;;  %696 = vmatmul.msk.bf16.vlgmr.msra.gmra.mxu3 %vm258_vm1, %v484_v29  ;;  %v390_v43 = vshll.u32 %v756_v37, 16  ;;  %v232_v45 = vrot.slane %v230_v40, 1  ;;  %v758_v5 = vld [vmem:[%s839_s6 + $0x24] sm:$0x10] }
  0x17   : > { %v380_v35 = vor.u32 %v379_v32, %v375_v26  ;;  %v486_v46 = vsel %vm481_vm2, %v483_v23, %v485_v41  ;;  %v388_v47 = vor.u32 %v386_v42, %v384_v33  ;;  %v722_v52 = vunpack.c.h.b16 %v729_v49  ;;  %v887_v32 = vld [vmem:[%s927_s2] ss:$0 sm:$0xff] }
  0x18   : > { %v225_v34 = vsel %vm213_vm3, %v220_v31, %v224_v30  ;;  %v228_v44 = vor.u32 %v226_v39, %v224_v30  ;;  %v392_v48 = vrot.slane %v390_v43, 1  ;;  %v725_v53 = vunpack.c.l.b16 %v730_v50 }
  0x19   : > { %665 = vmatmul.msk.bf16.vlgmr.msra.gmra.mxu0 %vm258_vm1, %v225_v34  ;;  %v385_v36 = vsel %vm213_vm3, %v380_v35, %v384_v33  ;;  %v234_v56 = vshrl.u32 %v728_v38, 16  ;;  %v238_v57 = vshll.u32 %v729_v49, 16  ;;  %v394_v59 = vshrl.u32 %v756_v37, 16 }
  0x1a   : > { %685 = vmatmul.msk.bf16.vlgmr.msra.gmra.mxu2 %vm258_vm1, %v385_v36  ;;  %v233_v51 = vsel %vm213_vm3, %v228_v44, %v232_v45  ;;  %v393_v54 = vsel %vm213_vm3, %v388_v47, %v392_v48  ;;  %v372_v55 = vpack.c.b16 %v725_v53, %v722_v52  ;;  %v750_v6 = vor.u32 %v758_v5, %v757_v4 }
  0x1b   : > { %v236_v61 = vor.u32 %v234_v56, %v232_v45  ;;  %v240_v62 = vrot.slane %v238_v57, 1  ;;  %v396_v0 = vor.u32 %v394_v59, %v392_v48  ;;  %v242_v7 = vshrl.u32 %v729_v49, 16 }
  0x1c   : > { %v487_v58 = vrot.slane %v372_v55, 1  ;;  %v398_v60 = vshll.u32 %v372_v55, 16  ;;  %v246_v8 = vshll.u32 %v730_v50, 16  ;;  %v489_v9 = vrot.slane %v750_v6, 1 }
  0x1d   : > { %v241_v2 = vsel %vm213_vm3, %v236_v61, %v240_v62  ;;  %v402_v10 = vshrl.u32 %v372_v55, 16  ;;  %v406_v11 = vshll.u32 %v750_v6, 16  ;;  %v244_v12 = vor.u32 %v242_v7, %v240_v62 }
  0x1e   : > { %v488_v63 = vsel %vm481_vm2, %v485_v41, %v487_v58  ;;  %v400_v1 = vrot.slane %v398_v60, 1  ;;  %v248_v13 = vrot.slane %v246_v8, 1  ;;  %v490_v14 = vsel %vm481_vm2, %v487_v58, %v489_v9 }
  0x1f   : > { %v408_v16 = vrot.slane %v406_v11, 1  ;;  %v311_v19 = vpack.c.b16 %v725_v53, %v725_v53  ;;  %v250_v20 = vshrl.u32 %v730_v50, 16 }
  0x20   : > { %v401_v3 = vsel %vm213_vm3, %v396_v0, %v400_v1  ;;  %v404_v15 = vor.u32 %v402_v10, %v400_v1  ;;  %v249_v17 = vsel %vm213_vm3, %v244_v12, %v248_v13 }
  0x21   : > { %v252_v22 = vor.u32 %v250_v20, %v248_v13 }
  0x22   : > { %675 = vmatmul.msk.bf16.gmra.mxu1 %vm258_vm1, %v727_v21  ;;  %v409_v18 = vsel %vm213_vm3, %v404_v15, %v408_v16  ;;  %v410_v21 = vshrl.u32 %v750_v6, 16 }
  0x24   : > { %v412_v23 = vor.u32 %v410_v21, %v408_v16 }
  0x26   : > { %697 = vmatmul.msk.bf16.gmra.mxu3 %vm258_vm1, %v486_v46 }
  0x29   : > { %666 = vmatmul.msk.bf16.gmra.mxu0 %vm258_vm1, %v233_v51 }
  0x2a   : > { %686 = vmatmul.msk.bf16.gmra.mxu2 %vm258_vm1, %v393_v54 }
  0x32   : > { %676 = vmatmul.msk.bf16.gmra.mxu1 %vm258_vm1, %v728_v38 }
  0x36   : > { %698 = vmatmul.msk.bf16.gmra.mxu3 %vm258_vm1, %v488_v63 }
  0x39   : > { %667 = vmatmul.msk.bf16.gmra.mxu0 %vm258_vm1, %v241_v2 }
  0x3a   : > { %687 = vmatmul.msk.bf16.gmra.mxu2 %vm258_vm1, %v401_v3 }
  0x42   : > { %677 = vmatmul.msk.bf16.gmra.mxu1 %vm258_vm1, %v729_v49 }
  0x46   : > { %699 = vmatmul.msk.bf16.gmra.mxu3 %vm258_vm1, %v490_v14 }
  0x49   : > { %668 = vmatmul.msk.bf16.gmra.mxu0 %vm258_vm1, %v249_v17 }
  0x4a   : > { %688 = vmatmul.msk.bf16.gmra.mxu2 %vm258_vm1, %v409_v18 }
  0x52   : > { %678 = vmatmul.msk.bf16.gmra.mxu1 %vm258_vm1, %v311_v19 }
  0x56   : > { %700 = vmatmul.msk.bf16.gmra.mxu3 %vm258_vm1, %v489_v9 }
  0x59   : > { %669 = vmatmul.msk.bf16.gmra.mxu0 %vm258_vm1, %v252_v22 }
  0x5a   : > { %689 = vmatmul.msk.bf16.gmra.mxu2 %vm258_vm1, %v412_v23 }
  0x8f   : > { %v340_v24 = vpop.f32.mrf.mxu1 }
  0x96   : > { %v287_v25 = vpop.f32.mrf.mxu0 }
  0x97   : > { %v342_v26 = vpop.f32.mrf.mxu1  ;;  %v341_v28 = vadd.f32 %v340_v24, %v287_v25 }
  0x99   : > { %v523_v27 = vpop.f32.mrf.mxu3 }
  0x9d   : > { %v445_v30 = vpop.f32.mrf.mxu2 }
  0x9e   : > { %v289_v29 = vpop.f32.mrf.mxu0  ;;  %v469_v31 = vadd.f32 %v445_v30, %v341_v28 }
  0x9f   : > { %v345_v33 = vpop.f32.mrf.mxu1  ;;  %v343_v37 = vadd.f32 %v342_v26, %v289_v29 }
  0xa0   : > { %v547_v34 = vadd.f32 %v523_v27, %v469_v31 }
  0xa1   : > { %v525_v35 = vpop.f32.mrf.mxu3 }
  0xa2   : > { %v560_v36 = vadd.f32 %v887_v32, %v547_v34 }
  0xa4   : > { %v569_v38 = vmax.f32 %v560_v36, 0.0 }
  0xa5   : > { %v447_v40 = vpop.f32.mrf.mxu2 }
  0xa6   : > { %v292_v39 = vpop.f32.mrf.mxu0  ;;  %v578_v41 = vpack.c.bf16 %v569_v38, %v569_v38  ;;  %v470_v42 = vadd.f32 %v447_v40, %v343_v37 }
  0xa7   : > { %v347_v43 = vpop.f32.mrf.mxu1  ;;  %v346_v46 = vadd.f32 %v345_v33, %v292_v39 }
  0xa8   : > { %588 = vst.msk [vmem:[%s894_s14] sm:$0xf] %vm587_vm4, %v578_v41  ;;  %v548_v44 = vadd.f32 %v525_v35, %v470_v42 }
  0xa9   : > { %v528_v45 = vpop.f32.mrf.mxu3 }
  0xaa   : > { %v561_v47 = vadd.f32 %v887_v32, %v548_v44 }
  0xac   : > { %v570_v48 = vmax.f32 %v561_v47, 0.0 }
  0xad   : > { %v450_v50 = vpop.f32.mrf.mxu2 }
  0xae   : > { %v294_v49 = vpop.f32.mrf.mxu0  ;;  %v579_v51 = vpack.c.bf16 %v570_v48, %v570_v48  ;;  %v471_v52 = vadd.f32 %v450_v50, %v346_v46 }
  0xaf   : > { %v350_v53 = vpop.f32.mrf.mxu1  ;;  %v348_v57 = vadd.f32 %v347_v43, %v294_v49 }
  0xb0   : > { %589 = vst.msk [vmem:[%s894_s14 + $0x4] sm:$0xf] %vm587_vm4, %v579_v51  ;;  %v549_v54 = vadd.f32 %v528_v45, %v471_v52 }
  0xb1   : > { %v530_v55 = vpop.f32.mrf.mxu3 }
  0xb2   : > { %v562_v56 = vadd.f32 %v887_v32, %v549_v54 }
  0xb4   : > { %v571_v58 = vmax.f32 %v562_v56, 0.0 }
  0xb5   : > { %v452_v60 = vpop.f32.mrf.mxu2 }
  0xb6   : > { %v297_v59 = vpop.f32.mrf.mxu0  ;;  %v580_v61 = vpack.c.bf16 %v571_v58, %v571_v58  ;;  %v472_v62 = vadd.f32 %v452_v60, %v348_v57 }
  0xb7   : > { %v352_v63 = vpop.f32.mrf.mxu1  ;;  %v351_v2 = vadd.f32 %v350_v53, %v297_v59 }
  0xb8   : > { %590 = vst.msk [vmem:[%s894_s14 + $0x8] sm:$0xf] %vm587_vm4, %v580_v61  ;;  %v550_v0 = vadd.f32 %v530_v55, %v472_v62 }
  0xb9   : > { %v533_v1 = vpop.f32.mrf.mxu3 }
  0xba   : > { %v563_v3 = vadd.f32 %v887_v32, %v550_v0 }
  0xbc   : > { %v572_v4 = vmax.f32 %v563_v3, 0.0 }
  0xbd   : > { %v455_v6 = vpop.f32.mrf.mxu2 }
  0xbe   : > { %v299_v5 = vpop.f32.mrf.mxu0  ;;  %v581_v7 = vpack.c.bf16 %v572_v4, %v572_v4  ;;  %v473_v8 = vadd.f32 %v455_v6, %v351_v2 }
  0xbf   : > { %v355_v9 = vpop.f32.mrf.mxu1  ;;  %v353_v13 = vadd.f32 %v352_v63, %v299_v5 }
  0xc0   : > { %591 = vst.msk [vmem:[%s894_s14 + $0xc] sm:$0xf] %vm587_vm4, %v581_v7  ;;  %v551_v10 = vadd.f32 %v533_v1, %v473_v8 }
  0xc1   : > { %v535_v11 = vpop.f32.mrf.mxu3 }
  0xc2   : > { %v564_v12 = vadd.f32 %v887_v32, %v551_v10 }
  0xc4   : > { %v573_v14 = vmax.f32 %v564_v12, 0.0 }
  0xc5   : > { %v457_v16 = vpop.f32.mrf.mxu2 }
  0xc6   : > { %v302_v15 = vpop.f32.mrf.mxu0  ;;  %v582_v17 = vpack.c.bf16 %v573_v14, %v573_v14  ;;  %v474_v18 = vadd.f32 %v457_v16, %v353_v13 }
  0xc7   : > { %v357_v19 = vpop.f32.mrf.mxu1  ;;  %v356_v22 = vadd.f32 %v355_v9, %v302_v15 }
  0xc8   : > { %592 = vst.msk [vmem:[%s894_s14 + $0x10] sm:$0xf] %vm587_vm4, %v582_v17  ;;  %v552_v20 = vadd.f32 %v535_v11, %v474_v18 }
  0xc9   : > { %v538_v21 = vpop.f32.mrf.mxu3 }
  0xca   : > { %v565_v23 = vadd.f32 %v887_v32, %v552_v20 }
  0xcc   : > { %v574_v24 = vmax.f32 %v565_v23, 0.0 }
  0xcd   : > { %v460_v26 = vpop.f32.mrf.mxu2 }
  0xce   : > { %v304_v25 = vpop.f32.mrf.mxu0  ;;  %v583_v27 = vpack.c.bf16 %v574_v24, %v574_v24  ;;  %v475_v28 = vadd.f32 %v460_v26, %v356_v22 }
  0xcf   : > { %v360_v29 = vpop.f32.mrf.mxu1  ;;  %v358_v34 = vadd.f32 %v357_v19, %v304_v25 }
  0xd0   : > { %593 = vst.msk [vmem:[%s894_s14 + $0x14] sm:$0xf] %vm587_vm4, %v583_v27  ;;  %v553_v30 = vadd.f32 %v538_v21, %v475_v28 }
  0xd1   : > { %v540_v31 = vpop.f32.mrf.mxu3 }
  0xd2   : > { %v566_v33 = vadd.f32 %v887_v32, %v553_v30 }
  0xd4   : > { %v575_v35 = vmax.f32 %v566_v33, 0.0 }
  0xd5   : > { %v462_v37 = vpop.f32.mrf.mxu2 }
  0xd6   : > { %v307_v36 = vpop.f32.mrf.mxu0  ;;  %v584_v38 = vpack.c.bf16 %v575_v35, %v575_v35  ;;  %v476_v39 = vadd.f32 %v462_v37, %v358_v34 }
  0xd7   : > { %v362_v40 = vpop.f32.mrf.mxu1  ;;  %v361_v43 = vadd.f32 %v360_v29, %v307_v36 }
  0xd8   : > { %594 = vst.msk [vmem:[%s894_s14 + $0x18] sm:$0xf] %vm587_vm4, %v584_v38  ;;  %v554_v41 = vadd.f32 %v540_v31, %v476_v39 }
  0xd9   : > { %v543_v42 = vpop.f32.mrf.mxu3 }
  0xda   : > { %v567_v44 = vadd.f32 %v887_v32, %v554_v41 }
  0xdc   : > { %v576_v45 = vmax.f32 %v567_v44, 0.0 }
  0xdd   : > { %v465_v47 = vpop.f32.mrf.mxu2 }
  0xde   : > { %v309_v46 = vpop.f32.mrf.mxu0  ;;  %v585_v48 = vpack.c.bf16 %v576_v45, %v576_v45  ;;  %v477_v49 = vadd.f32 %v465_v47, %v361_v43 }
  0xe0   : > { %595 = vst.msk [vmem:[%s894_s14 + $0x1c] sm:$0xf] %vm587_vm4, %v585_v48  ;;  %v555_v50 = vadd.f32 %v543_v42, %v477_v49 }
  0xe1   : > { %v545_v51 = vpop.f32.mrf.mxu3 }
  0xe2   : > { %v568_v52 = vadd.f32 %v887_v32, %v555_v50 }
  0xe4   : > { %v577_v53 = vmax.f32 %v568_v52, 0.0 }
  0xe5   : > { %v467_v54 = vpop.f32.mrf.mxu2 }
  0xe6   : > { %v586_v55 = vpack.c.bf16 %v577_v53, %v577_v53 }
  0xe8   : > { %596 = vst.msk [vmem:[%s894_s14 + $0x20] sm:$0xf] %vm587_vm4, %v586_v55 }
  0xe9 PF: > { %s13_s12 = sadd.s32 1, %s776_s12  }
  0xea   : > { %p10_p4 = scmp.ge.s32.totalorder %s13_s12, 4  }
  0xec   :  { %12 = sbr.rel (!%p10_p4) target bundleno = 1 (0x1), region = 65 }

// kernel: vqvae2_forward.30
= control target key start
LH: loop header
LB: loop body
LE: loop exit
PB: predicated region body
PF: predicated region fallthrough
CT: control target
= control target key end

     0   :  { %s1307_s12 = smov 0   ;;  %s1656_s0 = inlined_call_operand.vmem [shape: bf16[2,102,16], index: 0, kind: input, shape index: {}]   ;;  %s1657_s1 = inlined_call_operand.vmem [shape: bf16[9,16,32], index: 1, kind: input, shape index: {}]   ;;  %s1658_s2 = inlined_call_operand.vmem [shape: f32[1,32], index: 2, kind: input, shape index: {}]   ;;  %s1659_s3 = inlined_call_operand.vmem [shape: bf16[2,80,32], index: 3, kind: output, shape index: {}]  }
   0x1 LB: > { %s1093_s13 = sadd.s32 4294967295, %s1285_s12   ;;  %p1097_p0 = scmp.ge.s32.totalorder %s1285_s12, 1  ;;  %s1285_s12 = sphi %s1307_s12, %s13_s12  }
   0x2   : > { %p137_p1 = scmp.lt.s32.totalorder %s1285_s12, 3 }
   0x4   : > { %p138_p2 = pnand %p1097_p0, %p137_p1 }
   0x5   : > { %p161_p3 = scmp.lt.s32.totalorder (!%p138_p2), %s1093_s13, 1 }
   0x6   : > { %141 = sbr.rel (%p138_p2) target bundleno = 350 (0x15e), region = 32 }
   0xb   : > { %v1200_v0 = vld [vmem:[%s1657_s1 + $0x8] sm:$0xff]  ;;  %v1201_v1 = vld [vmem:[%s1657_s1 + $0x10] sm:$0xff]  ;;  %v1199_v2 = vld [vmem:[%s1657_s1] sm:$0xff]  ;;  %s1661_s13 = smov (!%p161_p3, %s1093_s13), 1  ;;  %vm218_vm0 = vsmask.f32 7424 }
   0xc   : > { %v1202_v3 = vld [vmem:[%s1657_s1 + $0x18] sm:$0xff]  ;;  %1265 = vmatpush.bf16.msra.mxu1 %v1200_v0  ;;  %1266 = vmatpush.bf16.msra.mxu2 %v1200_v0  ;;  %v1203_v4 = vld [vmem:[%s1657_s1 + $0x20] sm:$0xff]  ;;  %s1268_s24 = smul.u32 52, %s1661_s13  ;;  %vm269_vm1 = vcmask 130048   ;;  %v1205_v34 = vld [vmem:[%s1657_s1 + $0x30] sm:$0xff]  ;;  %vm372_vm2 = vcmask 1046528  }
   0xd   : > { %1267 = vmatpush.bf16.msra.mxu3 %v1200_v0  ;;  %292 = vmatpush.bf16.msra.mxu0 %v1200_v0  ;;  %v1206_v35 = vld [vmem:[%s1657_s1 + $0x38] sm:$0xff]  ;;  %v1204_v36 = vld [vmem:[%s1657_s1 + $0x28] sm:$0xff]  ;;  %v1207_v39 = vld [vmem:[%s1657_s1 + $0x40] sm:$0xff]  ;;  %vm539_vm3 = vsmask.f32 6400  ;;  %vm661_vm4 = vcmask 1045504  }
   0xe   : > { %s1336_s27 = scalar_lea.vmem %s1656_s0, %s1268_s24  ;;  %vm824_vm5 = vsmask.f32 5376  ;;  %vm926_vm6 = vcmask 1044480   ;;  %s1269_s11 = smul.u32 40, %s1661_s13  ;;  %vm1027_vm7 = vcmask 257024  }
   0xf   : > { %v1339_v5 = vld [vmem:[%s1336_s27 + $0x8] sm:$0xff]   ;;  %v1342_v6 = vld [vmem:[%s1336_s27 + $0x10] sm:$0xff]   ;;  %v1345_v7 = vld [vmem:[%s1336_s27 + $0x18] sm:$0xff]  }
  0x10   : > { %412 = vmatpush.bf16.msrb.mxu2 %v1201_v1  ;;  %342 = vmatpush.bf16.msrb.mxu1 %v1199_v2  ;;  %v227_v8 = vshll.u32 %v1339_v5, 16  ;;  %v231_v9 = vshrl.u32 %v1339_v5, 16  ;;  %v235_v10 = vshll.u32 %v1342_v6, 16  ;;  %v239_v11 = vshrl.u32 %v1342_v6, 16  ;;  %v1352_v12 = vld [vmem:[%s1336_s27 + $0x20] sm:$0xff]   ;;  %v1355_v13 = vld [vmem:[%s1336_s27 + $0x28] sm:$0xff]   ;;  %s1614_s16 = scalar_lea.vmem %s1659_s3, %s1269_s11 }
  0x11   : > { %499 = vmatpush.bf16.msrb.mxu3 %v1202_v3  ;;  %621 = vmatpush.bf16.msrb.mxu0 %v1203_v4  ;;  %v243_v14 = vshll.u32 %v1345_v7, 16  ;;  %v1359_v15 = vunpack.c.l.b16 %v1355_v13  ;;  %v251_v16 = vshll.u32 %v1352_v12, 16  ;;  %v1367_v19 = vld [vmem:[%s1336_s27] sm:$0xff]   ;;  %v255_v25 = vshrl.u32 %v1352_v12, 16  ;;  %v1410_v42 = vld [vmem:[%s1336_s27 + $0xc] sm:$0xff]   ;;  %v1430_v60 = vld [vmem:[%s1336_s27 + $0x14] sm:$0xff]  }
  0x12   : > { %v229_v17 = vrot.slane %v227_v8, 1  ;;  %v237_v18 = vrot.slane %v235_v10, 1  ;;  %v220_v27 = vshrl.u32 %v1367_v19, 16  ;;  %v222_v28 = vshll.u32 %v1367_v19, 16  ;;  %v1407_v41 = vld [vmem:[%s1336_s27 + $0x4] sm:$0xff]  }
  0x13   : > { %v245_v20 = vrot.slane %v243_v14, 1  ;;  %v1373_v21 = vpack.c.b16 %v1359_v15, %v1359_v15  ;;  %v253_v22 = vrot.slane %v251_v16, 1  ;;  %v247_v43 = vshrl.u32 %v1345_v7, 16 }
  0x14   : > { %v233_v23 = vor.u32 %v231_v9, %v229_v17  ;;  %v241_v24 = vor.u32 %v239_v11, %v237_v18  ;;  %v224_v33 = vrot.slane %v222_v28, 1  ;;  %v541_v44 = vshrl.u32 %v1407_v41, 16 }
  0x15   : > { %v259_v26 = vshll.u32 %v1373_v21, 16  ;;  %v257_v31 = vor.u32 %v255_v25, %v253_v22  ;;  %v544_v45 = vshll.u32 %v1407_v41, 16  ;;  %v549_v46 = vshrl.u32 %v1410_v42, 16 }
  0x16   : > { %v238_v29 = vsel %vm218_vm0, %v233_v23, %v237_v18  ;;  %v246_v30 = vsel %vm218_vm0, %v241_v24, %v245_v20  ;;  %v225_v38 = vor.u32 %v224_v33, %v220_v27  ;;  %v552_v47 = vshll.u32 %v1410_v42, 16 }
  0x17   : > { %1107 = vmatmul.msk.bf16.vlgmr.msra.gmra.mxu1 %vm269_vm1, %v238_v29  ;;  %1108 = vmatmul.msk.bf16.vlgmr.msra.gmra.mxu2 %vm269_vm1, %v246_v30  ;;  %v261_v32 = vrot.slane %v259_v26, 1  ;;  %v249_v48 = vor.u32 %v247_v43, %v245_v20  ;;  %v543_v49 = vrot.slane %v541_v44, 1  ;;  %v546_v50 = vrot.slane %v544_v45, 2 }
  0x18   : > { %784 = vmatpush.bf16.msra.mxu2 %v1205_v34  ;;  %701 = vmatpush.bf16.msra.mxu1 %v1204_v36  ;;  %v230_v40 = vsel %vm218_vm0, %v225_v38, %v229_v17  ;;  %v551_v51 = vrot.slane %v549_v46, 1  ;;  %v554_v52 = vrot.slane %v552_v47, 2  ;;  %v460_v53 = vrot.slane %v1407_v41, 1 }
  0x19   : > { %v262_v37 = vsel %vm218_vm0, %v257_v31, %v261_v32  ;;  %1106 = vmatmul.msk.bf16.vlgmr.msra.gmra.mxu0 %vm269_vm1, %v230_v40  ;;  %v461_v54 = vrot.slane %v1410_v42, 1  ;;  %v254_v55 = vsel %vm218_vm0, %v249_v48, %v253_v22  ;;  %v547_v56 = vor.u32 %v546_v50, %v543_v49 }
  0x1a   : > { %1110 = vmatmul.msk.bf16.vlgmr.msra.gmra.mxu3 %vm269_vm1, %v262_v37  ;;  %966 = vmatpush.bf16.msra.mxu0 %v1207_v39  ;;  %v555_v57 = vor.u32 %v554_v52, %v551_v51  ;;  %v558_v61 = vshrl.u32 %v1430_v60, 16  ;;  %v561_v62 = vshll.u32 %v1430_v60, 16  ;;  %v373_v63 = vrot.slane %v1367_v19, 1 }
  0x1b   : > { %886 = vmatpush.bf16.msra.mxu3 %v1206_v35  ;;  %v462_v58 = vsel %vm372_vm2, %v460_v53, %v461_v54  ;;  %v374_v0 = vrot.slane %v1339_v5, 1  ;;  %v463_v3 = vrot.slane %v1430_v60, 1  ;;  %v376_v24 = vrot.slane %v1342_v6, 1 }
  0x1c   : > { %v556_v59 = vsel %vm539_vm3, %v547_v56, %v555_v57  ;;  %v560_v1 = vrot.slane %v558_v61, 1  ;;  %v563_v2 = vrot.slane %v561_v62, 2  ;;  %v1227_v31 = vunpack.c.h.b16 %v1352_v12 }
  0x1d   : > { %v375_v4 = vsel %vm372_vm2, %v373_v63, %v374_v0  ;;  %v464_v18 = vsel %vm372_vm2, %v461_v54, %v463_v3  ;;  %v377_v29 = vsel %vm372_vm2, %v374_v0, %v376_v24  ;;  %v380_v34 = vrot.slane %v1352_v12, 1 }
  0x1e   : > { %v564_v17 = vor.u32 %v563_v2, %v560_v1  ;;  %v382_v35 = vrot.slane %v1373_v21, 1  ;;  %v1464_v36 = vpack.c.b16 %v1359_v15, %v1227_v31  ;;  %v378_v40 = vrot.slane %v1345_v7, 1 }
  0x1f   : > { %v829_v46 = vrot.slane %v235_v10, 3  ;;  %v828_v21 = vrot.slane %v239_v11, 2  ;;  %v662_v48 = vrot.slane %v1407_v41, 2  ;;  %v663_v49 = vrot.slane %v1410_v42, 2 }
  0x20   : > { %v565_v20 = vsel %vm539_vm3, %v555_v57, %v564_v17  ;;  %v383_v37 = vsel %vm372_vm2, %v380_v34, %v382_v35  ;;  %v576_v38 = vshrl.u32 %v1464_v36, 16  ;;  %v579_v39 = vshll.u32 %v1464_v36, 16 }
  0x21   : > { %v467_v15 = vrot.slane %v1464_v36, 1  ;;  %v379_v47 = vsel %vm372_vm2, %v376_v24, %v378_v40  ;;  %v825_v50 = vrot.slane %v231_v9, 2  ;;  %v664_v52 = vsel %vm661_vm4, %v662_v48, %v663_v49 }
  0x22   : > { %v578_v44 = vrot.slane %v576_v38, 1  ;;  %v581_v45 = vrot.slane %v579_v39, 2  ;;  %v1231_v11 = vunpack.c.h.b16 %v1355_v13  ;;  %v826_v41 = vrot.slane %v227_v8, 3 }
  0x23   : > { %v830_v42 = vor.u32 %v829_v46, %v828_v21  ;;  %v665_v54 = vrot.slane %v1430_v60, 2  ;;  %v381_v63 = vsel %vm372_vm2, %v378_v40, %v380_v34  ;;  %v927_v2 = vrot.slane %v1339_v5, 3  ;;  %v184_v46 = vld [vmem:[%s1336_s27 + $0x30] sm:$0x7] }
  0x24   : > { %v582_v51 = vor.u32 %v581_v45, %v578_v44  ;;  %v827_v53 = vor.u32 %v826_v41, %v825_v50  ;;  %v844_v35 = vshll.u32 %v1355_v13, 16  ;;  %v669_v44 = vrot.slane %v1464_v36, 2 }
  0x25   : > { %v666_v57 = vsel %vm661_vm4, %v663_v49, %v665_v54  ;;  %v750_v45 = vrot.slane %v1352_v12, 2  ;;  %v742_v48 = vunpack.c.l.b16 %v184_v46 }
  0x26   : > { %v831_v56 = vsel %vm824_vm5, %v827_v53, %v830_v42  ;;  %v846_v40 = vrot.slane %v844_v35, 3 }
  0x27   : > { %1109 = vmatmul.msk.bf16.gmra.mxu2 %vm269_vm1, %v254_v55  ;;  %1115 = vmatmul.msk.bf16.vlgmr.msrb.gmra.mxu1 %vm269_vm1, %v1367_v19  ;;  %v1446_v19 = vld [vmem:[%s1336_s27 + $0x1c] sm:$0xff]   ;;  %v1492_v55 = vpack.c.b16 %v1231_v11, %v1231_v11  ;;  %v934_v11 = vrot.slane %v1355_v13, 3  ;;  %v744_v36 = vpack.c.b16 %v742_v48, %v742_v48 }
  0x28   : > { %v567_v22 = vshrl.u32 %v1446_v19, 16  ;;  %v570_v23 = vshll.u32 %v1446_v19, 16  ;;  %v465_v28 = vrot.slane %v1446_v19, 1 }
  0x29   : > { %1148 = vmatmul.msk.bf16.vlgmr.msrb.gmra.mxu0 %vm269_vm1, %v556_v59  ;;  %v588_v8 = vshll.u32 %v1492_v55, 16  ;;  %v469_v62 = vrot.slane %v1492_v55, 1  ;;  %v850_v53 = vshrl.u32 %v744_v36, 16 }
  0x2a   : > { %1137 = vmatmul.msk.bf16.vlgmr.msrb.gmra.mxu3 %vm269_vm1, %v462_v58  ;;  %v569_v26 = vrot.slane %v567_v22, 1  ;;  %v572_v27 = vrot.slane %v570_v23, 2  ;;  %v466_v32 = vsel %vm372_vm2, %v463_v3, %v465_v28  ;;  %v468_v10 = vsel %vm372_vm2, %v465_v28, %v467_v15 }
  0x2b   : > { %v585_v58 = vshrl.u32 %v1492_v55, 16  ;;  %v590_v61 = vrot.slane %v588_v8, 2  ;;  %v470_v60 = vsel %vm372_vm2, %v467_v15, %v469_v62  ;;  %v928_v3 = vrot.slane %v1342_v6, 3 }
  0x2c   : > { %v573_v30 = vor.u32 %v572_v27, %v569_v26  ;;  %v746_v22 = vrot.slane %v1342_v6, 2  ;;  %v930_v26 = vrot.slane %v1345_v7, 3  ;;  %v748_v28 = vrot.slane %v1345_v7, 2 }
  0x2d   : > { %v587_v59 = vrot.slane %v585_v58, 1  ;;  %v852_v8 = vrot.slane %v850_v53, 2  ;;  %v752_v62 = vrot.slane %v1355_v13, 2 }
  0x2e   : > { %v574_v33 = vsel %vm539_vm3, %v564_v17, %v573_v30  ;;  %v583_v9 = vsel %vm539_vm3, %v573_v30, %v582_v51  ;;  %v832_v17 = vrot.slane %v247_v43, 2  ;;  %v931_v43 = vsel %vm926_vm6, %v928_v3, %v930_v26 }
  0x2f   : > { %v591_v0 = vor.u32 %v590_v61, %v587_v59  ;;  %v671_v61 = vrot.slane %v1492_v55, 2 }
  0x31   : > { %v592_v1 = vsel %vm539_vm3, %v582_v51, %v591_v0  ;;  %v751_v51 = vsel %vm661_vm4, %v748_v28, %v750_v45 }
  0x37   : > { %1116 = vmatmul.msk.bf16.gmra.mxu1 %vm269_vm1, %v1339_v5  ;;  %1126 = vmatmul.msk.bf16.vlgmr.msrb.gmra.mxu2 %vm269_vm1, %v375_v4  ;;  %v929_v4 = vsel %vm926_vm6, %v927_v2, %v928_v3  ;;  %v672_v2 = vsel %vm661_vm4, %v669_v44, %v671_v61  ;;  %v753_v3 = vsel %vm661_vm4, %v750_v45, %v752_v62 }
  0x39   : > { %1149 = vmatmul.msk.bf16.gmra.mxu0 %vm269_vm1, %v565_v20  ;;  %v745_v20 = vrot.slane %v1339_v5, 2  ;;  %v836_v5 = vrot.slane %v255_v25, 2 }
  0x3a   : > { %1138 = vmatmul.msk.bf16.gmra.mxu3 %vm269_vm1, %v464_v18  ;;  %v833_v18 = vrot.slane %v243_v14, 3  ;;  %v667_v14 = vrot.slane %v1446_v19, 2 }
  0x3b   : > { %v747_v24 = vsel %vm661_vm4, %v745_v20, %v746_v22 }
  0x3c   : > { %v834_v23 = vor.u32 %v833_v18, %v832_v17  ;;  %v668_v31 = vsel %vm661_vm4, %v665_v54, %v667_v14  ;;  %v670_v50 = vsel %vm661_vm4, %v667_v14, %v669_v44  ;;  %v853_v54 = vshll.u32 %v744_v36, 16 }
  0x3d   : > { %v936_v18 = vrot.slane %v744_v36, 3 }
  0x3e   : > { %v835_v27 = vsel %vm824_vm5, %v830_v42, %v834_v23  ;;  %v855_v59 = vrot.slane %v853_v54, 3 }
  0x47   : > { %1117 = vmatmul.msk.bf16.gmra.mxu1 %vm269_vm1, %v1342_v6  ;;  %1127 = vmatmul.msk.bf16.gmra.mxu2 %vm269_vm1, %v377_v29  ;;  %v837_v6 = vrot.slane %v251_v16, 3 }
  0x49   : > { %1150 = vmatmul.msk.bf16.gmra.mxu0 %vm269_vm1, %v574_v33  ;;  %v838_v29 = vor.u32 %v837_v6, %v836_v5  ;;  %v932_v33 = vrot.slane %v1352_v12, 3  ;;  %v754_v6 = vrot.slane %v744_v36, 2 }
  0x4a   : > { %1139 = vmatmul.msk.bf16.gmra.mxu3 %vm269_vm1, %v466_v32  ;;  %v749_v32 = vsel %vm661_vm4, %v746_v22, %v748_v28 }
  0x4b   : > { %v839_v25 = vsel %vm824_vm5, %v834_v23, %v838_v29  ;;  %v933_v19 = vsel %vm926_vm6, %v930_v26, %v932_v33  ;;  %v935_v42 = vsel %vm926_vm6, %v932_v33, %v934_v11 }
  0x57   : > { %1118 = vmatmul.msk.bf16.gmra.mxu1 %vm269_vm1, %v1345_v7  ;;  %1128 = vmatmul.msk.bf16.gmra.mxu2 %vm269_vm1, %v379_v47  ;;  %v841_v7 = vshrl.u32 %v1355_v13, 16  ;;  %v937_v13 = vsel %vm926_vm6, %v934_v11, %v936_v18 }
  0x59   : > { %1151 = vmatmul.msk.bf16.gmra.mxu0 %vm269_vm1, %v583_v9  ;;  %v843_v39 = vrot.slane %v841_v7, 2 }
  0x5a   : > { %1140 = vmatmul.msk.bf16.gmra.mxu3 %vm269_vm1, %v468_v10 }
  0x5b   : > { %v847_v47 = vor.u32 %v846_v40, %v843_v39 }
  0x67   : > { %1119 = vmatmul.msk.bf16.gmra.mxu1 %vm269_vm1, %v1352_v12  ;;  %1129 = vmatmul.msk.bf16.gmra.mxu2 %vm269_vm1, %v381_v63  ;;  %v848_v12 = vsel %vm824_vm5, %v838_v29, %v847_v47 }
  0x69   : > { %1152 = vmatmul.msk.bf16.gmra.mxu0 %vm269_vm1, %v592_v1 }
  0x6a   : > { %1141 = vmatmul.msk.bf16.gmra.mxu3 %vm269_vm1, %v470_v60  ;;  %v856_v60 = vor.u32 %v855_v59, %v852_v8 }
  0x6c   : > { %v857_v20 = vsel %vm824_vm5, %v847_v47, %v856_v60 }
  0x77   : > { %1130 = vmatmul.msk.bf16.gmra.mxu2 %vm269_vm1, %v383_v37  ;;  %1159 = vmatmul.msk.bf16.vlgmr.msra.gmra.mxu1 %vm269_vm1, %v664_v52 }
  0x79   : > { %1192 = vmatmul.msk.bf16.vlgmr.msra.gmra.mxu0 %vm269_vm1, %v929_v4 }
  0x7a   : > { %1181 = vmatmul.msk.bf16.vlgmr.msra.gmra.mxu3 %vm269_vm1, %v831_v56 }
  0x87   : > { %1160 = vmatmul.msk.bf16.gmra.mxu1 %vm269_vm1, %v666_v57  ;;  %1170 = vmatmul.msk.bf16.vlgmr.msra.gmra.mxu2 %vm269_vm1, %v747_v24 }
  0x89   : > { %1193 = vmatmul.msk.bf16.gmra.mxu0 %vm269_vm1, %v931_v43 }
  0x8a   : > { %1182 = vmatmul.msk.bf16.gmra.mxu3 %vm269_vm1, %v835_v27 }
  0x94   : > { %v299_v30 = vpop.f32.mrf.mxu1 }
  0x96   : > { %v294_v16 = vpop.f32.mrf.mxu0 }
  0x97   : > { %1161 = vmatmul.msk.bf16.gmra.mxu1 %vm269_vm1, %v668_v31  ;;  %1171 = vmatmul.msk.bf16.gmra.mxu2 %vm269_vm1, %v749_v32  ;;  %v755_v31 = vsel %vm661_vm4, %v752_v62, %v754_v6 }
  0x99   : > { %1194 = vmatmul.msk.bf16.gmra.mxu0 %vm269_vm1, %v933_v19 }
  0x9a   : > { %v1542_v34 = vpop.f32.mrf.mxu2  ;;  %1183 = vmatmul.msk.bf16.gmra.mxu3 %vm269_vm1, %v839_v25 }
  0x9c   : > { %v301_v37 = vpop.f32.mrf.mxu1 }
  0x9d   : > { %v1548_v38 = vpop.f32.mrf.mxu3 }
  0x9e   : > { %v296_v21 = vpop.f32.mrf.mxu0 }
  0xa2   : > { %v1553_v15 = vpop.f32.mrf.mxu2 }
  0xa4   : > { %v344_v49 = vpop.f32.mrf.mxu1 }
  0xa5   : > { %v345_v52 = vadd.f32 %v344_v49, %v294_v16  ;;  %v1557_v10 = vpop.f32.mrf.mxu3 }
  0xa6   : > { %v623_v41 = vpop.f32.mrf.mxu0 }
  0xa7   : > { %1162 = vmatmul.msk.bf16.gmra.mxu1 %vm269_vm1, %v670_v50  ;;  %1172 = vmatmul.msk.bf16.gmra.mxu2 %vm269_vm1, %v751_v51 }
  0xa9   : > { %1195 = vmatmul.msk.bf16.gmra.mxu0 %vm269_vm1, %v935_v42 }
  0xaa   : > { %v309_v9 = vpop.f32.mrf.mxu2  ;;  %1184 = vmatmul.msk.bf16.gmra.mxu3 %vm269_vm1, %v848_v12 }
  0xac   : > { %v346_v56 = vpop.f32.mrf.mxu1 }
  0xad   : > { %v347_v57 = vadd.f32 %v346_v56, %v296_v21  ;;  %v501_v58 = vpop.f32.mrf.mxu3 }
  0xae   : > { %v625_v63 = vpop.f32.mrf.mxu0 }
  0xb2   : > { %v311_v0 = vpop.f32.mrf.mxu2 }
  0xb4   : > { %v349_v1 = vpop.f32.mrf.mxu1 }
  0xb5   : > { %v350_v4 = vadd.f32 %v349_v1, %v299_v30  ;;  %v503_v17 = vpop.f32.mrf.mxu3 }
  0xb6   : > { %v628_v55 = vpop.f32.mrf.mxu0 }
  0xb7   : > { %1163 = vmatmul.msk.bf16.gmra.mxu1 %vm269_vm1, %v672_v2  ;;  %1173 = vmatmul.msk.bf16.gmra.mxu2 %vm269_vm1, %v753_v3 }
  0xb9   : > { %1196 = vmatmul.msk.bf16.gmra.mxu0 %vm269_vm1, %v937_v13 }
  0xba   : > { %v414_v22 = vpop.f32.mrf.mxu2  ;;  %1185 = vmatmul.msk.bf16.gmra.mxu3 %vm269_vm1, %v857_v20 }
  0xbb   : > { %v439_v23 = vadd.f32 %v414_v22, %v345_v52 }
  0xbc   : > { %v351_v24 = vpop.f32.mrf.mxu1 }
  0xbd   : > { %v526_v26 = vadd.f32 %v501_v58, %v439_v23  ;;  %v352_v27 = vadd.f32 %v351_v24, %v301_v37  ;;  %v506_v43 = vpop.f32.mrf.mxu3 }
  0xbe   : > { %v630_v14 = vpop.f32.mrf.mxu0 }
  0xbf   : > { %v1576_v5 = vadd.f32 %v623_v41, %v526_v26 }
  0xc2   : > { %v416_v28 = vpop.f32.mrf.mxu2 }
  0xc3   : > { %v440_v29 = vadd.f32 %v416_v28, %v347_v57 }
  0xc4   : > { %v354_v30 = vpop.f32.mrf.mxu1 }
  0xc5   : > { %v527_v32 = vadd.f32 %v503_v17, %v440_v29  ;;  %v355_v33 = vadd.f32 %v354_v30, %v1542_v34  ;;  %v508_v25 = vpop.f32.mrf.mxu3 }
  0xc6   : > { %v633_v19 = vpop.f32.mrf.mxu0 }
  0xc7   : > { %1174 = vmatmul.msk.bf16.gmra.mxu2 %vm269_vm1, %v755_v31  ;;  %v1581_v16 = vadd.f32 %v625_v63, %v527_v32 }
  0xca   : > { %v419_v7 = vpop.f32.mrf.mxu2 }
  0xcb   : > { %v441_v35 = vadd.f32 %v419_v7, %v350_v4 }
  0xcc   : > { %v356_v37 = vpop.f32.mrf.mxu1 }
  0xcd   : > { %v528_v39 = vadd.f32 %v506_v43, %v441_v35  ;;  %v357_v40 = vadd.f32 %v356_v37, %v1553_v15  ;;  %v511_v44 = vpop.f32.mrf.mxu3  ;;  %v1606_v37 = vld [vmem:[%s1658_s2] ss:$0 sm:$0xff] }
  0xce   : > { %v635_v46 = vpop.f32.mrf.mxu0 }
  0xcf   : > { %v1584_v45 = vadd.f32 %v628_v55, %v528_v39 }
  0xd2   : > { %v421_v21 = vpop.f32.mrf.mxu2 }
  0xd3   : > { %v442_v47 = vadd.f32 %v421_v21, %v352_v27 }
  0xd4   : > { %v359_v48 = vpop.f32.mrf.mxu1 }
  0xd5   : > { %v529_v34 = vadd.f32 %v508_v25, %v442_v47  ;;  %v360_v49 = vadd.f32 %v359_v48, %v309_v9  ;;  %v513_v50 = vpop.f32.mrf.mxu3 }
  0xd6   : > { %v638_v52 = vpop.f32.mrf.mxu0 }
  0xd7   : > { %v1586_v51 = vadd.f32 %v630_v14, %v529_v34 }
  0xda   : > { %v424_v11 = vpop.f32.mrf.mxu2 }
  0xdb   : > { %v443_v12 = vadd.f32 %v424_v11, %v355_v33 }
  0xdc   : > { %v361_v36 = vpop.f32.mrf.mxu1 }
  0xdd   : > { %v530_v41 = vadd.f32 %v511_v44, %v443_v12  ;;  %v362_v42 = vadd.f32 %v361_v36, %v311_v0  ;;  %v516_v53 = vpop.f32.mrf.mxu3 }
  0xde   : > { %v640_v54 = vpop.f32.mrf.mxu0 }
  0xdf   : > { %v1588_v15 = vadd.f32 %v633_v19, %v530_v41 }
  0xe2   : > { %v426_v56 = vpop.f32.mrf.mxu2 }
  0xe3   : > { %v444_v57 = vadd.f32 %v426_v56, %v357_v40 }
  0xe4   : > { %v364_v58 = vpop.f32.mrf.mxu1 }
  0xe5   : > { %v531_v8 = vadd.f32 %v513_v50, %v444_v57  ;;  %v365_v59 = vadd.f32 %v364_v58, %v1548_v38  ;;  %v518_v9 = vpop.f32.mrf.mxu3 }
  0xe6   : > { %v643_v62 = vpop.f32.mrf.mxu0 }
  0xe7   : > { %v1591_v61 = vadd.f32 %v635_v46, %v531_v8 }
  0xea   : > { %v429_v63 = vpop.f32.mrf.mxu2 }
  0xeb   : > { %v445_v60 = vadd.f32 %v429_v63, %v360_v49 }
  0xec   : > { %v366_v1 = vpop.f32.mrf.mxu1 }
  0xed   : > { %v532_v2 = vadd.f32 %v516_v53, %v445_v60  ;;  %v367_v0 = vadd.f32 %v366_v1, %v1557_v10  ;;  %v521_v3 = vpop.f32.mrf.mxu3 }
  0xee   : > { %v645_v18 = vpop.f32.mrf.mxu0 }
  0xef   : > { %v1594_v4 = vadd.f32 %v638_v52, %v532_v2 }
  0xf2   : > { %v431_v17 = vpop.f32.mrf.mxu2 }
  0xf3   : > { %v446_v20 = vadd.f32 %v431_v17, %v362_v42 }
  0xf4   : > { %v703_v55 = vpop.f32.mrf.mxu1 }
  0xf5   : > { %v533_v13 = vadd.f32 %v518_v9, %v446_v20  ;;  %v523_v22 = vpop.f32.mrf.mxu3  ;;  %v728_v25 = vadd.f32 %v703_v55, %v1576_v5 }
  0xf6   : > { %v968_v26 = vpop.f32.mrf.mxu0 }
  0xf7   : > { %v1596_v38 = vadd.f32 %v640_v54, %v533_v13 }
  0xfa   : > { %v434_v23 = vpop.f32.mrf.mxu2 }
  0xfb   : > { %v447_v24 = vadd.f32 %v434_v23, %v365_v59 }
  0xfc   : > { %v705_v6 = vpop.f32.mrf.mxu1 }
  0xfd   : > { %v534_v27 = vadd.f32 %v521_v3, %v447_v24  ;;  %v888_v43 = vpop.f32.mrf.mxu3  ;;  %v729_v46 = vadd.f32 %v705_v6, %v1581_v16 }
  0xfe   : > { %v970_v31 = vpop.f32.mrf.mxu0 }
  0xff   : > { %v1598_v14 = vadd.f32 %v643_v62, %v534_v27 }
 0x102   : > { %v436_v10 = vpop.f32.mrf.mxu2 }
 0x103   : > { %v448_v28 = vadd.f32 %v436_v10, %v367_v0 }
 0x104   : > { %v708_v33 = vpop.f32.mrf.mxu1 }
 0x105   : > { %v535_v29 = vadd.f32 %v523_v22, %v448_v28  ;;  %v890_v30 = vpop.f32.mrf.mxu3  ;;  %v730_v16 = vadd.f32 %v708_v33, %v1584_v45 }
 0x106   : > { %v973_v44 = vpop.f32.mrf.mxu0 }
 0x107   : > { %v1600_v32 = vadd.f32 %v645_v18, %v535_v29 }
 0x10a   : > { %v786_v19 = vpop.f32.mrf.mxu2 }
 0x10b   : > { %v811_v7 = vadd.f32 %v786_v19, %v728_v25 }
 0x10c   : > { %v710_v5 = vpop.f32.mrf.mxu1 }
 0x10d   : > { %v913_v35 = vadd.f32 %v888_v43, %v811_v7  ;;  %v893_v39 = vpop.f32.mrf.mxu3  ;;  %v731_v57 = vadd.f32 %v710_v5, %v1586_v51 }
 0x10e   : > { %v975_v36 = vpop.f32.mrf.mxu0 }
 0x10f   : > { %v993_v40 = vadd.f32 %v968_v26, %v913_v35 }
 0x111   : > { %v1007_v21 = vadd.f32 %v1606_v37, %v993_v40 }
 0x112   : > { %v788_v47 = vpop.f32.mrf.mxu2 }
 0x113   : > { %v1017_v48 = vpack.c.bf16 %v1007_v21, %v1007_v21  ;;  %v812_v34 = vadd.f32 %v788_v47, %v729_v46 }
 0x114   : > { %v713_v53 = vpop.f32.mrf.mxu1 }
 0x115   : > { %1028 = vst.msk [vmem:[%s1614_s16] sm:$0xf] %vm1027_vm7, %v1017_v48  ;;  %v914_v49 = vadd.f32 %v890_v30, %v812_v34  ;;  %v895_v52 = vpop.f32.mrf.mxu3  ;;  %v732_v2 = vadd.f32 %v713_v53, %v1588_v15 }
 0x116   : > { %v978_v62 = vpop.f32.mrf.mxu0 }
 0x117   : > { %v994_v50 = vadd.f32 %v970_v31, %v914_v49 }
 0x119   : > { %v1008_v11 = vadd.f32 %v1606_v37, %v994_v50 }
 0x11a   : > { %v791_v12 = vpop.f32.mrf.mxu2 }
 0x11b   : > { %v1018_v41 = vpack.c.bf16 %v1008_v11, %v1008_v11  ;;  %v813_v42 = vadd.f32 %v791_v12, %v730_v16 }
 0x11c   : > { %v715_v60 = vpop.f32.mrf.mxu1 }
 0x11d   : > { %1029 = vst.msk [vmem:[%s1614_s16 + $0x4] sm:$0xf] %vm1027_vm7, %v1018_v41  ;;  %v915_v54 = vadd.f32 %v893_v39, %v813_v42  ;;  %v898_v59 = vpop.f32.mrf.mxu3  ;;  %v733_v23 = vadd.f32 %v715_v60, %v1591_v61 }
 0x11e   : > { %v980_v55 = vpop.f32.mrf.mxu0 }
 0x11f   : > { %v995_v56 = vadd.f32 %v973_v44, %v915_v54 }
 0x121   : > { %v1009_v58 = vadd.f32 %v1606_v37, %v995_v56 }
 0x122   : > { %v793_v8 = vpop.f32.mrf.mxu2 }
 0x123   : > { %v1019_v45 = vpack.c.bf16 %v1009_v58, %v1009_v58  ;;  %v814_v9 = vadd.f32 %v793_v8, %v731_v57 }
 0x124   : > { %v718_v22 = vpop.f32.mrf.mxu1 }
 0x125   : > { %1030 = vst.msk [vmem:[%s1614_s16 + $0x8] sm:$0xf] %vm1027_vm7, %v1019_v45  ;;  %v916_v63 = vadd.f32 %v895_v52, %v814_v9  ;;  %v900_v18 = vpop.f32.mrf.mxu3  ;;  %v734_v29 = vadd.f32 %v718_v22, %v1594_v4 }
 0x126   : > { %v983_v28 = vpop.f32.mrf.mxu0 }
 0x127   : > { %v996_v1 = vadd.f32 %v975_v36, %v916_v63 }
 0x129   : > { %v1010_v0 = vadd.f32 %v1606_v37, %v996_v1 }
 0x12a   : > { %v796_v3 = vpop.f32.mrf.mxu2 }
 0x12b   : > { %v1020_v51 = vpack.c.bf16 %v1010_v0, %v1010_v0  ;;  %v815_v17 = vadd.f32 %v796_v3, %v732_v2 }
 0x12c   : > { %v720_v31 = vpop.f32.mrf.mxu1 }
 0x12d   : > { %1031 = vst.msk [vmem:[%s1614_s16 + $0xc] sm:$0xf] %vm1027_vm7, %v1020_v51  ;;  %v917_v20 = vadd.f32 %v898_v59, %v815_v17  ;;  %v903_v6 = vpop.f32.mrf.mxu3  ;;  %v735_v39 = vadd.f32 %v720_v31, %v1596_v38 }
 0x12e   : > { %v985_v44 = vpop.f32.mrf.mxu0 }
 0x12f   : > { %v997_v13 = vadd.f32 %v978_v62, %v917_v20 }
 0x131   : > { %v1011_v24 = vadd.f32 %v1606_v37, %v997_v13 }
 0x132   : > { %v798_v26 = vpop.f32.mrf.mxu2 }
 0x133   : > { %v1021_v15 = vpack.c.bf16 %v1011_v24, %v1011_v24  ;;  %v816_v27 = vadd.f32 %v798_v26, %v733_v23 }
 0x134   : > { %v723_v5 = vpop.f32.mrf.mxu1 }
 0x135   : > { %1032 = vst.msk [vmem:[%s1614_s16 + $0x10] sm:$0xf] %vm1027_vm7, %v1021_v15  ;;  %v918_v43 = vadd.f32 %v900_v18, %v816_v27  ;;  %v905_v35 = vpop.f32.mrf.mxu3  ;;  %v736_v34 = vadd.f32 %v723_v5, %v1598_v14 }
 0x136   : > { %v988_v11 = vpop.f32.mrf.mxu0 }
 0x137   : > { %v998_v10 = vadd.f32 %v980_v55, %v918_v43 }
 0x139   : > { %v1012_v30 = vadd.f32 %v1606_v37, %v998_v10 }
 0x13a   : > { %v801_v33 = vpop.f32.mrf.mxu2 }
 0x13b   : > { %v1022_v61 = vpack.c.bf16 %v1012_v30, %v1012_v30  ;;  %v817_v25 = vadd.f32 %v801_v33, %v734_v29 }
 0x13c   : > { %v725_v36 = vpop.f32.mrf.mxu1 }
 0x13d   : > { %1033 = vst.msk [vmem:[%s1614_s16 + $0x14] sm:$0xf] %vm1027_vm7, %v1022_v61  ;;  %v919_v19 = vadd.f32 %v903_v6, %v817_v25  ;;  %v908_v50 = vpop.f32.mrf.mxu3  ;;  %v737_v42 = vadd.f32 %v725_v36, %v1600_v32 }
 0x13e   : > { %v990_v8 = vpop.f32.mrf.mxu0 }
 0x13f   : > { %v999_v7 = vadd.f32 %v983_v28, %v919_v19 }
 0x141   : > { %v1013_v40 = vadd.f32 %v1606_v37, %v999_v7 }
 0x142   : > { %v803_v46 = vpop.f32.mrf.mxu2 }
 0x143   : > { %v1023_v4 = vpack.c.bf16 %v1013_v40, %v1013_v40  ;;  %v818_v21 = vadd.f32 %v803_v46, %v735_v39 }
 0x145   : > { %1034 = vst.msk [vmem:[%s1614_s16 + $0x18] sm:$0xf] %vm1027_vm7, %v1023_v4  ;;  %v920_v47 = vadd.f32 %v905_v35, %v818_v21  ;;  %v910_v57 = vpop.f32.mrf.mxu3 }
 0x147   : > { %v1000_v48 = vadd.f32 %v985_v44, %v920_v47 }
 0x149   : > { %v1014_v49 = vadd.f32 %v1606_v37, %v1000_v48 }
 0x14a   : > { %v806_v52 = vpop.f32.mrf.mxu2 }
 0x14b   : > { %v1024_v38 = vpack.c.bf16 %v1014_v49, %v1014_v49  ;;  %v819_v16 = vadd.f32 %v806_v52, %v736_v34 }
 0x14d   : > { %1035 = vst.msk [vmem:[%s1614_s16 + $0x1c] sm:$0xf] %vm1027_vm7, %v1024_v38  ;;  %v921_v12 = vadd.f32 %v908_v50, %v819_v16 }
 0x14f   : > { %v1001_v41 = vadd.f32 %v988_v11, %v921_v12 }
 0x151   : > { %v1015_v53 = vadd.f32 %v1606_v37, %v1001_v41 }
 0x152   : > { %v808_v54 = vpop.f32.mrf.mxu2 }
 0x153   : > { %v1025_v14 = vpack.c.bf16 %v1015_v53, %v1015_v53  ;;  %v820_v56 = vadd.f32 %v808_v54, %v737_v42 }
 0x155   : > { %1036 = vst.msk [vmem:[%s1614_s16 + $0x20] sm:$0xf] %vm1027_vm7, %v1025_v14  ;;  %v922_v58 = vadd.f32 %v910_v57, %v820_v56 }
 0x157   : > { %v1002_v59 = vadd.f32 %v990_v8, %v922_v58 }
 0x159   : > { %v1016_v45 = vadd.f32 %v1606_v37, %v1002_v59 }
 0x15b   : > { %v1026_v9 = vpack.c.bf16 %v1016_v45, %v1016_v45 }
 0x15d   : > { %1037 = vst.msk [vmem:[%s1614_s16 + $0x24] sm:$0xf] %vm1027_vm7, %v1026_v9 }
 0x15e PF: > { %s13_s12 = sadd.s32 1, %s1285_s12  }
 0x15f   : > { %p10_p4 = scmp.ge.s32.totalorder %s13_s12, 4  }
 0x161   :  { %12 = sbr.rel (!%p10_p4) target bundleno = 1 (0x1), region = 70 }

// kernel: vqvae2_forward.32
= control target key start
LH: loop header
LB: loop body
LE: loop exit
PB: predicated region body
PF: predicated region fallthrough
CT: control target
= control target key end

     0   :  { %s509_s15 = smov 0   ;;  %s562_s0 = inlined_call_operand.vmem [shape: bf16[2,64,8], index: 0, kind: input, shape index: {}]   ;;  %s563_s1 = inlined_call_operand.vmem [shape: bf16[1,8,32], index: 1, kind: input, shape index: {}]   ;;  %s564_s2 = inlined_call_operand.vmem [shape: f32[1,32], index: 2, kind: input, shape index: {}]   ;;  %s565_s3 = inlined_call_operand.vmem [shape: bf16[2,64,32], index: 3, kind: input, shape index: {}]   ;;  %s566_s4 = inlined_call_operand.vmem [shape: bf16[2,64,32], index: 4, kind: output, shape index: {}]  }
   0x1 LB: > { %s406_s16 = sadd.s32 4294967295, %s482_s15   ;;  %p410_p0 = scmp.ge.s32.totalorder %s482_s15, 1  ;;  %s482_s15 = sphi %s509_s15, %s14_s15  }
   0x2   : > { %p172_p1 = scmp.lt.s32.totalorder %s482_s15, 3 }
   0x4   : > { %p173_p2 = pnand %p410_p0, %p172_p1 }
   0x5   : > { %p203_p3 = scmp.lt.s32.totalorder (!%p173_p2), %s406_s16, 1 }
   0x6   : > { %176 = sbr.rel (%p173_p2) target bundleno = 170 (0xaa), region = 36 }
   0xb   : > { %v247_v0 = vld [vmem:[%s563_s1] sm:$0xf]  ;;  %vm265_vm0 = vcmask 1043456   ;;  %s568_s16 = smov (!%p203_p3, %s406_s16), 1  ;;  %vm252_vm1 = vcmask 64512   ;;  %vm330_vm2 = vcmask 257024  }
   0xc   : > { %v267_v1 = vsel %vm265_vm0, %v247_v0, 0  ;;  %s520_s19 = sshll.u32 %s568_s16, 5  ;;  %v475_v28 = vld [vmem:[%s564_s2] ss:$0 sm:$0xff] }
   0xd   : > { %276 = vmatpush.bf16.msra.mxu0 %v267_v1  ;;  %464 = vmatpush.bf16.msra.mxu1 %v267_v1  ;;  %s207_s22 = scalar_lea.vmem %s562_s0, %s520_s19  ;;  %s212_s25 = scalar_lea.vmem %s565_s3, %s520_s19 }
   0xe   : > { %465 = vmatpush.bf16.msra.mxu2 %v267_v1  ;;  %466 = vmatpush.bf16.msra.mxu3 %v267_v1  ;;  %v427_v2 = vld [vmem:[%s207_s22] sm:$0xff]   ;;  %v458_v3 = vld [vmem:[%s207_s22 + $0x8] sm:$0xff]   ;;  %v459_v4 = vld [vmem:[%s207_s22 + $0x10] sm:$0xff]   ;;  %s541_s30 = scalar_lea.vmem %s566_s4, %s520_s19 }
   0xf   : > { %v428_v5 = vunpack.c.l.bf16 %v427_v2  ;;  %v429_v6 = vunpack.c.h.bf16 %v427_v2  ;;  %v432_v7 = vunpack.c.l.bf16 %v458_v3  ;;  %v433_v8 = vunpack.c.h.bf16 %v458_v3  ;;  %v460_v9 = vld [vmem:[%s207_s22 + $0x18] sm:$0xff]   ;;  %v443_v26 = vld [vmem:[%s212_s25] sm:$0xff]   ;;  %v461_v27 = vld [vmem:[%s212_s25 + $0x8] sm:$0xff]  }
  0x10   : > { %v436_v10 = vunpack.c.l.bf16 %v459_v4  ;;  %v437_v11 = vunpack.c.h.bf16 %v459_v4  ;;  %v440_v12 = vunpack.c.l.bf16 %v460_v9  ;;  %v441_v13 = vunpack.c.h.bf16 %v460_v9  ;;  %v462_v37 = vld [vmem:[%s212_s25 + $0x10] sm:$0xff]   ;;  %v463_v38 = vld [vmem:[%s212_s25 + $0x18] sm:$0xff]  }
  0x11   : > { %v235_v14 = vmax.f32 %v428_v5, 0.0  ;;  %v236_v15 = vmax.f32 %v429_v6, 0.0  ;;  %v237_v16 = vmax.f32 %v432_v7, 0.0  ;;  %v238_v17 = vmax.f32 %v433_v8, 0.0 }
  0x12   : > { %v239_v18 = vmax.f32 %v436_v10, 0.0  ;;  %v240_v19 = vmax.f32 %v437_v11, 0.0  ;;  %v241_v20 = vmax.f32 %v440_v12, 0.0  ;;  %v242_v21 = vmax.f32 %v441_v13, 0.0 }
  0x13   : > { %v243_v22 = vpack.c.bf16 %v236_v15, %v235_v14  ;;  %v244_v23 = vpack.c.bf16 %v238_v17, %v237_v16  ;;  %v444_v29 = vunpack.c.l.bf16 %v443_v26  ;;  %v448_v30 = vunpack.c.l.bf16 %v461_v27 }
  0x14   : > { %v245_v24 = vpack.c.bf16 %v240_v19, %v239_v18  ;;  %v246_v25 = vpack.c.bf16 %v242_v21, %v241_v20  ;;  %v452_v41 = vunpack.c.l.bf16 %v462_v37  ;;  %v456_v42 = vunpack.c.l.bf16 %v463_v38 }
  0x15   : > { %417 = vmatmul.msk.bf16.vlgmr.msra.gmra.mxu0 %vm252_vm1, %v243_v22  ;;  %418 = vmatmul.msk.bf16.vlgmr.msra.gmra.mxu1 %vm252_vm1, %v244_v23  ;;  %v445_v45 = vunpack.c.h.bf16 %v443_v26  ;;  %v449_v46 = vunpack.c.h.bf16 %v461_v27  ;;  %v453_v61 = vunpack.c.h.bf16 %v462_v37  ;;  %v457_v62 = vunpack.c.h.bf16 %v463_v38 }
  0x16   : > { %419 = vmatmul.msk.bf16.vlgmr.msra.gmra.mxu2 %vm252_vm1, %v245_v24  ;;  %420 = vmatmul.msk.bf16.vlgmr.msra.gmra.mxu3 %vm252_vm1, %v246_v25 }
  0x92   : > { %v278_v31 = vpop.f32.mrf.mxu0  ;;  %v283_v32 = vpop.f32.mrf.mxu1 }
  0x93   : > { %v279_v33 = vadd.f32 %v475_v28, %v278_v31  ;;  %v284_v34 = vadd.f32 %v475_v28, %v283_v32 }
  0x95   : > { %v314_v35 = vadd.f32 %v444_v29, %v279_v33  ;;  %v316_v36 = vadd.f32 %v448_v30, %v284_v34 }
  0x97   : > { %v322_v39 = vpack.c.bf16 %v314_v35, %v314_v35  ;;  %v324_v40 = vpack.c.bf16 %v316_v36, %v316_v36 }
  0x99   : > { %331 = vst.msk [vmem:[%s541_s30] sm:$0xf] %vm330_vm2, %v322_v39  ;;  %v288_v43 = vpop.f32.mrf.mxu2  ;;  %v293_v44 = vpop.f32.mrf.mxu3 }
  0x9a   : > { %333 = vst.msk [vmem:[%s541_s30 + $0x8] sm:$0xf] %vm330_vm2, %v324_v40  ;;  %v289_v47 = vadd.f32 %v475_v28, %v288_v43  ;;  %v294_v48 = vadd.f32 %v475_v28, %v293_v44  ;;  %v280_v49 = vpop.f32.mrf.mxu0  ;;  %v285_v50 = vpop.f32.mrf.mxu1 }
  0x9b   : > { %v281_v51 = vadd.f32 %v475_v28, %v280_v49  ;;  %v286_v52 = vadd.f32 %v475_v28, %v285_v50 }
  0x9c   : > { %v318_v53 = vadd.f32 %v452_v41, %v289_v47  ;;  %v320_v54 = vadd.f32 %v456_v42, %v294_v48 }
  0x9d   : > { %v315_v55 = vadd.f32 %v445_v45, %v281_v51  ;;  %v317_v56 = vadd.f32 %v449_v46, %v286_v52 }
  0x9e   : > { %v326_v57 = vpack.c.bf16 %v318_v53, %v318_v53  ;;  %v328_v58 = vpack.c.bf16 %v320_v54, %v320_v54 }
  0x9f   : > { %v323_v59 = vpack.c.bf16 %v315_v55, %v315_v55  ;;  %v325_v60 = vpack.c.bf16 %v317_v56, %v317_v56 }
  0xa0   : > { %335 = vst.msk [vmem:[%s541_s30 + $0x10] sm:$0xf] %vm330_vm2, %v326_v57 }
  0xa1   : > { %337 = vst.msk [vmem:[%s541_s30 + $0x18] sm:$0xf] %vm330_vm2, %v328_v58  ;;  %v290_v63 = vpop.f32.mrf.mxu2  ;;  %v295_v0 = vpop.f32.mrf.mxu3 }
  0xa2   : > { %332 = vst.msk [vmem:[%s541_s30 + $0x4] sm:$0xf] %vm330_vm2, %v323_v59  ;;  %v291_v1 = vadd.f32 %v475_v28, %v290_v63  ;;  %v296_v2 = vadd.f32 %v475_v28, %v295_v0 }
  0xa3   : > { %334 = vst.msk [vmem:[%s541_s30 + $0xc] sm:$0xf] %vm330_vm2, %v325_v60 }
  0xa4   : > { %v319_v3 = vadd.f32 %v453_v61, %v291_v1  ;;  %v321_v4 = vadd.f32 %v457_v62, %v296_v2 }
  0xa6   : > { %v327_v5 = vpack.c.bf16 %v319_v3, %v319_v3  ;;  %v329_v6 = vpack.c.bf16 %v321_v4, %v321_v4 }
  0xa8   : > { %336 = vst.msk [vmem:[%s541_s30 + $0x14] sm:$0xf] %vm330_vm2, %v327_v5 }
  0xa9   : > { %338 = vst.msk [vmem:[%s541_s30 + $0x1c] sm:$0xf] %vm330_vm2, %v329_v6 }
  0xaa PF: > { %s14_s15 = sadd.s32 1, %s482_s15  }
  0xab   : > { %p11_p4 = scmp.ge.s32.totalorder %s14_s15, 4  }
  0xad   :  { %13 = sbr.rel (!%p11_p4) target bundleno = 1 (0x1), region = 69 }

// kernel: vqvae2_forward.31
= control target key start
LH: loop header
LB: loop body
LE: loop exit
PB: predicated region body
PF: predicated region fallthrough
CT: control target
= control target key end

     0   :  { %s1454_s12 = smov 0   ;;  %s1857_s0 = inlined_call_operand.vmem [shape: bf16[2,102,32], index: 0, kind: input, shape index: {}]   ;;  %s1858_s1 = inlined_call_operand.vmem [shape: bf16[9,32,8], index: 1, kind: input, shape index: {}]   ;;  %s1859_s2 = inlined_call_operand.vmem [shape: f32[1,8], index: 2, kind: input, shape index: {}]   ;;  %s1860_s3 = inlined_call_operand.vmem [shape: bf16[2,80,8], index: 3, kind: output, shape index: {}]  }
   0x1 LB: > { %s1204_s13 = sadd.s32 4294967295, %s1432_s12   ;;  %p1208_p0 = scmp.ge.s32.totalorder %s1432_s12, 1  ;;  %s1432_s12 = sphi %s1454_s12, %s13_s12  }
   0x2   : > { %p137_p1 = scmp.lt.s32.totalorder %s1432_s12, 3 }
   0x4   : > { %p138_p2 = pnand %p1208_p0, %p137_p1 }
   0x5   : > { %p161_p3 = scmp.lt.s32.totalorder (!%p138_p2), %s1204_s13, 1 }
   0x6   : > { %141 = sbr.rel (%p138_p2) target bundleno = 361 (0x169), region = 32 }
   0xb   : > { %v1365_v0 = vld [vmem:[%s1858_s1 + $0x18] sm:$0xff]  ;;  %v1364_v1 = vld [vmem:[%s1858_s1 + $0x10] sm:$0xff]  ;;  %s1862_s13 = smov (!%p161_p3, %s1204_s13), 1  ;;  %v1367_v2 = vld [vmem:[%s1858_s1 + $0x28] sm:$0xff]  ;;  %vm261_vm0 = vsmask.f32 7424 }
   0xc   : > { %1409 = vmatpush.bf16.msra.mxu1 %v1365_v0  ;;  %1410 = vmatpush.bf16.msra.mxu2 %v1365_v0  ;;  %s1415_s20 = smul.u32 52, %s1862_s13  ;;  %v1363_v3 = vld [vmem:[%s1858_s1 + $0x8] sm:$0xff]  ;;  %v1362_v13 = vld [vmem:[%s1858_s1] sm:$0xff]  ;;  %v1369_v19 = vld [vmem:[%s1858_s1 + $0x38] sm:$0xff]  ;;  %vm318_vm1 = vcmask 261120   ;;  %vm429_vm2 = vcmask 1046528  }
   0xd   : > { %1411 = vmatpush.bf16.msra.mxu3 %v1365_v0  ;;  %340 = vmatpush.bf16.msra.mxu0 %v1365_v0  ;;  %v1366_v18 = vld [vmem:[%s1858_s1 + $0x20] sm:$0xff]  ;;  %v1368_v27 = vld [vmem:[%s1858_s1 + $0x30] sm:$0xff]  ;;  %v1371_v41 = vld [vmem:[%s1858_s1 + $0x48] sm:$0xff]  ;;  %vm612_vm3 = vsmask.f32 6400  ;;  %vm742_vm4 = vcmask 1045504  }
   0xe   : > { %s1480_s25 = scalar_lea.vmem %s1857_s0, %s1415_s20  ;;  %v1370_v50 = vld [vmem:[%s1858_s1 + $0x40] sm:$0xff]  ;;  %vm921_vm5 = vsmask.f32 5376  ;;  %vm1031_vm6 = vcmask 1044480   ;;  %s1416_s4 = smul.u32 40, %s1862_s13  ;;  %vm1138_vm7 = vcmask 60416  }
   0xf   : > { %v1404_v4 = vld [vmem:[%s1480_s25 + $0x8] sm:$0xff]   ;;  %v1405_v5 = vld [vmem:[%s1480_s25 + $0x10] sm:$0xff]   ;;  %v1406_v6 = vld [vmem:[%s1480_s25 + $0x18] sm:$0xff]  }
  0x10   : > { %1412 = vmatpush.bf16.msra.mxu1 %v1364_v1  ;;  %1413 = vmatpush.bf16.msra.mxu2 %v1364_v1  ;;  %v1386_v7 = vunpack.c.l.bf16 %v1404_v4  ;;  %v1387_v8 = vunpack.c.h.bf16 %v1404_v4  ;;  %v1390_v9 = vunpack.c.l.bf16 %v1405_v5  ;;  %v1391_v10 = vunpack.c.h.bf16 %v1405_v5  ;;  %v1407_v11 = vld [vmem:[%s1480_s25 + $0x20] sm:$0xff]   ;;  %v1487_v12 = vld [vmem:[%s1480_s25 + $0x28] sm:$0xff]   ;;  %s1815_s7 = scalar_lea.vmem %s1860_s3, %s1416_s4 }
  0x11   : > { %1414 = vmatpush.bf16.msra.mxu3 %v1364_v1  ;;  %341 = vmatpush.bf16.msra.mxu0 %v1364_v1  ;;  %v1394_v14 = vunpack.c.l.bf16 %v1406_v6  ;;  %v1395_v15 = vunpack.c.h.bf16 %v1406_v6  ;;  %v1398_v16 = vunpack.c.l.bf16 %v1407_v11  ;;  %v1399_v17 = vunpack.c.h.bf16 %v1407_v11  ;;  %v1381_v36 = vld [vmem:[%s1480_s25] sm:$0xff]  }
  0x12   : > { %v200_v20 = vmax.f32 %v1386_v7, 0.0  ;;  %v201_v21 = vmax.f32 %v1387_v8, 0.0  ;;  %v202_v22 = vmax.f32 %v1390_v9, 0.0  ;;  %v203_v23 = vmax.f32 %v1391_v10, 0.0 }
  0x13   : > { %v204_v24 = vmax.f32 %v1394_v14, 0.0  ;;  %v205_v25 = vmax.f32 %v1395_v15, 0.0  ;;  %v1402_v26 = vunpack.c.l.bf16 %v1487_v12  ;;  %v206_v34 = vmax.f32 %v1398_v16, 0.0 }
  0x14   : > { %474 = vmatpush.bf16.msrb.mxu2 %v1367_v2  ;;  %396 = vmatpush.bf16.msrb.mxu1 %v1363_v3  ;;  %v213_v28 = vpack.c.bf16 %v200_v20, %v200_v20  ;;  %v214_v29 = vpack.c.bf16 %v201_v21, %v201_v21  ;;  %v215_v30 = vpack.c.bf16 %v202_v22, %v202_v22  ;;  %v207_v35 = vmax.f32 %v1399_v17, 0.0  ;;  %v1375_v17 = vld [vmem:[%s1858_s1 + $0x68] sm:$0xff]  ;;  %v1377_v22 = vld [vmem:[%s1858_s1 + $0x78] sm:$0xff] }
  0x15   : > { %569 = vmatpush.bf16.msrb.mxu3 %v1369_v19  ;;  %v216_v31 = vpack.c.bf16 %v203_v23, %v203_v23  ;;  %v217_v32 = vpack.c.bf16 %v204_v24, %v204_v24  ;;  %v218_v33 = vpack.c.bf16 %v205_v25, %v205_v25  ;;  %v208_v44 = vmax.f32 %v1402_v26, 0.0  ;;  %699 = vmatpush.bf16.msrb.mxu0 %v1371_v41 }
  0x16   : > { %v1503_v37 = vunpack.c.l.b16 %v213_v28  ;;  %v1505_v38 = vunpack.c.l.b16 %v214_v29  ;;  %v1507_v39 = vunpack.c.l.b16 %v215_v30  ;;  %v219_v45 = vpack.c.bf16 %v206_v34, %v206_v34 }
  0x17   : > { %v1509_v40 = vunpack.c.l.b16 %v216_v31  ;;  %v1514_v42 = vunpack.c.l.b16 %v217_v32  ;;  %v1516_v43 = vunpack.c.l.b16 %v218_v33  ;;  %v220_v48 = vpack.c.bf16 %v207_v35, %v207_v35  ;;  %v1379_v31 = vld [vmem:[%s1858_s1 + $0x88] sm:$0xff] }
  0x18   : > { %475 = vmatpush.bf16.msrb.mxu2 %v1366_v18  ;;  %397 = vmatpush.bf16.msrb.mxu1 %v1362_v13  ;;  %v1520_v46 = vpack.c.b16 %v1505_v38, %v1503_v37  ;;  %v1382_v49 = vunpack.c.l.bf16 %v1381_v36  ;;  %v221_v52 = vpack.c.bf16 %v208_v44, %v208_v44  ;;  %v1533_v53 = vunpack.c.l.b16 %v219_v45  ;;  %v1373_v18 = vld [vmem:[%s1858_s1 + $0x58] sm:$0xff] }
  0x19   : > { %570 = vmatpush.bf16.msrb.mxu3 %v1368_v27  ;;  %v1524_v47 = vpack.c.b16 %v1509_v40, %v1507_v39  ;;  %v1531_v51 = vpack.c.b16 %v1516_v43, %v1514_v42  ;;  %v1383_v54 = vunpack.c.h.bf16 %v1381_v36  ;;  %v1540_v60 = vunpack.c.l.b16 %v220_v48  ;;  %700 = vmatpush.bf16.msrb.mxu0 %v1370_v50 }
  0x1a   : > { %v270_v55 = vshll.u32 %v1520_v46, 16  ;;  %v274_v56 = vshrl.u32 %v1520_v46, 16  ;;  %v1542_v61 = vunpack.c.l.b16 %v221_v52  ;;  %v198_v5 = vmax.f32 %v1382_v49, 0.0 }
  0x1b   : > { %v278_v57 = vshll.u32 %v1524_v47, 16  ;;  %v282_v58 = vshrl.u32 %v1524_v47, 16  ;;  %v286_v59 = vshll.u32 %v1531_v51, 16  ;;  %v1552_v1 = vpack.c.b16 %v1540_v60, %v1533_v53 }
  0x1c   : > { %v272_v62 = vrot.slane %v270_v55, 1  ;;  %v1556_v2 = vpack.c.b16 %v1542_v61, %v1542_v61  ;;  %v199_v6 = vmax.f32 %v1383_v54, 0.0  ;;  %v211_v13 = vpack.c.bf16 %v198_v5, %v198_v5 }
  0x1d   : > { %v280_v63 = vrot.slane %v278_v57, 1  ;;  %v288_v0 = vrot.slane %v286_v59, 1  ;;  %v294_v7 = vshll.u32 %v1552_v1, 16  ;;  %v298_v8 = vshrl.u32 %v1552_v1, 16 }
  0x1e   : > { %v276_v3 = vor.u32 %v274_v56, %v272_v62  ;;  %v302_v9 = vshll.u32 %v1556_v2, 16  ;;  %v212_v14 = vpack.c.bf16 %v199_v6, %v199_v6  ;;  %v244_v19 = vunpack.c.l.b16 %v211_v13 }
  0x1f   : > { %v284_v4 = vor.u32 %v282_v58, %v280_v63  ;;  %v296_v15 = vrot.slane %v294_v7, 1  ;;  %v290_v25 = vshrl.u32 %v1531_v51, 16  ;;  %v1595_v33 = vpack.c.b16 %v1507_v39, %v1505_v38 }
  0x20   : > { %v281_v10 = vsel %vm261_vm0, %v276_v3, %v280_v63  ;;  %v304_v16 = vrot.slane %v302_v9, 1  ;;  %v245_v20 = vunpack.c.l.b16 %v212_v14 }
  0x21   : > { %v289_v11 = vsel %vm261_vm0, %v284_v4, %v288_v0  ;;  %1224 = vmatmul.msk.bf16.vlgmr.msra.gmra.mxu1 %vm318_vm1, %v281_v10  ;;  %v300_v21 = vor.u32 %v298_v8, %v296_v15  ;;  %v292_v29 = vor.u32 %v290_v25, %v288_v0  ;;  %v622_v44 = vshrl.u32 %v1595_v33, 16 }
  0x22   : > { %1225 = vmatmul.msk.bf16.vlgmr.msra.gmra.mxu2 %vm318_vm1, %v289_v11  ;;  %787 = vmatpush.bf16.msra.mxu1 %v1373_v18  ;;  %v255_v23 = vpack.c.b16 %v245_v20, %v244_v19  ;;  %v1591_v32 = vpack.c.b16 %v1503_v37, %v245_v20  ;;  %v625_v45 = vshll.u32 %v1595_v33, 16  ;;  %v526_v38 = vrot.slane %v1595_v33, 1 }
  0x23   : > { %878 = vmatpush.bf16.msra.mxu2 %v1375_v17  ;;  %v305_v24 = vsel %vm261_vm0, %v300_v21, %v304_v16  ;;  %v297_v35 = vsel %vm261_vm0, %v292_v29, %v296_v15  ;;  %v624_v49 = vrot.slane %v622_v44, 1  ;;  %v431_v0 = vrot.slane %v1520_v46, 1  ;;  %v1376_v15 = vld [vmem:[%s1858_s1 + $0x70] sm:$0xff] }
  0x24   : > { %1227 = vmatmul.msk.bf16.vlgmr.msra.gmra.mxu3 %vm318_vm1, %v305_v24  ;;  %v263_v26 = vshrl.u32 %v255_v23, 16  ;;  %v265_v27 = vshll.u32 %v255_v23, 16  ;;  %v614_v36 = vshrl.u32 %v1591_v32, 16  ;;  %v617_v41 = vshll.u32 %v1591_v32, 16  ;;  %v1372_v16 = vld [vmem:[%s1858_s1 + $0x50] sm:$0xff] }
  0x25   : > { %988 = vmatpush.bf16.msra.mxu3 %v1377_v22  ;;  %v525_v37 = vrot.slane %v1591_v32, 1  ;;  %v627_v50 = vrot.slane %v625_v45, 2  ;;  %v430_v63 = vrot.slane %v255_v23, 1  ;;  %v1614_v4 = vpack.c.b16 %v1514_v42, %v1509_v40  ;;  %v1374_v40 = vld [vmem:[%s1858_s1 + $0x60] sm:$0xff] }
  0x26   : > { %v267_v28 = vrot.slane %v265_v27, 1  ;;  %v616_v39 = vrot.slane %v614_v36, 1  ;;  %v619_v48 = vrot.slane %v617_v41, 2  ;;  %788 = vmatpush.bf16.msra.mxu1 %v1372_v16  ;;  %v433_v17 = vrot.slane %v1524_v47, 1 }
  0x27   : > { %v527_v52 = vsel %vm429_vm2, %v525_v37, %v526_v38  ;;  %v432_v5 = vsel %vm429_vm2, %v430_v63, %v431_v0  ;;  %v631_v6 = vshrl.u32 %v1614_v4, 16  ;;  %v634_v9 = vshll.u32 %v1614_v4, 16  ;;  %879 = vmatpush.bf16.msra.mxu2 %v1374_v40 }
  0x28   : > { %v268_v30 = vor.u32 %v267_v28, %v263_v26  ;;  %v620_v54 = vor.u32 %v619_v48, %v616_v39  ;;  %v528_v10 = vrot.slane %v1614_v4, 1  ;;  %v1639_v19 = vpack.c.b16 %v1533_v53, %v1516_v43  ;;  %v1378_v43 = vld [vmem:[%s1858_s1 + $0x80] sm:$0xff] }
  0x29   : > { %v633_v42 = vrot.slane %v631_v6, 1  ;;  %v636_v11 = vrot.slane %v634_v9, 2  ;;  %989 = vmatpush.bf16.msra.mxu3 %v1376_v15  ;;  %v434_v20 = vsel %vm429_vm2, %v431_v0, %v433_v17  ;;  %v437_v28 = vrot.slane %v1552_v1, 1 }
  0x2a   : > { %v273_v34 = vsel %vm261_vm0, %v268_v30, %v272_v62  ;;  %v628_v62 = vor.u32 %v627_v50, %v624_v49  ;;  %v529_v13 = vsel %vm429_vm2, %v526_v38, %v528_v10  ;;  %v640_v21 = vshrl.u32 %v1639_v19, 16 }
  0x2b   : > { %1223 = vmatmul.msk.bf16.vlgmr.msra.gmra.mxu0 %vm318_vm1, %v273_v34  ;;  %v637_v14 = vor.u32 %v636_v11, %v633_v42  ;;  %v643_v22 = vshll.u32 %v1639_v19, 16  ;;  %v439_v29 = vrot.slane %v1556_v2, 1  ;;  %v1662_v36 = vpack.c.b16 %v1542_v61, %v1540_v60 }
  0x2c   : > { %1076 = vmatpush.bf16.msra.mxu0 %v1379_v31  ;;  %v629_v3 = vsel %vm612_vm3, %v620_v54, %v628_v62  ;;  %v642_v53 = vrot.slane %v640_v21, 1  ;;  %v435_v31 = vrot.slane %v1531_v51, 1  ;;  %v926_v41 = vrot.slane %v278_v57, 3 }
  0x2d   : > { %v638_v18 = vsel %vm612_vm3, %v628_v62, %v637_v14  ;;  %v645_v24 = vrot.slane %v643_v22, 2  ;;  %v440_v30 = vsel %vm429_vm2, %v437_v28, %v439_v29  ;;  %v925_v44 = vrot.slane %v282_v58, 2 }
  0x2e   : > { %v436_v2 = vsel %vm429_vm2, %v433_v17, %v435_v31  ;;  %v649_v45 = vshrl.u32 %v1662_v36, 16  ;;  %v652_v37 = vshll.u32 %v1662_v36, 16  ;;  %v744_v38 = vrot.slane %v1595_v33, 2 }
  0x2f   : > { %v646_v27 = vor.u32 %v645_v24, %v642_v53  ;;  %v922_v60 = vrot.slane %v274_v56, 2  ;;  %v532_v57 = vrot.slane %v1662_v36, 1  ;;  %v923_v48 = vrot.slane %v270_v55, 3  ;;  %v184_v53 = vld [vmem:[%s1480_s25 + $0x30] sm:$0x7] }
  0x30   : > { %1077 = vmatpush.bf16.msra.mxu0 %v1378_v43  ;;  %v651_v49 = vrot.slane %v649_v45, 1  ;;  %v654_v33 = vrot.slane %v652_v37, 2  ;;  %v746_v63 = vrot.slane %v1614_v4, 2  ;;  %v438_v6 = vsel %vm429_vm2, %v435_v31, %v437_v28 }
  0x31   : > { %1236 = vmatmul.msk.bf16.vlgmr.msrb.gmra.mxu1 %vm318_vm1, %v255_v23  ;;  %v530_v23 = vrot.slane %v1639_v19, 1  ;;  %v647_v34 = vsel %vm612_vm3, %v637_v14, %v646_v27  ;;  %v1032_v15 = vrot.slane %v1520_v46, 3  ;;  %v1033_v16 = vrot.slane %v1524_v47, 3 }
  0x32   : > { %1226 = vmatmul.msk.bf16.gmra.mxu2 %vm318_vm1, %v297_v35  ;;  %v1403_v35 = vunpack.c.h.bf16 %v1487_v12  ;;  %v743_v12 = vrot.slane %v1591_v32, 2  ;;  %v927_v32 = vor.u32 %v926_v41, %v925_v44  ;;  %v655_v62 = vor.u32 %v654_v33, %v651_v49 }
  0x33   : > { %v531_v26 = vsel %vm429_vm2, %v528_v10, %v530_v23  ;;  %v533_v56 = vsel %vm429_vm2, %v530_v23, %v532_v57  ;;  %v834_v17 = vrot.slane %v1520_v46, 2  ;;  %v929_v21 = vrot.slane %v290_v25, 2 }
  0x34   : > { %1270 = vmatmul.msk.bf16.vlgmr.msrb.gmra.mxu3 %vm318_vm1, %v527_v52  ;;  %v209_v39 = vmax.f32 %v1403_v35, 0.0  ;;  %v745_v58 = vsel %vm742_vm4, %v743_v12, %v744_v38  ;;  %v924_v52 = vor.u32 %v923_v48, %v922_v60  ;;  %v656_v55 = vsel %vm612_vm3, %v646_v27, %v655_v62 }
  0x35   : > { %v930_v22 = vrot.slane %v286_v59, 3  ;;  %v748_v25 = vrot.slane %v1639_v19, 2  ;;  %v837_v59 = vrot.slane %v1531_v51, 2  ;;  %v933_v27 = vrot.slane %v298_v8, 2 }
  0x36   : > { %v222_v50 = vpack.c.bf16 %v209_v39, %v209_v39  ;;  %v928_v54 = vsel %vm921_vm5, %v924_v52, %v927_v32  ;;  %v934_v28 = vrot.slane %v294_v7, 3 }
  0x37   : > { %v931_v43 = vor.u32 %v930_v22, %v929_v21  ;;  %v749_v19 = vsel %vm742_vm4, %v746_v63, %v748_v25 }
  0x38   : > { %v518_v0 = vunpack.c.l.b16 %v222_v50  ;;  %v935_v35 = vor.u32 %v934_v28, %v933_v27  ;;  %v839_v50 = vrot.slane %v1552_v1, 2 }
  0x3a   : > { %v1731_v29 = vpack.c.b16 %v518_v0, %v1542_v61  ;;  %v936_v7 = vsel %vm921_vm5, %v931_v43, %v935_v35 }
  0x3b   : > { %1287 = vmatmul.msk.bf16.vlgmr.msrb.gmra.mxu0 %vm318_vm1, %v629_v3  ;;  %v747_v3 = vsel %vm742_vm4, %v744_v38, %v746_v63 }
  0x3c   : > { %v938_v41 = vshrl.u32 %v1731_v29, 16  ;;  %v941_v8 = vshll.u32 %v1731_v29, 16 }
  0x3e   : > { %v940_v45 = vrot.slane %v938_v41, 2  ;;  %v943_v37 = vrot.slane %v941_v8, 3 }
  0x40   : > { %v944_v48 = vor.u32 %v943_v37, %v940_v45 }
  0x41   : > { %1237 = vmatmul.msk.bf16.gmra.mxu1 %vm318_vm1, %v1520_v46  ;;  %v932_v46 = vsel %vm921_vm5, %v927_v32, %v931_v43 }
  0x42   : > { %1253 = vmatmul.msk.bf16.vlgmr.msrb.gmra.mxu2 %vm318_vm1, %v432_v5  ;;  %v1689_v5 = vpack.c.b16 %v518_v0, %v518_v0 }
  0x44   : > { %1271 = vmatmul.msk.bf16.gmra.mxu3 %vm318_vm1, %v529_v13  ;;  %v658_v9 = vshrl.u32 %v1689_v5, 16  ;;  %v661_v10 = vshll.u32 %v1689_v5, 16  ;;  %v534_v40 = vrot.slane %v1689_v5, 1 }
  0x46   : > { %v660_v4 = vrot.slane %v658_v9, 1  ;;  %v663_v42 = vrot.slane %v661_v10, 2  ;;  %v535_v11 = vsel %vm429_vm2, %v532_v57, %v534_v40  ;;  %v1037_v57 = vrot.slane %v1552_v1, 3 }
  0x47   : > { %v945_v40 = vsel %vm921_vm5, %v935_v35, %v944_v48 }
  0x48   : > { %v664_v13 = vor.u32 %v663_v42, %v660_v4 }
  0x4a   : > { %v665_v14 = vsel %vm612_vm3, %v655_v62, %v664_v13 }
  0x4b   : > { %1288 = vmatmul.msk.bf16.gmra.mxu0 %vm318_vm1, %v638_v18  ;;  %v835_v18 = vrot.slane %v1524_v47, 2 }
  0x4d   : > { %v836_v23 = vsel %vm742_vm4, %v834_v17, %v835_v18 }
  0x51   : > { %1238 = vmatmul.msk.bf16.gmra.mxu1 %vm318_vm1, %v1524_v47  ;;  %v1035_v47 = vrot.slane %v1531_v51, 3 }
  0x52   : > { %1254 = vmatmul.msk.bf16.gmra.mxu2 %vm318_vm1, %v434_v20  ;;  %v1034_v20 = vsel %vm1031_vm6, %v1032_v15, %v1033_v16  ;;  %v752_v15 = vrot.slane %v1689_v5, 2 }
  0x53   : > { %v1036_v24 = vsel %vm1031_vm6, %v1033_v16, %v1035_v47  ;;  %v1038_v52 = vsel %vm1031_vm6, %v1035_v47, %v1037_v57  ;;  %v841_v16 = vrot.slane %v1731_v29, 2 }
  0x54   : > { %1272 = vmatmul.msk.bf16.gmra.mxu3 %vm318_vm1, %v531_v26  ;;  %v197_v26 = vunpack.c.l.bf16 %v184_v53 }
  0x55   : > { %v842_v22 = vsel %vm742_vm4, %v839_v50, %v841_v16 }
  0x5b   : > { %1289 = vmatmul.msk.bf16.gmra.mxu0 %vm318_vm1, %v647_v34 }
  0x61   : > { %1239 = vmatmul.msk.bf16.gmra.mxu1 %vm318_vm1, %v1531_v51  ;;  %v838_v51 = vsel %vm742_vm4, %v835_v18, %v837_v59 }
  0x62   : > { %1255 = vmatmul.msk.bf16.gmra.mxu2 %vm318_vm1, %v436_v2 }
  0x64   : > { %1273 = vmatmul.msk.bf16.gmra.mxu3 %vm318_vm1, %v533_v56  ;;  %v750_v56 = vrot.slane %v1662_v36, 2 }
  0x66   : > { %v751_v0 = vsel %vm742_vm4, %v748_v25, %v750_v56  ;;  %v753_v21 = vsel %vm742_vm4, %v750_v56, %v752_v15 }
  0x6b   : > { %1290 = vmatmul.msk.bf16.gmra.mxu0 %vm318_vm1, %v656_v55 }
  0x71   : > { %1240 = vmatmul.msk.bf16.gmra.mxu1 %vm318_vm1, %v1552_v1 }
  0x72   : > { %1256 = vmatmul.msk.bf16.gmra.mxu2 %vm318_vm1, %v438_v6  ;;  %v1039_v6 = vrot.slane %v1731_v29, 3 }
  0x74   : > { %1274 = vmatmul.msk.bf16.gmra.mxu3 %vm318_vm1, %v535_v11  ;;  %v1040_v17 = vsel %vm1031_vm6, %v1037_v57, %v1039_v6 }
  0x7b   : > { %1291 = vmatmul.msk.bf16.gmra.mxu0 %vm318_vm1, %v665_v14 }
  0x81   : > { %1304 = vmatmul.msk.bf16.vlgmr.msra.gmra.mxu1 %vm318_vm1, %v745_v58 }
  0x82   : > { %1257 = vmatmul.msk.bf16.gmra.mxu2 %vm318_vm1, %v440_v30  ;;  %v210_v30 = vmax.f32 %v197_v26, 0.0 }
  0x84   : > { %1338 = vmatmul.msk.bf16.vlgmr.msra.gmra.mxu3 %vm318_vm1, %v928_v54  ;;  %v223_v34 = vpack.c.bf16 %v210_v30, %v210_v30 }
  0x86   : > { %v831_v44 = vunpack.c.l.b16 %v223_v34 }
  0x88   : > { %v1740_v61 = vpack.c.b16 %v831_v44, %v831_v44 }
  0x8a   : > { %v947_v12 = vshrl.u32 %v1740_v61, 16  ;;  %v950_v38 = vshll.u32 %v1740_v61, 16  ;;  %v1041_v9 = vrot.slane %v1740_v61, 3  ;;  %v843_v28 = vrot.slane %v1740_v61, 2 }
  0x8b   : > { %1355 = vmatmul.msk.bf16.vlgmr.msra.gmra.mxu0 %vm318_vm1, %v1034_v20 }
  0x8c   : > { %v949_v39 = vrot.slane %v947_v12, 2  ;;  %v952_v58 = vrot.slane %v950_v38, 3  ;;  %v1042_v10 = vsel %vm1031_vm6, %v1039_v6, %v1041_v9 }
  0x8e   : > { %v953_v32 = vor.u32 %v952_v58, %v949_v39 }
  0x90   : > { %v954_v54 = vsel %vm921_vm5, %v944_v48, %v953_v32 }
  0x91   : > { %1305 = vmatmul.msk.bf16.gmra.mxu1 %vm318_vm1, %v747_v3  ;;  %v840_v3 = vsel %vm742_vm4, %v837_v59, %v839_v50 }
  0x92   : > { %1321 = vmatmul.msk.bf16.vlgmr.msra.gmra.mxu2 %vm318_vm1, %v836_v23 }
  0x94   : > { %1339 = vmatmul.msk.bf16.gmra.mxu3 %vm318_vm1, %v932_v46 }
  0x9b   : > { %1356 = vmatmul.msk.bf16.gmra.mxu0 %vm318_vm1, %v1036_v24 }
  0x9e   : > { %v348_v31 = vpop.f32.mrf.mxu1 }
  0xa1   : > { %1306 = vmatmul.msk.bf16.gmra.mxu1 %vm318_vm1, %v749_v19  ;;  %v844_v19 = vsel %vm742_vm4, %v841_v16, %v843_v28 }
  0xa2   : > { %1322 = vmatmul.msk.bf16.gmra.mxu2 %vm318_vm1, %v838_v51 }
  0xa4   : > { %1340 = vmatmul.msk.bf16.gmra.mxu3 %vm318_vm1, %v936_v7 }
  0xa5   : > { %v1743_v2 = vpop.f32.mrf.mxu2 }
  0xa6   : > { %v350_v60 = vpop.f32.mrf.mxu1 }
  0xa7   : > { %v1749_v49 = vpop.f32.mrf.mxu3 }
  0xa8   : > { %v343_v33 = vpop.f32.mrf.mxu0 }
  0xab   : > { %1357 = vmatmul.msk.bf16.gmra.mxu0 %vm318_vm1, %v1038_v52 }
  0xad   : > { %v355_v62 = vpop.f32.mrf.mxu2 }
  0xae   : > { %v399_v63 = vpop.f32.mrf.mxu1 }
  0xaf   : > { %v400_v55 = vadd.f32 %v399_v63, %v343_v33  ;;  %v1762_v1 = vpop.f32.mrf.mxu3 }
  0xb0   : > { %v345_v36 = vpop.f32.mrf.mxu0 }
  0xb1   : > { %1307 = vmatmul.msk.bf16.gmra.mxu1 %vm318_vm1, %v751_v0 }
  0xb2   : > { %1323 = vmatmul.msk.bf16.gmra.mxu2 %vm318_vm1, %v840_v3 }
  0xb4   : > { %1341 = vmatmul.msk.bf16.gmra.mxu3 %vm318_vm1, %v945_v40 }
  0xb5   : > { %v358_v4 = vpop.f32.mrf.mxu2 }
  0xb6   : > { %v401_v42 = vpop.f32.mrf.mxu1 }
  0xb7   : > { %v402_v11 = vadd.f32 %v401_v42, %v345_v36  ;;  %v572_v13 = vpop.f32.mrf.mxu3 }
  0xb8   : > { %v702_v14 = vpop.f32.mrf.mxu0 }
  0xbb   : > { %1358 = vmatmul.msk.bf16.gmra.mxu0 %vm318_vm1, %v1040_v17 }
  0xbd   : > { %v360_v18 = vpop.f32.mrf.mxu2 }
  0xbe   : > { %v404_v20 = vpop.f32.mrf.mxu1 }
  0xbf   : > { %v405_v23 = vadd.f32 %v404_v20, %v348_v31  ;;  %v574_v43 = vpop.f32.mrf.mxu3 }
  0xc0   : > { %v704_v46 = vpop.f32.mrf.mxu0 }
  0xc1   : > { %1308 = vmatmul.msk.bf16.gmra.mxu1 %vm318_vm1, %v753_v21 }
  0xc2   : > { %1324 = vmatmul.msk.bf16.gmra.mxu2 %vm318_vm1, %v842_v22 }
  0xc4   : > { %1342 = vmatmul.msk.bf16.gmra.mxu3 %vm318_vm1, %v954_v54 }
  0xc5   : > { %v477_v5 = vpop.f32.mrf.mxu2 }
  0xc6   : > { %v502_v47 = vadd.f32 %v477_v5, %v400_v55  ;;  %v406_v53 = vpop.f32.mrf.mxu1 }
  0xc7   : > { %v407_v59 = vadd.f32 %v406_v53, %v350_v60  ;;  %v577_v24 = vpop.f32.mrf.mxu3 }
  0xc8   : > { %v597_v25 = vadd.f32 %v572_v13, %v502_v47  ;;  %v707_v27 = vpop.f32.mrf.mxu0 }
  0xca   : > { %v1776_v26 = vadd.f32 %v702_v14, %v597_v25 }
  0xcb   : > { %1359 = vmatmul.msk.bf16.gmra.mxu0 %vm318_vm1, %v1042_v10 }
  0xcd   : > { %v479_v29 = vpop.f32.mrf.mxu2 }
  0xce   : > { %v503_v30 = vadd.f32 %v479_v29, %v402_v11  ;;  %v409_v31 = vpop.f32.mrf.mxu1 }
  0xcf   : > { %v410_v34 = vadd.f32 %v409_v31, %v1743_v2  ;;  %v579_v35 = vpop.f32.mrf.mxu3 }
  0xd0   : > { %v598_v51 = vadd.f32 %v574_v43, %v503_v30  ;;  %v709_v8 = vpop.f32.mrf.mxu0 }
  0xd2   : > { %1325 = vmatmul.msk.bf16.gmra.mxu2 %vm318_vm1, %v844_v19  ;;  %v1783_v41 = vadd.f32 %v704_v46, %v598_v51 }
  0xd5   : > { %v482_v44 = vpop.f32.mrf.mxu2 }
  0xd6   : > { %v504_v7 = vadd.f32 %v482_v44, %v405_v23  ;;  %v411_v45 = vpop.f32.mrf.mxu1 }
  0xd7   : > { %v412_v37 = vadd.f32 %v411_v45, %v355_v62  ;;  %v582_v12 = vpop.f32.mrf.mxu3 }
  0xd8   : > { %v599_v61 = vadd.f32 %v577_v24, %v504_v7  ;;  %v712_v60 = vpop.f32.mrf.mxu0 }
  0xda   : > { %v1785_v38 = vadd.f32 %v707_v27, %v599_v61  ;;  %v1807_v61 = vld [vmem:[%s1859_s2] ss:$0 sm:$0xff] }
  0xdd   : > { %v484_v57 = vpop.f32.mrf.mxu2 }
  0xde   : > { %v505_v39 = vadd.f32 %v484_v57, %v407_v59  ;;  %v414_v58 = vpop.f32.mrf.mxu1 }
  0xdf   : > { %v415_v2 = vadd.f32 %v414_v58, %v358_v4  ;;  %v584_v32 = vpop.f32.mrf.mxu3 }
  0xe0   : > { %v600_v48 = vadd.f32 %v579_v35, %v505_v39  ;;  %v714_v56 = vpop.f32.mrf.mxu0 }
  0xe2   : > { %v1787_v33 = vadd.f32 %v709_v8, %v600_v48 }
  0xe5   : > { %v487_v50 = vpop.f32.mrf.mxu2 }
  0xe6   : > { %v506_v52 = vadd.f32 %v487_v50, %v410_v34  ;;  %v416_v54 = vpop.f32.mrf.mxu1 }
  0xe7   : > { %v417_v0 = vadd.f32 %v416_v54, %v360_v18  ;;  %v587_v3 = vpop.f32.mrf.mxu3 }
  0xe8   : > { %v601_v63 = vadd.f32 %v582_v12, %v506_v52  ;;  %v717_v55 = vpop.f32.mrf.mxu0 }
  0xea   : > { %v1789_v62 = vadd.f32 %v712_v60, %v601_v63 }
  0xed   : > { %v489_v6 = vpop.f32.mrf.mxu2 }
  0xee   : > { %v507_v9 = vadd.f32 %v489_v6, %v412_v37  ;;  %v419_v36 = vpop.f32.mrf.mxu1 }
  0xef   : > { %v420_v40 = vadd.f32 %v419_v36, %v1749_v49  ;;  %v589_v4 = vpop.f32.mrf.mxu3 }
  0xf0   : > { %v602_v10 = vadd.f32 %v584_v32, %v507_v9  ;;  %v719_v11 = vpop.f32.mrf.mxu0 }
  0xf2   : > { %v1792_v42 = vadd.f32 %v714_v56, %v602_v10 }
  0xf5   : > { %v492_v13 = vpop.f32.mrf.mxu2 }
  0xf6   : > { %v508_v14 = vadd.f32 %v492_v13, %v415_v2  ;;  %v421_v15 = vpop.f32.mrf.mxu1 }
  0xf7   : > { %v422_v17 = vadd.f32 %v421_v15, %v1762_v1  ;;  %v592_v18 = vpop.f32.mrf.mxu3 }
  0xf8   : > { %v603_v16 = vadd.f32 %v587_v3, %v508_v14  ;;  %v722_v21 = vpop.f32.mrf.mxu0 }
  0xfa   : > { %v1795_v20 = vadd.f32 %v717_v55, %v603_v16 }
  0xfd   : > { %v494_v22 = vpop.f32.mrf.mxu2 }
  0xfe   : > { %v509_v23 = vadd.f32 %v494_v22, %v417_v0  ;;  %v790_v43 = vpop.f32.mrf.mxu1 }
  0xff   : > { %v594_v5 = vpop.f32.mrf.mxu3  ;;  %v815_v8 = vadd.f32 %v790_v43, %v1776_v26 }
 0x100   : > { %v604_v46 = vadd.f32 %v589_v4, %v509_v23  ;;  %v724_v47 = vpop.f32.mrf.mxu0 }
 0x102   : > { %v1797_v49 = vadd.f32 %v719_v11, %v604_v46 }
 0x105   : > { %v497_v53 = vpop.f32.mrf.mxu2 }
 0x106   : > { %v510_v25 = vadd.f32 %v497_v53, %v420_v40  ;;  %v792_v24 = vpop.f32.mrf.mxu1 }
 0x107   : > { %v991_v27 = vpop.f32.mrf.mxu3  ;;  %v816_v57 = vadd.f32 %v792_v24, %v1783_v41 }
 0x108   : > { %v605_v59 = vadd.f32 %v592_v18, %v510_v25  ;;  %v1079_v1 = vpop.f32.mrf.mxu0 }
 0x10a   : > { %v1799_v28 = vadd.f32 %v722_v21, %v605_v59 }
 0x10d   : > { %v499_v29 = vpop.f32.mrf.mxu2 }
 0x10e   : > { %v511_v30 = vadd.f32 %v499_v29, %v422_v17  ;;  %v795_v34 = vpop.f32.mrf.mxu1 }
 0x10f   : > { %v993_v19 = vpop.f32.mrf.mxu3  ;;  %v817_v41 = vadd.f32 %v795_v34, %v1785_v38 }
 0x110   : > { %v606_v31 = vadd.f32 %v594_v5, %v511_v30  ;;  %v1081_v35 = vpop.f32.mrf.mxu0 }
 0x112   : > { %v1801_v51 = vadd.f32 %v724_v47, %v606_v31 }
 0x115   : > { %v881_v44 = vpop.f32.mrf.mxu2 }
 0x116   : > { %v906_v7 = vadd.f32 %v881_v44, %v815_v8  ;;  %v797_v26 = vpop.f32.mrf.mxu1 }
 0x117   : > { %v996_v12 = vpop.f32.mrf.mxu3  ;;  %v818_v36 = vadd.f32 %v797_v26, %v1787_v33 }
 0x118   : > { %v1016_v45 = vadd.f32 %v991_v27, %v906_v7  ;;  %v1084_v60 = vpop.f32.mrf.mxu0 }
 0x11a   : > { %v1104_v37 = vadd.f32 %v1079_v1, %v1016_v45 }
 0x11c   : > { %v1118_v39 = vadd.f32 %v1807_v61, %v1104_v37 }
 0x11d   : > { %v883_v58 = vpop.f32.mrf.mxu2 }
 0x11e   : > { %v1128_v48 = vpack.c.bf16 %v1118_v39, %v1118_v39  ;;  %v907_v2 = vadd.f32 %v883_v58, %v816_v57  ;;  %v800_v55 = vpop.f32.mrf.mxu1 }
 0x11f   : > { %v998_v50 = vpop.f32.mrf.mxu3  ;;  %v819_v17 = vadd.f32 %v800_v55, %v1789_v62 }
 0x120   : > { %1139 = vst.msk [vmem:[%s1815_s7] sm:$0xf] %vm1138_vm7, %v1128_v48  ;;  %v1017_v32 = vadd.f32 %v993_v19, %v907_v2  ;;  %v1086_v63 = vpop.f32.mrf.mxu0 }
 0x122   : > { %v1105_v56 = vadd.f32 %v1081_v35, %v1017_v32 }
 0x124   : > { %v1119_v52 = vadd.f32 %v1807_v61, %v1105_v56 }
 0x125   : > { %v886_v54 = vpop.f32.mrf.mxu2 }
 0x126   : > { %v1129_v0 = vpack.c.bf16 %v1119_v52, %v1119_v52  ;;  %v908_v3 = vadd.f32 %v886_v54, %v817_v41  ;;  %v802_v15 = vpop.f32.mrf.mxu1 }
 0x127   : > { %v1001_v4 = vpop.f32.mrf.mxu3  ;;  %v820_v53 = vadd.f32 %v802_v15, %v1792_v42 }
 0x128   : > { %1140 = vst.msk [vmem:[%s1815_s7 + $0x4] sm:$0xf] %vm1138_vm7, %v1129_v0  ;;  %v1018_v6 = vadd.f32 %v996_v12, %v908_v3  ;;  %v1089_v13 = vpop.f32.mrf.mxu0 }
 0x12a   : > { %v1106_v9 = vadd.f32 %v1084_v60, %v1018_v6 }
 0x12c   : > { %v1120_v10 = vadd.f32 %v1807_v61, %v1106_v9 }
 0x12d   : > { %v888_v40 = vpop.f32.mrf.mxu2 }
 0x12e   : > { %v1130_v38 = vpack.c.bf16 %v1120_v10, %v1120_v10  ;;  %v909_v11 = vadd.f32 %v888_v40, %v818_v36  ;;  %v805_v47 = vpop.f32.mrf.mxu1 }
 0x12f   : > { %v1003_v23 = vpop.f32.mrf.mxu3  ;;  %v821_v31 = vadd.f32 %v805_v47, %v1795_v20 }
 0x130   : > { %1141 = vst.msk [vmem:[%s1815_s7 + $0x8] sm:$0xf] %vm1138_vm7, %v1130_v38  ;;  %v1019_v14 = vadd.f32 %v998_v50, %v909_v11  ;;  %v1091_v46 = vpop.f32.mrf.mxu0 }
 0x132   : > { %v1107_v16 = vadd.f32 %v1086_v63, %v1019_v14 }
 0x134   : > { %v1121_v18 = vadd.f32 %v1807_v61, %v1107_v16 }
 0x135   : > { %v891_v21 = vpop.f32.mrf.mxu2 }
 0x136   : > { %v1131_v33 = vpack.c.bf16 %v1121_v18, %v1121_v18  ;;  %v910_v22 = vadd.f32 %v891_v21, %v819_v17  ;;  %v807_v34 = vpop.f32.mrf.mxu1 }
 0x137   : > { %v1006_v1 = vpop.f32.mrf.mxu3  ;;  %v822_v37 = vadd.f32 %v807_v34, %v1797_v49 }
 0x138   : > { %1142 = vst.msk [vmem:[%s1815_s7 + $0xc] sm:$0xf] %vm1138_vm7, %v1131_v33  ;;  %v1020_v43 = vadd.f32 %v1001_v4, %v910_v22  ;;  %v1094_v30 = vpop.f32.mrf.mxu0 }
 0x13a   : > { %v1108_v5 = vadd.f32 %v1089_v13, %v1020_v43 }
 0x13c   : > { %v1122_v25 = vadd.f32 %v1807_v61, %v1108_v5 }
 0x13d   : > { %v893_v59 = vpop.f32.mrf.mxu2 }
 0x13e   : > { %v1132_v62 = vpack.c.bf16 %v1122_v25, %v1122_v25  ;;  %v911_v24 = vadd.f32 %v893_v59, %v820_v53  ;;  %v810_v26 = vpop.f32.mrf.mxu1 }
 0x13f   : > { %v1008_v45 = vpop.f32.mrf.mxu3  ;;  %v823_v2 = vadd.f32 %v810_v26, %v1799_v28 }
 0x140   : > { %1143 = vst.msk [vmem:[%s1815_s7 + $0x10] sm:$0xf] %vm1138_vm7, %v1132_v62  ;;  %v1021_v27 = vadd.f32 %v1003_v23, %v911_v24  ;;  %v1096_v60 = vpop.f32.mrf.mxu0 }
 0x142   : > { %v1109_v29 = vadd.f32 %v1091_v46, %v1021_v27 }
 0x144   : > { %v1123_v19 = vadd.f32 %v1807_v61, %v1109_v29 }
 0x145   : > { %v896_v35 = vpop.f32.mrf.mxu2 }
 0x146   : > { %v1133_v42 = vpack.c.bf16 %v1123_v19, %v1123_v19  ;;  %v912_v8 = vadd.f32 %v896_v35, %v821_v31  ;;  %v812_v63 = vpop.f32.mrf.mxu1 }
 0x147   : > { %v1011_v56 = vpop.f32.mrf.mxu3  ;;  %v824_v3 = vadd.f32 %v812_v63, %v1801_v51 }
 0x148   : > { %1144 = vst.msk [vmem:[%s1815_s7 + $0x14] sm:$0xf] %vm1138_vm7, %v1133_v42  ;;  %v1022_v44 = vadd.f32 %v1006_v1, %v912_v8  ;;  %v1099_v52 = vpop.f32.mrf.mxu0 }
 0x14a   : > { %v1110_v7 = vadd.f32 %v1094_v30, %v1022_v44 }
 0x14c   : > { %v1124_v12 = vadd.f32 %v1807_v61, %v1110_v7 }
 0x14d   : > { %v898_v57 = vpop.f32.mrf.mxu2 }
 0x14e   : > { %v1134_v20 = vpack.c.bf16 %v1124_v12, %v1124_v12  ;;  %v913_v39 = vadd.f32 %v898_v57, %v822_v37 }
 0x14f   : > { %v1013_v36 = vpop.f32.mrf.mxu3 }
 0x150   : > { %1145 = vst.msk [vmem:[%s1815_s7 + $0x18] sm:$0xf] %vm1138_vm7, %v1134_v20  ;;  %v1023_v58 = vadd.f32 %v1008_v45, %v913_v39  ;;  %v1101_v40 = vpop.f32.mrf.mxu0 }
 0x152   : > { %v1111_v48 = vadd.f32 %v1096_v60, %v1023_v58 }
 0x154   : > { %v1125_v32 = vadd.f32 %v1807_v61, %v1111_v48 }
 0x155   : > { %v901_v50 = vpop.f32.mrf.mxu2 }
 0x156   : > { %v1135_v49 = vpack.c.bf16 %v1125_v32, %v1125_v32  ;;  %v914_v41 = vadd.f32 %v901_v50, %v823_v2 }
 0x158   : > { %1146 = vst.msk [vmem:[%s1815_s7 + $0x1c] sm:$0xf] %vm1138_vm7, %v1135_v49  ;;  %v1024_v54 = vadd.f32 %v1011_v56, %v914_v41 }
 0x15a   : > { %v1112_v0 = vadd.f32 %v1099_v52, %v1024_v54 }
 0x15c   : > { %v1126_v55 = vadd.f32 %v1807_v61, %v1112_v0 }
 0x15d   : > { %v903_v6 = vpop.f32.mrf.mxu2 }
 0x15e   : > { %v1136_v28 = vpack.c.bf16 %v1126_v55, %v1126_v55  ;;  %v915_v9 = vadd.f32 %v903_v6, %v824_v3 }
 0x160   : > { %1147 = vst.msk [vmem:[%s1815_s7 + $0x20] sm:$0xf] %vm1138_vm7, %v1136_v28  ;;  %v1025_v10 = vadd.f32 %v1013_v36, %v915_v9 }
 0x162   : > { %v1113_v4 = vadd.f32 %v1101_v40, %v1025_v10 }
 0x164   : > { %v1127_v38 = vadd.f32 %v1807_v61, %v1113_v4 }
 0x166   : > { %v1137_v11 = vpack.c.bf16 %v1127_v38, %v1127_v38 }
 0x168   : > { %1148 = vst.msk [vmem:[%s1815_s7 + $0x24] sm:$0xf] %vm1138_vm7, %v1137_v11 }
 0x169 PF: > { %s13_s12 = sadd.s32 1, %s1432_s12  }
 0x16a   : > { %p10_p4 = scmp.ge.s32.totalorder %s13_s12, 4  }
 0x16c   :  { %12 = sbr.rel (!%p10_p4) target bundleno = 1 (0x1), region = 70 }

// kernel: vqvae2_forward.34
= control target key start
LH: loop header
LB: loop body
LE: loop exit
PB: predicated region body
PF: predicated region fallthrough
CT: control target
= control target key end

     0   :  { %s517_s15 = smov 0   ;;  %s570_s0 = inlined_call_operand.vmem [shape: bf16[2,64,8], index: 0, kind: input, shape index: {}]   ;;  %s571_s1 = inlined_call_operand.vmem [shape: bf16[1,8,32], index: 1, kind: input, shape index: {}]   ;;  %s572_s2 = inlined_call_operand.vmem [shape: f32[1,32], index: 2, kind: input, shape index: {}]   ;;  %s573_s3 = inlined_call_operand.vmem [shape: bf16[2,64,32], index: 3, kind: input, shape index: {}]   ;;  %s574_s4 = inlined_call_operand.vmem [shape: bf16[2,64,32], index: 4, kind: output, shape index: {}]  }
   0x1 LB: > { %s414_s16 = sadd.s32 4294967295, %s490_s15   ;;  %p418_p0 = scmp.ge.s32.totalorder %s490_s15, 1  ;;  %s490_s15 = sphi %s517_s15, %s14_s15  }
   0x2   : > { %p172_p1 = scmp.lt.s32.totalorder %s490_s15, 3 }
   0x4   : > { %p173_p2 = pnand %p418_p0, %p172_p1 }
   0x5   : > { %p203_p3 = scmp.lt.s32.totalorder (!%p173_p2), %s414_s16, 1 }
   0x6   : > { %176 = sbr.rel (%p173_p2) target bundleno = 172 (0xac), region = 36 }
   0xb   : > { %v247_v0 = vld [vmem:[%s571_s1] sm:$0xf]  ;;  %vm265_vm0 = vcmask 1043456   ;;  %s576_s16 = smov (!%p203_p3, %s414_s16), 1  ;;  %vm252_vm1 = vcmask 64512   ;;  %vm338_vm2 = vcmask 257024  }
   0xc   : > { %v267_v1 = vsel %vm265_vm0, %v247_v0, 0  ;;  %s528_s19 = sshll.u32 %s576_s16, 5  ;;  %v483_v28 = vld [vmem:[%s572_s2] ss:$0 sm:$0xff] }
   0xd   : > { %276 = vmatpush.bf16.msra.mxu0 %v267_v1  ;;  %472 = vmatpush.bf16.msra.mxu1 %v267_v1  ;;  %s207_s22 = scalar_lea.vmem %s570_s0, %s528_s19  ;;  %s212_s25 = scalar_lea.vmem %s573_s3, %s528_s19 }
   0xe   : > { %473 = vmatpush.bf16.msra.mxu2 %v267_v1  ;;  %474 = vmatpush.bf16.msra.mxu3 %v267_v1  ;;  %v435_v2 = vld [vmem:[%s207_s22] sm:$0xff]   ;;  %v466_v3 = vld [vmem:[%s207_s22 + $0x8] sm:$0xff]   ;;  %v467_v4 = vld [vmem:[%s207_s22 + $0x10] sm:$0xff]   ;;  %s549_s30 = scalar_lea.vmem %s574_s4, %s528_s19 }
   0xf   : > { %v436_v5 = vunpack.c.l.bf16 %v435_v2  ;;  %v437_v6 = vunpack.c.h.bf16 %v435_v2  ;;  %v440_v7 = vunpack.c.l.bf16 %v466_v3  ;;  %v441_v8 = vunpack.c.h.bf16 %v466_v3  ;;  %v468_v9 = vld [vmem:[%s207_s22 + $0x18] sm:$0xff]   ;;  %v451_v26 = vld [vmem:[%s212_s25] sm:$0xff]   ;;  %v469_v27 = vld [vmem:[%s212_s25 + $0x8] sm:$0xff]  }
  0x10   : > { %v444_v10 = vunpack.c.l.bf16 %v467_v4  ;;  %v445_v11 = vunpack.c.h.bf16 %v467_v4  ;;  %v448_v12 = vunpack.c.l.bf16 %v468_v9  ;;  %v449_v13 = vunpack.c.h.bf16 %v468_v9  ;;  %v470_v37 = vld [vmem:[%s212_s25 + $0x10] sm:$0xff]   ;;  %v471_v38 = vld [vmem:[%s212_s25 + $0x18] sm:$0xff]  }
  0x11   : > { %v235_v14 = vmax.f32 %v436_v5, 0.0  ;;  %v236_v15 = vmax.f32 %v437_v6, 0.0  ;;  %v237_v16 = vmax.f32 %v440_v7, 0.0  ;;  %v238_v17 = vmax.f32 %v441_v8, 0.0 }
  0x12   : > { %v239_v18 = vmax.f32 %v444_v10, 0.0  ;;  %v240_v19 = vmax.f32 %v445_v11, 0.0  ;;  %v241_v20 = vmax.f32 %v448_v12, 0.0  ;;  %v242_v21 = vmax.f32 %v449_v13, 0.0 }
  0x13   : > { %v243_v22 = vpack.c.bf16 %v236_v15, %v235_v14  ;;  %v244_v23 = vpack.c.bf16 %v238_v17, %v237_v16  ;;  %v452_v29 = vunpack.c.l.bf16 %v451_v26  ;;  %v456_v30 = vunpack.c.l.bf16 %v469_v27 }
  0x14   : > { %v245_v24 = vpack.c.bf16 %v240_v19, %v239_v18  ;;  %v246_v25 = vpack.c.bf16 %v242_v21, %v241_v20  ;;  %v460_v41 = vunpack.c.l.bf16 %v470_v37  ;;  %v464_v42 = vunpack.c.l.bf16 %v471_v38 }
  0x15   : > { %425 = vmatmul.msk.bf16.vlgmr.msra.gmra.mxu0 %vm252_vm1, %v243_v22  ;;  %426 = vmatmul.msk.bf16.vlgmr.msra.gmra.mxu1 %vm252_vm1, %v244_v23  ;;  %v453_v47 = vunpack.c.h.bf16 %v451_v26  ;;  %v457_v48 = vunpack.c.h.bf16 %v469_v27  ;;  %v461_v1 = vunpack.c.h.bf16 %v470_v37  ;;  %v465_v2 = vunpack.c.h.bf16 %v471_v38 }
  0x16   : > { %427 = vmatmul.msk.bf16.vlgmr.msra.gmra.mxu2 %vm252_vm1, %v245_v24  ;;  %428 = vmatmul.msk.bf16.vlgmr.msra.gmra.mxu3 %vm252_vm1, %v246_v25 }
  0x92   : > { %v278_v31 = vpop.f32.mrf.mxu0  ;;  %v283_v32 = vpop.f32.mrf.mxu1 }
  0x93   : > { %v279_v33 = vadd.f32 %v483_v28, %v278_v31  ;;  %v284_v34 = vadd.f32 %v483_v28, %v283_v32 }
  0x95   : > { %v314_v35 = vadd.f32 %v452_v29, %v279_v33  ;;  %v316_v36 = vadd.f32 %v456_v30, %v284_v34 }
  0x97   : > { %v322_v39 = vmax.f32 %v314_v35, 0.0  ;;  %v324_v40 = vmax.f32 %v316_v36, 0.0 }
  0x99   : > { %v330_v43 = vpack.c.bf16 %v322_v39, %v322_v39  ;;  %v332_v44 = vpack.c.bf16 %v324_v40, %v324_v40  ;;  %v288_v45 = vpop.f32.mrf.mxu2  ;;  %v293_v46 = vpop.f32.mrf.mxu3 }
  0x9a   : > { %v289_v49 = vadd.f32 %v483_v28, %v288_v45  ;;  %v294_v50 = vadd.f32 %v483_v28, %v293_v46  ;;  %v280_v51 = vpop.f32.mrf.mxu0  ;;  %v285_v52 = vpop.f32.mrf.mxu1 }
  0x9b   : > { %339 = vst.msk [vmem:[%s549_s30] sm:$0xf] %vm338_vm2, %v330_v43  ;;  %v281_v53 = vadd.f32 %v483_v28, %v280_v51  ;;  %v286_v54 = vadd.f32 %v483_v28, %v285_v52 }
  0x9c   : > { %341 = vst.msk [vmem:[%s549_s30 + $0x8] sm:$0xf] %vm338_vm2, %v332_v44  ;;  %v318_v55 = vadd.f32 %v460_v41, %v289_v49  ;;  %v320_v56 = vadd.f32 %v464_v42, %v294_v50 }
  0x9d   : > { %v315_v57 = vadd.f32 %v453_v47, %v281_v53  ;;  %v317_v58 = vadd.f32 %v457_v48, %v286_v54 }
  0x9e   : > { %v326_v59 = vmax.f32 %v318_v55, 0.0  ;;  %v328_v60 = vmax.f32 %v320_v56, 0.0 }
  0x9f   : > { %v323_v61 = vmax.f32 %v315_v57, 0.0  ;;  %v325_v62 = vmax.f32 %v317_v58, 0.0 }
  0xa0   : > { %v334_v63 = vpack.c.bf16 %v326_v59, %v326_v59  ;;  %v336_v0 = vpack.c.bf16 %v328_v60, %v328_v60 }
  0xa1   : > { %v331_v3 = vpack.c.bf16 %v323_v61, %v323_v61  ;;  %v333_v4 = vpack.c.bf16 %v325_v62, %v325_v62  ;;  %v290_v5 = vpop.f32.mrf.mxu2  ;;  %v295_v6 = vpop.f32.mrf.mxu3 }
  0xa2   : > { %343 = vst.msk [vmem:[%s549_s30 + $0x10] sm:$0xf] %vm338_vm2, %v334_v63  ;;  %v291_v7 = vadd.f32 %v483_v28, %v290_v5  ;;  %v296_v8 = vadd.f32 %v483_v28, %v295_v6 }
  0xa3   : > { %345 = vst.msk [vmem:[%s549_s30 + $0x18] sm:$0xf] %vm338_vm2, %v336_v0 }
  0xa4   : > { %340 = vst.msk [vmem:[%s549_s30 + $0x4] sm:$0xf] %vm338_vm2, %v331_v3  ;;  %v319_v9 = vadd.f32 %v461_v1, %v291_v7  ;;  %v321_v10 = vadd.f32 %v465_v2, %v296_v8 }
  0xa5   : > { %342 = vst.msk [vmem:[%s549_s30 + $0xc] sm:$0xf] %vm338_vm2, %v333_v4 }
  0xa6   : > { %v327_v11 = vmax.f32 %v319_v9, 0.0  ;;  %v329_v12 = vmax.f32 %v321_v10, 0.0 }
  0xa8   : > { %v335_v13 = vpack.c.bf16 %v327_v11, %v327_v11  ;;  %v337_v14 = vpack.c.bf16 %v329_v12, %v329_v12 }
  0xaa   : > { %344 = vst.msk [vmem:[%s549_s30 + $0x14] sm:$0xf] %vm338_vm2, %v335_v13 }
  0xab   : > { %346 = vst.msk [vmem:[%s549_s30 + $0x1c] sm:$0xf] %vm338_vm2, %v337_v14 }
  0xac PF: > { %s14_s15 = sadd.s32 1, %s490_s15  }
  0xad   : > { %p11_p4 = scmp.ge.s32.totalorder %s14_s15, 4  }
  0xaf   :  { %13 = sbr.rel (!%p11_p4) target bundleno = 1 (0x1), region = 69 }

// kernel: vqvae2_forward.35
= control target key start
LH: loop header
LB: loop body
LE: loop exit
PB: predicated region body
PF: predicated region fallthrough
CT: control target
= control target key end

     0   :  { %s899_s12 = smov 0   ;;  %s1021_s0 = inlined_call_operand.vmem [shape: bf16[2,26,128], index: 0, kind: input, shape index: {}]   ;;  %s1022_s1 = inlined_call_operand.vmem [shape: bf16[4,128,16], index: 1, kind: input, shape index: {}]   ;;  %s1023_s2 = inlined_call_operand.vmem [shape: f32[1,16], index: 2, kind: input, shape index: {}]   ;;  %s1024_s3 = inlined_call_operand.vmem [shape: bf16[2,20,16], index: 3, kind: output, shape index: {}]  }
   0x1 LB: > { %s637_s13 = sadd.s32 4294967295, %s877_s12   ;;  %p641_p0 = scmp.ge.s32.totalorder %s877_s12, 1  ;;  %s877_s12 = sphi %s899_s12, %s13_s12  }
   0x2   : > { %p137_p1 = scmp.lt.s32.totalorder %s877_s12, 3 }
   0x4   : > { %p138_p2 = pnand %p641_p0, %p137_p1 }
   0x5   : > { %p161_p3 = scmp.lt.s32.totalorder (!%p138_p2), %s637_s13, 1 }
   0x6   : > { %141 = sbr.rel (%p138_p2) target bundleno = 204 (0xcc), region = 32 }
   0xb   : > { %v844_v0 = vld [vmem:[%s1022_s1 + $0x78] sm:$0xff]  ;;  %v843_v4 = vld [vmem:[%s1022_s1 + $0x70] sm:$0xff]  ;;  %s1026_s13 = smov (!%p161_p3, %s637_s13), 1  ;;  %v842_v8 = vld [vmem:[%s1022_s1 + $0x68] sm:$0xff]  ;;  %vm216_vm0 = vsmask.f32 7424 }
   0xc   : > { %v836_v1 = vld [vmem:[%s1022_s1 + $0x38] sm:$0xff]  ;;  %282 = vmatpush.bf16.msra.mxu0 %v844_v0  ;;  %v835_v5 = vld [vmem:[%s1022_s1 + $0x30] sm:$0xff]  ;;  %s827_s30 = sshll.u32 %s1026_s13, 4  ;;  %v834_v9 = vld [vmem:[%s1022_s1 + $0x28] sm:$0xff]  ;;  %vm388_vm1 = vsmask.f32 5376 }
   0xd   : > { %v852_v2 = vld [vmem:[%s1022_s1 + $0xb8] sm:$0xff]  ;;  %350 = vmatpush.bf16.msra.mxu1 %v836_v1  ;;  %v851_v6 = vld [vmem:[%s1022_s1 + $0xb0] sm:$0xff]  ;;  %v850_v10 = vld [vmem:[%s1022_s1 + $0xa8] sm:$0xff]  ;;  %s165_s16 = scalar_lea.vmem %s1021_s0, %s827_s30  ;;  %vm489_vm2 = vcmask 1044480   ;;  %s861_s7 = smul.u32 12, %s1026_s13  ;;  %vm577_vm3 = vcmask 125952  }
   0xe   : > { %v860_v3 = vld [vmem:[%s1022_s1 + $0xf8] sm:$0xff]  ;;  %451 = vmatpush.bf16.msra.mxu2 %v852_v2  ;;  %v859_v7 = vld [vmem:[%s1022_s1 + $0xf0] sm:$0xff]  ;;  %v858_v11 = vld [vmem:[%s1022_s1 + $0xe8] sm:$0xff]  ;;  %vm580_vm4 = vcmask 123904  }
   0xf   : > { %543 = vmatpush.bf16.msra.mxu3 %v860_v3  ;;  %v841_v12 = vld [vmem:[%s1022_s1 + $0x60] sm:$0xff]  ;;  %v173_v16 = vld [vmem:[%s165_s16 + $0x8] sm:$0xf]  ;;  %v174_v17 = vld [vmem:[%s165_s16 + $0xc] sm:$0x1]  ;;  %s170_s10 = scalar_lea.vmem %s1024_s3, %s861_s7 }
  0x10   : > { %283 = vmatpush.bf16.msra.mxu0 %v843_v4  ;;  %v833_v13 = vld [vmem:[%s1022_s1 + $0x20] sm:$0xff]  ;;  %v213_v18 = vunpack.c.l.b16 %v173_v16  ;;  %v386_v19 = vunpack.c.l.b16 %v174_v17  ;;  %v840_v20 = vld [vmem:[%s1022_s1 + $0x58] sm:$0xff]  ;;  %v839_v26 = vld [vmem:[%s1022_s1 + $0x50] sm:$0xff] }
  0x11   : > { %351 = vmatpush.bf16.msra.mxu1 %v835_v5  ;;  %v849_v14 = vld [vmem:[%s1022_s1 + $0xa0] sm:$0xff]  ;;  %v832_v21 = vld [vmem:[%s1022_s1 + $0x18] sm:$0xff]  ;;  %v831_v27 = vld [vmem:[%s1022_s1 + $0x10] sm:$0xff] }
  0x12   : > { %452 = vmatpush.bf16.msra.mxu2 %v851_v6  ;;  %v857_v15 = vld [vmem:[%s1022_s1 + $0xe0] sm:$0xff]  ;;  %v848_v23 = vld [vmem:[%s1022_s1 + $0x98] sm:$0xff]  ;;  %v387_v25 = vpack.c.b16 %v386_v19, %v213_v18  ;;  %v215_v28 = vpack.c.b16 %v213_v18, %v213_v18  ;;  %v847_v30 = vld [vmem:[%s1022_s1 + $0x90] sm:$0xff] }
  0x13   : > { %544 = vmatpush.bf16.msra.mxu3 %v859_v7  ;;  %v828_v22 = vld [vmem:[%s165_s16] sm:$0xff]  ;;  %v856_v24 = vld [vmem:[%s1022_s1 + $0xd8] sm:$0xff]  ;;  %v855_v31 = vld [vmem:[%s1022_s1 + $0xd0] sm:$0xff] }
  0x14   : > { %284 = vmatpush.bf16.msra.mxu0 %v842_v8  ;;  %v220_v29 = vshll.u32 %v828_v22, 16  ;;  %v218_v32 = vshrl.u32 %v828_v22, 16  ;;  %v393_v33 = vshrl.u32 %v387_v25, 16  ;;  %v396_v34 = vshll.u32 %v387_v25, 16  ;;  %v838_v35 = vld [vmem:[%s1022_s1 + $0x48] sm:$0xff]  ;;  %v837_v45 = vld [vmem:[%s1022_s1 + $0x40] sm:$0xff] }
  0x15   : > { %352 = vmatpush.bf16.msra.mxu1 %v834_v9  ;;  %v830_v36 = vld [vmem:[%s1022_s1 + $0x8] sm:$0xff]  ;;  %v225_v38 = vshll.u32 %v215_v28, 16  ;;  %v829_v46 = vld [vmem:[%s1022_s1] sm:$0xff]  ;;  %v490_v53 = vrot.slane %v828_v22, 3  ;;  %v491_v54 = vrot.slane %v387_v25, 3  ;;  %v229_v58 = vshrl.u32 %v215_v28, 16 }
  0x16   : > { %453 = vmatpush.bf16.msra.mxu2 %v850_v10  ;;  %v222_v37 = vrot.slane %v220_v29, 1  ;;  %v846_v39 = vld [vmem:[%s1022_s1 + $0x88] sm:$0xff]  ;;  %v389_v41 = vrot.slane %v218_v32, 2  ;;  %v390_v42 = vrot.slane %v220_v29, 3  ;;  %v395_v43 = vrot.slane %v393_v33, 2  ;;  %v845_v49 = vld [vmem:[%s1022_s1 + $0x80] sm:$0xff] }
  0x17   : > { %545 = vmatpush.bf16.msra.mxu3 %v858_v11  ;;  %v854_v40 = vld [vmem:[%s1022_s1 + $0xc8] sm:$0xff]  ;;  %v398_v44 = vrot.slane %v396_v34, 3  ;;  %v227_v48 = vrot.slane %v225_v38, 1  ;;  %v853_v50 = vld [vmem:[%s1022_s1 + $0xc0] sm:$0xff]  ;;  %v492_v57 = vsel %vm489_vm2, %v490_v53, %v491_v54 }
  0x18   : > { %285 = vmatpush.bf16.msra.mxu0 %v841_v12  ;;  %v223_v47 = vor.u32 %v222_v37, %v218_v32  ;;  %v391_v51 = vor.u32 %v390_v42, %v389_v41  ;;  %v870_v2 = vld [vmem:[%s1023_s2] ss:$0 sm:$0xff] }
  0x19   : > { %353 = vmatpush.bf16.msra.mxu1 %v833_v13  ;;  %v399_v52 = vor.u32 %v398_v44, %v395_v43  ;;  %v231_v59 = vor.u32 %v229_v58, %v227_v48 }
  0x1a   : > { %454 = vmatpush.bf16.msra.mxu2 %v849_v14  ;;  %v228_v55 = vsel %vm216_vm0, %v223_v47, %v227_v48 }
  0x1b   : > { %546 = vmatpush.bf16.msra.mxu3 %v857_v15  ;;  %v400_v56 = vsel %vm388_vm1, %v391_v51, %v399_v52 }
  0x1c   : > { %286 = vmatpush.bf16.msra.mxu0 %v840_v20 }
  0x1d   : > { %354 = vmatpush.bf16.msra.mxu1 %v832_v21 }
  0x1e   : > { %455 = vmatpush.bf16.msra.mxu2 %v848_v23 }
  0x1f   : > { %547 = vmatpush.bf16.msra.mxu3 %v856_v24 }
  0x20   : > { %287 = vmatpush.bf16.msra.mxu0 %v839_v26 }
  0x21   : > { %355 = vmatpush.bf16.msra.mxu1 %v831_v27 }
  0x22   : > { %456 = vmatpush.bf16.msra.mxu2 %v847_v30 }
  0x23   : > { %548 = vmatpush.bf16.msra.mxu3 %v855_v31 }
  0x24   : > { %288 = vmatpush.bf16.msra.mxu0 %v838_v35 }
  0x25   : > { %356 = vmatpush.bf16.msra.mxu1 %v830_v36 }
  0x26   : > { %457 = vmatpush.bf16.msra.mxu2 %v846_v39 }
  0x27   : > { %549 = vmatpush.bf16.msra.mxu3 %v854_v40 }
  0x28   : > { %289 = vmatpush.bf16.msra.mxu0 %v837_v45 }
  0x29   : > { %357 = vmatpush.bf16.msra.mxu1 %v829_v46 }
  0x2a   : > { %458 = vmatpush.bf16.msra.mxu2 %v845_v49 }
  0x2b   : > { %550 = vmatpush.bf16.msra.mxu3 %v853_v50  ;;  %290 = vmatmul.bf16.vlgmr.msra.gmra.mxu0 %v228_v55 }
  0x2c   : > { %358 = vmatmul.bf16.vlgmr.msra.gmra.mxu1 %v828_v22 }
  0x2d   : > { %459 = vmatmul.bf16.vlgmr.msra.gmra.mxu2 %v400_v56 }
  0x2e   : > { %551 = vmatmul.bf16.vlgmr.msra.gmra.mxu3 %v492_v57 }
  0x3b   : > { %295 = vmatmul.bf16.gmra.mxu0 %v231_v59 }
  0x3c   : > { %363 = vmatmul.bf16.gmra.mxu1 %v215_v28 }
  0x3d   : > { %464 = vmatmul.bf16.gmra.mxu2 %v399_v52 }
  0x3e   : > { %556 = vmatmul.bf16.gmra.mxu3 %v491_v54 }
  0xa8   : > { %v291_v60 = vpop.f32.mrf.mxu0 }
  0xa9   : > { %v359_v61 = vpop.f32.mrf.mxu1 }
  0xaa   : > { %v360_v62 = vadd.f32 %v359_v61, %v291_v60 }
  0xb0   : > { %v460_v63 = vpop.f32.mrf.mxu2  ;;  %v293_v3 = vpop.f32.mrf.mxu0 }
  0xb1   : > { %v552_v0 = vpop.f32.mrf.mxu3  ;;  %v469_v1 = vadd.f32 %v460_v63, %v360_v62  ;;  %v361_v4 = vpop.f32.mrf.mxu1 }
  0xb2   : > { %v362_v8 = vadd.f32 %v361_v4, %v293_v3 }
  0xb3   : > { %v561_v5 = vadd.f32 %v552_v0, %v469_v1 }
  0xb5   : > { %v568_v6 = vadd.f32 %v870_v2, %v561_v5 }
  0xb7   : > { %v571_v7 = vmax.f32 %v568_v6, 0.0 }
  0xb8   : > { %v462_v9 = vpop.f32.mrf.mxu2  ;;  %v296_v13 = vpop.f32.mrf.mxu0 }
  0xb9   : > { %v554_v10 = vpop.f32.mrf.mxu3  ;;  %v574_v11 = vpack.c.bf16 %v571_v7, %v571_v7  ;;  %v470_v12 = vadd.f32 %v462_v9, %v362_v8  ;;  %v364_v14 = vpop.f32.mrf.mxu1 }
  0xba   : > { %v365_v17 = vadd.f32 %v364_v14, %v296_v13 }
  0xbb   : > { %578 = vst.msk [vmem:[%s170_s10] sm:$0xf] %vm577_vm3, %v574_v11  ;;  %v562_v15 = vadd.f32 %v554_v10, %v470_v12 }
  0xbd   : > { %v569_v16 = vadd.f32 %v870_v2, %v562_v15 }
  0xbf   : > { %v572_v18 = vmax.f32 %v569_v16, 0.0 }
  0xc0   : > { %v465_v19 = vpop.f32.mrf.mxu2  ;;  %v298_v23 = vpop.f32.mrf.mxu0 }
  0xc1   : > { %v557_v20 = vpop.f32.mrf.mxu3  ;;  %v575_v21 = vpack.c.bf16 %v572_v18, %v572_v18  ;;  %v471_v22 = vadd.f32 %v465_v19, %v365_v17  ;;  %v366_v24 = vpop.f32.mrf.mxu1 }
  0xc3   : > { %579 = vst.msk [vmem:[%s170_s10 + $0x4] sm:$0xf] %vm577_vm3, %v575_v21  ;;  %v563_v25 = vadd.f32 %v557_v20, %v471_v22 }
  0xc5   : > { %v570_v26 = vadd.f32 %v870_v2, %v563_v25 }
  0xc7   : > { %v573_v27 = vmax.f32 %v570_v26, 0.0 }
  0xc8   : > { %v467_v28 = vpop.f32.mrf.mxu2 }
  0xc9   : > { %v559_v29 = vpop.f32.mrf.mxu3  ;;  %v576_v30 = vpack.c.bf16 %v573_v27, %v573_v27 }
  0xcb   : > { %581 = vst.msk [vmem:[%s170_s10 + $0x8] sm:$0x3] %vm580_vm4, %v576_v30 }
  0xcc PF: > { %s13_s12 = sadd.s32 1, %s877_s12  }
  0xcd   : > { %p10_p4 = scmp.ge.s32.totalorder %s13_s12, 4  }
  0xcf   :  { %12 = sbr.rel (!%p10_p4) target bundleno = 1 (0x1), region = 65 }

// kernel: vqvae2_forward.36
= control target key start
LH: loop header
LB: loop body
LE: loop exit
PB: predicated region body
PF: predicated region fallthrough
CT: control target
= control target key end

     0   :  { %s772_s12 = smov 0   ;;  %s846_s0 = inlined_call_operand.vmem [shape: bf16[2,38,16], index: 0, kind: input, shape index: {}]   ;;  %s847_s1 = inlined_call_operand.vmem [shape: bf16[9,16,32], index: 1, kind: input, shape index: {}]   ;;  %s848_s2 = inlined_call_operand.vmem [shape: f32[1,32], index: 2, kind: input, shape index: {}]   ;;  %s849_s3 = inlined_call_operand.vmem [shape: bf16[2,24,32], index: 3, kind: output, shape index: {}]  }
   0x1 LB: > { %s635_s13 = sadd.s32 4294967295, %s750_s12   ;;  %p639_p0 = scmp.ge.s32.totalorder %s750_s12, 1  ;;  %s750_s12 = sphi %s772_s12, %s13_s12  }
   0x2   : > { %p137_p1 = scmp.lt.s32.totalorder %s750_s12, 3 }
   0x4   : > { %p138_p2 = pnand %p639_p0, %p137_p1 }
   0x5   : > { %p161_p3 = scmp.lt.s32.totalorder (!%p138_p2), %s635_s13, 1 }
   0x6   : > { %141 = sbr.rel (%p138_p2) target bundleno = 225 (0xe1), region = 32 }
   0xb   : > { %v715_v0 = vld [vmem:[%s847_s1 + $0x8] sm:$0xff]  ;;  %v714_v1 = vld [vmem:[%s847_s1] sm:$0xff]  ;;  %v716_v2 = vld [vmem:[%s847_s1 + $0x10] sm:$0xff]  ;;  %s851_s13 = smov (!%p161_p3, %s635_s13), 1  ;;  %vm272_vm0 = vcmask 1046528   ;;  %vm312_vm1 = vcmask 1044480  }
   0xc   : > { %v717_v3 = vld [vmem:[%s847_s1 + $0x18] sm:$0xff]  ;;  %v718_v4 = vld [vmem:[%s847_s1 + $0x20] sm:$0xff]  ;;  %732 = vmatpush.bf16.msra.mxu1 %v715_v0  ;;  %228 = vmatpush.bf16.msra.mxu0 %v715_v0  ;;  %v720_v5 = vld [vmem:[%s847_s1 + $0x30] sm:$0xff]  ;;  %s733_s28 = smul.u32 20, %s851_s13  ;;  %vm214_vm2 = vcmask 130048   ;;  %vm437_vm5 = vcmask 1045504  }
   0xd   : > { %v721_v6 = vld [vmem:[%s847_s1 + $0x38] sm:$0xff]  ;;  %295 = vmatpush.bf16.msra.mxu2 %v716_v2  ;;  %335 = vmatpush.bf16.msra.mxu3 %v717_v3  ;;  %vm192_vm3 = vsmask.f32 7424  ;;  %v719_v21 = vld [vmem:[%s847_s1 + $0x28] sm:$0xff]  ;;  %v722_v24 = vld [vmem:[%s847_s1 + $0x40] sm:$0xff]  ;;  %s734_s11 = smul.u32 12, %s851_s13 }
   0xe   : > { %s165_s4 = scalar_lea.vmem %s846_s0, %s733_s28  ;;  %vm352_vm4 = vsmask.f32 4352  ;;  %vm477_vm6 = vsmask.f32 5376  ;;  %vm576_vm7 = vcmask 257024  }
   0xf   : > { %v731_v7 = vld [vmem:[%s165_s4 + $0x8] sm:$0xff]   ;;  %v724_v8 = vld [vmem:[%s165_s4] sm:$0xff]   ;;  %v176_v26 = vld [vmem:[%s165_s4 + $0x10] sm:$0x7]  ;;  %s170_s16 = scalar_lea.vmem %s849_s3, %s734_s11 }
  0x10   : > { %258 = vmatpush.bf16.msrb.mxu1 %v714_v1  ;;  %379 = vmatpush.bf16.msrb.mxu0 %v718_v4  ;;  %v201_v9 = vshll.u32 %v731_v7, 16  ;;  %v205_v10 = vshrl.u32 %v731_v7, 16  ;;  %v194_v11 = vshrl.u32 %v724_v8, 16  ;;  %v196_v12 = vshll.u32 %v724_v8, 16 }
  0x11   : > { %460 = vmatpush.bf16.msrb.mxu2 %v720_v5  ;;  %513 = vmatpush.bf16.msrb.mxu3 %v721_v6  ;;  %v273_v13 = vrot.slane %v724_v8, 1  ;;  %v274_v14 = vrot.slane %v731_v7, 1  ;;  %v313_v15 = vrot.slane %v724_v8, 3  ;;  %v314_v16 = vrot.slane %v731_v7, 3 }
  0x12   : > { %v203_v17 = vrot.slane %v201_v9, 1  ;;  %v198_v18 = vrot.slane %v196_v12, 1  ;;  %v356_v27 = vrot.slane %v205_v10, 3  ;;  %v353_v28 = vrot.slane %v194_v11, 3 }
  0x13   : > { %v275_v19 = vsel %vm272_vm0, %v273_v13, %v274_v14  ;;  %v315_v20 = vsel %vm312_vm1, %v313_v15, %v314_v16  ;;  %v354_v29 = vrot.slane %v196_v12, 4  ;;  %v357_v30 = vrot.slane %v201_v9, 4 }
  0x14   : > { %v207_v22 = vor.u32 %v205_v10, %v203_v17  ;;  %v199_v23 = vor.u32 %v198_v18, %v194_v11  ;;  %662 = vmatmul.msk.bf16.vlgmr.msra.gmra.mxu2 %vm214_vm2, %v275_v19  ;;  %670 = vmatmul.msk.bf16.vlgmr.msra.gmra.mxu3 %vm214_vm2, %v315_v20  ;;  %v726_v31 = vunpack.c.h.b16 %v724_v8  ;;  %v729_v32 = vunpack.c.l.b16 %v731_v7 }
  0x15   : > { %v730_v33 = vunpack.c.h.b16 %v731_v7  ;;  %v435_v34 = vunpack.c.l.b16 %v176_v26  ;;  %v355_v35 = vor.u32 %v354_v29, %v353_v28  ;;  %v358_v36 = vor.u32 %v357_v30, %v356_v27 }
  0x16   : > { %649 = vmatmul.msk.bf16.vlgmr.msra.gmra.mxu1 %vm214_vm2, %v207_v22  ;;  %v204_v25 = vsel %vm192_vm3, %v199_v23, %v203_v17  ;;  %v396_v37 = vpack.c.b16 %v729_v32, %v726_v31  ;;  %v239_v54 = vpack.c.b16 %v729_v32, %v729_v32 }
  0x17   : > { %648 = vmatmul.msk.bf16.vlgmr.msra.gmra.mxu0 %vm214_vm2, %v204_v25  ;;  %417 = vmatpush.bf16.msra.mxu1 %v719_v21  ;;  %v436_v38 = vpack.c.b16 %v435_v34, %v730_v33  ;;  %v359_v39 = vsel %vm352_vm4, %v355_v35, %v358_v36  ;;  %v397_v58 = vpack.c.b16 %v730_v33, %v730_v33  ;;  %v743_v34 = vld [vmem:[%s848_s2] ss:$0 sm:$0xff] }
  0x18   : > { %552 = vmatpush.bf16.msra.mxu0 %v722_v24  ;;  %v478_v40 = vshrl.u32 %v396_v37, 16  ;;  %v481_v41 = vshll.u32 %v396_v37, 16  ;;  %v438_v48 = vrot.slane %v396_v37, 2  ;;  %v530_v55 = vrot.slane %v396_v37, 3 }
  0x19   : > { %v486_v42 = vshrl.u32 %v436_v38, 16  ;;  %v489_v43 = vshll.u32 %v436_v38, 16  ;;  %v439_v49 = vrot.slane %v436_v38, 2  ;;  %v531_v56 = vrot.slane %v436_v38, 3 }
  0x1a   : > { %v480_v44 = vrot.slane %v478_v40, 2  ;;  %v483_v45 = vrot.slane %v481_v41, 3 }
  0x1b   : > { %v488_v46 = vrot.slane %v486_v42, 2  ;;  %v491_v47 = vrot.slane %v489_v43, 3  ;;  %v440_v52 = vsel %vm437_vm5, %v438_v48, %v439_v49  ;;  %v532_v57 = vsel %vm312_vm1, %v530_v55, %v531_v56 }
  0x1c   : > { %v484_v50 = vor.u32 %v483_v45, %v480_v44 }
  0x1d   : > { %v492_v51 = vor.u32 %v491_v47, %v488_v46 }
  0x1f   : > { %v493_v53 = vsel %vm477_vm6, %v484_v50, %v492_v51 }
  0x24   : > { %663 = vmatmul.msk.bf16.gmra.mxu2 %vm214_vm2, %v274_v14  ;;  %671 = vmatmul.msk.bf16.gmra.mxu3 %vm214_vm2, %v314_v16 }
  0x26   : > { %654 = vmatmul.msk.bf16.vlgmr.msrb.gmra.mxu1 %vm214_vm2, %v724_v8 }
  0x27   : > { %678 = vmatmul.msk.bf16.vlgmr.msrb.gmra.mxu0 %vm214_vm2, %v359_v39 }
  0x34   : > { %694 = vmatmul.msk.bf16.vlgmr.msrb.gmra.mxu2 %vm214_vm2, %v440_v52  ;;  %702 = vmatmul.msk.bf16.vlgmr.msrb.gmra.mxu3 %vm214_vm2, %v493_v53 }
  0x36   : > { %655 = vmatmul.msk.bf16.gmra.mxu1 %vm214_vm2, %v239_v54 }
  0x37   : > { %679 = vmatmul.msk.bf16.gmra.mxu0 %vm214_vm2, %v358_v36 }
  0x44   : > { %695 = vmatmul.msk.bf16.gmra.mxu2 %vm214_vm2, %v439_v49  ;;  %703 = vmatmul.msk.bf16.gmra.mxu3 %vm214_vm2, %v492_v51 }
  0x46   : > { %686 = vmatmul.msk.bf16.vlgmr.msra.gmra.mxu1 %vm214_vm2, %v396_v37 }
  0x47   : > { %710 = vmatmul.msk.bf16.vlgmr.msra.gmra.mxu0 %vm214_vm2, %v532_v57 }
  0x56   : > { %687 = vmatmul.msk.bf16.gmra.mxu1 %vm214_vm2, %v397_v58 }
  0x57   : > { %711 = vmatmul.msk.bf16.gmra.mxu0 %vm214_vm2, %v531_v56 }
  0x93   : > { %v235_v59 = vpop.f32.mrf.mxu1 }
  0x94   : > { %v230_v60 = vpop.f32.mrf.mxu0 }
  0x97   : > { %v297_v61 = vpop.f32.mrf.mxu2  ;;  %v337_v62 = vpop.f32.mrf.mxu3 }
  0x9b   : > { %v237_v63 = vpop.f32.mrf.mxu1 }
  0x9c   : > { %v232_v0 = vpop.f32.mrf.mxu0 }
  0x9f   : > { %v299_v1 = vpop.f32.mrf.mxu2  ;;  %v339_v2 = vpop.f32.mrf.mxu3 }
  0xa3   : > { %v260_v3 = vpop.f32.mrf.mxu1 }
  0xa4   : > { %v381_v4 = vpop.f32.mrf.mxu0  ;;  %v261_v13 = vadd.f32 %v260_v3, %v230_v60 }
  0xa6   : > { %v306_v16 = vadd.f32 %v297_v61, %v261_v13 }
  0xa7   : > { %v302_v5 = vpop.f32.mrf.mxu2  ;;  %v342_v6 = vpop.f32.mrf.mxu3 }
  0xa8   : > { %v346_v19 = vadd.f32 %v337_v62, %v306_v16 }
  0xaa   : > { %v390_v23 = vadd.f32 %v381_v4, %v346_v19 }
  0xab   : > { %v262_v7 = vpop.f32.mrf.mxu1 }
  0xac   : > { %v383_v8 = vpop.f32.mrf.mxu0  ;;  %v263_v20 = vadd.f32 %v262_v7, %v232_v0 }
  0xae   : > { %v307_v24 = vadd.f32 %v299_v1, %v263_v20 }
  0xaf   : > { %v304_v9 = vpop.f32.mrf.mxu2  ;;  %v344_v10 = vpop.f32.mrf.mxu3 }
  0xb0   : > { %v347_v28 = vadd.f32 %v339_v2, %v307_v24 }
  0xb2   : > { %v391_v35 = vadd.f32 %v383_v8, %v347_v28 }
  0xb3   : > { %v265_v11 = vpop.f32.mrf.mxu1 }
  0xb4   : > { %v386_v12 = vpop.f32.mrf.mxu0  ;;  %v266_v29 = vadd.f32 %v265_v11, %v235_v59 }
  0xb6   : > { %v308_v36 = vadd.f32 %v302_v5, %v266_v29 }
  0xb7   : > { %v462_v14 = vpop.f32.mrf.mxu2  ;;  %v515_v15 = vpop.f32.mrf.mxu3 }
  0xb8   : > { %v348_v42 = vadd.f32 %v342_v6, %v308_v36 }
  0xba   : > { %v392_v48 = vadd.f32 %v386_v12, %v348_v42 }
  0xbb   : > { %v267_v17 = vpop.f32.mrf.mxu1 }
  0xbc   : > { %v388_v18 = vpop.f32.mrf.mxu0 }
  0xbf   : > { %v464_v21 = vpop.f32.mrf.mxu2  ;;  %v517_v22 = vpop.f32.mrf.mxu3 }
  0xc3   : > { %v419_v25 = vpop.f32.mrf.mxu1 }
  0xc4   : > { %v428_v26 = vadd.f32 %v419_v25, %v390_v23  ;;  %v554_v27 = vpop.f32.mrf.mxu0 }
  0xc6   : > { %v471_v30 = vadd.f32 %v462_v14, %v428_v26 }
  0xc7   : > { %v467_v31 = vpop.f32.mrf.mxu2  ;;  %v520_v32 = vpop.f32.mrf.mxu3 }
  0xc8   : > { %v524_v33 = vadd.f32 %v515_v15, %v471_v30 }
  0xca   : > { %v563_v37 = vadd.f32 %v554_v27, %v524_v33 }
  0xcb   : > { %v421_v38 = vpop.f32.mrf.mxu1 }
  0xcc   : > { %v570_v39 = vadd.f32 %v743_v34, %v563_v37  ;;  %v429_v40 = vadd.f32 %v421_v38, %v391_v35  ;;  %v556_v41 = vpop.f32.mrf.mxu0 }
  0xce   : > { %v573_v43 = vpack.c.bf16 %v570_v39, %v570_v39  ;;  %v472_v44 = vadd.f32 %v464_v21, %v429_v40 }
  0xcf   : > { %v469_v45 = vpop.f32.mrf.mxu2  ;;  %v522_v46 = vpop.f32.mrf.mxu3 }
  0xd0   : > { %577 = vst.msk [vmem:[%s170_s16] sm:$0xf] %vm576_vm7, %v573_v43  ;;  %v525_v47 = vadd.f32 %v517_v22, %v472_v44 }
  0xd2   : > { %v564_v49 = vadd.f32 %v556_v41, %v525_v47 }
  0xd3   : > { %v424_v50 = vpop.f32.mrf.mxu1 }
  0xd4   : > { %v571_v51 = vadd.f32 %v743_v34, %v564_v49  ;;  %v430_v52 = vadd.f32 %v424_v50, %v392_v48  ;;  %v559_v53 = vpop.f32.mrf.mxu0 }
  0xd6   : > { %v574_v54 = vpack.c.bf16 %v571_v51, %v571_v51  ;;  %v473_v55 = vadd.f32 %v467_v31, %v430_v52 }
  0xd8   : > { %578 = vst.msk [vmem:[%s170_s16 + $0x4] sm:$0xf] %vm576_vm7, %v574_v54  ;;  %v526_v56 = vadd.f32 %v520_v32, %v473_v55 }
  0xda   : > { %v565_v57 = vadd.f32 %v559_v53, %v526_v56 }
  0xdb   : > { %v426_v58 = vpop.f32.mrf.mxu1 }
  0xdc   : > { %v572_v59 = vadd.f32 %v743_v34, %v565_v57  ;;  %v561_v60 = vpop.f32.mrf.mxu0 }
  0xde   : > { %v575_v61 = vpack.c.bf16 %v572_v59, %v572_v59 }
  0xe0   : > { %579 = vst.msk [vmem:[%s170_s16 + $0x8] sm:$0xf] %vm576_vm7, %v575_v61 }
  0xe1 PF: > { %s13_s12 = sadd.s32 1, %s750_s12  }
  0xe2   : > { %p10_p4 = scmp.ge.s32.totalorder %s13_s12, 4  }
  0xe4   :  { %12 = sbr.rel (!%p10_p4) target bundleno = 1 (0x1), region = 70 }

// kernel: vqvae2_forward.38
= control target key start
LH: loop header
LB: loop body
LE: loop exit
PB: predicated region body
PF: predicated region fallthrough
CT: control target
= control target key end

     0   :  { %s398_s15 = smov 0   ;;  %s424_s0 = inlined_call_operand.vmem [shape: bf16[2,16,8], index: 0, kind: input, shape index: {}]   ;;  %s425_s1 = inlined_call_operand.vmem [shape: bf16[1,8,32], index: 1, kind: input, shape index: {}]   ;;  %s426_s2 = inlined_call_operand.vmem [shape: f32[1,32], index: 2, kind: input, shape index: {}]   ;;  %s427_s3 = inlined_call_operand.vmem [shape: bf16[2,16,32], index: 3, kind: input, shape index: {}]   ;;  %s428_s4 = inlined_call_operand.vmem [shape: bf16[2,16,32], index: 4, kind: output, shape index: {}]  }
   0x1 LB: > { %s331_s16 = sadd.s32 4294967295, %s371_s15   ;;  %p335_p0 = scmp.ge.s32.totalorder %s371_s15, 1  ;;  %s371_s15 = sphi %s398_s15, %s14_s15  }
   0x2   : > { %p172_p1 = scmp.lt.s32.totalorder %s371_s15, 3 }
   0x4   : > { %p173_p2 = pnand %p335_p0, %p172_p1 }
   0x5   : > { %p203_p3 = scmp.lt.s32.totalorder (!%p173_p2), %s331_s16, 1 }
   0x6   : > { %176 = sbr.rel (%p173_p2) target bundleno = 162 (0xa2), region = 36 }
   0xb   : > { %v226_v0 = vld [vmem:[%s425_s1] sm:$0xf]  ;;  %vm235_vm0 = vcmask 1043456   ;;  %s430_s16 = smov (!%p203_p3, %s331_s16), 1  ;;  %vm231_vm1 = vcmask 64512   ;;  %vm261_vm2 = vcmask 257024  }
   0xc   : > { %v237_v1 = vsel %vm235_vm0, %v226_v0, 0  ;;  %s345_s19 = sshll.u32 %s430_s16, 3  ;;  %v364_v9 = vld [vmem:[%s426_s2] ss:$0 sm:$0xff] }
   0xd   : > { %246 = vmatpush.bf16.msra.mxu0 %v237_v1  ;;  %s207_s22 = scalar_lea.vmem %s424_s0, %s345_s19  ;;  %s212_s25 = scalar_lea.vmem %s427_s3, %s345_s19 }
   0xe   : > { %v349_v2 = vld [vmem:[%s207_s22] sm:$0xff]   ;;  %s217_s30 = scalar_lea.vmem %s428_s4, %s345_s19 }
   0xf   : > { %v350_v3 = vunpack.c.l.bf16 %v349_v2  ;;  %v351_v4 = vunpack.c.h.bf16 %v349_v2  ;;  %v353_v8 = vld [vmem:[%s212_s25] sm:$0xff]  }
  0x10   : > { %v354_v10 = vunpack.c.l.bf16 %v353_v8  ;;  %v355_v15 = vunpack.c.h.bf16 %v353_v8 }
  0x11   : > { %v223_v5 = vmax.f32 %v350_v3, 0.0  ;;  %v224_v6 = vmax.f32 %v351_v4, 0.0 }
  0x13   : > { %v225_v7 = vpack.c.bf16 %v224_v6, %v223_v5 }
  0x15   : > { %342 = vmatmul.msk.bf16.vlgmr.msra.gmra.mxu0 %vm231_vm1, %v225_v7 }
  0x92   : > { %v248_v11 = vpop.f32.mrf.mxu0 }
  0x93   : > { %v249_v12 = vadd.f32 %v364_v9, %v248_v11 }
  0x95   : > { %v257_v13 = vadd.f32 %v354_v10, %v249_v12 }
  0x97   : > { %v259_v14 = vpack.c.bf16 %v257_v13, %v257_v13 }
  0x99   : > { %262 = vst.msk [vmem:[%s217_s30] sm:$0xf] %vm261_vm2, %v259_v14 }
  0x9a   : > { %v250_v16 = vpop.f32.mrf.mxu0 }
  0x9b   : > { %v251_v17 = vadd.f32 %v364_v9, %v250_v16 }
  0x9d   : > { %v258_v18 = vadd.f32 %v355_v15, %v251_v17 }
  0x9f   : > { %v260_v19 = vpack.c.bf16 %v258_v18, %v258_v18 }
  0xa1   : > { %263 = vst.msk [vmem:[%s217_s30 + $0x4] sm:$0xf] %vm261_vm2, %v260_v19 }
  0xa2 PF: > { %s14_s15 = sadd.s32 1, %s371_s15  }
  0xa3   : > { %p11_p4 = scmp.ge.s32.totalorder %s14_s15, 4  }
  0xa5   :  { %13 = sbr.rel (!%p11_p4) target bundleno = 1 (0x1), region = 69 }

// kernel: vqvae2_forward.37
= control target key start
LH: loop header
LB: loop body
LE: loop exit
PB: predicated region body
PF: predicated region fallthrough
CT: control target
= control target key end

     0   :  { %s921_s12 = smov 0   ;;  %s1039_s0 = inlined_call_operand.vmem [shape: bf16[2,38,32], index: 0, kind: input, shape index: {}]   ;;  %s1040_s1 = inlined_call_operand.vmem [shape: bf16[9,32,8], index: 1, kind: input, shape index: {}]   ;;  %s1041_s2 = inlined_call_operand.vmem [shape: f32[1,8], index: 2, kind: input, shape index: {}]   ;;  %s1042_s3 = inlined_call_operand.vmem [shape: bf16[2,24,8], index: 3, kind: output, shape index: {}]  }
   0x1 LB: > { %s722_s13 = sadd.s32 4294967295, %s899_s12   ;;  %p726_p0 = scmp.ge.s32.totalorder %s899_s12, 1  ;;  %s899_s12 = sphi %s921_s12, %s13_s12  }
   0x2   : > { %p137_p1 = scmp.lt.s32.totalorder %s899_s12, 3 }
   0x4   : > { %p138_p2 = pnand %p726_p0, %p137_p1 }
   0x5   : > { %p161_p3 = scmp.lt.s32.totalorder (!%p138_p2), %s722_s13, 1 }
   0x6   : > { %141 = sbr.rel (%p138_p2) target bundleno = 235 (0xeb), region = 32 }
   0xb   : > { %v856_v0 = vld [vmem:[%s1040_s1 + $0x18] sm:$0xff]  ;;  %v858_v1 = vld [vmem:[%s1040_s1 + $0x28] sm:$0xff]  ;;  %v855_v3 = vld [vmem:[%s1040_s1 + $0x10] sm:$0xff]  ;;  %s1044_s13 = smov (!%p161_p3, %s722_s13), 1  ;;  %vm305_vm0 = vcmask 1046528   ;;  %vm353_vm1 = vcmask 1044480  }
   0xc   : > { %v860_v2 = vld [vmem:[%s1040_s1 + $0x38] sm:$0xff]  ;;  %880 = vmatpush.bf16.msra.mxu1 %v856_v0  ;;  %252 = vmatpush.bf16.msra.mxu0 %v856_v0  ;;  %v854_v4 = vld [vmem:[%s1040_s1 + $0x8] sm:$0xff]  ;;  %v857_v5 = vld [vmem:[%s1040_s1 + $0x20] sm:$0xff]  ;;  %s882_s26 = smul.u32 20, %s1044_s13  ;;  %vm239_vm2 = vcmask 261120   ;;  %vm502_vm5 = vcmask 1045504  }
   0xd   : > { %333 = vmatpush.bf16.msra.mxu2 %v858_v1  ;;  %381 = vmatpush.bf16.msra.mxu3 %v860_v2  ;;  %v859_v6 = vld [vmem:[%s1040_s1 + $0x30] sm:$0xff]  ;;  %v862_v7 = vld [vmem:[%s1040_s1 + $0x48] sm:$0xff]  ;;  %v868_v9 = vld [vmem:[%s1040_s1 + $0x78] sm:$0xff]  ;;  %vm211_vm3 = vsmask.f32 7424  ;;  %s883_s4 = smul.u32 12, %s1044_s13 }
   0xe   : > { %v866_v8 = vld [vmem:[%s1040_s1 + $0x68] sm:$0xff]  ;;  %s965_s10 = scalar_lea.vmem %s1039_s0, %s882_s26  ;;  %v853_v12 = vld [vmem:[%s1040_s1] sm:$0xff]  ;;  %v867_v19 = vld [vmem:[%s1040_s1 + $0x70] sm:$0xff]  ;;  %vm401_vm4 = vsmask.f32 4352  ;;  %vm663_vm7 = vcmask 60416  }
   0xf   : > { %v879_v10 = vld [vmem:[%s965_s10 + $0x8] sm:$0xff]   ;;  %v872_v11 = vld [vmem:[%s965_s10] sm:$0xff]   ;;  %v176_v32 = vld [vmem:[%s965_s10 + $0x10] sm:$0x7]  ;;  %vm550_vm6 = vsmask.f32 5376  ;;  %s170_s7 = scalar_lea.vmem %s1042_s3, %s883_s4 }
  0x10   : > { %881 = vmatpush.bf16.msra.mxu1 %v855_v3  ;;  %253 = vmatpush.bf16.msra.mxu0 %v855_v3  ;;  %v877_v13 = vunpack.c.l.bf16 %v879_v10  ;;  %v878_v14 = vunpack.c.h.bf16 %v879_v10  ;;  %v873_v15 = vunpack.c.l.bf16 %v872_v11  ;;  %v874_v16 = vunpack.c.h.bf16 %v872_v11  ;;  %v861_v17 = vld [vmem:[%s1040_s1 + $0x40] sm:$0xff]  ;;  %v864_v48 = vld [vmem:[%s1040_s1 + $0x58] sm:$0xff]  ;;  %v870_v51 = vld [vmem:[%s1040_s1 + $0x88] sm:$0xff] }
  0x11   : > { %334 = vmatpush.bf16.msra.mxu2 %v857_v5  ;;  %382 = vmatpush.bf16.msra.mxu3 %v859_v6  ;;  %v865_v18 = vld [vmem:[%s1040_s1 + $0x60] sm:$0xff]  ;;  %v181_v35 = vunpack.c.l.bf16 %v176_v32  ;;  %v863_v54 = vld [vmem:[%s1040_s1 + $0x50] sm:$0xff] }
  0x12   : > { %v184_v20 = vmax.f32 %v877_v13, 0.0  ;;  %v185_v21 = vmax.f32 %v878_v14, 0.0  ;;  %v182_v22 = vmax.f32 %v873_v15, 0.0  ;;  %v183_v23 = vmax.f32 %v874_v16, 0.0  ;;  %v869_v55 = vld [vmem:[%s1040_s1 + $0x80] sm:$0xff] }
  0x13   : > { %v186_v52 = vmax.f32 %v181_v35, 0.0 }
  0x14   : > { %288 = vmatpush.bf16.msrb.mxu1 %v854_v4  ;;  %433 = vmatpush.bf16.msrb.mxu0 %v862_v7  ;;  %v189_v24 = vpack.c.bf16 %v184_v20, %v184_v20  ;;  %v190_v25 = vpack.c.bf16 %v185_v21, %v185_v21  ;;  %v187_v26 = vpack.c.bf16 %v182_v22, %v182_v22 }
  0x15   : > { %530 = vmatpush.bf16.msrb.mxu2 %v866_v8  ;;  %591 = vmatpush.bf16.msrb.mxu3 %v868_v9  ;;  %v188_v27 = vpack.c.bf16 %v183_v23, %v183_v23  ;;  %v191_v56 = vpack.c.bf16 %v186_v52, %v186_v52 }
  0x16   : > { %v981_v28 = vunpack.c.l.b16 %v189_v24  ;;  %v983_v29 = vunpack.c.l.b16 %v190_v25  ;;  %v205_v30 = vunpack.c.l.b16 %v187_v26 }
  0x17   : > { %v206_v31 = vunpack.c.l.b16 %v188_v27  ;;  %v500_v61 = vunpack.c.l.b16 %v191_v56 }
  0x18   : > { %289 = vmatpush.bf16.msrb.mxu1 %v853_v12  ;;  %434 = vmatpush.bf16.msrb.mxu0 %v861_v17  ;;  %v210_v33 = vpack.c.b16 %v983_v29, %v981_v28  ;;  %v264_v17 = vpack.c.b16 %v981_v28, %v981_v28  ;;  %v454_v21 = vpack.c.b16 %v983_v29, %v983_v29 }
  0x19   : > { %531 = vmatpush.bf16.msrb.mxu2 %v865_v18  ;;  %592 = vmatpush.bf16.msrb.mxu3 %v867_v19  ;;  %v209_v34 = vpack.c.b16 %v206_v31, %v205_v30  ;;  %v453_v0 = vpack.c.b16 %v981_v28, %v206_v31  ;;  %v501_v1 = vpack.c.b16 %v500_v61, %v983_v29  ;;  %v892_v61 = vld [vmem:[%s1041_s2] ss:$0 sm:$0xff] }
  0x1a   : > { %v220_v36 = vshll.u32 %v210_v33, 16  ;;  %v224_v37 = vshrl.u32 %v210_v33, 16  ;;  %v307_v41 = vrot.slane %v210_v33, 1  ;;  %v355_v43 = vrot.slane %v210_v33, 3 }
  0x1b   : > { %v213_v38 = vshrl.u32 %v209_v34, 16  ;;  %v215_v39 = vshll.u32 %v209_v34, 16  ;;  %v306_v40 = vrot.slane %v209_v34, 1  ;;  %v354_v42 = vrot.slane %v209_v34, 3 }
  0x1c   : > { %v222_v44 = vrot.slane %v220_v36, 1  ;;  %v405_v57 = vrot.slane %v224_v37, 3  ;;  %v406_v60 = vrot.slane %v220_v36, 4  ;;  %v551_v3 = vshrl.u32 %v453_v0, 16 }
  0x1d   : > { %v217_v45 = vrot.slane %v215_v39, 1  ;;  %v308_v46 = vsel %vm305_vm0, %v306_v40, %v307_v41  ;;  %v356_v47 = vsel %vm353_vm1, %v354_v42, %v355_v43  ;;  %v402_v58 = vrot.slane %v213_v38, 3 }
  0x1e   : > { %v226_v49 = vor.u32 %v224_v37, %v222_v44  ;;  %765 = vmatmul.msk.bf16.vlgmr.msra.gmra.mxu2 %vm239_vm2, %v308_v46  ;;  %779 = vmatmul.msk.bf16.vlgmr.msra.gmra.mxu3 %vm239_vm2, %v356_v47  ;;  %v403_v59 = vrot.slane %v215_v39, 4  ;;  %v407_v63 = vor.u32 %v406_v60, %v405_v57  ;;  %v554_v4 = vshll.u32 %v453_v0, 16 }
  0x1f   : > { %v218_v50 = vor.u32 %v217_v45, %v213_v38  ;;  %v559_v5 = vshrl.u32 %v501_v1, 16  ;;  %v562_v6 = vshll.u32 %v501_v1, 16  ;;  %v553_v7 = vrot.slane %v551_v3, 2 }
  0x20   : > { %742 = vmatmul.msk.bf16.vlgmr.msra.gmra.mxu1 %vm239_vm2, %v226_v49  ;;  %v404_v62 = vor.u32 %v403_v59, %v402_v58  ;;  %v556_v8 = vrot.slane %v554_v4, 3  ;;  %v503_v11 = vrot.slane %v453_v0, 2  ;;  %v504_v12 = vrot.slane %v501_v1, 2 }
  0x21   : > { %v223_v53 = vsel %vm211_vm3, %v218_v50, %v222_v44  ;;  %479 = vmatpush.bf16.msra.mxu1 %v864_v48  ;;  %v561_v9 = vrot.slane %v559_v5, 2  ;;  %v564_v10 = vrot.slane %v562_v6, 3  ;;  %v611_v18 = vrot.slane %v453_v0, 3 }
  0x22   : > { %741 = vmatmul.msk.bf16.vlgmr.msra.gmra.mxu0 %vm239_vm2, %v223_v53  ;;  %v408_v2 = vsel %vm401_vm4, %v404_v62, %v407_v63  ;;  %v557_v13 = vor.u32 %v556_v8, %v553_v7  ;;  %v505_v15 = vsel %vm502_vm5, %v503_v11, %v504_v12  ;;  %v612_v19 = vrot.slane %v501_v1, 3 }
  0x23   : > { %638 = vmatpush.bf16.msra.mxu0 %v870_v51  ;;  %v565_v14 = vor.u32 %v564_v10, %v561_v9 }
  0x24   : > { %v613_v20 = vsel %vm353_vm1, %v611_v18, %v612_v19 }
  0x25   : > { %480 = vmatpush.bf16.msra.mxu1 %v863_v54  ;;  %v566_v16 = vsel %vm550_vm6, %v557_v13, %v565_v14 }
  0x27   : > { %639 = vmatpush.bf16.msra.mxu0 %v869_v55 }
  0x2e   : > { %766 = vmatmul.msk.bf16.gmra.mxu2 %vm239_vm2, %v307_v41  ;;  %780 = vmatmul.msk.bf16.gmra.mxu3 %vm239_vm2, %v355_v43 }
  0x30   : > { %751 = vmatmul.msk.bf16.vlgmr.msrb.gmra.mxu1 %vm239_vm2, %v209_v34 }
  0x32   : > { %793 = vmatmul.msk.bf16.vlgmr.msrb.gmra.mxu0 %vm239_vm2, %v408_v2 }
  0x3e   : > { %821 = vmatmul.msk.bf16.vlgmr.msrb.gmra.mxu2 %vm239_vm2, %v505_v15  ;;  %835 = vmatmul.msk.bf16.vlgmr.msrb.gmra.mxu3 %vm239_vm2, %v566_v16 }
  0x40   : > { %752 = vmatmul.msk.bf16.gmra.mxu1 %vm239_vm2, %v264_v17 }
  0x42   : > { %794 = vmatmul.msk.bf16.gmra.mxu0 %vm239_vm2, %v407_v63 }
  0x4e   : > { %822 = vmatmul.msk.bf16.gmra.mxu2 %vm239_vm2, %v504_v12  ;;  %836 = vmatmul.msk.bf16.gmra.mxu3 %vm239_vm2, %v565_v14 }
  0x50   : > { %807 = vmatmul.msk.bf16.vlgmr.msra.gmra.mxu1 %vm239_vm2, %v453_v0 }
  0x52   : > { %849 = vmatmul.msk.bf16.vlgmr.msra.gmra.mxu0 %vm239_vm2, %v613_v20 }
  0x60   : > { %808 = vmatmul.msk.bf16.gmra.mxu1 %vm239_vm2, %v454_v21 }
  0x62   : > { %850 = vmatmul.msk.bf16.gmra.mxu0 %vm239_vm2, %v612_v19 }
  0x9d   : > { %v260_v22 = vpop.f32.mrf.mxu1 }
  0x9f   : > { %v255_v23 = vpop.f32.mrf.mxu0 }
  0xa1   : > { %v336_v24 = vpop.f32.mrf.mxu2  ;;  %v384_v25 = vpop.f32.mrf.mxu3 }
  0xa5   : > { %v262_v26 = vpop.f32.mrf.mxu1 }
  0xa7   : > { %v257_v27 = vpop.f32.mrf.mxu0 }
  0xa9   : > { %v338_v28 = vpop.f32.mrf.mxu2  ;;  %v386_v30 = vpop.f32.mrf.mxu3 }
  0xad   : > { %v291_v31 = vpop.f32.mrf.mxu1 }
  0xae   : > { %v292_v40 = vadd.f32 %v291_v31, %v255_v23 }
  0xaf   : > { %v436_v32 = vpop.f32.mrf.mxu0 }
  0xb0   : > { %v345_v43 = vadd.f32 %v336_v24, %v292_v40 }
  0xb1   : > { %v341_v33 = vpop.f32.mrf.mxu2  ;;  %v389_v34 = vpop.f32.mrf.mxu3 }
  0xb2   : > { %v393_v46 = vadd.f32 %v384_v25, %v345_v43 }
  0xb4   : > { %v445_v50 = vadd.f32 %v436_v32, %v393_v46 }
  0xb5   : > { %v293_v35 = vpop.f32.mrf.mxu1 }
  0xb6   : > { %v294_v47 = vadd.f32 %v293_v35, %v257_v27 }
  0xb7   : > { %v438_v36 = vpop.f32.mrf.mxu0 }
  0xb8   : > { %v346_v51 = vadd.f32 %v338_v28, %v294_v47 }
  0xb9   : > { %v343_v37 = vpop.f32.mrf.mxu2  ;;  %v391_v29 = vpop.f32.mrf.mxu3 }
  0xba   : > { %v394_v55 = vadd.f32 %v386_v30, %v346_v51 }
  0xbc   : > { %v446_v62 = vadd.f32 %v438_v36, %v394_v55 }
  0xbd   : > { %v296_v38 = vpop.f32.mrf.mxu1 }
  0xbe   : > { %v297_v56 = vadd.f32 %v296_v38, %v260_v22 }
  0xbf   : > { %v441_v39 = vpop.f32.mrf.mxu0 }
  0xc0   : > { %v347_v63 = vadd.f32 %v341_v33, %v297_v56 }
  0xc1   : > { %v533_v41 = vpop.f32.mrf.mxu2  ;;  %v594_v42 = vpop.f32.mrf.mxu3 }
  0xc2   : > { %v395_v5 = vadd.f32 %v389_v34, %v347_v63 }
  0xc4   : > { %v447_v11 = vadd.f32 %v441_v39, %v395_v5 }
  0xc5   : > { %v298_v44 = vpop.f32.mrf.mxu1 }
  0xc7   : > { %v443_v45 = vpop.f32.mrf.mxu0 }
  0xc9   : > { %v535_v48 = vpop.f32.mrf.mxu2  ;;  %v596_v49 = vpop.f32.mrf.mxu3 }
  0xcd   : > { %v482_v52 = vpop.f32.mrf.mxu1 }
  0xce   : > { %v491_v53 = vadd.f32 %v482_v52, %v445_v50 }
  0xcf   : > { %v641_v54 = vpop.f32.mrf.mxu0 }
  0xd0   : > { %v542_v57 = vadd.f32 %v533_v41, %v491_v53 }
  0xd1   : > { %v538_v58 = vpop.f32.mrf.mxu2  ;;  %v599_v59 = vpop.f32.mrf.mxu3 }
  0xd2   : > { %v603_v60 = vadd.f32 %v594_v42, %v542_v57 }
  0xd4   : > { %v650_v0 = vadd.f32 %v641_v54, %v603_v60 }
  0xd5   : > { %v484_v1 = vpop.f32.mrf.mxu1 }
  0xd6   : > { %v657_v2 = vadd.f32 %v892_v61, %v650_v0  ;;  %v492_v3 = vadd.f32 %v484_v1, %v446_v62 }
  0xd7   : > { %v643_v4 = vpop.f32.mrf.mxu0 }
  0xd8   : > { %v660_v6 = vpack.c.bf16 %v657_v2, %v657_v2  ;;  %v543_v7 = vadd.f32 %v535_v48, %v492_v3 }
  0xd9   : > { %v540_v8 = vpop.f32.mrf.mxu2  ;;  %v601_v9 = vpop.f32.mrf.mxu3 }
  0xda   : > { %664 = vst.msk [vmem:[%s170_s7] sm:$0xf] %vm663_vm7, %v660_v6  ;;  %v604_v10 = vadd.f32 %v596_v49, %v543_v7 }
  0xdc   : > { %v651_v12 = vadd.f32 %v643_v4, %v604_v10 }
  0xdd   : > { %v487_v13 = vpop.f32.mrf.mxu1 }
  0xde   : > { %v658_v14 = vadd.f32 %v892_v61, %v651_v12  ;;  %v493_v15 = vadd.f32 %v487_v13, %v447_v11 }
  0xdf   : > { %v646_v16 = vpop.f32.mrf.mxu0 }
  0xe0   : > { %v661_v17 = vpack.c.bf16 %v658_v14, %v658_v14  ;;  %v544_v18 = vadd.f32 %v538_v58, %v493_v15 }
  0xe2   : > { %665 = vst.msk [vmem:[%s170_s7 + $0x4] sm:$0xf] %vm663_vm7, %v661_v17  ;;  %v605_v19 = vadd.f32 %v599_v59, %v544_v18 }
  0xe4   : > { %v652_v20 = vadd.f32 %v646_v16, %v605_v19 }
  0xe5   : > { %v489_v21 = vpop.f32.mrf.mxu1 }
  0xe6   : > { %v659_v22 = vadd.f32 %v892_v61, %v652_v20 }
  0xe7   : > { %v648_v23 = vpop.f32.mrf.mxu0 }
  0xe8   : > { %v662_v24 = vpack.c.bf16 %v659_v22, %v659_v22 }
  0xea   : > { %666 = vst.msk [vmem:[%s170_s7 + $0x8] sm:$0xf] %vm663_vm7, %v662_v24 }
  0xeb PF: > { %s13_s12 = sadd.s32 1, %s899_s12  }
  0xec   : > { %p10_p4 = scmp.ge.s32.totalorder %s13_s12, 4  }
  0xee   :  { %12 = sbr.rel (!%p10_p4) target bundleno = 1 (0x1), region = 70 }

// kernel: vqvae2_forward.40
= control target key start
LH: loop header
LB: loop body
LE: loop exit
PB: predicated region body
PF: predicated region fallthrough
CT: control target
= control target key end

     0   :  { %s400_s15 = smov 0   ;;  %s426_s0 = inlined_call_operand.vmem [shape: bf16[2,16,8], index: 0, kind: input, shape index: {}]   ;;  %s427_s1 = inlined_call_operand.vmem [shape: bf16[1,8,32], index: 1, kind: input, shape index: {}]   ;;  %s428_s2 = inlined_call_operand.vmem [shape: f32[1,32], index: 2, kind: input, shape index: {}]   ;;  %s429_s3 = inlined_call_operand.vmem [shape: bf16[2,16,32], index: 3, kind: input, shape index: {}]   ;;  %s430_s4 = inlined_call_operand.vmem [shape: bf16[2,16,32], index: 4, kind: output, shape index: {}]  }
   0x1 LB: > { %s333_s16 = sadd.s32 4294967295, %s373_s15   ;;  %p337_p0 = scmp.ge.s32.totalorder %s373_s15, 1  ;;  %s373_s15 = sphi %s400_s15, %s14_s15  }
   0x2   : > { %p172_p1 = scmp.lt.s32.totalorder %s373_s15, 3 }
   0x4   : > { %p173_p2 = pnand %p337_p0, %p172_p1 }
   0x5   : > { %p203_p3 = scmp.lt.s32.totalorder (!%p173_p2), %s333_s16, 1 }
   0x6   : > { %176 = sbr.rel (%p173_p2) target bundleno = 164 (0xa4), region = 36 }
   0xb   : > { %v226_v0 = vld [vmem:[%s427_s1] sm:$0xf]  ;;  %vm235_vm0 = vcmask 1043456   ;;  %s432_s16 = smov (!%p203_p3, %s333_s16), 1  ;;  %vm231_vm1 = vcmask 64512   ;;  %vm263_vm2 = vcmask 257024  }
   0xc   : > { %v237_v1 = vsel %vm235_vm0, %v226_v0, 0  ;;  %s347_s19 = sshll.u32 %s432_s16, 3  ;;  %v366_v9 = vld [vmem:[%s428_s2] ss:$0 sm:$0xff] }
   0xd   : > { %246 = vmatpush.bf16.msra.mxu0 %v237_v1  ;;  %s207_s22 = scalar_lea.vmem %s426_s0, %s347_s19  ;;  %s212_s25 = scalar_lea.vmem %s429_s3, %s347_s19 }
   0xe   : > { %v351_v2 = vld [vmem:[%s207_s22] sm:$0xff]   ;;  %s217_s30 = scalar_lea.vmem %s430_s4, %s347_s19 }
   0xf   : > { %v352_v3 = vunpack.c.l.bf16 %v351_v2  ;;  %v353_v4 = vunpack.c.h.bf16 %v351_v2  ;;  %v355_v8 = vld [vmem:[%s212_s25] sm:$0xff]  }
  0x10   : > { %v356_v10 = vunpack.c.l.bf16 %v355_v8  ;;  %v357_v16 = vunpack.c.h.bf16 %v355_v8 }
  0x11   : > { %v223_v5 = vmax.f32 %v352_v3, 0.0  ;;  %v224_v6 = vmax.f32 %v353_v4, 0.0 }
  0x13   : > { %v225_v7 = vpack.c.bf16 %v224_v6, %v223_v5 }
  0x15   : > { %344 = vmatmul.msk.bf16.vlgmr.msra.gmra.mxu0 %vm231_vm1, %v225_v7 }
  0x92   : > { %v248_v11 = vpop.f32.mrf.mxu0 }
  0x93   : > { %v249_v12 = vadd.f32 %v366_v9, %v248_v11 }
  0x95   : > { %v257_v13 = vadd.f32 %v356_v10, %v249_v12 }
  0x97   : > { %v259_v14 = vmax.f32 %v257_v13, 0.0 }
  0x99   : > { %v261_v15 = vpack.c.bf16 %v259_v14, %v259_v14 }
  0x9a   : > { %v250_v17 = vpop.f32.mrf.mxu0 }
  0x9b   : > { %264 = vst.msk [vmem:[%s217_s30] sm:$0xf] %vm263_vm2, %v261_v15  ;;  %v251_v18 = vadd.f32 %v366_v9, %v250_v17 }
  0x9d   : > { %v258_v19 = vadd.f32 %v357_v16, %v251_v18 }
  0x9f   : > { %v260_v20 = vmax.f32 %v258_v19, 0.0 }
  0xa1   : > { %v262_v21 = vpack.c.bf16 %v260_v20, %v260_v20 }
  0xa3   : > { %265 = vst.msk [vmem:[%s217_s30 + $0x4] sm:$0xf] %vm263_vm2, %v262_v21 }
  0xa4 PF: > { %s14_s15 = sadd.s32 1, %s373_s15  }
  0xa5   : > { %p11_p4 = scmp.ge.s32.totalorder %s14_s15, 4  }
  0xa7   :  { %13 = sbr.rel (!%p11_p4) target bundleno = 1 (0x1), region = 69 }

// kernel: vqvae2_forward.41
= control target key start
LH: loop header
LB: loop body
LE: loop exit
PB: predicated region body
PF: predicated region fallthrough
CT: control target
= control target key end

     0   :  { %s343_s12 = smov 0   ;;  %s369_s0 = inlined_call_operand.vmem [shape: bf16[2,16,32], index: 0, kind: input, shape index: {}]   ;;  %s370_s1 = inlined_call_operand.vmem [shape: bf16[1,32,16], index: 1, kind: input, shape index: {}]   ;;  %s371_s2 = inlined_call_operand.vmem [shape: f32[1,16], index: 2, kind: input, shape index: {}]   ;;  %s372_s3 = inlined_call_operand.vmem [shape: bf16[2,16,16], index: 3, kind: output, shape index: {}]  }
   0x1 LB: > { %s277_s13 = sadd.s32 4294967295, %s321_s12   ;;  %p281_p0 = scmp.ge.s32.totalorder %s321_s12, 1  ;;  %s321_s12 = sphi %s343_s12, %s13_s12  }
   0x2   : > { %p137_p1 = scmp.lt.s32.totalorder %s321_s12, 3 }
   0x4   : > { %p138_p2 = pnand %p281_p0, %p137_p1 }
   0x5   : > { %p161_p3 = scmp.lt.s32.totalorder (!%p138_p2), %s277_s13, 1 }
   0x6   : > { %141 = sbr.rel (%p138_p2) target bundleno = 158 (0x9e), region = 32 }
   0xb   : > { %v305_v0 = vld [vmem:[%s370_s1 + $0x8] sm:$0xff]  ;;  %v304_v1 = vld [vmem:[%s370_s1] sm:$0xff]  ;;  %s374_s13 = smov (!%p161_p3, %s277_s13), 1  ;;  %vm199_vm0 = vcmask 261120   ;;  %vm219_vm1 = vcmask 125952  }
   0xc   : > { %209 = vmatpush.bf16.msra.mxu0 %v305_v0  ;;  %s301_s18 = sshll.u32 %s374_s13, 3  ;;  %v314_v3 = vld [vmem:[%s371_s2] ss:$0 sm:$0xff] }
   0xd   : > { %s165_s21 = scalar_lea.vmem %s369_s0, %s301_s18  ;;  %s170_s26 = scalar_lea.vmem %s372_s3, %s301_s18 }
   0xe   : > { %v303_v2 = vld [vmem:[%s165_s21] sm:$0xff] }
  0x10   : > { %210 = vmatpush.bf16.msra.mxu0 %v304_v1 }
  0x13   : > { %298 = vmatmul.msk.bf16.vlgmr.msra.gmra.mxu0 %vm199_vm0, %v303_v2 }
  0x90   : > { %v212_v4 = vpop.f32.mrf.mxu0 }
  0x91   : > { %v213_v5 = vadd.f32 %v314_v3, %v212_v4 }
  0x93   : > { %v217_v6 = vpack.c.bf16 %v213_v5, %v213_v5 }
  0x95   : > { %220 = vst.msk [vmem:[%s170_s26] sm:$0xf] %vm219_vm1, %v217_v6 }
  0x98   : > { %v214_v7 = vpop.f32.mrf.mxu0 }
  0x99   : > { %v215_v8 = vadd.f32 %v314_v3, %v214_v7 }
  0x9b   : > { %v218_v9 = vpack.c.bf16 %v215_v8, %v215_v8 }
  0x9d   : > { %221 = vst.msk [vmem:[%s170_s26 + $0x4] sm:$0xf] %vm219_vm1, %v218_v9 }
  0x9e PF: > { %s13_s12 = sadd.s32 1, %s321_s12  }
  0x9f   : > { %p10_p4 = scmp.ge.s32.totalorder %s13_s12, 4  }
  0xa1   :  { %12 = sbr.rel (!%p10_p4) target bundleno = 1 (0x1), region = 62 }

// kernel: vqvae2_forward.42
= control target key start
LH: loop header
LB: loop body
LE: loop exit
PB: predicated region body
PF: predicated region fallthrough
CT: control target
= control target key end

     0   :  { %vm86_vm0 = vcmask 130048   ;;  %s3078_s1 = inlined_call_operand.vmem [shape: f32[16,128], index: 1, kind: input, shape index: {}]   ;;  %s3079_s0 = inlined_call_operand.vmem [shape: bf16[256,16], index: 0, kind: input, shape index: {}]   ;;  %s3080_s2 = inlined_call_operand.vmem [shape: f32[1,128], index: 2, kind: input, shape index: {}]   ;;  %s3081_s3 = inlined_call_operand.vmem [shape: f32[128,16], index: 3, kind: input, shape index: {}]   ;;  %s3082_s4 = inlined_call_operand.vmem [shape: bf16[256,16], index: 4, kind: output, shape index: {0}]   ;;  %s3083_s5 = inlined_call_operand.vmem [shape: f32[256,1], index: 5, kind: output, shape index: {1}]  }
   0x1   :  { %v85_v0 = vld [vmem:[%s3078_s1 + $0x8] sm:$0xff]  ;;  %v84_v1 = vld [vmem:[%s3078_s1] sm:$0xff]  ;;  %v1714_v9 = vld [vmem:[%s3079_s0 + $0x50] sm:$0xff]  }
   0x2   :  { %v1683_v2 = vld [vmem:[%s3079_s0] sm:$0xff]   ;;  %197 = vmatpush.msra.mxu0 %v85_v0  ;;  %1607 = vmatpush.msra.mxu3 %v85_v0  ;;  %v1689_v4 = vld [vmem:[%s3079_s0 + $0x48] sm:$0xff]   ;;  %3154 = vst [vmem:[#allocation5_spill] sm:$0xff] %v1714_v9  ;;  %v3086_v11 = vunpack.c.l.bf16 %v1714_v9  ;;  %v3095_v13 = vunpack.c.h.bf16 %v1714_v9  ;;  %v1735_v14 = vld [vmem:[%s3079_s0 + $0x10] sm:$0xff]  }
   0x3   :  { %3151 = vst [vmem:[#allocation2_spill] sm:$0xff] %v1683_v2  ;;  %v3114_v3 = vunpack.c.l.bf16 %v1683_v2  ;;  %v3098_v5 = vunpack.c.l.bf16 %v1689_v4  ;;  %v3115_v6 = vunpack.c.h.bf16 %v1683_v2  ;;  %v3097_v7 = vunpack.c.h.bf16 %v1689_v4  ;;  %v1709_v8 = vld [vmem:[%s3079_s0 + $0x8] sm:$0xff]   ;;  %v1740_v15 = vld [vmem:[%s3079_s0 + $0x58] sm:$0xff]   ;;  %v1766_v21 = vld [vmem:[%s3079_s0 + $0x60] sm:$0xff]  }
   0x4   :  { %3152 = vst [vmem:[#allocation3_spill] sm:$0xff] %v1689_v4  ;;  %198 = vmatpush.msra.mxu0 %v84_v1  ;;  %1608 = vmatpush.msra.mxu3 %v84_v1  ;;  %v3113_v10 = vunpack.c.l.bf16 %v1709_v8  ;;  %v3112_v12 = vunpack.c.h.bf16 %v1709_v8  ;;  %v3111_v16 = vunpack.c.l.bf16 %v1735_v14  ;;  %v3094_v17 = vunpack.c.l.bf16 %v1740_v15  ;;  %v1761_v20 = vld [vmem:[%s3079_s0 + $0x18] sm:$0xff]   ;;  %v1787_v26 = vld [vmem:[%s3079_s0 + $0x20] sm:$0xff]   ;;  %v1792_v27 = vld [vmem:[%s3079_s0 + $0x68] sm:$0xff]  }
   0x5   :  { %1432 = vmatmul.msk.f32.vlgmr.msra.gmra.mxu0 %vm86_vm0, %v3114_v3  ;;  %1450 = vmatmul.msk.f32.vlgmr.msra.gmra.mxu3 %vm86_vm0, %v3098_v5  ;;  %3153 = vst [vmem:[#allocation4_spill] sm:$0xff] %v1709_v8  ;;  %v3110_v18 = vunpack.c.h.bf16 %v1735_v14  ;;  %v3085_v19 = vunpack.c.h.bf16 %v1740_v15  ;;  %v3109_v22 = vunpack.c.l.bf16 %v1761_v20  ;;  %v3093_v23 = vunpack.c.l.bf16 %v1766_v21  ;;  %v1809_v31 = vld [vmem:[%s3079_s0 + $0x28] sm:$0xff]   ;;  %v1822_v34 = vld [vmem:[%s3079_s0 + $0x30] sm:$0xff]   ;;  %v1835_v37 = vld [vmem:[%s3079_s0 + $0x38] sm:$0xff]  }
   0x6   :  { %3155 = vst [vmem:[#allocation6_spill] sm:$0xff] %v1735_v14  ;;  %v3108_v24 = vunpack.c.h.bf16 %v1761_v20  ;;  %v3090_v25 = vunpack.c.h.bf16 %v1766_v21  ;;  %v3107_v28 = vunpack.c.l.bf16 %v1787_v26  ;;  %v3084_v29 = vunpack.c.l.bf16 %v1792_v27  ;;  %v1848_v40 = vld [vmem:[%s3079_s0 + $0x40] sm:$0xff]  }
   0x7   :  { %3156 = vst [vmem:[#allocation7_spill] sm:$0xff] %v1740_v15  ;;  %v3106_v30 = vunpack.c.h.bf16 %v1787_v26  ;;  %v3105_v32 = vunpack.c.l.bf16 %v1809_v31  ;;  %v3104_v33 = vunpack.c.h.bf16 %v1809_v31  ;;  %v3103_v35 = vunpack.c.l.bf16 %v1822_v34  ;;  %v1854_v42 = vld [vmem:[%s3080_s2] ss:$0 sm:$0xff] }
   0x8   :  { %3157 = vst [vmem:[#allocation8_spill] sm:$0xff] %v1761_v20  ;;  %v3100_v36 = vunpack.c.h.bf16 %v1822_v34  ;;  %v3091_v38 = vunpack.c.l.bf16 %v1835_v37  ;;  %v3101_v39 = vunpack.c.h.bf16 %v1835_v37  ;;  %v3099_v41 = vunpack.c.l.bf16 %v1848_v40 }
   0x9   :  { %3158 = vst [vmem:[#allocation9_spill] sm:$0xff] %v1766_v21  ;;  %v3087_v48 = vunpack.c.h.bf16 %v1848_v40 }
   0xa   :  { %3159 = vst [vmem:[#allocation10_spill] sm:$0xff] %v1787_v26 }
   0xb   :  { %3160 = vst [vmem:[#allocation11_spill] sm:$0xff] %v1792_v27 }
   0xc   :  { %3161 = vst [vmem:[#allocation12_spill] sm:$0xff] %v1809_v31 }
   0xd   :  { %1433 = vmatmul.msk.f32.gmra.mxu0 %vm86_vm0, %v3115_v6  ;;  %1451 = vmatmul.msk.f32.gmra.mxu3 %vm86_vm0, %v3097_v7  ;;  %3162 = vst [vmem:[#allocation13_spill] sm:$0xff] %v1822_v34 }
   0xe   :  { %3163 = vst [vmem:[#allocation14_spill] sm:$0xff] %v1835_v37 }
   0xf   :  { %3164 = vst [vmem:[#allocation15_spill] sm:$0xff] %v1848_v40 }
  0x15   :  { %1434 = vmatmul.msk.f32.gmra.mxu0 %vm86_vm0, %v3113_v10  ;;  %1452 = vmatmul.msk.f32.gmra.mxu3 %vm86_vm0, %v3086_v11 }
  0x1d   :  { %1435 = vmatmul.msk.f32.gmra.mxu0 %vm86_vm0, %v3112_v12  ;;  %1453 = vmatmul.msk.f32.gmra.mxu3 %vm86_vm0, %v3095_v13 }
  0x25   :  { %1436 = vmatmul.msk.f32.gmra.mxu0 %vm86_vm0, %v3111_v16  ;;  %1454 = vmatmul.msk.f32.gmra.mxu3 %vm86_vm0, %v3094_v17 }
  0x2d   :  { %1437 = vmatmul.msk.f32.gmra.mxu0 %vm86_vm0, %v3110_v18  ;;  %1455 = vmatmul.msk.f32.gmra.mxu3 %vm86_vm0, %v3085_v19 }
  0x35   :  { %1438 = vmatmul.msk.f32.gmra.mxu0 %vm86_vm0, %v3109_v22  ;;  %1456 = vmatmul.msk.f32.gmra.mxu3 %vm86_vm0, %v3093_v23 }
  0x3d   :  { %1439 = vmatmul.msk.f32.gmra.mxu0 %vm86_vm0, %v3108_v24  ;;  %1457 = vmatmul.msk.f32.gmra.mxu3 %vm86_vm0, %v3090_v25 }
  0x45   :  { %1440 = vmatmul.msk.f32.gmra.mxu0 %vm86_vm0, %v3107_v28  ;;  %1458 = vmatmul.msk.f32.gmra.mxu3 %vm86_vm0, %v3084_v29  ;;  %v1932_v29 = vld [vmem:[%s3079_s0 + $0x70] sm:$0xff]  }
  0x46   :  { %3165 = vst [vmem:[#allocation16_spill] sm:$0xff] %v1932_v29  ;;  %v3089_v19 = vunpack.c.l.bf16 %v1932_v29 }
  0x4d   :  { %1441 = vmatmul.msk.f32.gmra.mxu0 %vm86_vm0, %v3106_v30 }
  0x55   :  { %1442 = vmatmul.msk.f32.gmra.mxu0 %vm86_vm0, %v3105_v32 }
  0x5d   :  { %1443 = vmatmul.msk.f32.gmra.mxu0 %vm86_vm0, %v3104_v33 }
  0x65   :  { %1444 = vmatmul.msk.f32.gmra.mxu0 %vm86_vm0, %v3103_v35 }
  0x6d   :  { %1445 = vmatmul.msk.f32.gmra.mxu0 %vm86_vm0, %v3100_v36 }
  0x75   :  { %1446 = vmatmul.msk.f32.gmra.mxu0 %vm86_vm0, %v3091_v38 }
  0x7d   :  { %1447 = vmatmul.msk.f32.gmra.mxu0 %vm86_vm0, %v3101_v39 }
  0x82   :  { %v200_v43 = vpop.f32.mrf.mxu0 }
  0x83   :  { %v296_v44 = vmul.f32 2.0, %v200_v43 }
  0x85   :  { %1448 = vmatmul.msk.f32.gmra.mxu0 %vm86_vm0, %v3099_v41  ;;  %v1860_v45 = vsub.f32 %v1854_v42, %v296_v44 }
  0x87   :  { %363 = vmin.xlane.f32.xlu0 %v1860_v45 }
  0x88   :  { %v254_v46 = vpop.f32.mrf.mxu3 }
  0x89   :  { %v314_v47 = vmul.f32 2.0, %v254_v46 }
  0x8a   :  { %v203_v49 = vpop.f32.mrf.mxu0 }
  0x8b   :  { %v297_v50 = vmul.f32 2.0, %v203_v49  ;;  %v1865_v51 = vsub.f32 %v1854_v42, %v314_v47 }
  0x8d   :  { %1449 = vmatmul.msk.f32.gmra.mxu0 %vm86_vm0, %v3087_v48  ;;  %v1871_v52 = vsub.f32 %v1854_v42, %v297_v50 }
  0x8f   :  { %399 = vmin.xlane.f32.xlu0 %v1865_v51  ;;  %365 = vmin.xlane.f32.xlu1 %v1871_v52 }
  0x90   :  { %v257_v53 = vpop.f32.mrf.mxu3 }
  0x91   :  { %v315_v54 = vmul.f32 2.0, %v257_v53 }
  0x92   :  { %v206_v55 = vpop.f32.mrf.mxu0 }
  0x93   :  { %v1876_v56 = vsub.f32 %v1854_v42, %v315_v54  ;;  %v298_v57 = vmul.f32 2.0, %v206_v55 }
  0x95   :  { %401 = vmin.xlane.f32.xlu2 %v1876_v56  ;;  %v1883_v62 = vsub.f32 %v1854_v42, %v298_v57 }
  0x98   :  { %v260_v58 = vpop.f32.mrf.mxu3 }
  0x99   :  { %v316_v59 = vmul.f32 2.0, %v260_v58 }
  0x9a   :  { %v209_v60 = vpop.f32.mrf.mxu0 }
  0x9b   :  { %v1880_v61 = vsub.f32 %v1854_v42, %v316_v59  ;;  %v299_v63 = vmul.f32 2.0, %v209_v60 }
  0x9d   :  { %403 = vmin.xlane.f32.xlu1 %v1880_v61  ;;  %367 = vmin.xlane.f32.xlu2 %v1883_v62  ;;  %v1888_v44 = vsub.f32 %v1854_v42, %v299_v63 }
  0xa0   :  { %v263_v0 = vpop.f32.mrf.mxu3 }
  0xa1   :  { %v317_v46 = vmul.f32 2.0, %v263_v0 }
  0xa2   :  { %v212_v1 = vpop.f32.mrf.mxu0 }
  0xa3   :  { %v300_v43 = vmul.f32 2.0, %v212_v1  ;;  %v1896_v53 = vsub.f32 %v1854_v42, %v317_v46 }
  0xa5   :  { %369 = vmin.xlane.f32.xlu1 %v1888_v44  ;;  %v1892_v47 = vsub.f32 %v1854_v42, %v300_v43 }
  0xa7   :  { %371 = vmin.xlane.f32.xlu0 %v1892_v47 }
  0xa8   :  { %v266_v49 = vpop.f32.mrf.mxu3 }
  0xa9   :  { %v318_v50 = vmul.f32 2.0, %v266_v49 }
  0xaa   :  { %v215_v54 = vpop.f32.mrf.mxu0 }
  0xab   :  { %v1899_v55 = vsub.f32 %v1854_v42, %v318_v50  ;;  %v301_v57 = vmul.f32 2.0, %v215_v54 }
  0xad   :  { %407 = vmin.xlane.f32.xlu2 %v1899_v55  ;;  %405 = vmin.xlane.f32.xlu1 %v1896_v53  ;;  %v1907_v0 = vsub.f32 %v1854_v42, %v301_v57 }
  0xb0   :  { %v269_v58 = vpop.f32.mrf.mxu3 }
  0xb1   :  { %v319_v59 = vmul.f32 2.0, %v269_v58  ;;  %v3088_v58 = vunpack.c.h.bf16 %v1792_v27 }
  0xb2   :  { %v218_v60 = vpop.f32.mrf.mxu0 }
  0xb3   :  { %v1904_v63 = vsub.f32 %v1854_v42, %v319_v59  ;;  %v302_v1 = vmul.f32 2.0, %v218_v60  ;;  %1459 = vmatmul.msk.f32.gmra.mxu3 %vm86_vm0, %v3088_v58  ;;  %v3092_v58 = vunpack.c.h.bf16 %v1932_v29 }
  0xb5   :  { %409 = vmin.xlane.f32.xlu0 %v1904_v63  ;;  %373 = vmin.xlane.f32.xlu2 %v1907_v0  ;;  %v1915_v54 = vsub.f32 %v1854_v42, %v302_v1 }
  0xb8   :  { %v272_v43 = vpop.f32.mrf.mxu3 }
  0xb9   :  { %v320_v46 = vmul.f32 2.0, %v272_v43 }
  0xba   :  { %v221_v49 = vpop.f32.mrf.mxu0 }
  0xbb   :  { %v1912_v50 = vsub.f32 %v1854_v42, %v320_v46  ;;  %v303_v57 = vmul.f32 2.0, %v221_v49  ;;  %1460 = vmatmul.msk.f32.gmra.mxu3 %vm86_vm0, %v3089_v19 }
  0xbd   :  { %411 = vmin.xlane.f32.xlu1 %v1912_v50  ;;  %375 = vmin.xlane.f32.xlu0 %v1915_v54  ;;  %v1927_v1 = vsub.f32 %v1854_v42, %v303_v57 }
  0xc0   :  { %v275_v59 = vpop.f32.mrf.mxu3 }
  0xc1   :  { %v321_v60 = vmul.f32 2.0, %v275_v59 }
  0xc2   :  { %v224_v43 = vpop.f32.mrf.mxu0 }
  0xc3   :  { %v1924_v46 = vsub.f32 %v1854_v42, %v321_v60  ;;  %v304_v49 = vmul.f32 2.0, %v224_v43  ;;  %1461 = vmatmul.msk.f32.gmra.mxu3 %vm86_vm0, %v3092_v58 }
  0xc5   :  { %413 = vmin.xlane.f32.xlu2 %v1924_v46  ;;  %377 = vmin.xlane.f32.xlu1 %v1927_v1  ;;  %v1944_v48 = vsub.f32 %v1854_v42, %v304_v49  ;;  %v1958_v49 = vld [vmem:[%s3079_s0 + $0x78] sm:$0xff]  }
  0xc6   :  { %3166 = vst [vmem:[#allocation17_spill] sm:$0xff] %v1958_v49  ;;  %v3102_v58 = vunpack.c.h.bf16 %v1958_v49 }
  0xc8   :  { %v278_v59 = vpop.f32.mrf.mxu3 }
  0xc9   :  { %v322_v60 = vmul.f32 2.0, %v278_v59 }
  0xca   :  { %v227_v57 = vpop.f32.mrf.mxu0 }
  0xcb   :  { %v1941_v11 = vsub.f32 %v1854_v42, %v322_v60  ;;  %v305_v43 = vmul.f32 2.0, %v227_v57  ;;  %v3096_v60 = vunpack.c.l.bf16 %v1958_v49 }
  0xcd   :  { %415 = vmin.xlane.f32.xlu0 %v1941_v11  ;;  %379 = vmin.xlane.f32.xlu2 %v1944_v48  ;;  %v1953_v25 = vsub.f32 %v1854_v42, %v305_v43 }
  0xce   :  { %1462 = vmatmul.msk.f32.gmra.mxu3 %vm86_vm0, %v3096_v60 }
  0xd2   :  { %v230_v19 = vpop.f32.mrf.mxu0 }
  0xd3   :  { %v306_v59 = vmul.f32 2.0, %v230_v19 }
  0xd5   :  { %381 = vmin.xlane.f32.xlu0 %v1953_v25  ;;  %v1963_v38 = vsub.f32 %v1854_v42, %v306_v59  ;;  %v427_v59 = vlaneseq }
  0xd6   :  { %1463 = vmatmul.msk.f32.gmra.mxu3 %vm86_vm0, %v3102_v58 }
  0xd7   :  { %383 = vmin.xlane.f32.xlu1 %v1963_v38  ;;  %v1979_v17 = vand.u32 127, %v427_v59 }
  0xda   :  { %v233_v19 = vpop.f32.mrf.mxu0 }
  0xdb   :  { %v307_v58 = vmul.f32 2.0, %v233_v19 }
  0xe2   :  { %v1969_v57 = vpop.f32.mrf.mxu0 }
  0xea   :  { %v1971_v43 = vpop.f32.mrf.mxu0 }
  0xf2   :  { %v1974_v23 = vpop.f32.mrf.mxu0 }
  0xfa   :  { %v364_v13 = vpop.xlane.xlu0 %363  ;;  %v245_v60 = vpop.f32.mrf.mxu0 }
  0xfb   :  { %vm429_vm1 = vcmp.le.f32.partialorder %v1860_v45, %v364_v13  ;;  %v311_v7 = vmul.f32 2.0, %v245_v60  ;;  %v1995_v60 = vsub.f32 %v1854_v42, %v307_v58 }
  0xfc   :  { %v1983_v5 = vsel %vm429_vm1, %v1979_v17, 128 }
  0xfd   :  { %v1986_v41 = vsub.f32 %v1854_v42, %v311_v7  ;;  %v494_v36 = vshra.s32 %v1983_v5, 16 }
  0xff   :  { %393 = vmin.xlane.f32.xlu0 %v1986_v41  ;;  %v1990_v39 = vcvt.s32.f32 %v494_v36 }
 0x101   :  { %497 = vmin.xlane.f32.xlu2 %v1990_v39 }
 0x102   :  { %v400_v59 = vpop.xlane.xlu0 %399  ;;  %v248_v13 = vpop.f32.mrf.mxu0 }
 0x103   :  { %vm447_vm2 = vcmp.le.f32.partialorder %v1865_v51, %v400_v59  ;;  %v312_v45 = vmul.f32 2.0, %v248_v13  ;;  %v366_v36 = vpop.xlane.xlu1 %365 }
 0x104   :  { %v1998_v7 = vsel %vm447_vm2, %v1979_v17, 128  ;;  %vm430_vm4 = vcmp.le.f32.partialorder %v1871_v52, %v366_v36 }
 0x105   :  { %v2001_v35 = vsub.f32 %v1854_v42, %v312_v45  ;;  %v746_v51 = vshra.s32 %v1998_v7, 16  ;;  %v2017_v30 = vsel %vm430_vm4, %v1979_v17, 128 }
 0x107   :  { %385 = vmin.xlane.f32.xlu0 %v1995_v60  ;;  %395 = vmin.xlane.f32.xlu1 %v2001_v35  ;;  %v2012_v33 = vcvt.s32.f32 %v746_v51 }
 0x108   :  { %v402_v19 = vpop.xlane.xlu2 %401 }
 0x109   :  { %vm448_vm3 = vcmp.le.f32.partialorder %v1876_v56, %v402_v19  ;;  %v508_v19 = vshra.s32 %v2017_v30, 16 }
 0x10a   :  { %v2008_v59 = vsel %vm448_vm3, %v1979_v17, 128  ;;  %v251_v58 = vpop.f32.mrf.mxu0 }
 0x10b   :  { %v760_v13 = vshra.s32 %v2008_v59, 16  ;;  %v313_v45 = vmul.f32 2.0, %v251_v58  ;;  %v2036_v28 = vcvt.s32.f32 %v508_v19 }
 0x10d   :  { %v2014_v32 = vcvt.s32.f32 %v760_v13  ;;  %v2020_v56 = vsub.f32 %v1854_v42, %v313_v45 }
 0x10f   :  { %749 = vmin.xlane.f32.xlu0 %v2012_v33  ;;  %763 = vmin.xlane.f32.xlu1 %v2014_v32 }
 0x110   :  { %397 = vmin.xlane.f32.xlu2 %v2020_v56  ;;  %v404_v52 = vpop.xlane.xlu1 %403  ;;  %v368_v36 = vpop.xlane.xlu2 %367 }
 0x111   :  { %vm449_vm5 = vcmp.le.f32.partialorder %v1880_v61, %v404_v52  ;;  %vm431_vm6 = vcmp.le.f32.partialorder %v1883_v62, %v368_v36 }
 0x112   :  { %v2029_v51 = vsel %vm449_vm5, %v1979_v17, 128  ;;  %v2032_v58 = vsel %vm431_vm6, %v1979_v17, 128 }
 0x113   :  { %v522_v13 = vshra.s32 %v2032_v58, 16  ;;  %v774_v45 = vshra.s32 %v2029_v51, 16 }
 0x115   :  { %v2038_v24 = vcvt.s32.f32 %v522_v13  ;;  %v2040_v22 = vcvt.s32.f32 %v774_v45 }
 0x117   :  { %511 = vmin.xlane.f32.xlu0 %v2036_v28  ;;  %525 = vmin.xlane.f32.xlu1 %v2038_v24 }
 0x118   :  { %777 = vmin.xlane.f32.xlu2 %v2040_v22  ;;  %v370_v61 = vpop.xlane.xlu1 %369 }
 0x119   :  { %vm432_vm7 = vcmp.le.f32.partialorder %v1888_v44, %v370_v61 }
 0x11a   :  { %v2047_v62 = vsel %vm432_vm7, %v1979_v17, 128  ;;  %v372_v52 = vpop.xlane.xlu0 %371 }
 0x11b   :  { %vm433_vm8 = vcmp.le.f32.partialorder %v1892_v47, %v372_v52  ;;  %v536_v36 = vshra.s32 %v2047_v62, 16 }
 0x11c   :  { %v2052_v19 = vsel %vm433_vm8, %v1979_v17, 128 }
 0x11d   :  { %v2054_v13 = vcvt.s32.f32 %v536_v36  ;;  %v550_v45 = vshra.s32 %v2052_v19, 16 }
 0x11f   :  { %v2057_v18 = vcvt.s32.f32 %v550_v45 }
 0x120   :  { %539 = vmin.xlane.f32.xlu2 %v2054_v13  ;;  %v408_v44 = vpop.xlane.xlu2 %407  ;;  %v406_v61 = vpop.xlane.xlu1 %405 }
 0x121   :  { %vm450_vm9 = vcmp.le.f32.partialorder %v1896_v53, %v406_v61  ;;  %553 = vmin.xlane.f32.xlu0 %v2057_v18  ;;  %vm451_vm12 = vcmp.le.f32.partialorder %v1899_v55, %v408_v44 }
 0x122   :  { %v2063_v47 = vsel %vm450_vm9, %v1979_v17, 128 }
 0x123   :  { %v788_v52 = vshra.s32 %v2063_v47, 16 }
 0x125   :  { %v2066_v16 = vcvt.s32.f32 %v788_v52 }
 0x128   :  { %791 = vmin.xlane.f32.xlu2 %v2066_v16  ;;  %v2069_v36 = vpop.xlane.xlu0 %409  ;;  %v374_v45 = vpop.xlane.xlu2 %373 }
 0x129   :  { %vm434_vm10 = vcmp.le.f32.partialorder %v1907_v0, %v374_v45  ;;  %v2088_v45 = vsel %vm451_vm12, %v1979_v17, 128  ;;  %vm452_vm5 = vcmp.le.f32.partialorder %v1904_v63, %v2069_v36 }
 0x12a   :  { %v2073_v12 = vsel %vm434_vm10, %v1979_v17, 128 }
 0x12b   :  { %v564_v53 = vshra.s32 %v2073_v12, 16 }
 0x12d   :  { %v2076_v61 = vcvt.s32.f32 %v564_v53  ;;  %v802_v53 = vshra.s32 %v2088_v45, 16 }
 0x12f   :  { %v2092_v6 = vcvt.s32.f32 %v802_v53  ;;  %v493_v53 = vand.u32 65535, %v1983_v5 }
 0x130   :  { %567 = vmin.xlane.f32.xlu2 %v2076_v61  ;;  %v376_v10 = vpop.xlane.xlu0 %375  ;;  %v2097_v29 = vpop.xlane.xlu1 %411 }
 0x131   :  { %vm435_vm11 = vcmp.le.f32.partialorder %v1915_v54, %v376_v10  ;;  %3167 = vst [vmem:[#allocation18_spill] sm:$0xff] %v2092_v6  ;;  %v495_v37 = vcvt.s32.f32 %v493_v53 }
 0x132   :  { %v2081_v52 = vsel %vm435_vm11, %v1979_v17, 128 }
 0x133   :  { %v578_v3 = vshra.s32 %v2081_v52, 16 }
 0x135   :  { %v2085_v0 = vcvt.s32.f32 %v578_v3 }
 0x136   :  { %v281_v10 = vpop.f32.mrf.mxu3 }
 0x138   :  { %581 = vmin.xlane.f32.xlu2 %v2085_v0  ;;  %v2099_v55 = vpop.xlane.xlu2 %413  ;;  %v378_v27 = vpop.xlane.xlu1 %377 }
 0x139   :  { %vm436_vm3 = vcmp.le.f32.partialorder %v1927_v1, %v378_v27 }
 0x13e   :  { %v284_v49 = vpop.f32.mrf.mxu3 }
 0x140   :  { %805 = vmin.xlane.f32.xlu2 %v2092_v6  ;;  %v2095_v54 = vpop.xlane.xlu0 %415  ;;  %v2105_v21 = vpop.xlane.xlu2 %379 }
 0x141   :  { %vm437_vm7 = vcmp.le.f32.partialorder %v1944_v48, %v2105_v21 }
 0x146   :  { %v2103_v44 = vpop.f32.mrf.mxu3 }
 0x148   :  { %v2101_v3 = vpop.xlane.xlu0 %381 }
 0x149   :  { %vm438_vm11 = vcmp.le.f32.partialorder %v1953_v25, %v2101_v3  ;;  %v1048_v3 = vld [vmem:[%s3081_s3 + $0x58] sm:$0xff] }
 0x14a   :  { %v2108_v9 = vpop.xlane.xlu1 %383 }
 0x151   :  { %v290_v34 = vpop.f32.mrf.mxu3 }
 0x152   :  { %v326_v20 = vmul.f32 2.0, %v290_v34 }
 0x154   :  { %v2125_v8 = vsub.f32 %v1854_v42, %v326_v20  ;;  %v507_v20 = vand.u32 65535, %v2017_v30 }
 0x172   :  { %v394_v15 = vpop.xlane.xlu0 %393 }
 0x173   :  { %vm444_vm13 = vcmp.le.f32.partialorder %v1986_v41, %v394_v15  ;;  %v323_v41 = vmul.f32 2.0, %v281_v10 }
 0x174   :  { %v2112_v4 = vsel %vm444_vm13, %v1979_v17, 128  ;;  %v2114_v40 = vpop.xlane.xlu2 %497  ;;  %vm455_vm13 = vcmp.le.f32.partialorder %v1941_v11, %v2095_v54 }
 0x175   :  { %vm499_vm14 = vcmp.eq.f32.partialorder %v1990_v39, %v2114_v40  ;;  %v704_v31 = vshra.s32 %v2112_v4, 16  ;;  %v2129_v39 = vsub.f32 %v1854_v42, %v323_v41 }
 0x176   :  { %v500_v26 = vsel %vm499_vm14, %v495_v37, inf }
 0x177   :  { %501 = vmin.xlane.f32.xlu1 %v500_v26  ;;  %v2119_v5 = vcvt.s32.f32 %v704_v31  ;;  %3168 = vst [vmem:[#allocation19_spill] sm:$0xff] %v2129_v39  ;;  %v308_v31 = vmul.f32 2.0, %v1969_v57 }
 0x179   :  { %707 = vmin.xlane.f32.xlu0 %v2119_v5  ;;  %v2144_v41 = vsub.f32 %v1854_v42, %v308_v31 }
 0x17a   :  { %v2122_v15 = vpop.xlane.xlu0 %385  ;;  %v396_v14 = vpop.xlane.xlu1 %395 }
 0x17b   :  { %vm445_vm1 = vcmp.le.f32.partialorder %v2001_v35, %v396_v14 }
 0x17c   :  { %v2161_v31 = vsel %vm445_vm1, %v1979_v17, 128 }
 0x17f   :  { %423 = vmin.xlane.f32.xlu1 %v2125_v8 }
 0x181   :  { %417 = vmin.xlane.f32.xlu0 %v2129_v39  ;;  %v324_v39 = vmul.f32 2.0, %v284_v49 }
 0x182   :  { %v2132_v26 = vpop.xlane.xlu0 %749  ;;  %v2135_v34 = vpop.xlane.xlu1 %763 }
 0x183   :  { %v398_v37 = vpop.xlane.xlu2 %397  ;;  %v2167_v35 = vsub.f32 %v1854_v42, %v324_v39  ;;  %vm751_vm9 = vcmp.eq.f32.partialorder %v2012_v33, %v2132_v26  ;;  %vm765_vm10 = vcmp.eq.f32.partialorder %v2014_v32, %v2135_v34 }
 0x184   :  { %vm446_vm15 = vcmp.le.f32.partialorder %v2020_v56, %v398_v37  ;;  %v509_v56 = vcvt.s32.f32 %v507_v20  ;;  %v521_v37 = vand.u32 65535, %v2032_v58  ;;  %v293_v58 = vpop.f32.mrf.mxu3  ;;  %v718_v20 = vshra.s32 %v2161_v31, 16 }
 0x185   :  { %v2139_v10 = vsel %vm446_vm15, %v1979_v17, 128 }
 0x186   :  { %v732_v53 = vshra.s32 %v2139_v10, 16  ;;  %v523_v49 = vcvt.s32.f32 %v521_v37  ;;  %v2176_v1 = vcvt.s32.f32 %v718_v20  ;;  %v309_v37 = vmul.f32 2.0, %v1971_v43 }
 0x187   :  { %v310_v43 = vmul.f32 2.0, %v1974_v23  ;;  %v759_v23 = vand.u32 65535, %v2008_v59 }
 0x188   :  { %v2146_v2 = vcvt.s32.f32 %v732_v53  ;;  %v2171_v53 = vsel %vm436_vm3, %v1979_v17, 128  ;;  %v2197_v63 = vsub.f32 %v1854_v42, %v309_v37  ;;  %vm454_vm3 = vcmp.le.f32.partialorder %v1924_v46, %v2099_v55 }
 0x189   :  { %387 = vmin.xlane.f32.xlu0 %v2144_v41  ;;  %v2211_v37 = vsub.f32 %v1854_v42, %v310_v43  ;;  %v535_v43 = vand.u32 65535, %v2047_v62  ;;  %v1051_v62 = vld [vmem:[%s3081_s3 + $0x70] sm:$0xff] }
 0x18a   :  { %735 = vmin.xlane.f32.xlu2 %v2146_v2  ;;  %v2151_v57 = vpop.xlane.xlu0 %511  ;;  %v2154_v30 = vpop.xlane.xlu1 %525 }
 0x18b   :  { %v2156_v6 = vpop.xlane.xlu2 %777  ;;  %vm513_vm2 = vcmp.eq.f32.partialorder %v2036_v28, %v2151_v57  ;;  %vm527_vm4 = vcmp.eq.f32.partialorder %v2038_v24, %v2154_v30  ;;  %v592_v24 = vshra.s32 %v2171_v53, 16  ;;  %v537_v32 = vcvt.s32.f32 %v535_v43  ;;  %v1041_v43 = vld [vmem:[%s3081_s3 + $0x20] sm:$0xff] }
 0x18c   :  { %v514_v14 = vsel %vm513_vm2, %v509_v56, inf  ;;  %v528_v28 = vsel %vm527_vm4, %v523_v49, inf  ;;  %v327_v56 = vmul.f32 2.0, %v293_v58  ;;  %v2190_v58 = vsel %vm452_vm5, %v1979_v17, 128 }
 0x18d   :  { %515 = vmin.xlane.f32.xlu1 %v514_v14  ;;  %v787_v14 = vand.u32 65535, %v2063_v47  ;;  %v2187_v49 = vcvt.s32.f32 %v592_v24  ;;  %v816_v36 = vshra.s32 %v2190_v58, 16  ;;  %v325_v24 = vmul.f32 2.0, %v2103_v44 }
 0x18e   :  { %v2183_v39 = vsub.f32 %v1854_v42, %v327_v56  ;;  %v563_v56 = vand.u32 65535, %v2073_v12  ;;  %vm779_vm14 = vcmp.eq.f32.partialorder %v2040_v22, %v2156_v6  ;;  %v1042_v22 = vld [vmem:[%s3081_s3 + $0x28] sm:$0xff] }
 0x18f   :  { %3169 = vst [vmem:[#allocation20_spill] sm:$0xff] %v2187_v49  ;;  %v2222_v12 = vsub.f32 %v1854_v42, %v325_v24  ;;  %v761_v42 = vcvt.s32.f32 %v759_v23 }
 0x190   :  { %v565_v44 = vcvt.s32.f32 %v563_v56  ;;  %v2249_v56 = vsel %vm438_vm11, %v1979_v17, 128 }
 0x191   :  { %419 = vmin.xlane.f32.xlu0 %v2167_v35  ;;  %v620_v25 = vshra.s32 %v2249_v56, 16 }
 0x192   :  { %529 = vmin.xlane.f32.xlu2 %v528_v28  ;;  %v789_v28 = vcvt.s32.f32 %v787_v14 }
 0x193   :  { %v2174_v27 = vpop.xlane.xlu2 %539  ;;  %v2264_v23 = vcvt.s32.f32 %v620_v25  ;;  %v1039_v25 = vld [vmem:[%s3081_s3 + $0x10] sm:$0xff] }
 0x194   :  { %vm541_vm12 = vcmp.eq.f32.partialorder %v2054_v13, %v2174_v27  ;;  %v1049_v13 = vld [vmem:[%s3081_s3 + $0x60] sm:$0xff] }
 0x195   :  { %721 = vmin.xlane.f32.xlu1 %v2176_v1  ;;  %v542_v24 = vsel %vm541_vm12, %v537_v32, inf  ;;  %v1040_v32 = vld [vmem:[%s3081_s3 + $0x18] sm:$0xff]  ;;  %vm439_vm12 = vcmp.le.f32.partialorder %v1963_v38, %v2108_v9 }
 0x199   :  { %595 = vmin.xlane.f32.xlu0 %v2187_v49  ;;  %v2208_v49 = vcvt.s32.f32 %v816_v36  ;;  %v2225_v36 = vsel %vm437_vm7, %v1979_v17, 128 }
 0x19a   :  { %425 = vmin.xlane.f32.xlu2 %v2183_v39 }
 0x19b   :  { %v2194_v20 = vpop.xlane.xlu2 %791 }
 0x19c   :  { %vm793_vm6 = vcmp.eq.f32.partialorder %v2066_v16, %v2194_v20  ;;  %v745_v16 = vand.u32 65535, %v1998_v7  ;;  %v606_v7 = vshra.s32 %v2225_v36, 16 }
 0x19d   :  { %389 = vmin.xlane.f32.xlu1 %v2197_v63  ;;  %v2204_v47 = vsel %vm793_vm6, %v789_v28, inf  ;;  %v766_v28 = vsel %vm765_vm10, %v761_v42, inf  ;;  %v773_v42 = vand.u32 65535, %v2029_v51  ;;  %vm440_vm10 = vcmp.le.f32.partialorder %v1995_v60, %v2122_v15 }
 0x19e   :  { %v747_v48 = vcvt.s32.f32 %v745_v16  ;;  %v2241_v33 = vcvt.s32.f32 %v606_v7  ;;  %v1050_v16 = vld [vmem:[%s3081_s3 + $0x68] sm:$0xff]  ;;  %v1045_v7 = vld [vmem:[%s3081_s3 + $0x40] sm:$0xff]  ;;  %v549_v60 = vand.u32 65535, %v2052_v19  ;;  %v2405_v19 = vsel %vm439_vm12, %v1979_v17, 128 }
 0x19f   :  { %v775_v51 = vcvt.s32.f32 %v773_v42  ;;  %v703_v42 = vand.u32 65535, %v2112_v4 }
 0x1a0   :  { %v752_v59 = vsel %vm751_vm9, %v747_v48, inf  ;;  %v1046_v48 = vld [vmem:[%s3081_s3 + $0x48] sm:$0xff] }
 0x1a1   :  { %819 = vmin.xlane.f32.xlu0 %v2208_v49  ;;  %v780_v11 = vsel %vm779_vm14, %v775_v51, inf }
 0x1a2   :  { %391 = vmin.xlane.f32.xlu2 %v2211_v37 }
 0x1a3   :  { %v2219_v14 = vpop.xlane.xlu2 %567 }
 0x1a4   :  { %vm569_vm8 = vcmp.eq.f32.partialorder %v2076_v61, %v2219_v14  ;;  %v1052_v61 = vld [vmem:[%s3081_s3 + $0x78] sm:$0xff] }
 0x1a5   :  { %421 = vmin.xlane.f32.xlu1 %v2222_v12  ;;  %v2232_v21 = vsel %vm569_vm8, %v565_v44, inf  ;;  %1053 = vmatpush.msra.mxu1 %v1052_v61  ;;  %v1047_v44 = vld [vmem:[%s3081_s3 + $0x50] sm:$0xff]  ;;  %vm453_vm8 = vcmp.le.f32.partialorder %v1912_v50, %v2097_v29 }
 0x1a6   :  { %1609 = vmatpush.msra.mxu2 %v1052_v61  ;;  %1610 = vmatpush.msrb.mxu3 %v1052_v61  ;;  %v2288_v61 = vsel %vm455_vm13, %v1979_v17, 128 }
 0x1a7   :  { %1054 = vmatpush.msra.mxu1 %v1051_v62  ;;  %v858_v54 = vshra.s32 %v2288_v61, 16 }
 0x1a8   :  { %1611 = vmatpush.msra.mxu2 %v1051_v62  ;;  %1612 = vmatpush.msrb.mxu3 %v1051_v62  ;;  %v577_v62 = vand.u32 65535, %v2081_v52  ;;  %v1037_v52 = vld [vmem:[%s3081_s3] sm:$0xff] }
 0x1a9   :  { %753 = vmin.xlane.f32.xlu0 %v752_v59  ;;  %1055 = vmatpush.msra.mxu1 %v1050_v16  ;;  %v1044_v59 = vld [vmem:[%s3081_s3 + $0x38] sm:$0xff] }
 0x1aa   :  { %767 = vmin.xlane.f32.xlu2 %v766_v28  ;;  %1613 = vmatpush.msra.mxu2 %v1050_v16  ;;  %v1043_v28 = vld [vmem:[%s3081_s3 + $0x30] sm:$0xff] }
 0x1ab   :  { %1614 = vmatpush.msrb.mxu3 %v1050_v16  ;;  %1056 = vmatpush.msra.mxu1 %v1049_v13  ;;  %v2304_v16 = vpop.xlane.xlu2 %581 }
 0x1ac   :  { %1615 = vmatpush.msra.mxu2 %v1049_v13  ;;  %vm583_vm15 = vcmp.eq.f32.partialorder %v2085_v0, %v2304_v16  ;;  %v2317_v0 = vpop.xlane.xlu0 %553 }
 0x1ad   :  { %609 = vmin.xlane.f32.xlu1 %v2241_v33  ;;  %1616 = vmatpush.msrb.mxu3 %v1049_v13  ;;  %v579_v13 = vcvt.s32.f32 %v577_v62  ;;  %v731_v62 = vand.u32 65535, %v2139_v10  ;;  %vm555_vm13 = vcmp.eq.f32.partialorder %v2057_v18, %v2317_v0  ;;  %v3170_v18 = vld [vmem:[#allocation18_spill] sm:$0xff] }
 0x1ae   :  { %1057 = vmatpush.msra.mxu1 %v1048_v3  ;;  %1617 = vmatpush.msra.mxu2 %v1048_v3 }
 0x1af   :  { %1618 = vmatpush.msrb.mxu3 %v1048_v3  ;;  %v1038_v3 = vld [vmem:[%s3081_s3 + $0x8] sm:$0xff] }
 0x1b0   :  { %1058 = vmatpush.msra.mxu1 %v1047_v44  ;;  %1619 = vmatpush.msra.mxu2 %v1047_v44 }
 0x1b1   :  { %543 = vmin.xlane.f32.xlu0 %v542_v24  ;;  %1620 = vmatpush.msrb.mxu3 %v1047_v44  ;;  %v2300_v24 = vcvt.s32.f32 %v858_v54  ;;  %v584_v44 = vsel %vm583_vm15, %v579_v13, inf }
 0x1b2   :  { %1059 = vmatpush.msra.mxu1 %v1046_v48  ;;  %1621 = vmatpush.msra.mxu2 %v1046_v48 }
 0x1b3   :  { %1622 = vmatpush.msrb.mxu3 %v1046_v48  ;;  %v504_v48 = vcvt.f32.s32 %v2114_v40  ;;  %v2329_v4 = vpop.xlane.xlu2 %805 }
 0x1b4   :  { %1060 = vmatpush.msra.mxu1 %v1045_v7  ;;  %1623 = vmatpush.msra.mxu2 %v1045_v7  ;;  %vm807_vm15 = vcmp.eq.f32.partialorder %v3170_v18, %v2329_v4 }
 0x1b5   :  { %1624 = vmatpush.msrb.mxu3 %v1045_v7 }
 0x1b6   :  { %1061 = vmatpush.msra.mxu1 %v1044_v59  ;;  %1625 = vmatpush.msra.mxu2 %v1044_v59 }
 0x1b7   :  { %1626 = vmatpush.msrb.mxu3 %v1044_v59  ;;  %v505_v59 = vshll.u32 %v504_v48, 16 }
 0x1b8   :  { %1062 = vmatpush.msra.mxu1 %v1043_v28  ;;  %1627 = vmatpush.msra.mxu2 %v1043_v28 }
 0x1b9   :  { %623 = vmin.xlane.f32.xlu0 %v2264_v23  ;;  %1628 = vmatpush.msrb.mxu3 %v1043_v28 }
 0x1ba   :  { %1063 = vmatpush.msra.mxu1 %v1042_v22  ;;  %1629 = vmatpush.msra.mxu2 %v1042_v22 }
 0x1bb   :  { %1630 = vmatpush.msrb.mxu3 %v1042_v22 }
 0x1bc   :  { %1064 = vmatpush.msra.mxu1 %v1041_v43  ;;  %1631 = vmatpush.msra.mxu2 %v1041_v43 }
 0x1bd   :  { %1632 = vmatpush.msrb.mxu3 %v1041_v43  ;;  %v1643_v43 = vmov 1.0  }
 0x1be   :  { %1065 = vmatpush.msra.mxu1 %v1040_v32  ;;  %1633 = vmatpush.msra.mxu2 %v1040_v32 }
 0x1bf   :  { %1634 = vmatpush.msrb.mxu3 %v1040_v32 }
 0x1c0   :  { %1066 = vmatpush.msra.mxu1 %v1039_v25  ;;  %1635 = vmatpush.msra.mxu2 %v1039_v25 }
 0x1c1   :  { %781 = vmin.xlane.f32.xlu0 %v780_v11  ;;  %1636 = vmatpush.msrb.mxu3 %v1039_v25  ;;  %v705_v11 = vcvt.s32.f32 %v703_v42 }
 0x1c2   :  { %1067 = vmatpush.msra.mxu1 %v1038_v3  ;;  %1637 = vmatpush.msra.mxu2 %v1038_v3 }
 0x1c3   :  { %1638 = vmatpush.msrb.mxu3 %v1038_v3  ;;  %v733_v3 = vcvt.s32.f32 %v731_v62 }
 0x1c4   :  { %1068 = vmatpush.msra.mxu1 %v1037_v52  ;;  %1639 = vmatpush.msra.mxu2 %v1037_v52 }
 0x1c5   :  { %1640 = vmatpush.msrb.mxu3 %v1037_v52 }
 0x1c9   :  { %861 = vmin.xlane.f32.xlu0 %v2300_v24 }
 0x1d1   :  { %585 = vmin.xlane.f32.xlu0 %v584_v44  ;;  %v2344_v44 = vsel %vm454_vm3, %v1979_v17, 128 }
 0x1ea   :  { %v502_v7 = vpop.xlane.xlu1 %501 }
 0x1eb   :  { %v503_v51 = vcvt.f32.s32 %v502_v7  ;;  %v844_v7 = vshra.s32 %v2344_v44, 16 }
 0x1ec   :  { %v2321_v28 = vpop.xlane.xlu0 %707 }
 0x1ed   :  { %v506_v22 = vadd.s32 %v505_v59, %v503_v51  ;;  %vm709_vm1 = vcmp.eq.f32.partialorder %v2119_v5, %v2321_v28  ;;  %v518_v5 = vcvt.f32.s32 %v2151_v57 }
 0x1ee   :  { %v710_v54 = vsel %vm709_vm1, %v705_v11, inf }
 0x1ef   :  { %711 = vmin.xlane.f32.xlu1 %v710_v54  ;;  %vm941_vm2 = vcmp.eq.s32.totalorder %v1979_v17, %v506_v22 }
 0x1f0   :  { %1496 = vmatmul.msk.f32.vlgmr.msra.gmra.mxu1 %vm941_vm2, %v1643_v43 }
 0x1f2   :  { %v424_v32 = vpop.xlane.xlu1 %423 }
 0x1f3   :  { %vm459_vm6 = vcmp.le.f32.partialorder %v2125_v8, %v424_v32  ;;  %v717_v8 = vand.u32 65535, %v2161_v31  ;;  %v2360_v32 = vcvt.s32.f32 %v844_v7  ;;  %v551_v7 = vcvt.s32.f32 %v549_v60 }
 0x1f4   :  { %v2327_v40 = vpop.xlane.xlu0 %417  ;;  %v2351_v42 = vsel %vm459_vm6, %v1979_v17, 128 }
 0x1f5   :  { %v914_v22 = vshra.s32 %v2351_v42, 16  ;;  %v719_v31 = vcvt.s32.f32 %v717_v8  ;;  %v556_v8 = vsel %vm555_vm13, %v551_v7, inf  ;;  %vm1391_vm13 = vcmask 125952  }
 0x1fc   :  { %v388_v25 = vpop.xlane.xlu0 %387 }
 0x1fd   :  { %vm441_vm4 = vcmp.le.f32.partialorder %v2144_v41, %v388_v25  ;;  %v2336_v13 = vpop.xlane.xlu2 %735  ;;  %v519_v41 = vshll.u32 %v518_v5, 16  ;;  %v2369_v5 = vcvt.s32.f32 %v914_v22 }
 0x1fe   :  { %v2339_v52 = vsel %vm441_vm4, %v1979_v17, 128  ;;  %vm737_vm5 = vcmp.eq.f32.partialorder %v2146_v2, %v2336_v13  ;;  %v532_v2 = vcvt.f32.s32 %v2154_v30 }
 0x1ff   :  { %v738_v46 = vsel %vm737_vm5, %v733_v3, inf  ;;  %v662_v55 = vshra.s32 %v2339_v52, 16  ;;  %v2372_v3 = vsel %vm453_vm8, %v1979_v17, 128 }
 0x200   :  { %739 = vmin.xlane.f32.xlu2 %v738_v46  ;;  %v516_v10 = vpop.xlane.xlu1 %515  ;;  %v533_v30 = vshll.u32 %v532_v2, 16  ;;  %v830_v50 = vshra.s32 %v2372_v3, 16  ;;  %v801_v2 = vand.u32 65535, %v2088_v45  ;;  %v634_v45 = vshra.s32 %v2405_v19, 16 }
 0x201   :  { %v517_v57 = vcvt.f32.s32 %v516_v10  ;;  %v2348_v48 = vcvt.s32.f32 %v662_v55 }
 0x202   :  { %v2386_v10 = vcvt.s32.f32 %v830_v50 }
 0x203   :  { %v520_v59 = vadd.s32 %v519_v41, %v517_v57  ;;  %665 = vmin.xlane.f32.xlu0 %v2348_v48 }
 0x204   :  { %v420_v51 = vpop.xlane.xlu0 %419 }
 0x205   :  { %v530_v11 = vpop.xlane.xlu2 %529  ;;  %vm942_vm7 = vcmp.eq.s32.totalorder %v1979_v17, %v520_v59  ;;  %v756_v59 = vcvt.f32.s32 %v2132_v26  ;;  %vm457_vm14 = vcmp.le.f32.partialorder %v2167_v35, %v420_v51  ;;  %v546_v35 = vcvt.f32.s32 %v2174_v27  ;;  %v3171_v27 = vld [vmem:[#allocation19_spill] sm:$0xff] }
 0x206   :  { %v531_v54 = vcvt.f32.s32 %v530_v11  ;;  %1497 = vmatmul.msk.f32.gmra.mxu1 %vm942_vm7, %v1643_v43  ;;  %v605_v11 = vand.u32 65535, %v2225_v36  ;;  %v2413_v26 = vsel %vm457_vm14, %v1979_v17, 128  ;;  %v2420_v51 = vcvt.s32.f32 %v634_v45 }
 0x207   :  { %v757_v38 = vshll.u32 %v756_v59, 16  ;;  %v886_v50 = vshra.s32 %v2413_v26, 16  ;;  %v547_v60 = vshll.u32 %v546_v35, 16  ;;  %vm456_vm3 = vcmp.le.f32.partialorder %v3171_v27, %v2327_v40 }
 0x208   :  { %847 = vmin.xlane.f32.xlu2 %v2360_v32  ;;  %v2365_v62 = vpop.xlane.xlu1 %721  ;;  %v534_v25 = vadd.s32 %v533_v30, %v531_v54  ;;  %v803_v54 = vcvt.s32.f32 %v801_v2  ;;  %v607_v36 = vcvt.s32.f32 %v605_v11  ;;  %v2437_v11 = vsel %vm456_vm3, %v1979_v17, 128 }
 0x209   :  { %vm723_vm9 = vcmp.eq.f32.partialorder %v2176_v1, %v2365_v62  ;;  %v2383_v1 = vsel %vm440_vm10, %v1979_v17, 128  ;;  %v2427_v2 = vcvt.s32.f32 %v886_v50  ;;  %v619_v50 = vand.u32 65535, %v2249_v56 }
 0x20a   :  { %v724_v46 = vsel %vm723_vm9, %v719_v31, inf  ;;  %vm943_vm11 = vcmp.eq.s32.totalorder %v1979_v17, %v534_v25  ;;  %v648_v41 = vshra.s32 %v2383_v1, 16  ;;  %v808_v31 = vsel %vm807_vm15, %v803_v54, inf }
 0x20b   :  { %725 = vmin.xlane.f32.xlu1 %v724_v46  ;;  %917 = vmin.xlane.f32.xlu0 %v2369_v5 }
 0x20c   :  { %v2377_v29 = vpop.xlane.xlu0 %595  ;;  %v2393_v57 = vcvt.s32.f32 %v648_v41 }
 0x20e   :  { %1498 = vmatmul.msk.f32.gmra.mxu1 %vm943_vm11, %v1643_v43 }
 0x210   :  { %571 = vmin.xlane.f32.xlu2 %v2232_v21  ;;  %v390_v55 = vpop.xlane.xlu1 %389 }
 0x211   :  { %vm442_vm2 = vcmp.le.f32.partialorder %v2197_v63, %v390_v55  ;;  %v872_v55 = vshra.s32 %v2437_v11, 16 }
 0x212   :  { %v2432_v59 = vsel %vm442_vm2, %v1979_v17, 128 }
 0x213   :  { %833 = vmin.xlane.f32.xlu1 %v2386_v10  ;;  %v676_v63 = vshra.s32 %v2432_v59, 16 }
 0x214   :  { %v2391_v15 = vpop.xlane.xlu0 %819 }
 0x215   :  { %vm821_vm9 = vcmp.eq.f32.partialorder %v2208_v49, %v2391_v15 }
 0x218   :  { %651 = vmin.xlane.f32.xlu2 %v2393_v57  ;;  %v2400_v21 = vpop.xlane.xlu1 %421 }
 0x219   :  { %vm458_vm8 = vcmp.le.f32.partialorder %v2222_v12, %v2400_v21 }
 0x21b   :  { %557 = vmin.xlane.f32.xlu1 %v556_v8  ;;  %v426_v8 = vpop.xlane.xlu2 %425 }
 0x21c   :  { %v754_v9 = vpop.xlane.xlu0 %753  ;;  %vm460_vm5 = vcmp.le.f32.partialorder %v2183_v39, %v426_v8  ;;  %v591_v39 = vand.u32 65535, %v2171_v53  ;;  %v621_v53 = vcvt.s32.f32 %v619_v50  ;;  %v2477_v8 = vsel %vm458_vm8, %v1979_v17, 128 }
 0x21d   :  { %v755_v22 = vcvt.f32.s32 %v754_v9  ;;  %v2446_v9 = vcvt.s32.f32 %v676_v63  ;;  %v2449_v18 = vsel %vm460_vm5, %v1979_v17, 128  ;;  %v900_v21 = vshra.s32 %v2477_v8, 16 }
 0x21e   :  { %v928_v54 = vshra.s32 %v2449_v18, 16 }
 0x21f   :  { %v2415_v30 = vadd.s32 %v757_v38, %v755_v22  ;;  %v784_v38 = vcvt.f32.s32 %v2156_v6  ;;  %v2453_v22 = vcvt.s32.f32 %v872_v55  ;;  %v593_v6 = vcvt.s32.f32 %v591_v39 }
 0x220   :  { %809 = vmin.xlane.f32.xlu2 %v808_v31  ;;  %v2417_v25 = vpop.xlane.xlu1 %609  ;;  %v2483_v63 = vcvt.s32.f32 %v900_v21 }
 0x221   :  { %vm611_vm1 = vcmp.eq.f32.partialorder %v2241_v33, %v2417_v25  ;;  %v785_v45 = vshll.u32 %v784_v38, 16  ;;  %vm959_vm5 = vcmp.eq.s32.totalorder %v1979_v17, %v2415_v30 }
 0x222   :  { %v612_v46 = vsel %vm611_vm1, %v607_v36, inf  ;;  %v2458_v36 = vcvt.s32.f32 %v928_v54 }
 0x223   :  { %637 = vmin.xlane.f32.xlu1 %v2420_v51  ;;  %613 = vmin.xlane.f32.xlu0 %v612_v46  ;;  %v3172_v46 = vld [vmem:[#allocation20_spill] sm:$0xff] }
 0x224   :  { %v544_v41 = vpop.xlane.xlu0 %543  ;;  %vm597_vm6 = vcmp.eq.f32.partialorder %v3172_v46, %v2377_v29 }
 0x225   :  { %v545_v7 = vcvt.f32.s32 %v544_v41  ;;  %v598_v41 = vsel %vm597_vm6, %v593_v6, inf }
 0x227   :  { %v548_v33 = vadd.s32 %v547_v60, %v545_v7  ;;  %v815_v60 = vand.u32 65535, %v2190_v58 }
 0x228   :  { %889 = vmin.xlane.f32.xlu2 %v2427_v2 }
 0x229   :  { %vm944_vm4 = vcmp.eq.s32.totalorder %v1979_v17, %v548_v33  ;;  %v817_v27 = vcvt.s32.f32 %v815_v60  ;;  %v857_v33 = vand.u32 65535, %v2288_v61 }
 0x22a   :  { %1499 = vmatmul.msk.f32.gmra.mxu1 %vm944_vm4, %v1643_v43 }
 0x22b   :  { %795 = vmin.xlane.f32.xlu1 %v2204_v47  ;;  %v822_v58 = vsel %vm821_vm9, %v817_v27, inf  ;;  %v859_v12 = vcvt.s32.f32 %v857_v33 }
 0x22c   :  { %v2443_v40 = vpop.xlane.xlu0 %623 }
 0x22d   :  { %vm625_vm7 = vcmp.eq.f32.partialorder %v2264_v23, %v2443_v40  ;;  %v392_v23 = vpop.xlane.xlu2 %391 }
 0x22e   :  { %v626_v7 = vsel %vm625_vm7, %v621_v53, inf  ;;  %vm443_vm11 = vcmp.le.f32.partialorder %v2211_v37, %v392_v23 }
 0x22f   :  { %v2486_v61 = vsel %vm443_vm11, %v1979_v17, 128 }
 0x230   :  { %679 = vmin.xlane.f32.xlu2 %v2446_v9  ;;  %v690_v55 = vshra.s32 %v2486_v61, 16 }
 0x232   :  { %v2490_v38 = vcvt.s32.f32 %v690_v55 }
 0x233   :  { %875 = vmin.xlane.f32.xlu1 %v2453_v22 }
 0x234   :  { %v782_v47 = vpop.xlane.xlu0 %781 }
 0x235   :  { %v783_v31 = vcvt.f32.s32 %v782_v47 }
 0x237   :  { %v2460_v35 = vadd.s32 %v785_v45, %v783_v31  ;;  %v2496_v45 = vpop.xlane.xlu2 %767 }
 0x238   :  { %931 = vmin.xlane.f32.xlu2 %v2458_v36 }
 0x23b   :  { %599 = vmin.xlane.f32.xlu1 %v598_v41 }
 0x23c   :  { %v2474_v56 = vpop.xlane.xlu0 %861 }
 0x23d   :  { %vm863_vm10 = vcmp.eq.f32.partialorder %v2300_v24, %v2474_v56  ;;  %v714_v24 = vcvt.f32.s32 %v2321_v28  ;;  %v661_v28 = vand.u32 65535, %v2339_v52  ;;  %v829_v52 = vand.u32 65535, %v2372_v3 }
 0x23e   :  { %v864_v49 = vsel %vm863_vm10, %v859_v12, inf  ;;  %v742_v12 = vcvt.f32.s32 %v2336_v13 }
 0x23f   :  { %v715_v39 = vshll.u32 %v714_v24, 16  ;;  %v663_v60 = vcvt.s32.f32 %v661_v28  ;;  %v831_v3 = vcvt.s32.f32 %v829_v52 }
 0x240   :  { %627 = vmin.xlane.f32.xlu2 %v626_v7  ;;  %v728_v7 = vcvt.f32.s32 %v2365_v62  ;;  %v743_v62 = vshll.u32 %v742_v12, 16  ;;  %v769_v12 = vcvt.f32.s32 %v2496_v45 }
 0x243   :  { %823 = vmin.xlane.f32.xlu1 %v822_v58  ;;  %v729_v58 = vshll.u32 %v728_v7, 16  ;;  %v770_v7 = vcvt.f32.s32 %v2135_v34 }
 0x244   :  { %v2500_v46 = vpop.xlane.xlu0 %585 }
 0x245   :  { %v771_v34 = vshll.u32 %v770_v7, 16 }
 0x248   :  { %865 = vmin.xlane.f32.xlu2 %v864_v49 }
 0x24b   :  { %903 = vmin.xlane.f32.xlu1 %v2483_v63 }
 0x253   :  { %693 = vmin.xlane.f32.xlu1 %v2490_v38 }
 0x262   :  { %v712_v54 = vpop.xlane.xlu1 %711 }
 0x263   :  { %v713_v37 = vcvt.f32.s32 %v712_v54 }
 0x265   :  { %v716_v47 = vadd.s32 %v715_v39, %v713_v37  ;;  %v843_v37 = vand.u32 65535, %v2344_v44 }
 0x267   :  { %vm956_vm12 = vcmp.eq.s32.totalorder %v1979_v17, %v716_v47  ;;  %v560_v47 = vcvt.f32.s32 %v2317_v0  ;;  %v845_v44 = vcvt.s32.f32 %v843_v37 }
 0x268   :  { %1511 = vmatmul.msk.f32.vlgmr.msra.gmra.mxu2 %vm956_vm12, %v1643_v43  ;;  %vm961_vm12 = vcmp.eq.s32.totalorder %v1979_v17, %v2460_v35 }
 0x26d   :  { %v2498_v31 = vpop.f32.mrf.mxu1 }
 0x26e   :  { %v1359_v6 = vpack.c.bf16 %v2498_v31, %v2498_v31 }
 0x270   :  { %1392 = vst.msk [vmem:[%s3082_s4] sm:$0xf] %vm1391_vm13, %v1359_v6 }
 0x273   :  { %v740_v50 = vpop.xlane.xlu2 %739 }
 0x274   :  { %v741_v49 = vcvt.f32.s32 %v740_v50 }
 0x276   :  { %v2509_v41 = vpop.xlane.xlu0 %665  ;;  %v744_v54 = vadd.s32 %v743_v62, %v741_v49  ;;  %v772_v49 = vadd.s32 %v771_v34, %v769_v12  ;;  %v588_v62 = vcvt.f32.s32 %v2304_v16 }
 0x277   :  { %vm667_vm14 = vcmp.eq.f32.partialorder %v2348_v48, %v2509_v41 }
 0x278   :  { %v668_v53 = vsel %vm667_vm14, %v663_v60, inf  ;;  %vm958_vm2 = vcmp.eq.s32.totalorder %v1979_v17, %v744_v54  ;;  %v587_v54 = vcvt.f32.s32 %v2500_v46  ;;  %vm960_vm9 = vcmp.eq.s32.totalorder %v1979_v17, %v772_v49 }
 0x279   :  { %669 = vmin.xlane.f32.xlu2 %v668_v53  ;;  %v927_v49 = vand.u32 65535, %v2449_v18 }
 0x27b   :  { %v2514_v27 = vpop.xlane.xlu2 %847 }
 0x27c   :  { %vm849_vm3 = vcmp.eq.f32.partialorder %v2360_v32, %v2514_v27  ;;  %v647_v32 = vand.u32 65535, %v2383_v1 }
 0x27d   :  { %v850_v53 = vsel %vm849_vm3, %v845_v44, inf }
 0x27e   :  { %v726_v33 = vpop.xlane.xlu1 %725  ;;  %v649_v45 = vcvt.s32.f32 %v647_v32  ;;  %v2595_v35 = vpop.xlane.xlu0 %917 }
 0x27f   :  { %v727_v23 = vcvt.f32.s32 %v726_v33  ;;  %v574_v33 = vcvt.f32.s32 %v2219_v14 }
 0x281   :  { %v730_v21 = vadd.s32 %v729_v58, %v727_v23  ;;  %v633_v23 = vand.u32 65535, %v2405_v19  ;;  %v575_v14 = vshll.u32 %v574_v33, 16 }
 0x283   :  { %v572_v55 = vpop.xlane.xlu2 %571  ;;  %v2518_v24 = vpop.f32.mrf.mxu1  ;;  %vm957_vm15 = vcmp.eq.s32.totalorder %v1979_v17, %v730_v21  ;;  %v635_v19 = vcvt.s32.f32 %v633_v23  ;;  %v602_v23 = vcvt.f32.s32 %v2377_v29  ;;  %v616_v29 = vcvt.f32.s32 %v2417_v25 }
 0x284   :  { %v1360_v48 = vpack.c.bf16 %v2518_v24, %v2518_v24  ;;  %1512 = vmatmul.msk.f32.gmra.mxu2 %vm957_vm15, %v1643_v43  ;;  %v573_v21 = vcvt.f32.s32 %v572_v55 }
 0x286   :  { %1393 = vst.msk [vmem:[%s3082_s4 + $0x4] sm:$0xf] %vm1391_vm13, %v1360_v48  ;;  %v2528_v13 = vpop.xlane.xlu1 %833  ;;  %v576_v55 = vadd.s32 %v575_v14, %v573_v21  ;;  %v603_v21 = vshll.u32 %v602_v23, 16 }
 0x287   :  { %vm835_vm1 = vcmp.eq.f32.partialorder %v2386_v10, %v2528_v13  ;;  %v561_v10 = vshll.u32 %v560_v47, 16  ;;  %v798_v47 = vcvt.f32.s32 %v2194_v20 }
 0x288   :  { %v836_v39 = vsel %vm835_vm1, %v831_v3, inf  ;;  %v885_v3 = vand.u32 65535, %v2413_v26  ;;  %vm946_vm8 = vcmp.eq.s32.totalorder %v1979_v17, %v576_v55  ;;  %v675_v26 = vand.u32 65535, %v2432_v59 }
 0x289   :  { %837 = vmin.xlane.f32.xlu0 %v836_v39  ;;  %v799_v20 = vshll.u32 %v798_v47, 16  ;;  %v826_v55 = vcvt.f32.s32 %v2391_v15 }
 0x28a   :  { %v887_v39 = vcvt.s32.f32 %v885_v3 }
 0x28b   :  { %v2534_v6 = vpop.xlane.xlu2 %651  ;;  %v2536_v28 = vpop.f32.mrf.mxu1 }
 0x28c   :  { %v1361_v50 = vpack.c.bf16 %v2536_v28, %v2536_v28  ;;  %1513 = vmatmul.msk.f32.gmra.mxu2 %vm958_vm2, %v1643_v43  ;;  %vm653_vm6 = vcmp.eq.f32.partialorder %v2393_v57, %v2534_v6  ;;  %vm919_vm2 = vcmp.eq.f32.partialorder %v2369_v5, %v2595_v35  ;;  %v617_v5 = vshll.u32 %v616_v29, 16 }
 0x28d   :  { %v654_v30 = vsel %vm653_vm6, %v649_v45, inf  ;;  %v854_v29 = vcvt.f32.s32 %v2514_v27 }
 0x28e   :  { %1394 = vst.msk [vmem:[%s3082_s4 + $0x8] sm:$0xf] %vm1391_vm13, %v1361_v50  ;;  %v558_v0 = vpop.xlane.xlu1 %557  ;;  %v871_v50 = vand.u32 65535, %v2437_v11 }
 0x28f   :  { %v559_v60 = vcvt.f32.s32 %v558_v0 }
 0x291   :  { %v562_v58 = vadd.s32 %v561_v10, %v559_v60  ;;  %851 = vmin.xlane.f32.xlu0 %v850_v53  ;;  %v873_v10 = vcvt.s32.f32 %v871_v50 }
 0x293   :  { %v2553_v52 = vpop.xlane.xlu2 %809  ;;  %vm945_vm4 = vcmp.eq.s32.totalorder %v1979_v17, %v562_v58  ;;  %v913_v58 = vand.u32 65535, %v2351_v42 }
 0x294   :  { %1500 = vmatmul.msk.f32.gmra.mxu1 %vm945_vm4, %v1643_v43  ;;  %1514 = vmatmul.msk.f32.gmra.mxu2 %vm959_vm5, %v1643_v43 }
 0x295   :  { %v915_v12 = vcvt.s32.f32 %v913_v58 }
 0x296   :  { %v2562_v1 = vpop.xlane.xlu1 %637 }
 0x297   :  { %vm639_vm7 = vcmp.eq.f32.partialorder %v2420_v51, %v2562_v1  ;;  %v589_v51 = vshll.u32 %v588_v62, 16  ;;  %v920_v45 = vsel %vm919_vm2, %v915_v12, inf  ;;  %v827_v62 = vshll.u32 %v826_v55, 16 }
 0x298   :  { %v640_v48 = vsel %vm639_vm7, %v635_v19, inf  ;;  %v614_v19 = vpop.xlane.xlu0 %613 }
 0x299   :  { %641 = vmin.xlane.f32.xlu1 %v640_v48  ;;  %655 = vmin.xlane.f32.xlu0 %v654_v30  ;;  %v590_v37 = vadd.s32 %v589_v51, %v587_v54  ;;  %v615_v48 = vcvt.f32.s32 %v614_v19  ;;  %v929_v30 = vcvt.s32.f32 %v927_v49  ;;  %v3173_v54 = vld [vmem:[#allocation2_spill] sm:$0xff]  ;;  %v855_v49 = vshll.u32 %v854_v29, 16 }
 0x29a   :  { %v3174_v15 = vunpack.c.h.bf16 %v3173_v54 }
 0x29b   :  { %v2569_v57 = vpop.xlane.xlu2 %889  ;;  %vm947_vm11 = vcmp.eq.s32.totalorder %v1979_v17, %v590_v37  ;;  %v618_v3 = vadd.s32 %v617_v5, %v615_v48  ;;  %v868_v5 = vcvt.f32.s32 %v2474_v56 }
 0x29c   :  { %1501 = vmatmul.msk.f32.gmra.mxu1 %vm946_vm8, %v1643_v43  ;;  %1515 = vmatmul.msk.f32.gmra.mxu2 %vm960_vm9, %v1643_v43  ;;  %vm891_vm10 = vcmp.eq.f32.partialorder %v2427_v2, %v2569_v57  ;;  %v677_v2 = vcvt.s32.f32 %v675_v26  ;;  %v1167_v51 = vsub.f32 %v2518_v24, %v3174_v15  ;;  %v630_v26 = vcvt.f32.s32 %v2443_v40 }
 0x29d   :  { %v892_v46 = vsel %vm891_vm10, %v887_v39, inf  ;;  %vm949_vm6 = vcmp.eq.s32.totalorder %v1979_v17, %v618_v3  ;;  %v3175_v40 = vunpack.c.l.bf16 %v3173_v54  ;;  %v869_v27 = vshll.u32 %v868_v5, 16 }
 0x29e   :  { %v796_v16 = vpop.xlane.xlu1 %795  ;;  %v631_v50 = vshll.u32 %v630_v26, 16 }
 0x29f   :  { %v797_v0 = vcvt.f32.s32 %v796_v16 }
 0x2a1   :  { %893 = vmin.xlane.f32.xlu0 %v892_v46  ;;  %v800_v60 = vadd.s32 %v799_v20, %v797_v0  ;;  %v899_v46 = vand.u32 65535, %v2477_v8  ;;  %v1166_v8 = vsub.f32 %v2498_v31, %v3175_v40 }
 0x2a3   :  { %v2580_v44 = vpop.xlane.xlu2 %679  ;;  %vm962_vm1 = vcmp.eq.s32.totalorder %v1979_v17, %v800_v60  ;;  %v901_v0 = vcvt.s32.f32 %v899_v46  ;;  %v1198_v60 = vmul.f32 %v1166_v8, %v1166_v8 }
 0x2a4   :  { %1502 = vmatmul.msk.f32.gmra.mxu1 %vm947_vm11, %v1643_v43  ;;  %1516 = vmatmul.msk.f32.gmra.mxu2 %vm961_vm12, %v1643_v43  ;;  %vm681_vm14 = vcmp.eq.f32.partialorder %v2446_v9, %v2580_v44  ;;  %v812_v9 = vcvt.f32.s32 %v2329_v4 }
 0x2a5   :  { %v682_v59 = vsel %vm681_vm14, %v677_v2, inf }
 0x2a6   :  { %683 = vmin.xlane.f32.xlu2 %v682_v59  ;;  %v2589_v11 = vpop.xlane.xlu1 %875  ;;  %v813_v32 = vshll.u32 %v812_v9, 16 }
 0x2a7   :  { %v2591_v53 = vpop.f32.mrf.mxu1  ;;  %vm877_vm15 = vcmp.eq.f32.partialorder %v2453_v22, %v2589_v11  ;;  %v811_v22 = vcvt.f32.s32 %v2553_v52 }
 0x2a8   :  { %v1362_v7 = vpack.c.bf16 %v2591_v53, %v2591_v53  ;;  %v878_v33 = vsel %vm877_vm15, %v873_v10, inf  ;;  %v689_v10 = vand.u32 65535, %v2486_v61  ;;  %v1230_v61 = vsel %vm86_vm0, %v1198_v60, 0.0 }
 0x2a9   :  { %879 = vmin.xlane.f32.xlu1 %v878_v33  ;;  %v814_v34 = vadd.s32 %v813_v32, %v811_v22 }
 0x2aa   :  { %1395 = vst.msk [vmem:[%s3082_s4 + $0xc] sm:$0xf] %vm1391_vm13, %v1362_v7  ;;  %v691_v33 = vcvt.s32.f32 %v689_v10 }
 0x2ab   :  { %v2611_v4 = vpop.xlane.xlu2 %931  ;;  %vm963_vm4 = vcmp.eq.s32.totalorder %v1979_v17, %v814_v34 }
 0x2ac   :  { %1517 = vmatmul.msk.f32.gmra.mxu2 %vm962_vm1, %v1643_v43  ;;  %vm933_vm5 = vcmp.eq.f32.partialorder %v2458_v36, %v2611_v4  ;;  %v1199_v36 = vmul.f32 %v1167_v51, %v1167_v51 }
 0x2ad   :  { %v934_v39 = vsel %vm933_vm5, %v929_v30, inf }
 0x2ae   :  { %v600_v42 = vpop.xlane.xlu1 %599  ;;  %v1233_v59 = vsel %vm86_vm0, %v1199_v36, 0.0 }
 0x2af   :  { %v601_v14 = vcvt.f32.s32 %v600_v42 }
 0x2b1   :  { %v604_v52 = vadd.s32 %v603_v21, %v601_v14  ;;  %921 = vmin.xlane.f32.xlu1 %v920_v45 }
 0x2b3   :  { %vm948_vm3 = vcmp.eq.s32.totalorder %v1979_v17, %v604_v52  ;;  %v628_v16 = vpop.xlane.xlu2 %627 }
 0x2b4   :  { %1503 = vmatmul.msk.f32.gmra.mxu1 %vm948_vm3, %v1643_v43  ;;  %1518 = vmatmul.msk.f32.gmra.mxu2 %vm963_vm4, %v1643_v43  ;;  %v629_v47 = vcvt.f32.s32 %v628_v16  ;;  %v658_v16 = vcvt.f32.s32 %v2534_v6 }
 0x2b6   :  { %v824_v25 = vpop.xlane.xlu1 %823  ;;  %v632_v2 = vadd.s32 %v631_v50, %v629_v47  ;;  %v3179_v47 = vld [vmem:[#allocation6_spill] sm:$0xff] }
 0x2b7   :  { %v825_v18 = vcvt.f32.s32 %v824_v25  ;;  %v3180_v36 = vunpack.c.l.bf16 %v3179_v47 }
 0x2b8   :  { %vm950_vm9 = vcmp.eq.s32.totalorder %v1979_v17, %v632_v2 }
 0x2b9   :  { %v828_v37 = vadd.s32 %v827_v62, %v825_v18  ;;  %935 = vmin.xlane.f32.xlu1 %v934_v39  ;;  %v644_v62 = vcvt.f32.s32 %v2562_v1 }
 0x2bb   :  { %vm964_vm7 = vcmp.eq.s32.totalorder %v1979_v17, %v828_v37  ;;  %v866_v48 = vpop.xlane.xlu2 %865  ;;  %v645_v18 = vshll.u32 %v644_v62, 16 }
 0x2bc   :  { %1504 = vmatmul.msk.f32.gmra.mxu1 %vm949_vm6, %v1643_v43  ;;  %1519 = vmatmul.msk.f32.gmra.mxu2 %vm964_vm7, %v1643_v43  ;;  %v867_v3 = vcvt.f32.s32 %v866_v48 }
 0x2be   :  { %v2631_v24 = vpop.xlane.xlu1 %903  ;;  %v870_v54 = vadd.s32 %v869_v27, %v867_v3 }
 0x2bf   :  { %vm905_vm8 = vcmp.eq.f32.partialorder %v2483_v63, %v2631_v24  ;;  %v3176_v63 = vld [vmem:[#allocation4_spill] sm:$0xff] }
 0x2c0   :  { %v906_v20 = vsel %vm905_vm8, %v901_v0, inf  ;;  %v3177_v31 = vunpack.c.l.bf16 %v3176_v63  ;;  %v3178_v58 = vunpack.c.h.bf16 %v3176_v63  ;;  %vm967_vm15 = vcmp.eq.s32.totalorder %v1979_v17, %v870_v54 }
 0x2c1   :  { %907 = vmin.xlane.f32.xlu0 %v906_v20  ;;  %1234 = vadd.xlane.f32.xlu1 %v1233_v59  ;;  %v659_v0 = vshll.u32 %v658_v16, 16  ;;  %v672_v59 = vcvt.f32.s32 %v2509_v41  ;;  %vm1326_vm8 = vcmask 7168  }
 0x2c2   :  { %v1168_v9 = vsub.f32 %v2536_v28, %v3177_v31  ;;  %v1169_v23 = vsub.f32 %v2591_v53, %v3178_v58  ;;  %v840_v53 = vcvt.f32.s32 %v2528_v13 }
 0x2c4   :  { %1505 = vmatmul.msk.f32.gmra.mxu1 %vm950_vm9, %v1643_v43  ;;  %v1200_v32 = vmul.f32 %v1168_v9, %v1168_v9  ;;  %v1201_v42 = vmul.f32 %v1169_v23, %v1169_v23  ;;  %v841_v14 = vshll.u32 %v840_v53, 16  ;;  %v3181_v9 = vunpack.c.h.bf16 %v3179_v47 }
 0x2c5   :  { %v673_v23 = vshll.u32 %v672_v59, 16  ;;  %v896_v53 = vcvt.f32.s32 %v2569_v57  ;;  %v3182_v57 = vld [vmem:[#allocation8_spill] sm:$0xff] }
 0x2c6   :  { %v2642_v7 = vpop.xlane.xlu1 %693  ;;  %v1239_v12 = vsel %vm86_vm0, %v1201_v42, 0.0  ;;  %v1236_v21 = vsel %vm86_vm0, %v1200_v32, 0.0 }
 0x2c7   :  { %vm695_vm10 = vcmp.eq.f32.partialorder %v2490_v38, %v2642_v7 }
 0x2c8   :  { %v696_v22 = vsel %vm695_vm10, %v691_v33, inf  ;;  %v882_v33 = vcvt.f32.s32 %v2589_v11 }
 0x2c9   :  { %1231 = vadd.xlane.f32.xlu0 %v1230_v61  ;;  %697 = vmin.xlane.f32.xlu2 %v696_v22 }
 0x2ca   :  { %v883_v22 = vshll.u32 %v882_v33, 16 }
 0x2d1   :  { %1240 = vadd.xlane.f32.xlu0 %v1239_v12  ;;  %1237 = vadd.xlane.f32.xlu2 %v1236_v21 }
 0x2eb   :  { %v2655_v38 = vpop.f32.mrf.mxu2 }
 0x2ec   :  { %v1374_v28 = vpack.c.bf16 %v2655_v38, %v2655_v38  ;;  %v670_v8 = vpop.xlane.xlu2 %669 }
 0x2ed   :  { %v671_v63 = vcvt.f32.s32 %v670_v8 }
 0x2ee   :  { %1407 = vst.msk [vmem:[%s3082_s4 + $0x3c] sm:$0xf] %vm1391_vm13, %v1374_v28 }
 0x2ef   :  { %v674_v32 = vadd.s32 %v673_v23, %v671_v63  ;;  %v3185_v23 = vld [vmem:[#allocation10_spill] sm:$0xff] }
 0x2f1   :  { %vm953_vm2 = vcmp.eq.s32.totalorder %v1979_v17, %v674_v32 }
 0x2fc   :  { %v838_v34 = vpop.xlane.xlu0 %837 }
 0x2fd   :  { %v839_v19 = vcvt.f32.s32 %v838_v34  ;;  %v686_v34 = vcvt.f32.s32 %v2580_v44  ;;  %v3183_v44 = vunpack.c.l.bf16 %v3182_v57 }
 0x2ff   :  { %v842_v45 = vadd.s32 %v841_v14, %v839_v19 }
 0x301   :  { %vm965_vm11 = vcmp.eq.s32.totalorder %v1979_v17, %v842_v45  ;;  %v924_v45 = vcvt.f32.s32 %v2595_v35  ;;  %v897_v35 = vshll.u32 %v896_v53, 16 }
 0x302   :  { %1520 = vmatmul.msk.f32.gmra.mxu2 %vm965_vm11, %v1643_v43 }
 0x303   :  { %v925_v3 = vshll.u32 %v924_v45, 16 }
 0x304   :  { %v852_v52 = vpop.xlane.xlu0 %851 }
 0x305   :  { %v853_v55 = vcvt.f32.s32 %v852_v52 }
 0x307   :  { %v856_v25 = vadd.s32 %v855_v49, %v853_v55  ;;  %v2668_v30 = vpop.f32.mrf.mxu2 }
 0x308   :  { %v1375_v13 = vpack.c.bf16 %v2668_v30, %v2668_v30 }
 0x309   :  { %vm966_vm12 = vcmp.eq.s32.totalorder %v1979_v17, %v856_v25  ;;  %v687_v25 = vshll.u32 %v686_v34, 16 }
 0x30a   :  { %1408 = vst.msk [vmem:[%s3082_s4 + $0x40] sm:$0xf] %vm1391_vm13, %v1375_v13  ;;  %1521 = vmatmul.msk.f32.gmra.mxu2 %vm966_vm12, %v1643_v43 }
 0x30c   :  { %v642_v56 = vpop.xlane.xlu1 %641  ;;  %v656_v51 = vpop.xlane.xlu0 %655 }
 0x30d   :  { %v643_v15 = vcvt.f32.s32 %v642_v56  ;;  %v657_v37 = vcvt.f32.s32 %v656_v51 }
 0x30f   :  { %v646_v39 = vadd.s32 %v645_v18, %v643_v15  ;;  %v2680_v1 = vpop.f32.mrf.mxu2  ;;  %v660_v40 = vadd.s32 %v659_v0, %v657_v37  ;;  %v3184_v0 = vunpack.c.h.bf16 %v3182_v57 }
 0x310   :  { %v1376_v26 = vpack.c.bf16 %v2680_v1, %v2680_v1 }
 0x311   :  { %v1082_v46 = vpop.f32.mrf.mxu1  ;;  %vm951_vm14 = vcmp.eq.s32.totalorder %v1979_v17, %v646_v39  ;;  %vm952_vm1 = vcmp.eq.s32.totalorder %v1979_v17, %v660_v40  ;;  %v938_v39 = vcvt.f32.s32 %v2611_v4 }
 0x312   :  { %1409 = vst.msk [vmem:[%s3082_s4 + $0x44] sm:$0xf] %vm1391_vm13, %v1376_v26  ;;  %v1170_v6 = vsub.f32 %v1082_v46, %v3180_v36  ;;  %v1363_v50 = vpack.c.bf16 %v1082_v46, %v1082_v46  ;;  %1506 = vmatmul.msk.f32.gmra.mxu1 %vm951_vm14, %v1643_v43  ;;  %1522 = vmatmul.msk.f32.gmra.mxu2 %vm967_vm15, %v1643_v43 }
 0x313   :  { %v939_v37 = vshll.u32 %v938_v39, 16 }
 0x314   :  { %v1202_v2 = vmul.f32 %v1170_v6, %v1170_v6  ;;  %1396 = vst.msk [vmem:[%s3082_s4 + $0x10] sm:$0xf] %vm1391_vm13, %v1363_v50  ;;  %v894_v12 = vpop.xlane.xlu0 %893  ;;  %v910_v6 = vcvt.f32.s32 %v2631_v24 }
 0x315   :  { %v895_v52 = vcvt.f32.s32 %v894_v12 }
 0x316   :  { %v1242_v20 = vsel %vm86_vm0, %v1202_v2, 0.0  ;;  %v911_v59 = vshll.u32 %v910_v6, 16 }
 0x317   :  { %v2700_v10 = vpop.f32.mrf.mxu2  ;;  %1243 = vadd.xlane.f32.xlu1 %v1242_v20  ;;  %v898_v27 = vadd.s32 %v897_v35, %v895_v52 }
 0x318   :  { %v1377_v60 = vpack.c.bf16 %v2700_v10, %v2700_v10 }
 0x319   :  { %v1085_v31 = vpop.f32.mrf.mxu1  ;;  %v684_v21 = vpop.xlane.xlu2 %683  ;;  %vm969_vm5 = vcmp.eq.s32.totalorder %v1979_v17, %v898_v27 }
 0x31a   :  { %1410 = vst.msk [vmem:[%s3082_s4 + $0x48] sm:$0xf] %vm1391_vm13, %v1377_v60  ;;  %v1171_v41 = vsub.f32 %v1085_v31, %v3181_v9  ;;  %v1364_v58 = vpack.c.bf16 %v1085_v31, %v1085_v31  ;;  %1507 = vmatmul.msk.f32.gmra.mxu1 %vm952_vm1, %v1643_v43  ;;  %v685_v49 = vcvt.f32.s32 %v684_v21 }
 0x31c   :  { %v1203_v61 = vmul.f32 %v1171_v41, %v1171_v41  ;;  %1397 = vst.msk [vmem:[%s3082_s4 + $0x14] sm:$0xf] %vm1391_vm13, %v1364_v58  ;;  %v880_v11 = vpop.xlane.xlu1 %879  ;;  %v688_v56 = vadd.s32 %v687_v25, %v685_v49  ;;  %v700_v41 = vcvt.f32.s32 %v2642_v7 }
 0x31d   :  { %v881_v42 = vcvt.f32.s32 %v880_v11 }
 0x31e   :  { %v1245_v28 = vsel %vm86_vm0, %v1203_v61, 0.0  ;;  %vm954_vm4 = vcmp.eq.s32.totalorder %v1979_v17, %v688_v56  ;;  %v3186_v61 = vunpack.c.l.bf16 %v3185_v23  ;;  %v701_v12 = vshll.u32 %v700_v41, 16 }
 0x31f   :  { %v884_v14 = vadd.s32 %v883_v22, %v881_v42  ;;  %v2720_v19 = vpop.f32.mrf.mxu2  ;;  %1246 = vadd.xlane.f32.xlu2 %v1245_v28 }
 0x320   :  { %v1378_v29 = vpack.c.bf16 %v2720_v19, %v2720_v19 }
 0x321   :  { %v1088_v55 = vpop.f32.mrf.mxu1  ;;  %vm968_vm3 = vcmp.eq.s32.totalorder %v1979_v17, %v884_v14 }
 0x322   :  { %1411 = vst.msk [vmem:[%s3082_s4 + $0x4c] sm:$0xf] %vm1391_vm13, %v1378_v29  ;;  %v1172_v48 = vsub.f32 %v1088_v55, %v3183_v44  ;;  %v1365_v5 = vpack.c.bf16 %v1088_v55, %v1088_v55  ;;  %1508 = vmatmul.msk.f32.gmra.mxu1 %vm953_vm2, %v1643_v43  ;;  %1523 = vmatmul.msk.f32.gmra.mxu2 %vm968_vm3, %v1643_v43  ;;  %v3187_v29 = vunpack.c.h.bf16 %v3185_v23 }
 0x324   :  { %v1204_v13 = vmul.f32 %v1172_v48, %v1172_v48  ;;  %1398 = vst.msk [vmem:[%s3082_s4 + $0x18] sm:$0xf] %vm1391_vm13, %v1365_v5  ;;  %v922_v62 = vpop.xlane.xlu1 %921 }
 0x325   :  { %v923_v18 = vcvt.f32.s32 %v922_v62  ;;  %v3188_v62 = vld [vmem:[#allocation12_spill] sm:$0xff] }
 0x326   :  { %v1248_v54 = vsel %vm86_vm0, %v1204_v13, 0.0 }
 0x327   :  { %v926_v15 = vadd.s32 %v925_v3, %v923_v18  ;;  %v2740_v51 = vpop.f32.mrf.mxu2  ;;  %1249 = vadd.xlane.f32.xlu0 %v1248_v54  ;;  %v3189_v3 = vunpack.c.l.bf16 %v3188_v62 }
 0x328   :  { %v1379_v16 = vpack.c.bf16 %v2740_v51, %v2740_v51 }
 0x329   :  { %vm971_vm6 = vcmp.eq.s32.totalorder %v1979_v17, %v926_v15 }
 0x32a   :  { %1412 = vst.msk [vmem:[%s3082_s4 + $0x50] sm:$0xf] %vm1391_vm13, %v1379_v16  ;;  %1509 = vmatmul.msk.f32.gmra.mxu1 %vm954_vm4, %v1643_v43  ;;  %1524 = vmatmul.msk.f32.gmra.mxu2 %vm969_vm5, %v1643_v43 }
 0x32b   :  { %1526 = vmatmul.msk.f32.vlgmr.msrb.gmra.mxu3 %vm971_vm6, %v1643_v43 }
 0x32c   :  { %v936_v26 = vpop.xlane.xlu1 %935 }
 0x32d   :  { %v937_v4 = vcvt.f32.s32 %v936_v26 }
 0x32f   :  { %v940_v46 = vadd.s32 %v939_v37, %v937_v4  ;;  %v2755_v47 = vpop.f32.mrf.mxu2  ;;  %v3190_v37 = vunpack.c.h.bf16 %v3188_v62 }
 0x330   :  { %v1380_v36 = vpack.c.bf16 %v2755_v47, %v2755_v47 }
 0x331   :  { %v1091_v50 = vpop.f32.mrf.mxu1  ;;  %vm972_vm7 = vcmp.eq.s32.totalorder %v1979_v17, %v940_v46 }
 0x332   :  { %1413 = vst.msk [vmem:[%s3082_s4 + $0x54] sm:$0xf] %vm1391_vm13, %v1380_v36  ;;  %v1173_v2 = vsub.f32 %v1091_v50, %v3184_v0  ;;  %v1366_v40 = vpack.c.bf16 %v1091_v50, %v1091_v50 }
 0x333   :  { %1527 = vmatmul.msk.f32.gmra.mxu3 %vm972_vm7, %v1643_v43 }
 0x334   :  { %v1205_v8 = vmul.f32 %v1173_v2, %v1173_v2  ;;  %1399 = vst.msk [vmem:[%s3082_s4 + $0x1c] sm:$0xf] %vm1391_vm13, %v1366_v40  ;;  %v908_v24 = vpop.xlane.xlu0 %907  ;;  %v1235_v20 = vpop.xlane.xlu1 %1234  ;;  %v3191_v2 = vld [vmem:[#allocation13_spill] sm:$0xff] }
 0x335   :  { %v909_v60 = vcvt.f32.s32 %v908_v24  ;;  %1328 = vst.msk [vmem:[%s3083_s5 + $0x8] sm:$0xff] %vm1326_vm8, %v1235_v20  ;;  %v3192_v40 = vunpack.c.l.bf16 %v3191_v2 }
 0x336   :  { %v1251_v33 = vsel %vm86_vm0, %v1205_v8, 0.0 }
 0x337   :  { %v912_v63 = vadd.s32 %v911_v59, %v909_v60  ;;  %v2777_v31 = vpop.f32.mrf.mxu2  ;;  %1252 = vadd.xlane.f32.xlu1 %v1251_v33  ;;  %v3193_v59 = vld [vmem:[#allocation14_spill] sm:$0xff] }
 0x338   :  { %v1381_v9 = vpack.c.bf16 %v2777_v31, %v2777_v31  ;;  %v3194_v60 = vunpack.c.h.bf16 %v3193_v59 }
 0x339   :  { %v1094_v58 = vpop.f32.mrf.mxu1  ;;  %vm970_vm9 = vcmp.eq.s32.totalorder %v1979_v17, %v912_v63 }
 0x33a   :  { %1414 = vst.msk [vmem:[%s3082_s4 + $0x58] sm:$0xf] %vm1391_vm13, %v1381_v9  ;;  %v1174_v11 = vsub.f32 %v1094_v58, %v3186_v61  ;;  %v1367_v22 = vpack.c.bf16 %v1094_v58, %v1094_v58  ;;  %1525 = vmatmul.msk.f32.gmra.mxu2 %vm970_vm9, %v1643_v43  ;;  %v1181_v33 = vsub.f32 %v2655_v38, %v3194_v60  ;;  %v3195_v61 = vunpack.c.h.bf16 %v3191_v2 }
 0x33b   :  { %v3207_v2 = vunpack.c.l.bf16 %v3193_v59 }
 0x33c   :  { %v1206_v32 = vmul.f32 %v1174_v11, %v1174_v11  ;;  %1400 = vst.msk [vmem:[%s3082_s4 + $0x20] sm:$0xf] %vm1391_vm13, %v1367_v22  ;;  %v1232_v7 = vpop.xlane.xlu0 %1231  ;;  %v698_v42 = vpop.xlane.xlu2 %697  ;;  %v1213_v23 = vmul.f32 %v1181_v33, %v1181_v33  ;;  %v3209_v33 = vld [vmem:[#allocation11_spill] sm:$0xff] }
 0x33d   :  { %1327 = vst.msk [vmem:[%s3083_s5] sm:$0xff] %vm1326_vm8, %v1232_v7  ;;  %v699_v21 = vcvt.f32.s32 %v698_v42  ;;  %v3196_v7 = vld [vmem:[#allocation15_spill] sm:$0xff] }
 0x33e   :  { %v1254_v28 = vsel %vm86_vm0, %v1206_v32, 0.0  ;;  %v3197_v42 = vunpack.c.l.bf16 %v3196_v7 }
 0x33f   :  { %v702_v53 = vadd.s32 %v701_v12, %v699_v21  ;;  %v2799_v34 = vpop.f32.mrf.mxu2  ;;  %1255 = vadd.xlane.f32.xlu2 %v1254_v28  ;;  %v3198_v21 = vld [vmem:[#allocation3_spill] sm:$0xff] }
 0x340   :  { %v1382_v14 = vpack.c.bf16 %v2799_v34, %v2799_v34  ;;  %v1182_v12 = vsub.f32 %v2668_v30, %v3197_v42  ;;  %v3199_v28 = vunpack.c.l.bf16 %v3198_v21 }
 0x341   :  { %v1097_v45 = vpop.f32.mrf.mxu1  ;;  %vm955_vm10 = vcmp.eq.s32.totalorder %v1979_v17, %v702_v53 }
 0x342   :  { %1415 = vst.msk [vmem:[%s3082_s4 + $0x5c] sm:$0xf] %vm1391_vm13, %v1382_v14  ;;  %v1175_v52 = vsub.f32 %v1097_v45, %v3187_v29  ;;  %v1368_v49 = vpack.c.bf16 %v1097_v45, %v1097_v45  ;;  %1510 = vmatmul.msk.f32.gmra.mxu1 %vm955_vm10, %v1643_v43  ;;  %v1184_v53 = vsub.f32 %v2700_v10, %v3199_v28  ;;  %v1275_v14 = vsel %vm86_vm0, %v1213_v23, 0.0 }
 0x343   :  { %v3200_v10 = vunpack.c.h.bf16 %v3198_v21  ;;  %v3211_v23 = vunpack.c.h.bf16 %v3196_v7 }
 0x344   :  { %v1207_v55 = vmul.f32 %v1175_v52, %v1175_v52  ;;  %1401 = vst.msk [vmem:[%s3082_s4 + $0x24] sm:$0xf] %vm1391_vm13, %v1368_v49  ;;  %v1241_v57 = vpop.xlane.xlu0 %1240  ;;  %v1238_v44 = vpop.xlane.xlu2 %1237 }
 0x345   :  { %1330 = vst.msk [vmem:[%s3083_s5 + $0x18] sm:$0xff] %vm1326_vm8, %v1241_v57  ;;  %v1214_v57 = vmul.f32 %v1182_v12, %v1182_v12  ;;  %v3214_v12 = vld [vmem:[#allocation17_spill] sm:$0xff] }
 0x346   :  { %1329 = vst.msk [vmem:[%s3083_s5 + $0x10] sm:$0xff] %vm1326_vm8, %v1238_v44  ;;  %v1257_v17 = vsel %vm86_vm0, %v1207_v55, 0.0  ;;  %v1216_v44 = vmul.f32 %v1184_v53, %v1184_v53  ;;  %v3215_v21 = vunpack.c.l.bf16 %v3214_v12 }
 0x347   :  { %1258 = vadd.xlane.f32.xlu0 %v1257_v17  ;;  %v1185_v17 = vsub.f32 %v2720_v19, %v3200_v10  ;;  %v1278_v62 = vsel %vm86_vm0, %v1214_v57, 0.0 }
 0x385   :  { %v2824_v43 = vpop.f32.mrf.mxu2 }
 0x386   :  { %v1383_v48 = vpack.c.bf16 %v2824_v43, %v2824_v43 }
 0x388   :  { %1416 = vst.msk [vmem:[%s3082_s4 + $0x60] sm:$0xf] %vm1391_vm13, %v1383_v48  ;;  %v3201_v48 = vld [vmem:[#allocation5_spill] sm:$0xff] }
 0x389   :  { %v3216_v7 = vunpack.c.l.bf16 %v3201_v48 }
 0x38a   :  { %v1244_v5 = vpop.xlane.xlu1 %1243 }
 0x38b   :  { %1331 = vst.msk [vmem:[%s3083_s5 + $0x20] sm:$0xff] %vm1326_vm8, %v1244_v5  ;;  %v3202_v5 = vunpack.c.h.bf16 %v3201_v48 }
 0x38d   :  { %v2836_v35 = vpop.f32.mrf.mxu2 }
 0x38e   :  { %v1384_v25 = vpack.c.bf16 %v2836_v35, %v2836_v35 }
 0x38f   :  { %v1100_v13 = vpop.f32.mrf.mxu1 }
 0x390   :  { %1417 = vst.msk [vmem:[%s3082_s4 + $0x64] sm:$0xf] %vm1391_vm13, %v1384_v25  ;;  %v1176_v27 = vsub.f32 %v1100_v13, %v3189_v3  ;;  %v1369_v56 = vpack.c.bf16 %v1100_v13, %v1100_v13  ;;  %v1187_v25 = vsub.f32 %v2755_v47, %v3202_v5  ;;  %v1284_v13 = vsel %vm86_vm0, %v1216_v44, 0.0 }
 0x392   :  { %v1208_v18 = vmul.f32 %v1176_v27, %v1176_v27  ;;  %1402 = vst.msk [vmem:[%s3082_s4 + $0x28] sm:$0xf] %vm1391_vm13, %v1369_v56  ;;  %v1247_v54 = vpop.xlane.xlu2 %1246  ;;  %v1217_v56 = vmul.f32 %v1185_v17, %v1185_v17 }
 0x393   :  { %1332 = vst.msk [vmem:[%s3083_s5 + $0x28] sm:$0xff] %vm1326_vm8, %v1247_v54  ;;  %v3203_v54 = vld [vmem:[#allocation7_spill] sm:$0xff] }
 0x394   :  { %v1260_v15 = vsel %vm86_vm0, %v1208_v18, 0.0  ;;  %v1219_v18 = vmul.f32 %v1187_v25, %v1187_v25  ;;  %v3219_v25 = vunpack.c.l.bf16 %v3209_v33 }
 0x395   :  { %1261 = vadd.xlane.f32.xlu1 %v1260_v15  ;;  %v2855_v16 = vpop.f32.mrf.mxu2  ;;  %v3204_v15 = vunpack.c.l.bf16 %v3203_v54 }
 0x396   :  { %v1385_v39 = vpack.c.bf16 %v2855_v16, %v2855_v16 }
 0x397   :  { %v1103_v26 = vpop.f32.mrf.mxu1  ;;  %v1188_v47 = vsub.f32 %v2777_v31, %v3204_v15 }
 0x398   :  { %1418 = vst.msk [vmem:[%s3082_s4 + $0x68] sm:$0xf] %vm1391_vm13, %v1385_v39  ;;  %v1177_v4 = vsub.f32 %v1103_v26, %v3190_v37  ;;  %v1370_v46 = vpack.c.bf16 %v1103_v26, %v1103_v26  ;;  %v3205_v39 = vld [vmem:[#allocation9_spill] sm:$0xff] }
 0x399   :  { %v3206_v26 = vunpack.c.l.bf16 %v3205_v39 }
 0x39a   :  { %v1209_v36 = vmul.f32 %v1177_v4, %v1177_v4  ;;  %1403 = vst.msk [vmem:[%s3082_s4 + $0x2c] sm:$0xf] %vm1391_vm13, %v1370_v46  ;;  %v1250_v6 = vpop.xlane.xlu0 %1249  ;;  %v1293_v4 = vsel %vm86_vm0, %v1219_v18, 0.0  ;;  %v1287_v46 = vsel %vm86_vm0, %v1217_v56, 0.0 }
 0x39b   :  { %1333 = vst.msk [vmem:[%s3083_s5 + $0x30] sm:$0xff] %vm1326_vm8, %v1250_v6  ;;  %v1190_v37 = vsub.f32 %v2824_v43, %v3206_v26 }
 0x39c   :  { %v1263_v50 = vsel %vm86_vm0, %v1209_v36, 0.0 }
 0x39d   :  { %1264 = vadd.xlane.f32.xlu2 %v1263_v50  ;;  %v1220_v50 = vmul.f32 %v1188_v47, %v1188_v47  ;;  %v1222_v31 = vmul.f32 %v1190_v37, %v1190_v37 }
 0x39f   :  { %v1106_v0 = vpop.f32.mrf.mxu1 }
 0x3a0   :  { %v1178_v8 = vsub.f32 %v1106_v0, %v3192_v40  ;;  %v1371_v24 = vpack.c.bf16 %v1106_v0, %v1106_v0 }
 0x3a2   :  { %v1210_v20 = vmul.f32 %v1178_v8, %v1178_v8  ;;  %1404 = vst.msk [vmem:[%s3082_s4 + $0x30] sm:$0xf] %vm1391_vm13, %v1371_v24  ;;  %v1296_v24 = vsel %vm86_vm0, %v1220_v50, 0.0 }
 0x3a4   :  { %v1266_v63 = vsel %vm86_vm0, %v1210_v20, 0.0  ;;  %v3208_v20 = vunpack.c.h.bf16 %v3205_v39 }
 0x3a5   :  { %v1151_v9 = vpop.f32.mrf.mxu2  ;;  %1267 = vadd.xlane.f32.xlu0 %v1266_v63  ;;  %v3210_v63 = vunpack.c.h.bf16 %v3209_v33 }
 0x3a6   :  { %v1386_v41 = vpack.c.bf16 %v1151_v9, %v1151_v9  ;;  %v1191_v60 = vsub.f32 %v2836_v35, %v3208_v20 }
 0x3a7   :  { %v1109_v58 = vpop.f32.mrf.mxu1 }
 0x3a8   :  { %1419 = vst.msk [vmem:[%s3082_s4 + $0x6c] sm:$0xf] %vm1391_vm13, %v1386_v41  ;;  %v1179_v11 = vsub.f32 %v1109_v58, %v3195_v61  ;;  %v1372_v22 = vpack.c.bf16 %v1109_v58, %v1109_v58  ;;  %v1193_v41 = vsub.f32 %v1151_v9, %v3210_v63  ;;  %v1302_v58 = vsel %vm86_vm0, %v1222_v31, 0.0 }
 0x3a9   :  { %v1183_v61 = vsub.f32 %v2680_v1, %v3211_v23  ;;  %v1186_v1 = vsub.f32 %v2740_v51, %v3216_v7 }
 0x3aa   :  { %v1211_v32 = vmul.f32 %v1179_v11, %v1179_v11  ;;  %1405 = vst.msk [vmem:[%s3082_s4 + $0x34] sm:$0xf] %vm1391_vm13, %v1372_v22  ;;  %v1253_v38 = vpop.xlane.xlu1 %1252  ;;  %v1223_v11 = vmul.f32 %v1191_v60, %v1191_v60  ;;  %v1225_v22 = vmul.f32 %v1193_v41, %v1193_v41 }
 0x3ab   :  { %1334 = vst.msk [vmem:[%s3083_s5 + $0x38] sm:$0xff] %vm1326_vm8, %v1253_v38  ;;  %v3212_v38 = vld [vmem:[#allocation16_spill] sm:$0xff] }
 0x3ac   :  { %v1269_v45 = vsel %vm86_vm0, %v1211_v32, 0.0  ;;  %v1215_v32 = vmul.f32 %v1183_v61, %v1183_v61  ;;  %v3213_v42 = vunpack.c.l.bf16 %v3212_v38  ;;  %v1311_v28 = vsel %vm86_vm0, %v1225_v22, 0.0 }
 0x3ad   :  { %v1154_v29 = vpop.f32.mrf.mxu2  ;;  %1276 = vadd.xlane.f32.xlu0 %v1275_v14  ;;  %1270 = vadd.xlane.f32.xlu1 %v1269_v45  ;;  %v1305_v53 = vsel %vm86_vm0, %v1223_v11, 0.0 }
 0x3ae   :  { %v1387_v52 = vpack.c.bf16 %v1154_v29, %v1154_v29  ;;  %v1160_v49 = vpop.f32.mrf.mxu3  ;;  %v1194_v35 = vsub.f32 %v1154_v29, %v3213_v42  ;;  %v1281_v14 = vsel %vm86_vm0, %v1215_v32, 0.0  ;;  %v3217_v29 = vunpack.c.h.bf16 %v3214_v12 }
 0x3af   :  { %v1389_v55 = vpack.c.bf16 %v1160_v49, %v1160_v49  ;;  %v1196_v9 = vsub.f32 %v1160_v49, %v3215_v21 }
 0x3b0   :  { %1420 = vst.msk [vmem:[%s3082_s4 + $0x70] sm:$0xf] %vm1391_vm13, %v1387_v52  ;;  %v1226_v45 = vmul.f32 %v1194_v35, %v1194_v35 }
 0x3b1   :  { %1422 = vst.msk [vmem:[%s3082_s4 + $0x78] sm:$0xf] %vm1391_vm13, %v1389_v55  ;;  %v1228_v52 = vmul.f32 %v1196_v9, %v1196_v9  ;;  %v1218_v55 = vmul.f32 %v1186_v1, %v1186_v1 }
 0x3b2   :  { %v1256_v30 = vpop.xlane.xlu2 %1255  ;;  %v1314_v44 = vsel %vm86_vm0, %v1226_v45, 0.0 }
 0x3b3   :  { %1335 = vst.msk [vmem:[%s3083_s5 + $0x40] sm:$0xff] %vm1326_vm8, %v1256_v30  ;;  %v1320_v49 = vsel %vm86_vm0, %v1228_v52, 0.0  ;;  %v3218_v30 = vunpack.c.h.bf16 %v3203_v54  ;;  %v1290_v51 = vsel %vm86_vm0, %v1218_v55, 0.0 }
 0x3b5   :  { %1285 = vadd.xlane.f32.xlu0 %v1284_v13  ;;  %1279 = vadd.xlane.f32.xlu1 %v1278_v62  ;;  %v1189_v10 = vsub.f32 %v2799_v34, %v3218_v30  ;;  %v1192_v13 = vsub.f32 %v2855_v16, %v3219_v25  ;;  %v3220_v34 = vunpack.c.h.bf16 %v3212_v38 }
 0x3b6   :  { %v1163_v3 = vpop.f32.mrf.mxu3 }
 0x3b7   :  { %v1390_v27 = vpack.c.bf16 %v1163_v3, %v1163_v3  ;;  %v1197_v57 = vsub.f32 %v1163_v3, %v3217_v29  ;;  %v1221_v48 = vmul.f32 %v1189_v10, %v1189_v10  ;;  %v1224_v3 = vmul.f32 %v1192_v13, %v1192_v13 }
 0x3b9   :  { %1423 = vst.msk [vmem:[%s3082_s4 + $0x7c] sm:$0xf] %vm1391_vm13, %v1390_v27  ;;  %v1229_v17 = vmul.f32 %v1197_v57, %v1197_v57  ;;  %v1299_v62 = vsel %vm86_vm0, %v1221_v48, 0.0  ;;  %v1308_v56 = vsel %vm86_vm0, %v1224_v3, 0.0 }
 0x3ba   :  { %v1259_v19 = vpop.xlane.xlu0 %1258 }
 0x3bb   :  { %1336 = vst.msk [vmem:[%s3083_s5 + $0x48] sm:$0xff] %vm1326_vm8, %v1259_v19  ;;  %v1323_v5 = vsel %vm86_vm0, %v1229_v17, 0.0 }
 0x3bd   :  { %v1157_v36 = vpop.f32.mrf.mxu2  ;;  %1294 = vadd.xlane.f32.xlu0 %v1293_v4  ;;  %1288 = vadd.xlane.f32.xlu1 %v1287_v46 }
 0x3be   :  { %v1388_v6 = vpack.c.bf16 %v1157_v36, %v1157_v36  ;;  %v1195_v27 = vsub.f32 %v1157_v36, %v3220_v34 }
 0x3bf   :  { %v1112_v0 = vpop.f32.mrf.mxu1 }
 0x3c0   :  { %1421 = vst.msk [vmem:[%s3082_s4 + $0x74] sm:$0xf] %vm1391_vm13, %v1388_v6  ;;  %v1180_v40 = vsub.f32 %v1112_v0, %v3207_v2  ;;  %v1373_v43 = vpack.c.bf16 %v1112_v0, %v1112_v0  ;;  %v1227_v18 = vmul.f32 %v1195_v27, %v1195_v27 }
 0x3c2   :  { %v1212_v8 = vmul.f32 %v1180_v40, %v1180_v40  ;;  %1406 = vst.msk [vmem:[%s3082_s4 + $0x38] sm:$0xf] %vm1391_vm13, %v1373_v43  ;;  %v1317_v19 = vsel %vm86_vm0, %v1227_v18, 0.0 }
 0x3c4   :  { %v1272_v59 = vsel %vm86_vm0, %v1212_v8, 0.0 }
 0x3c5   :  { %1303 = vadd.xlane.f32.xlu0 %v1302_v58  ;;  %1297 = vadd.xlane.f32.xlu1 %v1296_v24 }
 0x3c6   :  { %1273 = vadd.xlane.f32.xlu2 %v1272_v59 }
 0x3cd   :  { %1312 = vadd.xlane.f32.xlu0 %v1311_v28  ;;  %1306 = vadd.xlane.f32.xlu1 %v1305_v53 }
 0x3ce   :  { %1282 = vadd.xlane.f32.xlu2 %v1281_v14 }
 0x3d5   :  { %1321 = vadd.xlane.f32.xlu0 %v1320_v49  ;;  %1315 = vadd.xlane.f32.xlu1 %v1314_v44 }
 0x3d6   :  { %1291 = vadd.xlane.f32.xlu2 %v1290_v51 }
 0x3dd   :  { %1324 = vadd.xlane.f32.xlu1 %v1323_v5 }
 0x3de   :  { %1300 = vadd.xlane.f32.xlu2 %v1299_v62 }
 0x3e6   :  { %1309 = vadd.xlane.f32.xlu2 %v1308_v56 }
 0x3ee   :  { %1318 = vadd.xlane.f32.xlu2 %v1317_v19 }
 0x408   :  { %v1262_v54 = vpop.xlane.xlu1 %1261 }
 0x409   :  { %1337 = vst.msk [vmem:[%s3083_s5 + $0x50] sm:$0xff] %vm1326_vm8, %v1262_v54 }
 0x410   :  { %v1265_v16 = vpop.xlane.xlu2 %1264 }
 0x411   :  { %1338 = vst.msk [vmem:[%s3083_s5 + $0x58] sm:$0xff] %vm1326_vm8, %v1265_v16 }
 0x418   :  { %v1268_v15 = vpop.xlane.xlu0 %1267 }
 0x419   :  { %1339 = vst.msk [vmem:[%s3083_s5 + $0x60] sm:$0xff] %vm1326_vm8, %v1268_v15 }
 0x420   :  { %v1277_v47 = vpop.xlane.xlu0 %1276  ;;  %v1271_v39 = vpop.xlane.xlu1 %1270 }
 0x421   :  { %1342 = vst.msk [vmem:[%s3083_s5 + $0x78] sm:$0xff] %vm1326_vm8, %v1277_v47 }
 0x422   :  { %1340 = vst.msk [vmem:[%s3083_s5 + $0x68] sm:$0xff] %vm1326_vm8, %v1271_v39 }
 0x428   :  { %v1286_v26 = vpop.xlane.xlu0 %1285  ;;  %v1280_v37 = vpop.xlane.xlu1 %1279 }
 0x429   :  { %1345 = vst.msk [vmem:[%s3083_s5 + $0x90] sm:$0xff] %vm1326_vm8, %v1286_v26 }
 0x42a   :  { %1343 = vst.msk [vmem:[%s3083_s5 + $0x80] sm:$0xff] %vm1326_vm8, %v1280_v37 }
 0x430   :  { %v1295_v4 = vpop.xlane.xlu0 %1294  ;;  %v1289_v46 = vpop.xlane.xlu1 %1288 }
 0x431   :  { %1348 = vst.msk [vmem:[%s3083_s5 + $0xa8] sm:$0xff] %vm1326_vm8, %v1295_v4 }
 0x432   :  { %1346 = vst.msk [vmem:[%s3083_s5 + $0x98] sm:$0xff] %vm1326_vm8, %v1289_v46 }
 0x438   :  { %v1304_v36 = vpop.xlane.xlu0 %1303  ;;  %v1298_v6 = vpop.xlane.xlu1 %1297 }
 0x439   :  { %1351 = vst.msk [vmem:[%s3083_s5 + $0xc0] sm:$0xff] %vm1326_vm8, %v1304_v36  ;;  %v1274_v50 = vpop.xlane.xlu2 %1273 }
 0x43a   :  { %1349 = vst.msk [vmem:[%s3083_s5 + $0xb0] sm:$0xff] %vm1326_vm8, %v1298_v6 }
 0x43b   :  { %1341 = vst.msk [vmem:[%s3083_s5 + $0x70] sm:$0xff] %vm1326_vm8, %v1274_v50 }
 0x440   :  { %v1313_v0 = vpop.xlane.xlu0 %1312  ;;  %v1307_v31 = vpop.xlane.xlu1 %1306 }
 0x441   :  { %1354 = vst.msk [vmem:[%s3083_s5 + $0xd8] sm:$0xff] %vm1326_vm8, %v1313_v0  ;;  %v1283_v2 = vpop.xlane.xlu2 %1282 }
 0x442   :  { %1352 = vst.msk [vmem:[%s3083_s5 + $0xc8] sm:$0xff] %vm1326_vm8, %v1307_v31 }
 0x443   :  { %1344 = vst.msk [vmem:[%s3083_s5 + $0x88] sm:$0xff] %vm1326_vm8, %v1283_v2 }
 0x448   :  { %v1322_v40 = vpop.xlane.xlu0 %1321  ;;  %v1316_v43 = vpop.xlane.xlu1 %1315 }
 0x449   :  { %1357 = vst.msk [vmem:[%s3083_s5 + $0xf0] sm:$0xff] %vm1326_vm8, %v1322_v40  ;;  %v1292_v8 = vpop.xlane.xlu2 %1291 }
 0x44a   :  { %1355 = vst.msk [vmem:[%s3083_s5 + $0xe0] sm:$0xff] %vm1326_vm8, %v1316_v43 }
 0x44b   :  { %1347 = vst.msk [vmem:[%s3083_s5 + $0xa0] sm:$0xff] %vm1326_vm8, %v1292_v8 }
 0x450   :  { %v1325_v24 = vpop.xlane.xlu1 %1324 }
 0x451   :  { %1358 = vst.msk [vmem:[%s3083_s5 + $0xf8] sm:$0xff] %vm1326_vm8, %v1325_v24  ;;  %v1301_v20 = vpop.xlane.xlu2 %1300 }
 0x452   :  { %1350 = vst.msk [vmem:[%s3083_s5 + $0xb8] sm:$0xff] %vm1326_vm8, %v1301_v20 }
 0x459   :  { %v1310_v60 = vpop.xlane.xlu2 %1309 }
 0x45a   :  { %1353 = vst.msk [vmem:[%s3083_s5 + $0xd0] sm:$0xff] %vm1326_vm8, %v1310_v60 }
 0x461   :  { %v1319_v33 = vpop.xlane.xlu2 %1318 }
 0x462   :  { %1356 = vst.msk [vmem:[%s3083_s5 + $0xe8] sm:$0xff] %vm1326_vm8, %v1319_v33 }

// kernel: vqvae2_forward.49
= control target key start
LH: loop header
LB: loop body
LE: loop exit
PB: predicated region body
PF: predicated region fallthrough
CT: control target
= control target key end

     0   :  { %s440_s12 = smov 0   ;;  %s480_s0 = inlined_call_operand.vmem [shape: bf16[2,64,48], index: 0, kind: input, shape index: {}]   ;;  %s481_s1 = inlined_call_operand.vmem [shape: bf16[1,48,16], index: 1, kind: input, shape index: {}]   ;;  %s482_s2 = inlined_call_operand.vmem [shape: f32[1,16], index: 2, kind: input, shape index: {}]   ;;  %s483_s3 = inlined_call_operand.vmem [shape: bf16[2,64,16], index: 3, kind: output, shape index: {}]  }
   0x1 LB: > { %s342_s13 = sadd.s32 4294967295, %s418_s12   ;;  %p346_p0 = scmp.ge.s32.totalorder %s418_s12, 1  ;;  %s418_s12 = sphi %s440_s12, %s13_s12  }
   0x2   : > { %p137_p1 = scmp.lt.s32.totalorder %s418_s12, 3 }
   0x4   : > { %p138_p2 = pnand %p346_p0, %p137_p1 }
   0x5   : > { %p161_p3 = scmp.lt.s32.totalorder (!%p138_p2), %s342_s13, 1 }
   0x6   : > { %141 = sbr.rel (%p138_p2) target bundleno = 170 (0xaa), region = 32 }
   0xb   : > { %v393_v0 = vld [vmem:[%s481_s1 + $0x10] sm:$0xff]  ;;  %v392_v1 = vld [vmem:[%s481_s1 + $0x8] sm:$0xff]  ;;  %s485_s13 = smov (!%p161_p3, %s342_s13), 1  ;;  %v391_v2 = vld [vmem:[%s481_s1] sm:$0xff]  ;;  %vm228_vm0 = vcmask 392192   ;;  %vm278_vm1 = vcmask 125952  }
   0xc   : > { %246 = vmatpush.bf16.msra.mxu0 %v393_v0  ;;  %394 = vmatpush.bf16.msra.mxu1 %v393_v0  ;;  %s385_s18 = sshll.u32 %s485_s13, 5  ;;  %v411_v7 = vld [vmem:[%s482_s2] ss:$0 sm:$0xff] }
   0xd   : > { %395 = vmatpush.bf16.msra.mxu2 %v393_v0  ;;  %396 = vmatpush.bf16.msra.mxu3 %v393_v0  ;;  %s165_s23 = scalar_lea.vmem %s480_s0, %s385_s18  ;;  %s170_s28 = scalar_lea.vmem %s483_s3, %s385_s18 }
   0xe   : > { %v387_v3 = vld [vmem:[%s165_s23] sm:$0xff]  ;;  %v388_v4 = vld [vmem:[%s165_s23 + $0x8] sm:$0xff]  ;;  %v389_v5 = vld [vmem:[%s165_s23 + $0x10] sm:$0xff] }
   0xf   : > { %v390_v6 = vld [vmem:[%s165_s23 + $0x18] sm:$0xff] }
  0x10   : > { %247 = vmatpush.bf16.msra.mxu0 %v392_v1  ;;  %397 = vmatpush.bf16.msra.mxu1 %v392_v1 }
  0x11   : > { %398 = vmatpush.bf16.msra.mxu2 %v392_v1  ;;  %399 = vmatpush.bf16.msra.mxu3 %v392_v1 }
  0x14   : > { %248 = vmatpush.bf16.msra.mxu0 %v391_v2  ;;  %400 = vmatpush.bf16.msra.mxu1 %v391_v2 }
  0x15   : > { %401 = vmatpush.bf16.msra.mxu2 %v391_v2  ;;  %402 = vmatpush.bf16.msra.mxu3 %v391_v2 }
  0x17   : > { %379 = vmatmul.msk.bf16.vlgmr.msra.gmra.mxu0 %vm228_vm0, %v387_v3  ;;  %380 = vmatmul.msk.bf16.vlgmr.msra.gmra.mxu1 %vm228_vm0, %v388_v4 }
  0x18   : > { %381 = vmatmul.msk.bf16.vlgmr.msra.gmra.mxu2 %vm228_vm0, %v389_v5  ;;  %382 = vmatmul.msk.bf16.vlgmr.msra.gmra.mxu3 %vm228_vm0, %v390_v6 }
  0x94   : > { %v250_v8 = vpop.f32.mrf.mxu0  ;;  %v255_v9 = vpop.f32.mrf.mxu1 }
  0x95   : > { %v251_v10 = vadd.f32 %v411_v7, %v250_v8  ;;  %v256_v11 = vadd.f32 %v411_v7, %v255_v9 }
  0x97   : > { %v270_v12 = vpack.c.bf16 %v251_v10, %v251_v10  ;;  %v272_v13 = vpack.c.bf16 %v256_v11, %v256_v11 }
  0x99   : > { %279 = vst.msk [vmem:[%s170_s28] sm:$0xf] %vm278_vm1, %v270_v12 }
  0x9a   : > { %281 = vst.msk [vmem:[%s170_s28 + $0x8] sm:$0xf] %vm278_vm1, %v272_v13 }
  0x9b   : > { %v260_v14 = vpop.f32.mrf.mxu2  ;;  %v265_v15 = vpop.f32.mrf.mxu3 }
  0x9c   : > { %v261_v16 = vadd.f32 %v411_v7, %v260_v14  ;;  %v266_v17 = vadd.f32 %v411_v7, %v265_v15  ;;  %v252_v18 = vpop.f32.mrf.mxu0  ;;  %v257_v19 = vpop.f32.mrf.mxu1 }
  0x9d   : > { %v253_v20 = vadd.f32 %v411_v7, %v252_v18  ;;  %v258_v21 = vadd.f32 %v411_v7, %v257_v19 }
  0x9e   : > { %v274_v22 = vpack.c.bf16 %v261_v16, %v261_v16  ;;  %v276_v23 = vpack.c.bf16 %v266_v17, %v266_v17 }
  0x9f   : > { %v271_v24 = vpack.c.bf16 %v253_v20, %v253_v20  ;;  %v273_v25 = vpack.c.bf16 %v258_v21, %v258_v21 }
  0xa0   : > { %283 = vst.msk [vmem:[%s170_s28 + $0x10] sm:$0xf] %vm278_vm1, %v274_v22 }
  0xa1   : > { %285 = vst.msk [vmem:[%s170_s28 + $0x18] sm:$0xf] %vm278_vm1, %v276_v23 }
  0xa2   : > { %280 = vst.msk [vmem:[%s170_s28 + $0x4] sm:$0xf] %vm278_vm1, %v271_v24 }
  0xa3   : > { %282 = vst.msk [vmem:[%s170_s28 + $0xc] sm:$0xf] %vm278_vm1, %v273_v25  ;;  %v262_v26 = vpop.f32.mrf.mxu2  ;;  %v267_v27 = vpop.f32.mrf.mxu3 }
  0xa4   : > { %v263_v28 = vadd.f32 %v411_v7, %v262_v26  ;;  %v268_v29 = vadd.f32 %v411_v7, %v267_v27 }
  0xa6   : > { %v275_v30 = vpack.c.bf16 %v263_v28, %v263_v28  ;;  %v277_v31 = vpack.c.bf16 %v268_v29, %v268_v29 }
  0xa8   : > { %284 = vst.msk [vmem:[%s170_s28 + $0x14] sm:$0xf] %vm278_vm1, %v275_v30 }
  0xa9   : > { %286 = vst.msk [vmem:[%s170_s28 + $0x1c] sm:$0xf] %vm278_vm1, %v277_v31 }
  0xaa PF: > { %s13_s12 = sadd.s32 1, %s418_s12  }
  0xab   : > { %p10_p4 = scmp.ge.s32.totalorder %s13_s12, 4  }
  0xad   :  { %12 = sbr.rel (!%p10_p4) target bundleno = 1 (0x1), region = 62 }

// kernel: vqvae2_forward.48
= control target key start
LH: loop header
LB: loop body
LE: loop exit
PB: predicated region body
PF: predicated region fallthrough
CT: control target
= control target key end

     0   :  { %s906_s12 = smov 0   ;;  %s1029_s0 = inlined_call_operand.vmem [shape: bf16[2,38,32], index: 0, kind: input, shape index: {}]   ;;  %s1030_s1 = inlined_call_operand.vmem [shape: bf16[9,32,64], index: 1, kind: input, shape index: {}]   ;;  %s1031_s2 = inlined_call_operand.vmem [shape: f32[1,64], index: 2, kind: input, shape index: {}]   ;;  %s1032_s3 = inlined_call_operand.vmem [shape: bf16[2,24,64], index: 3, kind: output, shape index: {}]  }
   0x1 LB: > { %s707_s13 = sadd.s32 4294967295, %s884_s12   ;;  %p711_p0 = scmp.ge.s32.totalorder %s884_s12, 1  ;;  %s884_s12 = sphi %s906_s12, %s13_s12  }
   0x2   : > { %p137_p1 = scmp.lt.s32.totalorder %s884_s12, 3 }
   0x4   : > { %p138_p2 = pnand %p711_p0, %p137_p1 }
   0x5   : > { %p161_p3 = scmp.lt.s32.totalorder (!%p138_p2), %s707_s13, 1 }
   0x6   : > { %141 = sbr.rel (%p138_p2) target bundleno = 226 (0xe2), region = 32 }
   0xb   : > { %v841_v0 = vld [vmem:[%s1030_s1 + $0x18] sm:$0xff]  ;;  %v843_v1 = vld [vmem:[%s1030_s1 + $0x28] sm:$0xff]  ;;  %v840_v3 = vld [vmem:[%s1030_s1 + $0x10] sm:$0xff]  ;;  %s1034_s13 = smov (!%p161_p3, %s707_s13), 1  ;;  %vm290_vm0 = vcmask 1046528   ;;  %vm338_vm1 = vcmask 1044480  }
   0xc   : > { %v845_v2 = vld [vmem:[%s1030_s1 + $0x38] sm:$0xff]  ;;  %865 = vmatpush.bf16.msra.mxu1 %v841_v0  ;;  %237 = vmatpush.bf16.msra.mxu0 %v841_v0  ;;  %v839_v4 = vld [vmem:[%s1030_s1 + $0x8] sm:$0xff]  ;;  %v842_v5 = vld [vmem:[%s1030_s1 + $0x20] sm:$0xff]  ;;  %s867_s26 = smul.u32 20, %s1034_s13  ;;  %vm224_vm2 = vcmask 261120   ;;  %vm487_vm5 = vcmask 1045504  }
   0xd   : > { %318 = vmatpush.bf16.msra.mxu2 %v843_v1  ;;  %366 = vmatpush.bf16.msra.mxu3 %v845_v2  ;;  %v844_v6 = vld [vmem:[%s1030_s1 + $0x30] sm:$0xff]  ;;  %v847_v7 = vld [vmem:[%s1030_s1 + $0x48] sm:$0xff]  ;;  %v853_v9 = vld [vmem:[%s1030_s1 + $0x78] sm:$0xff]  ;;  %vm196_vm3 = vsmask.f32 7424  ;;  %s868_s4 = smul.u32 12, %s1034_s13 }
   0xe   : > { %v851_v8 = vld [vmem:[%s1030_s1 + $0x68] sm:$0xff]  ;;  %s950_s10 = scalar_lea.vmem %s1029_s0, %s867_s26  ;;  %v838_v12 = vld [vmem:[%s1030_s1] sm:$0xff]  ;;  %v852_v25 = vld [vmem:[%s1030_s1 + $0x70] sm:$0xff]  ;;  %vm386_vm4 = vsmask.f32 4352  ;;  %vm648_vm7 = vcmask 519168  }
   0xf   : > { %v953_v10 = vld [vmem:[%s950_s10 + $0x8] sm:$0xff]   ;;  %v956_v11 = vld [vmem:[%s950_s10] sm:$0xff]   ;;  %v849_v28 = vld [vmem:[%s1030_s1 + $0x58] sm:$0xff]  ;;  %vm535_vm6 = vsmask.f32 5376  ;;  %s170_s7 = scalar_lea.vmem %s1032_s3, %s868_s4 }
  0x10   : > { %866 = vmatpush.bf16.msra.mxu1 %v840_v3  ;;  %238 = vmatpush.bf16.msra.mxu0 %v840_v3  ;;  %v205_v13 = vshll.u32 %v953_v10, 16  ;;  %v209_v14 = vshrl.u32 %v953_v10, 16  ;;  %v198_v15 = vshrl.u32 %v956_v11, 16  ;;  %v200_v16 = vshll.u32 %v956_v11, 16  ;;  %v846_v21 = vld [vmem:[%s1030_s1 + $0x40] sm:$0xff]  ;;  %v855_v31 = vld [vmem:[%s1030_s1 + $0x88] sm:$0xff] }
  0x11   : > { %319 = vmatpush.bf16.msra.mxu2 %v842_v5  ;;  %367 = vmatpush.bf16.msra.mxu3 %v844_v6  ;;  %v291_v17 = vrot.slane %v956_v11, 1  ;;  %v292_v18 = vrot.slane %v953_v10, 1  ;;  %v339_v19 = vrot.slane %v956_v11, 3  ;;  %v340_v20 = vrot.slane %v953_v10, 3  ;;  %v850_v22 = vld [vmem:[%s1030_s1 + $0x60] sm:$0xff]  ;;  %v848_v33 = vld [vmem:[%s1030_s1 + $0x50] sm:$0xff] }
  0x12   : > { %v207_v23 = vrot.slane %v205_v13, 1  ;;  %v202_v24 = vrot.slane %v200_v16, 1  ;;  %v854_v34 = vld [vmem:[%s1030_s1 + $0x80] sm:$0xff]  ;;  %v176_v35 = vld [vmem:[%s950_s10 + $0x10] sm:$0x7]  ;;  %v390_v36 = vrot.slane %v209_v14, 3  ;;  %v859_v40 = vunpack.c.h.b16 %v956_v11 }
  0x13   : > { %v293_v26 = vsel %vm290_vm0, %v291_v17, %v292_v18  ;;  %v341_v27 = vsel %vm338_vm1, %v339_v19, %v340_v20  ;;  %v387_v37 = vrot.slane %v198_v15, 3  ;;  %v388_v38 = vrot.slane %v200_v16, 4 }
  0x14   : > { %273 = vmatpush.bf16.msrb.mxu1 %v839_v4  ;;  %418 = vmatpush.bf16.msrb.mxu0 %v847_v7  ;;  %v211_v29 = vor.u32 %v209_v14, %v207_v23  ;;  %v203_v30 = vor.u32 %v202_v24, %v198_v15  ;;  %v391_v39 = vrot.slane %v205_v13, 4  ;;  %v862_v41 = vunpack.c.l.b16 %v953_v10 }
  0x15   : > { %515 = vmatpush.bf16.msrb.mxu2 %v851_v8  ;;  %576 = vmatpush.bf16.msrb.mxu3 %v853_v9  ;;  %v863_v42 = vunpack.c.h.b16 %v953_v10  ;;  %v485_v43 = vunpack.c.l.b16 %v176_v35  ;;  %v389_v44 = vor.u32 %v388_v38, %v387_v37 }
  0x16   : > { %750 = vmatmul.msk.bf16.vlgmr.msra.gmra.mxu2 %vm224_vm2, %v293_v26  ;;  %764 = vmatmul.msk.bf16.vlgmr.msra.gmra.mxu3 %vm224_vm2, %v341_v27  ;;  %v208_v32 = vsel %vm196_vm3, %v203_v30, %v207_v23  ;;  %v392_v45 = vor.u32 %v391_v39, %v390_v36  ;;  %v438_v46 = vpack.c.b16 %v862_v41, %v859_v40 }
  0x17   : > { %727 = vmatmul.msk.bf16.vlgmr.msra.gmra.mxu1 %vm224_vm2, %v211_v29  ;;  %726 = vmatmul.msk.bf16.vlgmr.msra.gmra.mxu0 %vm224_vm2, %v208_v32  ;;  %v486_v47 = vpack.c.b16 %v485_v43, %v863_v42  ;;  %v249_v63 = vpack.c.b16 %v862_v41, %v862_v41  ;;  %v439_v3 = vpack.c.b16 %v863_v42, %v863_v42  ;;  %v877_v43 = vld [vmem:[%s1031_s2] ss:$0 sm:$0xff] }
  0x18   : > { %274 = vmatpush.bf16.msrb.mxu1 %v838_v12  ;;  %419 = vmatpush.bf16.msrb.mxu0 %v846_v21  ;;  %v393_v48 = vsel %vm386_vm4, %v389_v44, %v392_v45  ;;  %v536_v49 = vshrl.u32 %v438_v46, 16  ;;  %v539_v50 = vshll.u32 %v438_v46, 16  ;;  %v488_v57 = vrot.slane %v438_v46, 2 }
  0x19   : > { %516 = vmatpush.bf16.msrb.mxu2 %v850_v22  ;;  %577 = vmatpush.bf16.msrb.mxu3 %v852_v25  ;;  %v544_v51 = vshrl.u32 %v486_v47, 16  ;;  %v547_v52 = vshll.u32 %v486_v47, 16  ;;  %v489_v58 = vrot.slane %v486_v47, 2  ;;  %v596_v0 = vrot.slane %v438_v46, 3 }
  0x1a   : > { %v538_v53 = vrot.slane %v536_v49, 2  ;;  %v541_v54 = vrot.slane %v539_v50, 3  ;;  %v597_v1 = vrot.slane %v486_v47, 3 }
  0x1b   : > { %v546_v55 = vrot.slane %v544_v51, 2  ;;  %v549_v56 = vrot.slane %v547_v52, 3  ;;  %v490_v61 = vsel %vm487_vm5, %v488_v57, %v489_v58 }
  0x1c   : > { %464 = vmatpush.bf16.msra.mxu1 %v849_v28  ;;  %623 = vmatpush.bf16.msra.mxu0 %v855_v31  ;;  %v542_v59 = vor.u32 %v541_v54, %v538_v53  ;;  %v598_v2 = vsel %vm338_vm1, %v596_v0, %v597_v1 }
  0x1d   : > { %v550_v60 = vor.u32 %v549_v56, %v546_v55 }
  0x1f   : > { %v551_v62 = vsel %vm535_vm6, %v542_v59, %v550_v60 }
  0x20   : > { %465 = vmatpush.bf16.msra.mxu1 %v848_v33  ;;  %624 = vmatpush.bf16.msra.mxu0 %v854_v34 }
  0x26   : > { %751 = vmatmul.msk.bf16.gmra.mxu2 %vm224_vm2, %v292_v18  ;;  %765 = vmatmul.msk.bf16.gmra.mxu3 %vm224_vm2, %v340_v20 }
  0x27   : > { %736 = vmatmul.msk.bf16.vlgmr.msrb.gmra.mxu1 %vm224_vm2, %v956_v11  ;;  %778 = vmatmul.msk.bf16.vlgmr.msrb.gmra.mxu0 %vm224_vm2, %v393_v48 }
  0x36   : > { %806 = vmatmul.msk.bf16.vlgmr.msrb.gmra.mxu2 %vm224_vm2, %v490_v61  ;;  %820 = vmatmul.msk.bf16.vlgmr.msrb.gmra.mxu3 %vm224_vm2, %v551_v62 }
  0x37   : > { %737 = vmatmul.msk.bf16.gmra.mxu1 %vm224_vm2, %v249_v63  ;;  %779 = vmatmul.msk.bf16.gmra.mxu0 %vm224_vm2, %v392_v45 }
  0x46   : > { %807 = vmatmul.msk.bf16.gmra.mxu2 %vm224_vm2, %v489_v58  ;;  %821 = vmatmul.msk.bf16.gmra.mxu3 %vm224_vm2, %v550_v60 }
  0x47   : > { %792 = vmatmul.msk.bf16.vlgmr.msra.gmra.mxu1 %vm224_vm2, %v438_v46  ;;  %834 = vmatmul.msk.bf16.vlgmr.msra.gmra.mxu0 %vm224_vm2, %v598_v2 }
  0x57   : > { %793 = vmatmul.msk.bf16.gmra.mxu1 %vm224_vm2, %v439_v3  ;;  %835 = vmatmul.msk.bf16.gmra.mxu0 %vm224_vm2, %v597_v1 }
  0x94   : > { %v245_v4 = vpop.f32.mrf.mxu1  ;;  %v240_v5 = vpop.f32.mrf.mxu0 }
  0x99   : > { %v321_v6 = vpop.f32.mrf.mxu2  ;;  %v369_v7 = vpop.f32.mrf.mxu3 }
  0x9c   : > { %v247_v8 = vpop.f32.mrf.mxu1  ;;  %v242_v9 = vpop.f32.mrf.mxu0 }
  0xa1   : > { %v323_v10 = vpop.f32.mrf.mxu2  ;;  %v371_v11 = vpop.f32.mrf.mxu3 }
  0xa4   : > { %v276_v12 = vpop.f32.mrf.mxu1  ;;  %v421_v13 = vpop.f32.mrf.mxu0 }
  0xa5   : > { %v277_v22 = vadd.f32 %v276_v12, %v240_v5 }
  0xa7   : > { %v330_v25 = vadd.f32 %v321_v6, %v277_v22 }
  0xa9   : > { %v326_v14 = vpop.f32.mrf.mxu2  ;;  %v374_v15 = vpop.f32.mrf.mxu3  ;;  %v378_v28 = vadd.f32 %v369_v7, %v330_v25 }
  0xab   : > { %v430_v32 = vadd.f32 %v421_v13, %v378_v28 }
  0xac   : > { %v278_v16 = vpop.f32.mrf.mxu1  ;;  %v423_v17 = vpop.f32.mrf.mxu0 }
  0xad   : > { %v279_v29 = vadd.f32 %v278_v16, %v242_v9 }
  0xaf   : > { %v331_v33 = vadd.f32 %v323_v10, %v279_v29 }
  0xb1   : > { %v328_v18 = vpop.f32.mrf.mxu2  ;;  %v376_v19 = vpop.f32.mrf.mxu3  ;;  %v379_v37 = vadd.f32 %v371_v11, %v331_v33 }
  0xb3   : > { %v431_v44 = vadd.f32 %v423_v17, %v379_v37 }
  0xb4   : > { %v281_v20 = vpop.f32.mrf.mxu1  ;;  %v426_v21 = vpop.f32.mrf.mxu0 }
  0xb5   : > { %v282_v38 = vadd.f32 %v281_v20, %v245_v4 }
  0xb7   : > { %v332_v45 = vadd.f32 %v326_v14, %v282_v38 }
  0xb9   : > { %v518_v23 = vpop.f32.mrf.mxu2  ;;  %v579_v24 = vpop.f32.mrf.mxu3  ;;  %v380_v51 = vadd.f32 %v374_v15, %v332_v45 }
  0xbb   : > { %v432_v57 = vadd.f32 %v426_v21, %v380_v51 }
  0xbc   : > { %v283_v26 = vpop.f32.mrf.mxu1  ;;  %v428_v27 = vpop.f32.mrf.mxu0 }
  0xc1   : > { %v520_v30 = vpop.f32.mrf.mxu2  ;;  %v581_v31 = vpop.f32.mrf.mxu3 }
  0xc4   : > { %v467_v34 = vpop.f32.mrf.mxu1  ;;  %v626_v36 = vpop.f32.mrf.mxu0 }
  0xc5   : > { %v476_v35 = vadd.f32 %v467_v34, %v430_v32 }
  0xc7   : > { %v527_v39 = vadd.f32 %v518_v23, %v476_v35 }
  0xc9   : > { %v523_v40 = vpop.f32.mrf.mxu2  ;;  %v584_v41 = vpop.f32.mrf.mxu3  ;;  %v588_v42 = vadd.f32 %v579_v24, %v527_v39 }
  0xcb   : > { %v635_v46 = vadd.f32 %v626_v36, %v588_v42 }
  0xcc   : > { %v469_v47 = vpop.f32.mrf.mxu1  ;;  %v628_v50 = vpop.f32.mrf.mxu0 }
  0xcd   : > { %v642_v48 = vadd.f32 %v877_v43, %v635_v46  ;;  %v477_v49 = vadd.f32 %v469_v47, %v431_v44 }
  0xcf   : > { %v645_v52 = vpack.c.bf16 %v642_v48, %v642_v48  ;;  %v528_v53 = vadd.f32 %v520_v30, %v477_v49 }
  0xd1   : > { %v525_v54 = vpop.f32.mrf.mxu2  ;;  %v586_v55 = vpop.f32.mrf.mxu3  ;;  %649 = vst.msk [vmem:[%s170_s7] sm:$0xf] %vm648_vm7, %v645_v52  ;;  %v589_v56 = vadd.f32 %v581_v31, %v528_v53 }
  0xd3   : > { %v636_v58 = vadd.f32 %v628_v50, %v589_v56 }
  0xd4   : > { %v472_v59 = vpop.f32.mrf.mxu1  ;;  %v631_v62 = vpop.f32.mrf.mxu0 }
  0xd5   : > { %v643_v60 = vadd.f32 %v877_v43, %v636_v58  ;;  %v478_v61 = vadd.f32 %v472_v59, %v432_v57 }
  0xd7   : > { %v646_v63 = vpack.c.bf16 %v643_v60, %v643_v60  ;;  %v529_v0 = vadd.f32 %v523_v40, %v478_v61 }
  0xd9   : > { %650 = vst.msk [vmem:[%s170_s7 + $0x4] sm:$0xf] %vm648_vm7, %v646_v63  ;;  %v590_v1 = vadd.f32 %v584_v41, %v529_v0 }
  0xdb   : > { %v637_v2 = vadd.f32 %v631_v62, %v590_v1 }
  0xdc   : > { %v474_v3 = vpop.f32.mrf.mxu1  ;;  %v633_v5 = vpop.f32.mrf.mxu0 }
  0xdd   : > { %v644_v4 = vadd.f32 %v877_v43, %v637_v2 }
  0xdf   : > { %v647_v6 = vpack.c.bf16 %v644_v4, %v644_v4 }
  0xe1   : > { %651 = vst.msk [vmem:[%s170_s7 + $0x8] sm:$0xf] %vm648_vm7, %v647_v6 }
  0xe2 PF: > { %s13_s12 = sadd.s32 1, %s884_s12  }
  0xe3   : > { %p10_p4 = scmp.ge.s32.totalorder %s13_s12, 4  }
  0xe5   :  { %12 = sbr.rel (!%p10_p4) target bundleno = 1 (0x1), region = 70 }

// kernel: vqvae2_forward.51
= control target key start
LH: loop header
LB: loop body
LE: loop exit
PB: predicated region body
PF: predicated region fallthrough
CT: control target
= control target key end

     0   :  { %s772_s12 = smov 0   ;;  %s846_s0 = inlined_call_operand.vmem [shape: bf16[2,38,16], index: 0, kind: input, shape index: {}]   ;;  %s847_s1 = inlined_call_operand.vmem [shape: bf16[9,16,64], index: 1, kind: input, shape index: {}]   ;;  %s848_s2 = inlined_call_operand.vmem [shape: f32[1,64], index: 2, kind: input, shape index: {}]   ;;  %s849_s3 = inlined_call_operand.vmem [shape: bf16[2,24,64], index: 3, kind: output, shape index: {}]  }
   0x1 LB: > { %s635_s13 = sadd.s32 4294967295, %s750_s12   ;;  %p639_p0 = scmp.ge.s32.totalorder %s750_s12, 1  ;;  %s750_s12 = sphi %s772_s12, %s13_s12  }
   0x2   : > { %p137_p1 = scmp.lt.s32.totalorder %s750_s12, 3 }
   0x4   : > { %p138_p2 = pnand %p639_p0, %p137_p1 }
   0x5   : > { %p161_p3 = scmp.lt.s32.totalorder (!%p138_p2), %s635_s13, 1 }
   0x6   : > { %141 = sbr.rel (%p138_p2) target bundleno = 225 (0xe1), region = 32 }
   0xb   : > { %v715_v0 = vld [vmem:[%s847_s1 + $0x8] sm:$0xff]  ;;  %v714_v1 = vld [vmem:[%s847_s1] sm:$0xff]  ;;  %v716_v2 = vld [vmem:[%s847_s1 + $0x10] sm:$0xff]  ;;  %s851_s13 = smov (!%p161_p3, %s635_s13), 1  ;;  %vm272_vm0 = vcmask 1046528   ;;  %vm312_vm1 = vcmask 1044480  }
   0xc   : > { %v717_v3 = vld [vmem:[%s847_s1 + $0x18] sm:$0xff]  ;;  %v718_v4 = vld [vmem:[%s847_s1 + $0x20] sm:$0xff]  ;;  %732 = vmatpush.bf16.msra.mxu1 %v715_v0  ;;  %228 = vmatpush.bf16.msra.mxu0 %v715_v0  ;;  %v720_v5 = vld [vmem:[%s847_s1 + $0x30] sm:$0xff]  ;;  %s733_s28 = smul.u32 20, %s851_s13  ;;  %vm214_vm2 = vcmask 130048   ;;  %vm437_vm5 = vcmask 1045504  }
   0xd   : > { %v721_v6 = vld [vmem:[%s847_s1 + $0x38] sm:$0xff]  ;;  %295 = vmatpush.bf16.msra.mxu2 %v716_v2  ;;  %335 = vmatpush.bf16.msra.mxu3 %v717_v3  ;;  %vm192_vm3 = vsmask.f32 7424  ;;  %v719_v21 = vld [vmem:[%s847_s1 + $0x28] sm:$0xff]  ;;  %v722_v24 = vld [vmem:[%s847_s1 + $0x40] sm:$0xff]  ;;  %s734_s11 = smul.u32 12, %s851_s13 }
   0xe   : > { %s165_s4 = scalar_lea.vmem %s846_s0, %s733_s28  ;;  %vm352_vm4 = vsmask.f32 4352  ;;  %vm477_vm6 = vsmask.f32 5376  ;;  %vm576_vm7 = vcmask 519168  }
   0xf   : > { %v731_v7 = vld [vmem:[%s165_s4 + $0x8] sm:$0xff]   ;;  %v724_v8 = vld [vmem:[%s165_s4] sm:$0xff]   ;;  %v176_v26 = vld [vmem:[%s165_s4 + $0x10] sm:$0x7]  ;;  %s170_s16 = scalar_lea.vmem %s849_s3, %s734_s11 }
  0x10   : > { %258 = vmatpush.bf16.msrb.mxu1 %v714_v1  ;;  %379 = vmatpush.bf16.msrb.mxu0 %v718_v4  ;;  %v201_v9 = vshll.u32 %v731_v7, 16  ;;  %v205_v10 = vshrl.u32 %v731_v7, 16  ;;  %v194_v11 = vshrl.u32 %v724_v8, 16  ;;  %v196_v12 = vshll.u32 %v724_v8, 16 }
  0x11   : > { %460 = vmatpush.bf16.msrb.mxu2 %v720_v5  ;;  %513 = vmatpush.bf16.msrb.mxu3 %v721_v6  ;;  %v273_v13 = vrot.slane %v724_v8, 1  ;;  %v274_v14 = vrot.slane %v731_v7, 1  ;;  %v313_v15 = vrot.slane %v724_v8, 3  ;;  %v314_v16 = vrot.slane %v731_v7, 3 }
  0x12   : > { %v203_v17 = vrot.slane %v201_v9, 1  ;;  %v198_v18 = vrot.slane %v196_v12, 1  ;;  %v356_v27 = vrot.slane %v205_v10, 3  ;;  %v353_v28 = vrot.slane %v194_v11, 3 }
  0x13   : > { %v275_v19 = vsel %vm272_vm0, %v273_v13, %v274_v14  ;;  %v315_v20 = vsel %vm312_vm1, %v313_v15, %v314_v16  ;;  %v354_v29 = vrot.slane %v196_v12, 4  ;;  %v357_v30 = vrot.slane %v201_v9, 4 }
  0x14   : > { %v207_v22 = vor.u32 %v205_v10, %v203_v17  ;;  %v199_v23 = vor.u32 %v198_v18, %v194_v11  ;;  %662 = vmatmul.msk.bf16.vlgmr.msra.gmra.mxu2 %vm214_vm2, %v275_v19  ;;  %670 = vmatmul.msk.bf16.vlgmr.msra.gmra.mxu3 %vm214_vm2, %v315_v20  ;;  %v726_v31 = vunpack.c.h.b16 %v724_v8  ;;  %v729_v32 = vunpack.c.l.b16 %v731_v7 }
  0x15   : > { %v730_v33 = vunpack.c.h.b16 %v731_v7  ;;  %v435_v34 = vunpack.c.l.b16 %v176_v26  ;;  %v355_v35 = vor.u32 %v354_v29, %v353_v28  ;;  %v358_v36 = vor.u32 %v357_v30, %v356_v27 }
  0x16   : > { %649 = vmatmul.msk.bf16.vlgmr.msra.gmra.mxu1 %vm214_vm2, %v207_v22  ;;  %v204_v25 = vsel %vm192_vm3, %v199_v23, %v203_v17  ;;  %v396_v37 = vpack.c.b16 %v729_v32, %v726_v31  ;;  %v239_v54 = vpack.c.b16 %v729_v32, %v729_v32 }
  0x17   : > { %648 = vmatmul.msk.bf16.vlgmr.msra.gmra.mxu0 %vm214_vm2, %v204_v25  ;;  %417 = vmatpush.bf16.msra.mxu1 %v719_v21  ;;  %v436_v38 = vpack.c.b16 %v435_v34, %v730_v33  ;;  %v359_v39 = vsel %vm352_vm4, %v355_v35, %v358_v36  ;;  %v397_v58 = vpack.c.b16 %v730_v33, %v730_v33  ;;  %v743_v34 = vld [vmem:[%s848_s2] ss:$0 sm:$0xff] }
  0x18   : > { %552 = vmatpush.bf16.msra.mxu0 %v722_v24  ;;  %v478_v40 = vshrl.u32 %v396_v37, 16  ;;  %v481_v41 = vshll.u32 %v396_v37, 16  ;;  %v438_v48 = vrot.slane %v396_v37, 2  ;;  %v530_v55 = vrot.slane %v396_v37, 3 }
  0x19   : > { %v486_v42 = vshrl.u32 %v436_v38, 16  ;;  %v489_v43 = vshll.u32 %v436_v38, 16  ;;  %v439_v49 = vrot.slane %v436_v38, 2  ;;  %v531_v56 = vrot.slane %v436_v38, 3 }
  0x1a   : > { %v480_v44 = vrot.slane %v478_v40, 2  ;;  %v483_v45 = vrot.slane %v481_v41, 3 }
  0x1b   : > { %v488_v46 = vrot.slane %v486_v42, 2  ;;  %v491_v47 = vrot.slane %v489_v43, 3  ;;  %v440_v52 = vsel %vm437_vm5, %v438_v48, %v439_v49  ;;  %v532_v57 = vsel %vm312_vm1, %v530_v55, %v531_v56 }
  0x1c   : > { %v484_v50 = vor.u32 %v483_v45, %v480_v44 }
  0x1d   : > { %v492_v51 = vor.u32 %v491_v47, %v488_v46 }
  0x1f   : > { %v493_v53 = vsel %vm477_vm6, %v484_v50, %v492_v51 }
  0x24   : > { %663 = vmatmul.msk.bf16.gmra.mxu2 %vm214_vm2, %v274_v14  ;;  %671 = vmatmul.msk.bf16.gmra.mxu3 %vm214_vm2, %v314_v16 }
  0x26   : > { %654 = vmatmul.msk.bf16.vlgmr.msrb.gmra.mxu1 %vm214_vm2, %v724_v8 }
  0x27   : > { %678 = vmatmul.msk.bf16.vlgmr.msrb.gmra.mxu0 %vm214_vm2, %v359_v39 }
  0x34   : > { %694 = vmatmul.msk.bf16.vlgmr.msrb.gmra.mxu2 %vm214_vm2, %v440_v52  ;;  %702 = vmatmul.msk.bf16.vlgmr.msrb.gmra.mxu3 %vm214_vm2, %v493_v53 }
  0x36   : > { %655 = vmatmul.msk.bf16.gmra.mxu1 %vm214_vm2, %v239_v54 }
  0x37   : > { %679 = vmatmul.msk.bf16.gmra.mxu0 %vm214_vm2, %v358_v36 }
  0x44   : > { %695 = vmatmul.msk.bf16.gmra.mxu2 %vm214_vm2, %v439_v49  ;;  %703 = vmatmul.msk.bf16.gmra.mxu3 %vm214_vm2, %v492_v51 }
  0x46   : > { %686 = vmatmul.msk.bf16.vlgmr.msra.gmra.mxu1 %vm214_vm2, %v396_v37 }
  0x47   : > { %710 = vmatmul.msk.bf16.vlgmr.msra.gmra.mxu0 %vm214_vm2, %v532_v57 }
  0x56   : > { %687 = vmatmul.msk.bf16.gmra.mxu1 %vm214_vm2, %v397_v58 }
  0x57   : > { %711 = vmatmul.msk.bf16.gmra.mxu0 %vm214_vm2, %v531_v56 }
  0x93   : > { %v235_v59 = vpop.f32.mrf.mxu1 }
  0x94   : > { %v230_v60 = vpop.f32.mrf.mxu0 }
  0x97   : > { %v297_v61 = vpop.f32.mrf.mxu2  ;;  %v337_v62 = vpop.f32.mrf.mxu3 }
  0x9b   : > { %v237_v63 = vpop.f32.mrf.mxu1 }
  0x9c   : > { %v232_v0 = vpop.f32.mrf.mxu0 }
  0x9f   : > { %v299_v1 = vpop.f32.mrf.mxu2  ;;  %v339_v2 = vpop.f32.mrf.mxu3 }
  0xa3   : > { %v260_v3 = vpop.f32.mrf.mxu1 }
  0xa4   : > { %v381_v4 = vpop.f32.mrf.mxu0  ;;  %v261_v13 = vadd.f32 %v260_v3, %v230_v60 }
  0xa6   : > { %v306_v16 = vadd.f32 %v297_v61, %v261_v13 }
  0xa7   : > { %v302_v5 = vpop.f32.mrf.mxu2  ;;  %v342_v6 = vpop.f32.mrf.mxu3 }
  0xa8   : > { %v346_v19 = vadd.f32 %v337_v62, %v306_v16 }
  0xaa   : > { %v390_v23 = vadd.f32 %v381_v4, %v346_v19 }
  0xab   : > { %v262_v7 = vpop.f32.mrf.mxu1 }
  0xac   : > { %v383_v8 = vpop.f32.mrf.mxu0  ;;  %v263_v20 = vadd.f32 %v262_v7, %v232_v0 }
  0xae   : > { %v307_v24 = vadd.f32 %v299_v1, %v263_v20 }
  0xaf   : > { %v304_v9 = vpop.f32.mrf.mxu2  ;;  %v344_v10 = vpop.f32.mrf.mxu3 }
  0xb0   : > { %v347_v28 = vadd.f32 %v339_v2, %v307_v24 }
  0xb2   : > { %v391_v35 = vadd.f32 %v383_v8, %v347_v28 }
  0xb3   : > { %v265_v11 = vpop.f32.mrf.mxu1 }
  0xb4   : > { %v386_v12 = vpop.f32.mrf.mxu0  ;;  %v266_v29 = vadd.f32 %v265_v11, %v235_v59 }
  0xb6   : > { %v308_v36 = vadd.f32 %v302_v5, %v266_v29 }
  0xb7   : > { %v462_v14 = vpop.f32.mrf.mxu2  ;;  %v515_v15 = vpop.f32.mrf.mxu3 }
  0xb8   : > { %v348_v42 = vadd.f32 %v342_v6, %v308_v36 }
  0xba   : > { %v392_v48 = vadd.f32 %v386_v12, %v348_v42 }
  0xbb   : > { %v267_v17 = vpop.f32.mrf.mxu1 }
  0xbc   : > { %v388_v18 = vpop.f32.mrf.mxu0 }
  0xbf   : > { %v464_v21 = vpop.f32.mrf.mxu2  ;;  %v517_v22 = vpop.f32.mrf.mxu3 }
  0xc3   : > { %v419_v25 = vpop.f32.mrf.mxu1 }
  0xc4   : > { %v428_v26 = vadd.f32 %v419_v25, %v390_v23  ;;  %v554_v27 = vpop.f32.mrf.mxu0 }
  0xc6   : > { %v471_v30 = vadd.f32 %v462_v14, %v428_v26 }
  0xc7   : > { %v467_v31 = vpop.f32.mrf.mxu2  ;;  %v520_v32 = vpop.f32.mrf.mxu3 }
  0xc8   : > { %v524_v33 = vadd.f32 %v515_v15, %v471_v30 }
  0xca   : > { %v563_v37 = vadd.f32 %v554_v27, %v524_v33 }
  0xcb   : > { %v421_v38 = vpop.f32.mrf.mxu1 }
  0xcc   : > { %v570_v39 = vadd.f32 %v743_v34, %v563_v37  ;;  %v429_v40 = vadd.f32 %v421_v38, %v391_v35  ;;  %v556_v41 = vpop.f32.mrf.mxu0 }
  0xce   : > { %v573_v43 = vpack.c.bf16 %v570_v39, %v570_v39  ;;  %v472_v44 = vadd.f32 %v464_v21, %v429_v40 }
  0xcf   : > { %v469_v45 = vpop.f32.mrf.mxu2  ;;  %v522_v46 = vpop.f32.mrf.mxu3 }
  0xd0   : > { %577 = vst.msk [vmem:[%s170_s16] sm:$0xf] %vm576_vm7, %v573_v43  ;;  %v525_v47 = vadd.f32 %v517_v22, %v472_v44 }
  0xd2   : > { %v564_v49 = vadd.f32 %v556_v41, %v525_v47 }
  0xd3   : > { %v424_v50 = vpop.f32.mrf.mxu1 }
  0xd4   : > { %v571_v51 = vadd.f32 %v743_v34, %v564_v49  ;;  %v430_v52 = vadd.f32 %v424_v50, %v392_v48  ;;  %v559_v53 = vpop.f32.mrf.mxu0 }
  0xd6   : > { %v574_v54 = vpack.c.bf16 %v571_v51, %v571_v51  ;;  %v473_v55 = vadd.f32 %v467_v31, %v430_v52 }
  0xd8   : > { %578 = vst.msk [vmem:[%s170_s16 + $0x4] sm:$0xf] %vm576_vm7, %v574_v54  ;;  %v526_v56 = vadd.f32 %v520_v32, %v473_v55 }
  0xda   : > { %v565_v57 = vadd.f32 %v559_v53, %v526_v56 }
  0xdb   : > { %v426_v58 = vpop.f32.mrf.mxu1 }
  0xdc   : > { %v572_v59 = vadd.f32 %v743_v34, %v565_v57  ;;  %v561_v60 = vpop.f32.mrf.mxu0 }
  0xde   : > { %v575_v61 = vpack.c.bf16 %v572_v59, %v572_v59 }
  0xe0   : > { %579 = vst.msk [vmem:[%s170_s16 + $0x8] sm:$0xf] %vm576_vm7, %v575_v61 }
  0xe1 PF: > { %s13_s12 = sadd.s32 1, %s750_s12  }
  0xe2   : > { %p10_p4 = scmp.ge.s32.totalorder %s13_s12, 4  }
  0xe4   :  { %12 = sbr.rel (!%p10_p4) target bundleno = 1 (0x1), region = 70 }

// kernel: vqvae2_forward.52
= control target key start
LH: loop header
LB: loop body
LE: loop exit
PB: predicated region body
PF: predicated region fallthrough
CT: control target
= control target key end

     0   :  { %s1443_s12 = smov 0   ;;  %s1819_s0 = inlined_call_operand.vmem [shape: bf16[2,102,32], index: 0, kind: input, shape index: {}]   ;;  %s1820_s1 = inlined_call_operand.vmem [shape: bf16[9,32,32], index: 1, kind: input, shape index: {}]   ;;  %s1821_s2 = inlined_call_operand.vmem [shape: f32[1,32], index: 2, kind: input, shape index: {}]   ;;  %s1822_s3 = inlined_call_operand.vmem [shape: bf16[2,80,32], index: 3, kind: output, shape index: {}]  }
   0x1 LB: > { %s1165_s13 = sadd.s32 4294967295, %s1421_s12   ;;  %p1169_p0 = scmp.ge.s32.totalorder %s1421_s12, 1  ;;  %s1421_s12 = sphi %s1443_s12, %s13_s12  }
   0x2   : > { %p137_p1 = scmp.lt.s32.totalorder %s1421_s12, 3 }
   0x4   : > { %p138_p2 = pnand %p1169_p0, %p137_p1 }
   0x5   : > { %p161_p3 = scmp.lt.s32.totalorder (!%p138_p2), %s1165_s13, 1 }
   0x6   : > { %141 = sbr.rel (%p138_p2) target bundleno = 350 (0x15e), region = 32 }
   0xb   : > { %v1326_v0 = vld [vmem:[%s1820_s1 + $0x18] sm:$0xff]  ;;  %v1325_v1 = vld [vmem:[%s1820_s1 + $0x10] sm:$0xff]  ;;  %s1824_s13 = smov (!%p161_p3, %s1165_s13), 1  ;;  %v1328_v2 = vld [vmem:[%s1820_s1 + $0x28] sm:$0xff]  ;;  %vm222_vm0 = vsmask.f32 7424 }
   0xc   : > { %1398 = vmatpush.bf16.msra.mxu1 %v1326_v0  ;;  %1399 = vmatpush.bf16.msra.mxu2 %v1326_v0  ;;  %s1404_s20 = smul.u32 52, %s1824_s13  ;;  %v1324_v3 = vld [vmem:[%s1820_s1 + $0x8] sm:$0xff]  ;;  %v1330_v4 = vld [vmem:[%s1820_s1 + $0x38] sm:$0xff]  ;;  %v1323_v6 = vld [vmem:[%s1820_s1] sm:$0xff]  ;;  %vm279_vm1 = vcmask 261120   ;;  %vm390_vm2 = vcmask 1046528  }
   0xd   : > { %1400 = vmatpush.bf16.msra.mxu3 %v1326_v0  ;;  %301 = vmatpush.bf16.msra.mxu0 %v1326_v0  ;;  %v1332_v5 = vld [vmem:[%s1820_s1 + $0x48] sm:$0xff]  ;;  %v1327_v7 = vld [vmem:[%s1820_s1 + $0x20] sm:$0xff]  ;;  %v1329_v20 = vld [vmem:[%s1820_s1 + $0x30] sm:$0xff]  ;;  %vm573_vm3 = vsmask.f32 6400  ;;  %vm703_vm4 = vcmask 1045504  }
   0xe   : > { %s1475_s29 = scalar_lea.vmem %s1819_s0, %s1404_s20  ;;  %v1331_v21 = vld [vmem:[%s1820_s1 + $0x40] sm:$0xff]  ;;  %v1336_v39 = vld [vmem:[%s1820_s1 + $0x68] sm:$0xff]  ;;  %v1338_v40 = vld [vmem:[%s1820_s1 + $0x78] sm:$0xff]  ;;  %vm882_vm5 = vsmask.f32 5376  ;;  %vm992_vm6 = vcmask 1044480  }
   0xf   : > { %v1484_v8 = vld [vmem:[%s1475_s29 + $0x8] sm:$0xff]   ;;  %v1487_v9 = vld [vmem:[%s1475_s29 + $0x10] sm:$0xff]   ;;  %v1490_v10 = vld [vmem:[%s1475_s29 + $0x18] sm:$0xff]   ;;  %s1405_s4 = smul.u32 40, %s1824_s13  ;;  %vm1099_vm7 = vcmask 257024  }
  0x10   : > { %1401 = vmatpush.bf16.msra.mxu1 %v1325_v1  ;;  %1402 = vmatpush.bf16.msra.mxu2 %v1325_v1  ;;  %v231_v11 = vshll.u32 %v1484_v8, 16  ;;  %v235_v12 = vshrl.u32 %v1484_v8, 16  ;;  %v239_v13 = vshll.u32 %v1487_v9, 16  ;;  %v243_v14 = vshrl.u32 %v1487_v9, 16  ;;  %v1497_v15 = vld [vmem:[%s1475_s29 + $0x20] sm:$0xff]   ;;  %v1500_v16 = vld [vmem:[%s1475_s29 + $0x28] sm:$0xff]  }
  0x11   : > { %1403 = vmatpush.bf16.msra.mxu3 %v1325_v1  ;;  %302 = vmatpush.bf16.msra.mxu0 %v1325_v1  ;;  %v247_v17 = vshll.u32 %v1490_v10, 16  ;;  %v1504_v18 = vunpack.c.l.b16 %v1500_v16  ;;  %v255_v19 = vshll.u32 %v1497_v15, 16  ;;  %v1518_v24 = vld [vmem:[%s1475_s29] sm:$0xff]   ;;  %v259_v30 = vshrl.u32 %v1497_v15, 16  ;;  %v1334_v41 = vld [vmem:[%s1820_s1 + $0x58] sm:$0xff]  ;;  %v1340_v44 = vld [vmem:[%s1820_s1 + $0x88] sm:$0xff]  ;;  %s1777_s7 = scalar_lea.vmem %s1822_s3, %s1405_s4 }
  0x12   : > { %v233_v22 = vrot.slane %v231_v11, 1  ;;  %v241_v23 = vrot.slane %v239_v13, 1  ;;  %v224_v32 = vshrl.u32 %v1518_v24, 16  ;;  %v226_v33 = vshll.u32 %v1518_v24, 16  ;;  %v1558_v46 = vld [vmem:[%s1475_s29 + $0x4] sm:$0xff]   ;;  %v1561_v47 = vld [vmem:[%s1475_s29 + $0xc] sm:$0xff]  }
  0x13   : > { %v249_v25 = vrot.slane %v247_v17, 1  ;;  %v1524_v26 = vpack.c.b16 %v1504_v18, %v1504_v18  ;;  %v257_v27 = vrot.slane %v255_v19, 1  ;;  %v251_v48 = vshrl.u32 %v1490_v10, 16  ;;  %v1581_v1 = vld [vmem:[%s1475_s29 + $0x14] sm:$0xff]  }
  0x14   : > { %435 = vmatpush.bf16.msrb.mxu2 %v1328_v2  ;;  %357 = vmatpush.bf16.msrb.mxu1 %v1324_v3  ;;  %v237_v28 = vor.u32 %v235_v12, %v233_v22  ;;  %v245_v29 = vor.u32 %v243_v14, %v241_v23  ;;  %v228_v38 = vrot.slane %v226_v33, 1  ;;  %v575_v49 = vshrl.u32 %v1558_v46, 16 }
  0x15   : > { %530 = vmatpush.bf16.msrb.mxu3 %v1330_v4  ;;  %660 = vmatpush.bf16.msrb.mxu0 %v1332_v5  ;;  %v263_v31 = vshll.u32 %v1524_v26, 16  ;;  %v261_v36 = vor.u32 %v259_v30, %v257_v27  ;;  %v578_v50 = vshll.u32 %v1558_v46, 16  ;;  %v583_v51 = vshrl.u32 %v1561_v47, 16 }
  0x16   : > { %v242_v34 = vsel %vm222_vm0, %v237_v28, %v241_v23  ;;  %v250_v35 = vsel %vm222_vm0, %v245_v29, %v249_v25  ;;  %v229_v43 = vor.u32 %v228_v38, %v224_v32  ;;  %v586_v52 = vshll.u32 %v1561_v47, 16  ;;  %v1333_v28 = vld [vmem:[%s1820_s1 + $0x50] sm:$0xff]  ;;  %v1606_v29 = vld [vmem:[%s1475_s29 + $0x1c] sm:$0xff]  }
  0x17   : > { %1185 = vmatmul.msk.bf16.vlgmr.msra.gmra.mxu1 %vm279_vm1, %v242_v34  ;;  %1186 = vmatmul.msk.bf16.vlgmr.msra.gmra.mxu2 %vm279_vm1, %v250_v35  ;;  %v265_v37 = vrot.slane %v263_v31, 1  ;;  %v253_v53 = vor.u32 %v251_v48, %v249_v25  ;;  %v577_v54 = vrot.slane %v575_v49, 1  ;;  %v580_v55 = vrot.slane %v578_v50, 2 }
  0x18   : > { %436 = vmatpush.bf16.msrb.mxu2 %v1327_v7  ;;  %358 = vmatpush.bf16.msrb.mxu1 %v1323_v6  ;;  %v234_v45 = vsel %vm222_vm0, %v229_v43, %v233_v22  ;;  %v585_v56 = vrot.slane %v583_v51, 1  ;;  %v588_v57 = vrot.slane %v586_v52, 2  ;;  %v486_v58 = vrot.slane %v1558_v46, 1 }
  0x19   : > { %531 = vmatpush.bf16.msrb.mxu3 %v1329_v20  ;;  %661 = vmatpush.bf16.msrb.mxu0 %v1331_v21  ;;  %v266_v42 = vsel %vm222_vm0, %v261_v36, %v265_v37  ;;  %v487_v59 = vrot.slane %v1561_v47, 1  ;;  %v258_v60 = vsel %vm222_vm0, %v253_v53, %v257_v27  ;;  %v581_v61 = vor.u32 %v580_v55, %v577_v54  ;;  %v1337_v27 = vld [vmem:[%s1820_s1 + $0x70] sm:$0xff] }
  0x1a   : > { %1188 = vmatmul.msk.bf16.vlgmr.msra.gmra.mxu3 %vm279_vm1, %v266_v42  ;;  %1184 = vmatmul.msk.bf16.vlgmr.msra.gmra.mxu0 %vm279_vm1, %v234_v45  ;;  %v589_v62 = vor.u32 %v588_v57, %v585_v56  ;;  %v592_v2 = vshrl.u32 %v1581_v1, 16  ;;  %v595_v3 = vshll.u32 %v1581_v1, 16  ;;  %v391_v4 = vrot.slane %v1518_v24, 1 }
  0x1b   : > { %v488_v63 = vsel %vm390_vm2, %v486_v58, %v487_v59  ;;  %v392_v5 = vrot.slane %v1484_v8, 1  ;;  %v489_v20 = vrot.slane %v1581_v1, 1  ;;  %v601_v31 = vshrl.u32 %v1606_v29, 16 }
  0x1c   : > { %839 = vmatpush.bf16.msra.mxu2 %v1336_v39  ;;  %748 = vmatpush.bf16.msra.mxu1 %v1334_v41  ;;  %v590_v0 = vsel %vm573_vm3, %v581_v61, %v589_v62  ;;  %v594_v6 = vrot.slane %v592_v2, 1  ;;  %v597_v7 = vrot.slane %v595_v3, 2  ;;  %v604_v32 = vshll.u32 %v1606_v29, 16  ;;  %v1339_v41 = vld [vmem:[%s1820_s1 + $0x80] sm:$0xff] }
  0x1d   : > { %949 = vmatpush.bf16.msra.mxu3 %v1338_v40  ;;  %1037 = vmatpush.bf16.msra.mxu0 %v1340_v44  ;;  %v393_v21 = vsel %vm390_vm2, %v391_v4, %v392_v5  ;;  %v490_v23 = vsel %vm390_vm2, %v487_v59, %v489_v20  ;;  %v394_v33 = vrot.slane %v1487_v9, 1  ;;  %v603_v34 = vrot.slane %v601_v31, 1 }
  0x1e   : > { %v598_v22 = vor.u32 %v597_v7, %v594_v6  ;;  %v606_v35 = vrot.slane %v604_v32, 2  ;;  %v491_v36 = vrot.slane %v1606_v29, 1  ;;  %v1360_v39 = vunpack.c.h.b16 %v1497_v15 }
  0x1f   : > { %v395_v37 = vsel %vm390_vm2, %v392_v5, %v394_v33  ;;  %v398_v43 = vrot.slane %v1497_v15, 1  ;;  %v400_v44 = vrot.slane %v1524_v26, 1  ;;  %v396_v52 = vrot.slane %v1490_v10, 1 }
  0x20   : > { %v599_v25 = vsel %vm573_vm3, %v589_v62, %v598_v22  ;;  %749 = vmatpush.bf16.msra.mxu1 %v1333_v28  ;;  %v607_v38 = vor.u32 %v606_v35, %v603_v34  ;;  %v492_v40 = vsel %vm390_vm2, %v489_v20, %v491_v36  ;;  %v1627_v45 = vpack.c.b16 %v1504_v18, %v1360_v39 }
  0x21   : > { %950 = vmatpush.bf16.msra.mxu3 %v1337_v27  ;;  %1038 = vmatpush.bf16.msra.mxu0 %v1339_v41  ;;  %v401_v49 = vsel %vm390_vm2, %v398_v43, %v400_v44  ;;  %v887_v55 = vrot.slane %v239_v13, 3  ;;  %v886_v26 = vrot.slane %v243_v14, 2  ;;  %v397_v56 = vsel %vm390_vm2, %v394_v33, %v396_v52 }
  0x22   : > { %v608_v42 = vsel %vm573_vm3, %v598_v22, %v607_v38  ;;  %v610_v50 = vshrl.u32 %v1627_v45, 16  ;;  %v613_v51 = vshll.u32 %v1627_v45, 16  ;;  %v493_v18 = vrot.slane %v1627_v45, 1 }
  0x23   : > { %v704_v57 = vrot.slane %v1558_v46, 2  ;;  %v705_v58 = vrot.slane %v1561_v47, 2  ;;  %v883_v59 = vrot.slane %v235_v12, 2  ;;  %v1364_v14 = vunpack.c.h.b16 %v1500_v16 }
  0x24   : > { %v612_v53 = vrot.slane %v610_v50, 1  ;;  %v615_v54 = vrot.slane %v613_v51, 2  ;;  %v494_v13 = vsel %vm390_vm2, %v491_v36, %v493_v18  ;;  %v884_v46 = vrot.slane %v231_v11, 3 }
  0x25   : > { %v706_v61 = vsel %vm703_vm4, %v704_v57, %v705_v58  ;;  %v888_v47 = vor.u32 %v887_v55, %v886_v26  ;;  %v399_v20 = vsel %vm390_vm2, %v396_v52, %v398_v43  ;;  %v890_v27 = vrot.slane %v251_v48, 2  ;;  %v184_v55 = vld [vmem:[%s1475_s29 + $0x30] sm:$0x7] }
  0x26   : > { %v885_v62 = vor.u32 %v884_v46, %v883_v59  ;;  %v891_v28 = vrot.slane %v247_v17, 3  ;;  %v795_v31 = vrot.slane %v1484_v8, 2  ;;  %v796_v32 = vrot.slane %v1487_v9, 2 }
  0x27   : > { %1187 = vmatmul.msk.bf16.gmra.mxu2 %vm279_vm1, %v258_v60  ;;  %1197 = vmatmul.msk.bf16.vlgmr.msrb.gmra.mxu1 %vm279_vm1, %v1518_v24  ;;  %v1335_v24 = vld [vmem:[%s1820_s1 + $0x60] sm:$0xff]  ;;  %v616_v60 = vor.u32 %v615_v54, %v612_v53  ;;  %v996_v35 = vrot.slane %v1490_v10, 3  ;;  %v709_v17 = vrot.slane %v1606_v29, 2  ;;  %v902_v44 = vshll.u32 %v1500_v16, 16 }
  0x28   : > { %840 = vmatpush.bf16.msra.mxu2 %v1335_v24  ;;  %v889_v2 = vsel %vm882_vm5, %v885_v62, %v888_v47  ;;  %v994_v24 = vrot.slane %v1487_v9, 3  ;;  %v892_v33 = vor.u32 %v891_v28, %v890_v27  ;;  %v797_v34 = vsel %vm703_vm4, %v795_v31, %v796_v32 }
  0x29   : > { %v617_v12 = vsel %vm573_vm3, %v607_v38, %v616_v60  ;;  %v904_v52 = vrot.slane %v902_v44, 3  ;;  %v711_v53 = vrot.slane %v1627_v45, 2  ;;  %v800_v54 = vrot.slane %v1497_v15, 2 }
  0x2a   : > { %1231 = vmatmul.msk.bf16.vlgmr.msrb.gmra.mxu3 %vm279_vm1, %v488_v63  ;;  %1248 = vmatmul.msk.bf16.vlgmr.msrb.gmra.mxu0 %vm279_vm1, %v590_v0  ;;  %v707_v63 = vrot.slane %v1581_v1, 2  ;;  %v1655_v0 = vpack.c.b16 %v1364_v14, %v1364_v14  ;;  %v893_v36 = vsel %vm882_vm5, %v888_v47, %v892_v33  ;;  %v997_v48 = vsel %vm992_vm6, %v994_v24, %v996_v35 }
  0x2b   : > { %v792_v57 = vunpack.c.l.b16 %v184_v55  ;;  %v712_v59 = vsel %vm703_vm4, %v709_v17, %v711_v53  ;;  %v1000_v14 = vrot.slane %v1500_v16, 3 }
  0x2c   : > { %v708_v3 = vsel %vm703_vm4, %v705_v58, %v707_v63  ;;  %v619_v4 = vshrl.u32 %v1655_v0, 16  ;;  %v622_v11 = vshll.u32 %v1655_v0, 16  ;;  %v495_v7 = vrot.slane %v1655_v0, 1 }
  0x2d   : > { %v794_v45 = vpack.c.b16 %v792_v57, %v792_v57 }
  0x2e   : > { %v621_v5 = vrot.slane %v619_v4, 1  ;;  %v624_v6 = vrot.slane %v622_v11, 2  ;;  %v496_v1 = vsel %vm390_vm2, %v493_v18, %v495_v7  ;;  %v802_v7 = vrot.slane %v1500_v16, 2 }
  0x2f   : > { %v908_v62 = vshrl.u32 %v794_v45, 16  ;;  %v1002_v28 = vrot.slane %v794_v45, 3 }
  0x31   : > { %v910_v11 = vrot.slane %v908_v62, 2 }
  0x37   : > { %1198 = vmatmul.msk.bf16.gmra.mxu1 %vm279_vm1, %v1484_v8  ;;  %1214 = vmatmul.msk.bf16.vlgmr.msrb.gmra.mxu2 %vm279_vm1, %v393_v21  ;;  %v625_v21 = vor.u32 %v624_v6, %v621_v5  ;;  %v713_v6 = vrot.slane %v1655_v0, 2 }
  0x39   : > { %v626_v22 = vsel %vm573_vm3, %v616_v60, %v625_v21 }
  0x3a   : > { %1232 = vmatmul.msk.bf16.gmra.mxu3 %vm279_vm1, %v490_v23  ;;  %1249 = vmatmul.msk.bf16.gmra.mxu0 %vm279_vm1, %v599_v25  ;;  %v993_v23 = vrot.slane %v1484_v8, 3  ;;  %v894_v8 = vrot.slane %v259_v30, 2 }
  0x3c   : > { %v995_v25 = vsel %vm992_vm6, %v993_v23, %v994_v24  ;;  %v714_v23 = vsel %vm703_vm4, %v711_v53, %v713_v6  ;;  %v803_v24 = vsel %vm703_vm4, %v800_v54, %v802_v7 }
  0x47   : > { %1199 = vmatmul.msk.bf16.gmra.mxu1 %vm279_vm1, %v1487_v9  ;;  %1215 = vmatmul.msk.bf16.gmra.mxu2 %vm279_vm1, %v395_v37  ;;  %v895_v9 = vrot.slane %v255_v19, 3  ;;  %v798_v37 = vrot.slane %v1490_v10, 2 }
  0x49   : > { %v896_v38 = vor.u32 %v895_v9, %v894_v8  ;;  %v799_v41 = vsel %vm703_vm4, %v796_v32, %v798_v37  ;;  %v801_v60 = vsel %vm703_vm4, %v798_v37, %v800_v54  ;;  %v804_v9 = vrot.slane %v794_v45, 2 }
  0x4a   : > { %1233 = vmatmul.msk.bf16.gmra.mxu3 %vm279_vm1, %v492_v40  ;;  %1250 = vmatmul.msk.bf16.gmra.mxu0 %vm279_vm1, %v608_v42  ;;  %v710_v40 = vsel %vm703_vm4, %v707_v63, %v709_v17  ;;  %v998_v42 = vrot.slane %v1497_v15, 3  ;;  %v911_v63 = vshll.u32 %v794_v45, 16 }
  0x4b   : > { %v897_v30 = vsel %vm882_vm5, %v892_v33, %v896_v38 }
  0x4c   : > { %v999_v29 = vsel %vm992_vm6, %v996_v35, %v998_v42  ;;  %v1001_v47 = vsel %vm992_vm6, %v998_v42, %v1000_v14  ;;  %v913_v5 = vrot.slane %v911_v63, 3 }
  0x57   : > { %1200 = vmatmul.msk.bf16.gmra.mxu1 %vm279_vm1, %v1490_v10  ;;  %1216 = vmatmul.msk.bf16.gmra.mxu2 %vm279_vm1, %v397_v56  ;;  %v899_v10 = vshrl.u32 %v1500_v16, 16  ;;  %v1003_v16 = vsel %vm992_vm6, %v1000_v14, %v1002_v28 }
  0x59   : > { %v901_v51 = vrot.slane %v899_v10, 2 }
  0x5a   : > { %1234 = vmatmul.msk.bf16.gmra.mxu3 %vm279_vm1, %v494_v13  ;;  %1251 = vmatmul.msk.bf16.gmra.mxu0 %vm279_vm1, %v617_v12 }
  0x5b   : > { %v905_v56 = vor.u32 %v904_v52, %v901_v51 }
  0x67   : > { %1201 = vmatmul.msk.bf16.gmra.mxu1 %vm279_vm1, %v1497_v15  ;;  %1217 = vmatmul.msk.bf16.gmra.mxu2 %vm279_vm1, %v399_v20  ;;  %v906_v15 = vsel %vm882_vm5, %v896_v38, %v905_v56 }
  0x6a   : > { %1235 = vmatmul.msk.bf16.gmra.mxu3 %vm279_vm1, %v496_v1  ;;  %1252 = vmatmul.msk.bf16.gmra.mxu0 %vm279_vm1, %v626_v22  ;;  %v914_v1 = vor.u32 %v913_v5, %v910_v11 }
  0x6c   : > { %v915_v31 = vsel %vm882_vm5, %v905_v56, %v914_v1 }
  0x77   : > { %1218 = vmatmul.msk.bf16.gmra.mxu2 %vm279_vm1, %v401_v49  ;;  %1265 = vmatmul.msk.bf16.vlgmr.msra.gmra.mxu1 %vm279_vm1, %v706_v61 }
  0x7a   : > { %1299 = vmatmul.msk.bf16.vlgmr.msra.gmra.mxu3 %vm279_vm1, %v889_v2  ;;  %1316 = vmatmul.msk.bf16.vlgmr.msra.gmra.mxu0 %vm279_vm1, %v995_v25 }
  0x87   : > { %1266 = vmatmul.msk.bf16.gmra.mxu1 %vm279_vm1, %v708_v3  ;;  %1282 = vmatmul.msk.bf16.vlgmr.msra.gmra.mxu2 %vm279_vm1, %v797_v34 }
  0x8a   : > { %1300 = vmatmul.msk.bf16.gmra.mxu3 %vm279_vm1, %v893_v36  ;;  %1317 = vmatmul.msk.bf16.gmra.mxu0 %vm279_vm1, %v997_v48 }
  0x94   : > { %v309_v39 = vpop.f32.mrf.mxu1 }
  0x97   : > { %1267 = vmatmul.msk.bf16.gmra.mxu1 %vm279_vm1, %v710_v40  ;;  %1283 = vmatmul.msk.bf16.gmra.mxu2 %vm279_vm1, %v799_v41  ;;  %v304_v19 = vpop.f32.mrf.mxu0  ;;  %v805_v40 = vsel %vm703_vm4, %v802_v7, %v804_v9 }
  0x9a   : > { %v1705_v43 = vpop.f32.mrf.mxu2  ;;  %1301 = vmatmul.msk.bf16.gmra.mxu3 %vm279_vm1, %v897_v30  ;;  %1318 = vmatmul.msk.bf16.gmra.mxu0 %vm279_vm1, %v999_v29 }
  0x9c   : > { %v311_v49 = vpop.f32.mrf.mxu1 }
  0x9d   : > { %v1711_v50 = vpop.f32.mrf.mxu3 }
  0x9f   : > { %v306_v26 = vpop.f32.mrf.mxu0 }
  0xa2   : > { %v1716_v18 = vpop.f32.mrf.mxu2 }
  0xa4   : > { %v360_v58 = vpop.f32.mrf.mxu1 }
  0xa5   : > { %v361_v61 = vadd.f32 %v360_v58, %v304_v19  ;;  %v1720_v13 = vpop.f32.mrf.mxu3 }
  0xa7   : > { %1268 = vmatmul.msk.bf16.gmra.mxu1 %vm279_vm1, %v712_v59  ;;  %1284 = vmatmul.msk.bf16.gmra.mxu2 %vm279_vm1, %v801_v60  ;;  %v663_v46 = vpop.f32.mrf.mxu0 }
  0xaa   : > { %v319_v12 = vpop.f32.mrf.mxu2  ;;  %1302 = vmatmul.msk.bf16.gmra.mxu3 %vm279_vm1, %v906_v15  ;;  %1319 = vmatmul.msk.bf16.gmra.mxu0 %vm279_vm1, %v1001_v47 }
  0xac   : > { %v362_v2 = vpop.f32.mrf.mxu1 }
  0xad   : > { %v363_v3 = vadd.f32 %v362_v2, %v306_v26  ;;  %v533_v4 = vpop.f32.mrf.mxu3 }
  0xaf   : > { %v665_v20 = vpop.f32.mrf.mxu0 }
  0xb2   : > { %v321_v21 = vpop.f32.mrf.mxu2 }
  0xb4   : > { %v365_v22 = vpop.f32.mrf.mxu1 }
  0xb5   : > { %v366_v25 = vadd.f32 %v365_v22, %v309_v39  ;;  %v535_v27 = vpop.f32.mrf.mxu3 }
  0xb7   : > { %1269 = vmatmul.msk.bf16.gmra.mxu1 %vm279_vm1, %v714_v23  ;;  %1285 = vmatmul.msk.bf16.gmra.mxu2 %vm279_vm1, %v803_v24  ;;  %v668_v0 = vpop.f32.mrf.mxu0 }
  0xba   : > { %v438_v32 = vpop.f32.mrf.mxu2  ;;  %1303 = vmatmul.msk.bf16.gmra.mxu3 %vm279_vm1, %v915_v31  ;;  %1320 = vmatmul.msk.bf16.gmra.mxu0 %vm279_vm1, %v1003_v16 }
  0xbb   : > { %v463_v33 = vadd.f32 %v438_v32, %v361_v61 }
  0xbc   : > { %v367_v34 = vpop.f32.mrf.mxu1 }
  0xbd   : > { %v558_v35 = vadd.f32 %v533_v4, %v463_v33  ;;  %v368_v36 = vadd.f32 %v367_v34, %v311_v49  ;;  %v538_v48 = vpop.f32.mrf.mxu3 }
  0xbf   : > { %v1739_v8 = vadd.f32 %v663_v46, %v558_v35  ;;  %v670_v17 = vpop.f32.mrf.mxu0 }
  0xc2   : > { %v440_v37 = vpop.f32.mrf.mxu2 }
  0xc3   : > { %v464_v38 = vadd.f32 %v440_v37, %v363_v3 }
  0xc4   : > { %v370_v39 = vpop.f32.mrf.mxu1 }
  0xc5   : > { %v559_v41 = vadd.f32 %v535_v27, %v464_v38  ;;  %v371_v42 = vadd.f32 %v370_v39, %v1705_v43  ;;  %v540_v30 = vpop.f32.mrf.mxu3 }
  0xc7   : > { %1286 = vmatmul.msk.bf16.gmra.mxu2 %vm279_vm1, %v805_v40  ;;  %v1744_v19 = vadd.f32 %v665_v20, %v559_v41  ;;  %v673_v29 = vpop.f32.mrf.mxu0 }
  0xca   : > { %v443_v10 = vpop.f32.mrf.mxu2 }
  0xcb   : > { %v465_v44 = vadd.f32 %v443_v10, %v366_v25 }
  0xcc   : > { %v372_v49 = vpop.f32.mrf.mxu1 }
  0xcd   : > { %v560_v51 = vadd.f32 %v538_v48, %v465_v44  ;;  %v373_v52 = vadd.f32 %v372_v49, %v1716_v18  ;;  %v543_v53 = vpop.f32.mrf.mxu3  ;;  %v1769_v49 = vld [vmem:[%s1821_s2] ss:$0 sm:$0xff] }
  0xcf   : > { %v1747_v54 = vadd.f32 %v668_v0, %v560_v51  ;;  %v675_v55 = vpop.f32.mrf.mxu0 }
  0xd2   : > { %v445_v26 = vpop.f32.mrf.mxu2 }
  0xd3   : > { %v466_v56 = vadd.f32 %v445_v26, %v368_v36 }
  0xd4   : > { %v375_v57 = vpop.f32.mrf.mxu1 }
  0xd5   : > { %v561_v43 = vadd.f32 %v540_v30, %v466_v56  ;;  %v376_v58 = vadd.f32 %v375_v57, %v319_v12  ;;  %v545_v59 = vpop.f32.mrf.mxu3 }
  0xd7   : > { %v1749_v60 = vadd.f32 %v670_v17, %v561_v43  ;;  %v678_v61 = vpop.f32.mrf.mxu0 }
  0xda   : > { %v448_v14 = vpop.f32.mrf.mxu2 }
  0xdb   : > { %v467_v15 = vadd.f32 %v448_v14, %v371_v42 }
  0xdc   : > { %v377_v45 = vpop.f32.mrf.mxu1 }
  0xdd   : > { %v562_v46 = vadd.f32 %v543_v53, %v467_v15  ;;  %v378_v47 = vadd.f32 %v377_v45, %v321_v21  ;;  %v548_v62 = vpop.f32.mrf.mxu3 }
  0xdf   : > { %v1751_v18 = vadd.f32 %v673_v29, %v562_v46  ;;  %v680_v63 = vpop.f32.mrf.mxu0 }
  0xe2   : > { %v450_v2 = vpop.f32.mrf.mxu2 }
  0xe3   : > { %v468_v3 = vadd.f32 %v450_v2, %v373_v52 }
  0xe4   : > { %v380_v4 = vpop.f32.mrf.mxu1 }
  0xe5   : > { %v563_v11 = vadd.f32 %v545_v59, %v468_v3  ;;  %v381_v5 = vadd.f32 %v380_v4, %v1711_v50  ;;  %v550_v12 = vpop.f32.mrf.mxu3 }
  0xe7   : > { %v1754_v6 = vadd.f32 %v675_v55, %v563_v11  ;;  %v683_v7 = vpop.f32.mrf.mxu0 }
  0xea   : > { %v453_v20 = vpop.f32.mrf.mxu2 }
  0xeb   : > { %v469_v1 = vadd.f32 %v453_v20, %v376_v58 }
  0xec   : > { %v382_v22 = vpop.f32.mrf.mxu1 }
  0xed   : > { %v564_v23 = vadd.f32 %v548_v62, %v469_v1  ;;  %v383_v21 = vadd.f32 %v382_v22, %v1720_v13  ;;  %v553_v24 = vpop.f32.mrf.mxu3 }
  0xef   : > { %v1757_v25 = vadd.f32 %v678_v61, %v564_v23  ;;  %v685_v28 = vpop.f32.mrf.mxu0 }
  0xf2   : > { %v455_v27 = vpop.f32.mrf.mxu2 }
  0xf3   : > { %v470_v31 = vadd.f32 %v455_v27, %v378_v47 }
  0xf4   : > { %v751_v0 = vpop.f32.mrf.mxu1 }
  0xf5   : > { %v565_v16 = vadd.f32 %v550_v12, %v470_v31  ;;  %v555_v32 = vpop.f32.mrf.mxu3  ;;  %v776_v30 = vadd.f32 %v751_v0, %v1739_v8 }
  0xf7   : > { %v1759_v50 = vadd.f32 %v680_v63, %v565_v16  ;;  %v1040_v35 = vpop.f32.mrf.mxu0 }
  0xfa   : > { %v458_v33 = vpop.f32.mrf.mxu2 }
  0xfb   : > { %v471_v34 = vadd.f32 %v458_v33, %v381_v5 }
  0xfc   : > { %v753_v9 = vpop.f32.mrf.mxu1 }
  0xfd   : > { %v566_v36 = vadd.f32 %v553_v24, %v471_v34  ;;  %v952_v48 = vpop.f32.mrf.mxu3  ;;  %v777_v55 = vadd.f32 %v753_v9, %v1744_v19 }
  0xff   : > { %v1761_v17 = vadd.f32 %v683_v7, %v566_v36  ;;  %v1042_v40 = vpop.f32.mrf.mxu0 }
 0x102   : > { %v460_v13 = vpop.f32.mrf.mxu2 }
 0x103   : > { %v472_v37 = vadd.f32 %v460_v13, %v383_v21 }
 0x104   : > { %v756_v42 = vpop.f32.mrf.mxu1 }
 0x105   : > { %v567_v38 = vadd.f32 %v555_v32, %v472_v37  ;;  %v954_v39 = vpop.f32.mrf.mxu3  ;;  %v778_v19 = vadd.f32 %v756_v42, %v1747_v54 }
 0x107   : > { %v1763_v41 = vadd.f32 %v685_v28, %v567_v38  ;;  %v1045_v53 = vpop.f32.mrf.mxu0 }
 0x10a   : > { %v842_v29 = vpop.f32.mrf.mxu2 }
 0x10b   : > { %v867_v10 = vadd.f32 %v842_v29, %v776_v30 }
 0x10c   : > { %v758_v8 = vpop.f32.mrf.mxu1 }
 0x10d   : > { %v977_v44 = vadd.f32 %v952_v48, %v867_v10  ;;  %v957_v51 = vpop.f32.mrf.mxu3  ;;  %v779_v3 = vadd.f32 %v758_v8, %v1749_v60 }
 0x10f   : > { %v1065_v52 = vadd.f32 %v1040_v35, %v977_v44  ;;  %v1047_v45 = vpop.f32.mrf.mxu0 }
 0x111   : > { %v1079_v26 = vadd.f32 %v1769_v49, %v1065_v52 }
 0x112   : > { %v844_v56 = vpop.f32.mrf.mxu2 }
 0x113   : > { %v1089_v57 = vpack.c.bf16 %v1079_v26, %v1079_v26  ;;  %v868_v43 = vadd.f32 %v844_v56, %v777_v55 }
 0x114   : > { %v761_v62 = vpop.f32.mrf.mxu1 }
 0x115   : > { %1100 = vst.msk [vmem:[%s1777_s7] sm:$0xf] %vm1099_vm7, %v1089_v57  ;;  %v978_v58 = vadd.f32 %v954_v39, %v868_v43  ;;  %v959_v61 = vpop.f32.mrf.mxu3  ;;  %v780_v23 = vadd.f32 %v761_v62, %v1751_v18 }
 0x117   : > { %v1066_v59 = vadd.f32 %v1042_v40, %v978_v58  ;;  %v1050_v7 = vpop.f32.mrf.mxu0 }
 0x119   : > { %v1080_v14 = vadd.f32 %v1769_v49, %v1066_v59 }
 0x11a   : > { %v847_v15 = vpop.f32.mrf.mxu2 }
 0x11b   : > { %v1090_v46 = vpack.c.bf16 %v1080_v14, %v1080_v14  ;;  %v869_v47 = vadd.f32 %v847_v15, %v778_v19 }
 0x11c   : > { %v763_v1 = vpop.f32.mrf.mxu1 }
 0x11d   : > { %1101 = vst.msk [vmem:[%s1777_s7 + $0x4] sm:$0xf] %vm1099_vm7, %v1090_v46  ;;  %v979_v63 = vadd.f32 %v957_v51, %v869_v47  ;;  %v962_v5 = vpop.f32.mrf.mxu3  ;;  %v781_v33 = vadd.f32 %v763_v1, %v1754_v6 }
 0x11f   : > { %v1067_v2 = vadd.f32 %v1045_v53, %v979_v63  ;;  %v1052_v0 = vpop.f32.mrf.mxu0 }
 0x121   : > { %v1081_v4 = vadd.f32 %v1769_v49, %v1067_v2 }
 0x122   : > { %v849_v11 = vpop.f32.mrf.mxu2 }
 0x123   : > { %v1091_v54 = vpack.c.bf16 %v1081_v4, %v1081_v4  ;;  %v870_v12 = vadd.f32 %v849_v11, %v779_v3 }
 0x124   : > { %v766_v32 = vpop.f32.mrf.mxu1 }
 0x125   : > { %1102 = vst.msk [vmem:[%s1777_s7 + $0x8] sm:$0xf] %vm1099_vm7, %v1091_v54  ;;  %v980_v20 = vadd.f32 %v959_v61, %v870_v12  ;;  %v964_v28 = vpop.f32.mrf.mxu3  ;;  %v782_v38 = vadd.f32 %v766_v32, %v1757_v25 }
 0x127   : > { %v1068_v22 = vadd.f32 %v1047_v45, %v980_v20  ;;  %v1055_v37 = vpop.f32.mrf.mxu0 }
 0x129   : > { %v1082_v21 = vadd.f32 %v1769_v49, %v1068_v22 }
 0x12a   : > { %v852_v24 = vpop.f32.mrf.mxu2 }
 0x12b   : > { %v1092_v60 = vpack.c.bf16 %v1082_v21, %v1082_v21  ;;  %v871_v27 = vadd.f32 %v852_v24, %v780_v23 }
 0x12c   : > { %v768_v40 = vpop.f32.mrf.mxu1 }
 0x12d   : > { %1103 = vst.msk [vmem:[%s1777_s7 + $0xc] sm:$0xf] %vm1099_vm7, %v1092_v60  ;;  %v981_v31 = vadd.f32 %v962_v5, %v871_v27  ;;  %v967_v9 = vpop.f32.mrf.mxu3  ;;  %v783_v51 = vadd.f32 %v768_v40, %v1759_v50 }
 0x12f   : > { %v1069_v16 = vadd.f32 %v1050_v7, %v981_v31  ;;  %v1057_v53 = vpop.f32.mrf.mxu0 }
 0x131   : > { %v1083_v34 = vadd.f32 %v1769_v49, %v1069_v16 }
 0x132   : > { %v854_v35 = vpop.f32.mrf.mxu2 }
 0x133   : > { %v1093_v18 = vpack.c.bf16 %v1083_v34, %v1083_v34  ;;  %v872_v36 = vadd.f32 %v854_v35, %v781_v33 }
 0x134   : > { %v771_v8 = vpop.f32.mrf.mxu1 }
 0x135   : > { %1104 = vst.msk [vmem:[%s1777_s7 + $0x10] sm:$0xf] %vm1099_vm7, %v1093_v18  ;;  %v982_v48 = vadd.f32 %v964_v28, %v872_v36  ;;  %v969_v44 = vpop.f32.mrf.mxu3  ;;  %v784_v43 = vadd.f32 %v771_v8, %v1761_v17 }
 0x137   : > { %v1070_v13 = vadd.f32 %v1052_v0, %v982_v48  ;;  %v1060_v14 = vpop.f32.mrf.mxu0 }
 0x139   : > { %v1084_v39 = vadd.f32 %v1769_v49, %v1070_v13 }
 0x13a   : > { %v857_v42 = vpop.f32.mrf.mxu2 }
 0x13b   : > { %v1094_v6 = vpack.c.bf16 %v1084_v39, %v1084_v39  ;;  %v873_v30 = vadd.f32 %v857_v42, %v782_v38 }
 0x13c   : > { %v773_v45 = vpop.f32.mrf.mxu1 }
 0x13d   : > { %1105 = vst.msk [vmem:[%s1777_s7 + $0x14] sm:$0xf] %vm1099_vm7, %v1094_v6  ;;  %v983_v29 = vadd.f32 %v967_v9, %v873_v30  ;;  %v972_v59 = vpop.f32.mrf.mxu3  ;;  %v785_v47 = vadd.f32 %v773_v45, %v1763_v41 }
 0x13f   : > { %v1071_v10 = vadd.f32 %v1055_v37, %v983_v29  ;;  %v1062_v11 = vpop.f32.mrf.mxu0 }
 0x141   : > { %v1085_v52 = vadd.f32 %v1769_v49, %v1071_v10 }
 0x142   : > { %v859_v55 = vpop.f32.mrf.mxu2 }
 0x143   : > { %v1095_v25 = vpack.c.bf16 %v1085_v52, %v1085_v52  ;;  %v874_v26 = vadd.f32 %v859_v55, %v783_v51 }
 0x145   : > { %1106 = vst.msk [vmem:[%s1777_s7 + $0x18] sm:$0xf] %vm1099_vm7, %v1095_v25  ;;  %v984_v56 = vadd.f32 %v969_v44, %v874_v26  ;;  %v974_v3 = vpop.f32.mrf.mxu3 }
 0x147   : > { %v1072_v57 = vadd.f32 %v1057_v53, %v984_v56 }
 0x149   : > { %v1086_v58 = vadd.f32 %v1769_v49, %v1072_v57 }
 0x14a   : > { %v862_v61 = vpop.f32.mrf.mxu2 }
 0x14b   : > { %v1096_v50 = vpack.c.bf16 %v1086_v58, %v1086_v58  ;;  %v875_v19 = vadd.f32 %v862_v61, %v784_v43 }
 0x14d   : > { %1107 = vst.msk [vmem:[%s1777_s7 + $0x1c] sm:$0xf] %vm1099_vm7, %v1096_v50  ;;  %v985_v15 = vadd.f32 %v972_v59, %v875_v19 }
 0x14f   : > { %v1073_v46 = vadd.f32 %v1060_v14, %v985_v15 }
 0x151   : > { %v1087_v62 = vadd.f32 %v1769_v49, %v1073_v46 }
 0x152   : > { %v864_v63 = vpop.f32.mrf.mxu2 }
 0x153   : > { %v1097_v17 = vpack.c.bf16 %v1087_v62, %v1087_v62  ;;  %v876_v2 = vadd.f32 %v864_v63, %v785_v47 }
 0x155   : > { %1108 = vst.msk [vmem:[%s1777_s7 + $0x20] sm:$0xf] %vm1099_vm7, %v1097_v17  ;;  %v986_v4 = vadd.f32 %v974_v3, %v876_v2 }
 0x157   : > { %v1074_v5 = vadd.f32 %v1062_v11, %v986_v4 }
 0x159   : > { %v1088_v54 = vadd.f32 %v1769_v49, %v1074_v5 }
 0x15b   : > { %v1098_v12 = vpack.c.bf16 %v1088_v54, %v1088_v54 }
 0x15d   : > { %1109 = vst.msk [vmem:[%s1777_s7 + $0x24] sm:$0xf] %vm1099_vm7, %v1098_v12 }
 0x15e PF: > { %s13_s12 = sadd.s32 1, %s1421_s12  }
 0x15f   : > { %p10_p4 = scmp.ge.s32.totalorder %s13_s12, 4  }
 0x161   :  { %12 = sbr.rel (!%p10_p4) target bundleno = 1 (0x1), region = 70 }

// kernel: vqvae2_forward.57
= control target key start
LH: loop header
LB: loop body
LE: loop exit
PB: predicated region body
PF: predicated region fallthrough
CT: control target
= control target key end

     0   :  { %s1443_s12 = smov 0   ;;  %s1819_s0 = inlined_call_operand.vmem [shape: bf16[2,102,32], index: 0, kind: input, shape index: {}]   ;;  %s1820_s1 = inlined_call_operand.vmem [shape: bf16[9,32,12], index: 1, kind: input, shape index: {}]   ;;  %s1821_s2 = inlined_call_operand.vmem [shape: f32[1,12], index: 2, kind: input, shape index: {}]   ;;  %s1822_s3 = inlined_call_operand.vmem [shape: bf16[2,80,12], index: 3, kind: output, shape index: {}]  }
   0x1 LB: > { %s1165_s13 = sadd.s32 4294967295, %s1421_s12   ;;  %p1169_p0 = scmp.ge.s32.totalorder %s1421_s12, 1  ;;  %s1421_s12 = sphi %s1443_s12, %s13_s12  }
   0x2   : > { %p137_p1 = scmp.lt.s32.totalorder %s1421_s12, 3 }
   0x4   : > { %p138_p2 = pnand %p1169_p0, %p137_p1 }
   0x5   : > { %p161_p3 = scmp.lt.s32.totalorder (!%p138_p2), %s1165_s13, 1 }
   0x6   : > { %141 = sbr.rel (%p138_p2) target bundleno = 350 (0x15e), region = 32 }
   0xb   : > { %v1326_v0 = vld [vmem:[%s1820_s1 + $0x18] sm:$0xff]  ;;  %v1325_v1 = vld [vmem:[%s1820_s1 + $0x10] sm:$0xff]  ;;  %s1824_s13 = smov (!%p161_p3, %s1165_s13), 1  ;;  %v1328_v2 = vld [vmem:[%s1820_s1 + $0x28] sm:$0xff]  ;;  %vm222_vm0 = vsmask.f32 7424 }
   0xc   : > { %1398 = vmatpush.bf16.msra.mxu1 %v1326_v0  ;;  %1399 = vmatpush.bf16.msra.mxu2 %v1326_v0  ;;  %s1404_s20 = smul.u32 52, %s1824_s13  ;;  %v1324_v3 = vld [vmem:[%s1820_s1 + $0x8] sm:$0xff]  ;;  %v1330_v4 = vld [vmem:[%s1820_s1 + $0x38] sm:$0xff]  ;;  %v1323_v6 = vld [vmem:[%s1820_s1] sm:$0xff]  ;;  %vm279_vm1 = vcmask 261120   ;;  %vm390_vm2 = vcmask 1046528  }
   0xd   : > { %1400 = vmatpush.bf16.msra.mxu3 %v1326_v0  ;;  %301 = vmatpush.bf16.msra.mxu0 %v1326_v0  ;;  %v1332_v5 = vld [vmem:[%s1820_s1 + $0x48] sm:$0xff]  ;;  %v1327_v7 = vld [vmem:[%s1820_s1 + $0x20] sm:$0xff]  ;;  %v1329_v20 = vld [vmem:[%s1820_s1 + $0x30] sm:$0xff]  ;;  %vm573_vm3 = vsmask.f32 6400  ;;  %vm703_vm4 = vcmask 1045504  }
   0xe   : > { %s1475_s29 = scalar_lea.vmem %s1819_s0, %s1404_s20  ;;  %v1331_v21 = vld [vmem:[%s1820_s1 + $0x40] sm:$0xff]  ;;  %v1336_v39 = vld [vmem:[%s1820_s1 + $0x68] sm:$0xff]  ;;  %v1338_v40 = vld [vmem:[%s1820_s1 + $0x78] sm:$0xff]  ;;  %vm882_vm5 = vsmask.f32 5376  ;;  %vm992_vm6 = vcmask 1044480  }
   0xf   : > { %v1484_v8 = vld [vmem:[%s1475_s29 + $0x8] sm:$0xff]   ;;  %v1487_v9 = vld [vmem:[%s1475_s29 + $0x10] sm:$0xff]   ;;  %v1490_v10 = vld [vmem:[%s1475_s29 + $0x18] sm:$0xff]   ;;  %s1405_s4 = smul.u32 40, %s1824_s13  ;;  %vm1099_vm7 = vcmask 93184  }
  0x10   : > { %1401 = vmatpush.bf16.msra.mxu1 %v1325_v1  ;;  %1402 = vmatpush.bf16.msra.mxu2 %v1325_v1  ;;  %v231_v11 = vshll.u32 %v1484_v8, 16  ;;  %v235_v12 = vshrl.u32 %v1484_v8, 16  ;;  %v239_v13 = vshll.u32 %v1487_v9, 16  ;;  %v243_v14 = vshrl.u32 %v1487_v9, 16  ;;  %v1497_v15 = vld [vmem:[%s1475_s29 + $0x20] sm:$0xff]   ;;  %v1500_v16 = vld [vmem:[%s1475_s29 + $0x28] sm:$0xff]  }
  0x11   : > { %1403 = vmatpush.bf16.msra.mxu3 %v1325_v1  ;;  %302 = vmatpush.bf16.msra.mxu0 %v1325_v1  ;;  %v247_v17 = vshll.u32 %v1490_v10, 16  ;;  %v1504_v18 = vunpack.c.l.b16 %v1500_v16  ;;  %v255_v19 = vshll.u32 %v1497_v15, 16  ;;  %v1518_v24 = vld [vmem:[%s1475_s29] sm:$0xff]   ;;  %v259_v30 = vshrl.u32 %v1497_v15, 16  ;;  %v1334_v41 = vld [vmem:[%s1820_s1 + $0x58] sm:$0xff]  ;;  %v1340_v44 = vld [vmem:[%s1820_s1 + $0x88] sm:$0xff]  ;;  %s1777_s7 = scalar_lea.vmem %s1822_s3, %s1405_s4 }
  0x12   : > { %v233_v22 = vrot.slane %v231_v11, 1  ;;  %v241_v23 = vrot.slane %v239_v13, 1  ;;  %v224_v32 = vshrl.u32 %v1518_v24, 16  ;;  %v226_v33 = vshll.u32 %v1518_v24, 16  ;;  %v1558_v46 = vld [vmem:[%s1475_s29 + $0x4] sm:$0xff]   ;;  %v1561_v47 = vld [vmem:[%s1475_s29 + $0xc] sm:$0xff]  }
  0x13   : > { %v249_v25 = vrot.slane %v247_v17, 1  ;;  %v1524_v26 = vpack.c.b16 %v1504_v18, %v1504_v18  ;;  %v257_v27 = vrot.slane %v255_v19, 1  ;;  %v251_v48 = vshrl.u32 %v1490_v10, 16  ;;  %v1581_v1 = vld [vmem:[%s1475_s29 + $0x14] sm:$0xff]  }
  0x14   : > { %435 = vmatpush.bf16.msrb.mxu2 %v1328_v2  ;;  %357 = vmatpush.bf16.msrb.mxu1 %v1324_v3  ;;  %v237_v28 = vor.u32 %v235_v12, %v233_v22  ;;  %v245_v29 = vor.u32 %v243_v14, %v241_v23  ;;  %v228_v38 = vrot.slane %v226_v33, 1  ;;  %v575_v49 = vshrl.u32 %v1558_v46, 16 }
  0x15   : > { %530 = vmatpush.bf16.msrb.mxu3 %v1330_v4  ;;  %660 = vmatpush.bf16.msrb.mxu0 %v1332_v5  ;;  %v263_v31 = vshll.u32 %v1524_v26, 16  ;;  %v261_v36 = vor.u32 %v259_v30, %v257_v27  ;;  %v578_v50 = vshll.u32 %v1558_v46, 16  ;;  %v583_v51 = vshrl.u32 %v1561_v47, 16 }
  0x16   : > { %v242_v34 = vsel %vm222_vm0, %v237_v28, %v241_v23  ;;  %v250_v35 = vsel %vm222_vm0, %v245_v29, %v249_v25  ;;  %v229_v43 = vor.u32 %v228_v38, %v224_v32  ;;  %v586_v52 = vshll.u32 %v1561_v47, 16  ;;  %v1333_v28 = vld [vmem:[%s1820_s1 + $0x50] sm:$0xff]  ;;  %v1606_v29 = vld [vmem:[%s1475_s29 + $0x1c] sm:$0xff]  }
  0x17   : > { %1185 = vmatmul.msk.bf16.vlgmr.msra.gmra.mxu1 %vm279_vm1, %v242_v34  ;;  %1186 = vmatmul.msk.bf16.vlgmr.msra.gmra.mxu2 %vm279_vm1, %v250_v35  ;;  %v265_v37 = vrot.slane %v263_v31, 1  ;;  %v253_v53 = vor.u32 %v251_v48, %v249_v25  ;;  %v577_v54 = vrot.slane %v575_v49, 1  ;;  %v580_v55 = vrot.slane %v578_v50, 2 }
  0x18   : > { %436 = vmatpush.bf16.msrb.mxu2 %v1327_v7  ;;  %358 = vmatpush.bf16.msrb.mxu1 %v1323_v6  ;;  %v234_v45 = vsel %vm222_vm0, %v229_v43, %v233_v22  ;;  %v585_v56 = vrot.slane %v583_v51, 1  ;;  %v588_v57 = vrot.slane %v586_v52, 2  ;;  %v486_v58 = vrot.slane %v1558_v46, 1 }
  0x19   : > { %531 = vmatpush.bf16.msrb.mxu3 %v1329_v20  ;;  %661 = vmatpush.bf16.msrb.mxu0 %v1331_v21  ;;  %v266_v42 = vsel %vm222_vm0, %v261_v36, %v265_v37  ;;  %v487_v59 = vrot.slane %v1561_v47, 1  ;;  %v258_v60 = vsel %vm222_vm0, %v253_v53, %v257_v27  ;;  %v581_v61 = vor.u32 %v580_v55, %v577_v54  ;;  %v1337_v27 = vld [vmem:[%s1820_s1 + $0x70] sm:$0xff] }
  0x1a   : > { %1188 = vmatmul.msk.bf16.vlgmr.msra.gmra.mxu3 %vm279_vm1, %v266_v42  ;;  %1184 = vmatmul.msk.bf16.vlgmr.msra.gmra.mxu0 %vm279_vm1, %v234_v45  ;;  %v589_v62 = vor.u32 %v588_v57, %v585_v56  ;;  %v592_v2 = vshrl.u32 %v1581_v1, 16  ;;  %v595_v3 = vshll.u32 %v1581_v1, 16  ;;  %v391_v4 = vrot.slane %v1518_v24, 1 }
  0x1b   : > { %v488_v63 = vsel %vm390_vm2, %v486_v58, %v487_v59  ;;  %v392_v5 = vrot.slane %v1484_v8, 1  ;;  %v489_v20 = vrot.slane %v1581_v1, 1  ;;  %v601_v31 = vshrl.u32 %v1606_v29, 16 }
  0x1c   : > { %839 = vmatpush.bf16.msra.mxu2 %v1336_v39  ;;  %748 = vmatpush.bf16.msra.mxu1 %v1334_v41  ;;  %v590_v0 = vsel %vm573_vm3, %v581_v61, %v589_v62  ;;  %v594_v6 = vrot.slane %v592_v2, 1  ;;  %v597_v7 = vrot.slane %v595_v3, 2  ;;  %v604_v32 = vshll.u32 %v1606_v29, 16  ;;  %v1339_v41 = vld [vmem:[%s1820_s1 + $0x80] sm:$0xff] }
  0x1d   : > { %949 = vmatpush.bf16.msra.mxu3 %v1338_v40  ;;  %1037 = vmatpush.bf16.msra.mxu0 %v1340_v44  ;;  %v393_v21 = vsel %vm390_vm2, %v391_v4, %v392_v5  ;;  %v490_v23 = vsel %vm390_vm2, %v487_v59, %v489_v20  ;;  %v394_v33 = vrot.slane %v1487_v9, 1  ;;  %v603_v34 = vrot.slane %v601_v31, 1 }
  0x1e   : > { %v598_v22 = vor.u32 %v597_v7, %v594_v6  ;;  %v606_v35 = vrot.slane %v604_v32, 2  ;;  %v491_v36 = vrot.slane %v1606_v29, 1  ;;  %v1360_v39 = vunpack.c.h.b16 %v1497_v15 }
  0x1f   : > { %v395_v37 = vsel %vm390_vm2, %v392_v5, %v394_v33  ;;  %v398_v43 = vrot.slane %v1497_v15, 1  ;;  %v400_v44 = vrot.slane %v1524_v26, 1  ;;  %v396_v52 = vrot.slane %v1490_v10, 1 }
  0x20   : > { %v599_v25 = vsel %vm573_vm3, %v589_v62, %v598_v22  ;;  %749 = vmatpush.bf16.msra.mxu1 %v1333_v28  ;;  %v607_v38 = vor.u32 %v606_v35, %v603_v34  ;;  %v492_v40 = vsel %vm390_vm2, %v489_v20, %v491_v36  ;;  %v1627_v45 = vpack.c.b16 %v1504_v18, %v1360_v39 }
  0x21   : > { %950 = vmatpush.bf16.msra.mxu3 %v1337_v27  ;;  %1038 = vmatpush.bf16.msra.mxu0 %v1339_v41  ;;  %v401_v49 = vsel %vm390_vm2, %v398_v43, %v400_v44  ;;  %v887_v55 = vrot.slane %v239_v13, 3  ;;  %v886_v26 = vrot.slane %v243_v14, 2  ;;  %v397_v56 = vsel %vm390_vm2, %v394_v33, %v396_v52 }
  0x22   : > { %v608_v42 = vsel %vm573_vm3, %v598_v22, %v607_v38  ;;  %v610_v50 = vshrl.u32 %v1627_v45, 16  ;;  %v613_v51 = vshll.u32 %v1627_v45, 16  ;;  %v493_v18 = vrot.slane %v1627_v45, 1 }
  0x23   : > { %v704_v57 = vrot.slane %v1558_v46, 2  ;;  %v705_v58 = vrot.slane %v1561_v47, 2  ;;  %v883_v59 = vrot.slane %v235_v12, 2  ;;  %v1364_v14 = vunpack.c.h.b16 %v1500_v16 }
  0x24   : > { %v612_v53 = vrot.slane %v610_v50, 1  ;;  %v615_v54 = vrot.slane %v613_v51, 2  ;;  %v494_v13 = vsel %vm390_vm2, %v491_v36, %v493_v18  ;;  %v884_v46 = vrot.slane %v231_v11, 3 }
  0x25   : > { %v706_v61 = vsel %vm703_vm4, %v704_v57, %v705_v58  ;;  %v888_v47 = vor.u32 %v887_v55, %v886_v26  ;;  %v399_v20 = vsel %vm390_vm2, %v396_v52, %v398_v43  ;;  %v890_v27 = vrot.slane %v251_v48, 2  ;;  %v184_v55 = vld [vmem:[%s1475_s29 + $0x30] sm:$0x7] }
  0x26   : > { %v885_v62 = vor.u32 %v884_v46, %v883_v59  ;;  %v891_v28 = vrot.slane %v247_v17, 3  ;;  %v795_v31 = vrot.slane %v1484_v8, 2  ;;  %v796_v32 = vrot.slane %v1487_v9, 2 }
  0x27   : > { %1187 = vmatmul.msk.bf16.gmra.mxu2 %vm279_vm1, %v258_v60  ;;  %1197 = vmatmul.msk.bf16.vlgmr.msrb.gmra.mxu1 %vm279_vm1, %v1518_v24  ;;  %v1335_v24 = vld [vmem:[%s1820_s1 + $0x60] sm:$0xff]  ;;  %v616_v60 = vor.u32 %v615_v54, %v612_v53  ;;  %v996_v35 = vrot.slane %v1490_v10, 3  ;;  %v709_v17 = vrot.slane %v1606_v29, 2  ;;  %v902_v44 = vshll.u32 %v1500_v16, 16 }
  0x28   : > { %840 = vmatpush.bf16.msra.mxu2 %v1335_v24  ;;  %v889_v2 = vsel %vm882_vm5, %v885_v62, %v888_v47  ;;  %v994_v24 = vrot.slane %v1487_v9, 3  ;;  %v892_v33 = vor.u32 %v891_v28, %v890_v27  ;;  %v797_v34 = vsel %vm703_vm4, %v795_v31, %v796_v32 }
  0x29   : > { %v617_v12 = vsel %vm573_vm3, %v607_v38, %v616_v60  ;;  %v904_v52 = vrot.slane %v902_v44, 3  ;;  %v711_v53 = vrot.slane %v1627_v45, 2  ;;  %v800_v54 = vrot.slane %v1497_v15, 2 }
  0x2a   : > { %1231 = vmatmul.msk.bf16.vlgmr.msrb.gmra.mxu3 %vm279_vm1, %v488_v63  ;;  %1248 = vmatmul.msk.bf16.vlgmr.msrb.gmra.mxu0 %vm279_vm1, %v590_v0  ;;  %v707_v63 = vrot.slane %v1581_v1, 2  ;;  %v1655_v0 = vpack.c.b16 %v1364_v14, %v1364_v14  ;;  %v893_v36 = vsel %vm882_vm5, %v888_v47, %v892_v33  ;;  %v997_v48 = vsel %vm992_vm6, %v994_v24, %v996_v35 }
  0x2b   : > { %v792_v57 = vunpack.c.l.b16 %v184_v55  ;;  %v712_v59 = vsel %vm703_vm4, %v709_v17, %v711_v53  ;;  %v1000_v14 = vrot.slane %v1500_v16, 3 }
  0x2c   : > { %v708_v3 = vsel %vm703_vm4, %v705_v58, %v707_v63  ;;  %v619_v4 = vshrl.u32 %v1655_v0, 16  ;;  %v622_v11 = vshll.u32 %v1655_v0, 16  ;;  %v495_v7 = vrot.slane %v1655_v0, 1 }
  0x2d   : > { %v794_v45 = vpack.c.b16 %v792_v57, %v792_v57 }
  0x2e   : > { %v621_v5 = vrot.slane %v619_v4, 1  ;;  %v624_v6 = vrot.slane %v622_v11, 2  ;;  %v496_v1 = vsel %vm390_vm2, %v493_v18, %v495_v7  ;;  %v802_v7 = vrot.slane %v1500_v16, 2 }
  0x2f   : > { %v908_v62 = vshrl.u32 %v794_v45, 16  ;;  %v1002_v28 = vrot.slane %v794_v45, 3 }
  0x31   : > { %v910_v11 = vrot.slane %v908_v62, 2 }
  0x37   : > { %1198 = vmatmul.msk.bf16.gmra.mxu1 %vm279_vm1, %v1484_v8  ;;  %1214 = vmatmul.msk.bf16.vlgmr.msrb.gmra.mxu2 %vm279_vm1, %v393_v21  ;;  %v625_v21 = vor.u32 %v624_v6, %v621_v5  ;;  %v713_v6 = vrot.slane %v1655_v0, 2 }
  0x39   : > { %v626_v22 = vsel %vm573_vm3, %v616_v60, %v625_v21 }
  0x3a   : > { %1232 = vmatmul.msk.bf16.gmra.mxu3 %vm279_vm1, %v490_v23  ;;  %1249 = vmatmul.msk.bf16.gmra.mxu0 %vm279_vm1, %v599_v25  ;;  %v993_v23 = vrot.slane %v1484_v8, 3  ;;  %v894_v8 = vrot.slane %v259_v30, 2 }
  0x3c   : > { %v995_v25 = vsel %vm992_vm6, %v993_v23, %v994_v24  ;;  %v714_v23 = vsel %vm703_vm4, %v711_v53, %v713_v6  ;;  %v803_v24 = vsel %vm703_vm4, %v800_v54, %v802_v7 }
  0x47   : > { %1199 = vmatmul.msk.bf16.gmra.mxu1 %vm279_vm1, %v1487_v9  ;;  %1215 = vmatmul.msk.bf16.gmra.mxu2 %vm279_vm1, %v395_v37  ;;  %v895_v9 = vrot.slane %v255_v19, 3  ;;  %v798_v37 = vrot.slane %v1490_v10, 2 }
  0x49   : > { %v896_v38 = vor.u32 %v895_v9, %v894_v8  ;;  %v799_v41 = vsel %vm703_vm4, %v796_v32, %v798_v37  ;;  %v801_v60 = vsel %vm703_vm4, %v798_v37, %v800_v54  ;;  %v804_v9 = vrot.slane %v794_v45, 2 }
  0x4a   : > { %1233 = vmatmul.msk.bf16.gmra.mxu3 %vm279_vm1, %v492_v40  ;;  %1250 = vmatmul.msk.bf16.gmra.mxu0 %vm279_vm1, %v608_v42  ;;  %v710_v40 = vsel %vm703_vm4, %v707_v63, %v709_v17  ;;  %v998_v42 = vrot.slane %v1497_v15, 3  ;;  %v911_v63 = vshll.u32 %v794_v45, 16 }
  0x4b   : > { %v897_v30 = vsel %vm882_vm5, %v892_v33, %v896_v38 }
  0x4c   : > { %v999_v29 = vsel %vm992_vm6, %v996_v35, %v998_v42  ;;  %v1001_v47 = vsel %vm992_vm6, %v998_v42, %v1000_v14  ;;  %v913_v5 = vrot.slane %v911_v63, 3 }
  0x57   : > { %1200 = vmatmul.msk.bf16.gmra.mxu1 %vm279_vm1, %v1490_v10  ;;  %1216 = vmatmul.msk.bf16.gmra.mxu2 %vm279_vm1, %v397_v56  ;;  %v899_v10 = vshrl.u32 %v1500_v16, 16  ;;  %v1003_v16 = vsel %vm992_vm6, %v1000_v14, %v1002_v28 }
  0x59   : > { %v901_v51 = vrot.slane %v899_v10, 2 }
  0x5a   : > { %1234 = vmatmul.msk.bf16.gmra.mxu3 %vm279_vm1, %v494_v13  ;;  %1251 = vmatmul.msk.bf16.gmra.mxu0 %vm279_vm1, %v617_v12 }
  0x5b   : > { %v905_v56 = vor.u32 %v904_v52, %v901_v51 }
  0x67   : > { %1201 = vmatmul.msk.bf16.gmra.mxu1 %vm279_vm1, %v1497_v15  ;;  %1217 = vmatmul.msk.bf16.gmra.mxu2 %vm279_vm1, %v399_v20  ;;  %v906_v15 = vsel %vm882_vm5, %v896_v38, %v905_v56 }
  0x6a   : > { %1235 = vmatmul.msk.bf16.gmra.mxu3 %vm279_vm1, %v496_v1  ;;  %1252 = vmatmul.msk.bf16.gmra.mxu0 %vm279_vm1, %v626_v22  ;;  %v914_v1 = vor.u32 %v913_v5, %v910_v11 }
  0x6c   : > { %v915_v31 = vsel %vm882_vm5, %v905_v56, %v914_v1 }
  0x77   : > { %1218 = vmatmul.msk.bf16.gmra.mxu2 %vm279_vm1, %v401_v49  ;;  %1265 = vmatmul.msk.bf16.vlgmr.msra.gmra.mxu1 %vm279_vm1, %v706_v61 }
  0x7a   : > { %1299 = vmatmul.msk.bf16.vlgmr.msra.gmra.mxu3 %vm279_vm1, %v889_v2  ;;  %1316 = vmatmul.msk.bf16.vlgmr.msra.gmra.mxu0 %vm279_vm1, %v995_v25 }
  0x87   : > { %1266 = vmatmul.msk.bf16.gmra.mxu1 %vm279_vm1, %v708_v3  ;;  %1282 = vmatmul.msk.bf16.vlgmr.msra.gmra.mxu2 %vm279_vm1, %v797_v34 }
  0x8a   : > { %1300 = vmatmul.msk.bf16.gmra.mxu3 %vm279_vm1, %v893_v36  ;;  %1317 = vmatmul.msk.bf16.gmra.mxu0 %vm279_vm1, %v997_v48 }
  0x94   : > { %v309_v39 = vpop.f32.mrf.mxu1 }
  0x97   : > { %1267 = vmatmul.msk.bf16.gmra.mxu1 %vm279_vm1, %v710_v40  ;;  %1283 = vmatmul.msk.bf16.gmra.mxu2 %vm279_vm1, %v799_v41  ;;  %v304_v19 = vpop.f32.mrf.mxu0  ;;  %v805_v40 = vsel %vm703_vm4, %v802_v7, %v804_v9 }
  0x9a   : > { %v1705_v43 = vpop.f32.mrf.mxu2  ;;  %1301 = vmatmul.msk.bf16.gmra.mxu3 %vm279_vm1, %v897_v30  ;;  %1318 = vmatmul.msk.bf16.gmra.mxu0 %vm279_vm1, %v999_v29 }
  0x9c   : > { %v311_v49 = vpop.f32.mrf.mxu1 }
  0x9d   : > { %v1711_v50 = vpop.f32.mrf.mxu3 }
  0x9f   : > { %v306_v26 = vpop.f32.mrf.mxu0 }
  0xa2   : > { %v1716_v18 = vpop.f32.mrf.mxu2 }
  0xa4   : > { %v360_v58 = vpop.f32.mrf.mxu1 }
  0xa5   : > { %v361_v61 = vadd.f32 %v360_v58, %v304_v19  ;;  %v1720_v13 = vpop.f32.mrf.mxu3 }
  0xa7   : > { %1268 = vmatmul.msk.bf16.gmra.mxu1 %vm279_vm1, %v712_v59  ;;  %1284 = vmatmul.msk.bf16.gmra.mxu2 %vm279_vm1, %v801_v60  ;;  %v663_v46 = vpop.f32.mrf.mxu0 }
  0xaa   : > { %v319_v12 = vpop.f32.mrf.mxu2  ;;  %1302 = vmatmul.msk.bf16.gmra.mxu3 %vm279_vm1, %v906_v15  ;;  %1319 = vmatmul.msk.bf16.gmra.mxu0 %vm279_vm1, %v1001_v47 }
  0xac   : > { %v362_v2 = vpop.f32.mrf.mxu1 }
  0xad   : > { %v363_v3 = vadd.f32 %v362_v2, %v306_v26  ;;  %v533_v4 = vpop.f32.mrf.mxu3 }
  0xaf   : > { %v665_v20 = vpop.f32.mrf.mxu0 }
  0xb2   : > { %v321_v21 = vpop.f32.mrf.mxu2 }
  0xb4   : > { %v365_v22 = vpop.f32.mrf.mxu1 }
  0xb5   : > { %v366_v25 = vadd.f32 %v365_v22, %v309_v39  ;;  %v535_v27 = vpop.f32.mrf.mxu3 }
  0xb7   : > { %1269 = vmatmul.msk.bf16.gmra.mxu1 %vm279_vm1, %v714_v23  ;;  %1285 = vmatmul.msk.bf16.gmra.mxu2 %vm279_vm1, %v803_v24  ;;  %v668_v0 = vpop.f32.mrf.mxu0 }
  0xba   : > { %v438_v32 = vpop.f32.mrf.mxu2  ;;  %1303 = vmatmul.msk.bf16.gmra.mxu3 %vm279_vm1, %v915_v31  ;;  %1320 = vmatmul.msk.bf16.gmra.mxu0 %vm279_vm1, %v1003_v16 }
  0xbb   : > { %v463_v33 = vadd.f32 %v438_v32, %v361_v61 }
  0xbc   : > { %v367_v34 = vpop.f32.mrf.mxu1 }
  0xbd   : > { %v558_v35 = vadd.f32 %v533_v4, %v463_v33  ;;  %v368_v36 = vadd.f32 %v367_v34, %v311_v49  ;;  %v538_v48 = vpop.f32.mrf.mxu3 }
  0xbf   : > { %v1739_v8 = vadd.f32 %v663_v46, %v558_v35  ;;  %v670_v17 = vpop.f32.mrf.mxu0 }
  0xc2   : > { %v440_v37 = vpop.f32.mrf.mxu2 }
  0xc3   : > { %v464_v38 = vadd.f32 %v440_v37, %v363_v3 }
  0xc4   : > { %v370_v39 = vpop.f32.mrf.mxu1 }
  0xc5   : > { %v559_v41 = vadd.f32 %v535_v27, %v464_v38  ;;  %v371_v42 = vadd.f32 %v370_v39, %v1705_v43  ;;  %v540_v30 = vpop.f32.mrf.mxu3 }
  0xc7   : > { %1286 = vmatmul.msk.bf16.gmra.mxu2 %vm279_vm1, %v805_v40  ;;  %v1744_v19 = vadd.f32 %v665_v20, %v559_v41  ;;  %v673_v29 = vpop.f32.mrf.mxu0 }
  0xca   : > { %v443_v10 = vpop.f32.mrf.mxu2 }
  0xcb   : > { %v465_v44 = vadd.f32 %v443_v10, %v366_v25 }
  0xcc   : > { %v372_v49 = vpop.f32.mrf.mxu1 }
  0xcd   : > { %v560_v51 = vadd.f32 %v538_v48, %v465_v44  ;;  %v373_v52 = vadd.f32 %v372_v49, %v1716_v18  ;;  %v543_v53 = vpop.f32.mrf.mxu3  ;;  %v1769_v49 = vld [vmem:[%s1821_s2] ss:$0 sm:$0xff] }
  0xcf   : > { %v1747_v54 = vadd.f32 %v668_v0, %v560_v51  ;;  %v675_v55 = vpop.f32.mrf.mxu0 }
  0xd2   : > { %v445_v26 = vpop.f32.mrf.mxu2 }
  0xd3   : > { %v466_v56 = vadd.f32 %v445_v26, %v368_v36 }
  0xd4   : > { %v375_v57 = vpop.f32.mrf.mxu1 }
  0xd5   : > { %v561_v43 = vadd.f32 %v540_v30, %v466_v56  ;;  %v376_v58 = vadd.f32 %v375_v57, %v319_v12  ;;  %v545_v59 = vpop.f32.mrf.mxu3 }
  0xd7   : > { %v1749_v60 = vadd.f32 %v670_v17, %v561_v43  ;;  %v678_v61 = vpop.f32.mrf.mxu0 }
  0xda   : > { %v448_v14 = vpop.f32.mrf.mxu2 }
  0xdb   : > { %v467_v15 = vadd.f32 %v448_v14, %v371_v42 }
  0xdc   : > { %v377_v45 = vpop.f32.mrf.mxu1 }
  0xdd   : > { %v562_v46 = vadd.f32 %v543_v53, %v467_v15  ;;  %v378_v47 = vadd.f32 %v377_v45, %v321_v21  ;;  %v548_v62 = vpop.f32.mrf.mxu3 }
  0xdf   : > { %v1751_v18 = vadd.f32 %v673_v29, %v562_v46  ;;  %v680_v63 = vpop.f32.mrf.mxu0 }
  0xe2   : > { %v450_v2 = vpop.f32.mrf.mxu2 }
  0xe3   : > { %v468_v3 = vadd.f32 %v450_v2, %v373_v52 }
  0xe4   : > { %v380_v4 = vpop.f32.mrf.mxu1 }
  0xe5   : > { %v563_v11 = vadd.f32 %v545_v59, %v468_v3  ;;  %v381_v5 = vadd.f32 %v380_v4, %v1711_v50  ;;  %v550_v12 = vpop.f32.mrf.mxu3 }
  0xe7   : > { %v1754_v6 = vadd.f32 %v675_v55, %v563_v11  ;;  %v683_v7 = vpop.f32.mrf.mxu0 }
  0xea   : > { %v453_v20 = vpop.f32.mrf.mxu2 }
  0xeb   : > { %v469_v1 = vadd.f32 %v453_v20, %v376_v58 }
  0xec   : > { %v382_v22 = vpop.f32.mrf.mxu1 }
  0xed   : > { %v564_v23 = vadd.f32 %v548_v62, %v469_v1  ;;  %v383_v21 = vadd.f32 %v382_v22, %v1720_v13  ;;  %v553_v24 = vpop.f32.mrf.mxu3 }
  0xef   : > { %v1757_v25 = vadd.f32 %v678_v61, %v564_v23  ;;  %v685_v28 = vpop.f32.mrf.mxu0 }
  0xf2   : > { %v455_v27 = vpop.f32.mrf.mxu2 }
  0xf3   : > { %v470_v31 = vadd.f32 %v455_v27, %v378_v47 }
  0xf4   : > { %v751_v0 = vpop.f32.mrf.mxu1 }
  0xf5   : > { %v565_v16 = vadd.f32 %v550_v12, %v470_v31  ;;  %v555_v32 = vpop.f32.mrf.mxu3  ;;  %v776_v30 = vadd.f32 %v751_v0, %v1739_v8 }
  0xf7   : > { %v1759_v50 = vadd.f32 %v680_v63, %v565_v16  ;;  %v1040_v35 = vpop.f32.mrf.mxu0 }
  0xfa   : > { %v458_v33 = vpop.f32.mrf.mxu2 }
  0xfb   : > { %v471_v34 = vadd.f32 %v458_v33, %v381_v5 }
  0xfc   : > { %v753_v9 = vpop.f32.mrf.mxu1 }
  0xfd   : > { %v566_v36 = vadd.f32 %v553_v24, %v471_v34  ;;  %v952_v48 = vpop.f32.mrf.mxu3  ;;  %v777_v55 = vadd.f32 %v753_v9, %v1744_v19 }
  0xff   : > { %v1761_v17 = vadd.f32 %v683_v7, %v566_v36  ;;  %v1042_v40 = vpop.f32.mrf.mxu0 }
 0x102   : > { %v460_v13 = vpop.f32.mrf.mxu2 }
 0x103   : > { %v472_v37 = vadd.f32 %v460_v13, %v383_v21 }
 0x104   : > { %v756_v42 = vpop.f32.mrf.mxu1 }
 0x105   : > { %v567_v38 = vadd.f32 %v555_v32, %v472_v37  ;;  %v954_v39 = vpop.f32.mrf.mxu3  ;;  %v778_v19 = vadd.f32 %v756_v42, %v1747_v54 }
 0x107   : > { %v1763_v41 = vadd.f32 %v685_v28, %v567_v38  ;;  %v1045_v53 = vpop.f32.mrf.mxu0 }
 0x10a   : > { %v842_v29 = vpop.f32.mrf.mxu2 }
 0x10b   : > { %v867_v10 = vadd.f32 %v842_v29, %v776_v30 }
 0x10c   : > { %v758_v8 = vpop.f32.mrf.mxu1 }
 0x10d   : > { %v977_v44 = vadd.f32 %v952_v48, %v867_v10  ;;  %v957_v51 = vpop.f32.mrf.mxu3  ;;  %v779_v3 = vadd.f32 %v758_v8, %v1749_v60 }
 0x10f   : > { %v1065_v52 = vadd.f32 %v1040_v35, %v977_v44  ;;  %v1047_v45 = vpop.f32.mrf.mxu0 }
 0x111   : > { %v1079_v26 = vadd.f32 %v1769_v49, %v1065_v52 }
 0x112   : > { %v844_v56 = vpop.f32.mrf.mxu2 }
 0x113   : > { %v1089_v57 = vpack.c.bf16 %v1079_v26, %v1079_v26  ;;  %v868_v43 = vadd.f32 %v844_v56, %v777_v55 }
 0x114   : > { %v761_v62 = vpop.f32.mrf.mxu1 }
 0x115   : > { %1100 = vst.msk [vmem:[%s1777_s7] sm:$0xf] %vm1099_vm7, %v1089_v57  ;;  %v978_v58 = vadd.f32 %v954_v39, %v868_v43  ;;  %v959_v61 = vpop.f32.mrf.mxu3  ;;  %v780_v23 = vadd.f32 %v761_v62, %v1751_v18 }
 0x117   : > { %v1066_v59 = vadd.f32 %v1042_v40, %v978_v58  ;;  %v1050_v7 = vpop.f32.mrf.mxu0 }
 0x119   : > { %v1080_v14 = vadd.f32 %v1769_v49, %v1066_v59 }
 0x11a   : > { %v847_v15 = vpop.f32.mrf.mxu2 }
 0x11b   : > { %v1090_v46 = vpack.c.bf16 %v1080_v14, %v1080_v14  ;;  %v869_v47 = vadd.f32 %v847_v15, %v778_v19 }
 0x11c   : > { %v763_v1 = vpop.f32.mrf.mxu1 }
 0x11d   : > { %1101 = vst.msk [vmem:[%s1777_s7 + $0x4] sm:$0xf] %vm1099_vm7, %v1090_v46  ;;  %v979_v63 = vadd.f32 %v957_v51, %v869_v47  ;;  %v962_v5 = vpop.f32.mrf.mxu3  ;;  %v781_v33 = vadd.f32 %v763_v1, %v1754_v6 }
 0x11f   : > { %v1067_v2 = vadd.f32 %v1045_v53, %v979_v63  ;;  %v1052_v0 = vpop.f32.mrf.mxu0 }
 0x121   : > { %v1081_v4 = vadd.f32 %v1769_v49, %v1067_v2 }
 0x122   : > { %v849_v11 = vpop.f32.mrf.mxu2 }
 0x123   : > { %v1091_v54 = vpack.c.bf16 %v1081_v4, %v1081_v4  ;;  %v870_v12 = vadd.f32 %v849_v11, %v779_v3 }
 0x124   : > { %v766_v32 = vpop.f32.mrf.mxu1 }
 0x125   : > { %1102 = vst.msk [vmem:[%s1777_s7 + $0x8] sm:$0xf] %vm1099_vm7, %v1091_v54  ;;  %v980_v20 = vadd.f32 %v959_v61, %v870_v12  ;;  %v964_v28 = vpop.f32.mrf.mxu3  ;;  %v782_v38 = vadd.f32 %v766_v32, %v1757_v25 }
 0x127   : > { %v1068_v22 = vadd.f32 %v1047_v45, %v980_v20  ;;  %v1055_v37 = vpop.f32.mrf.mxu0 }
 0x129   : > { %v1082_v21 = vadd.f32 %v1769_v49, %v1068_v22 }
 0x12a   : > { %v852_v24 = vpop.f32.mrf.mxu2 }
 0x12b   : > { %v1092_v60 = vpack.c.bf16 %v1082_v21, %v1082_v21  ;;  %v871_v27 = vadd.f32 %v852_v24, %v780_v23 }
 0x12c   : > { %v768_v40 = vpop.f32.mrf.mxu1 }
 0x12d   : > { %1103 = vst.msk [vmem:[%s1777_s7 + $0xc] sm:$0xf] %vm1099_vm7, %v1092_v60  ;;  %v981_v31 = vadd.f32 %v962_v5, %v871_v27  ;;  %v967_v9 = vpop.f32.mrf.mxu3  ;;  %v783_v51 = vadd.f32 %v768_v40, %v1759_v50 }
 0x12f   : > { %v1069_v16 = vadd.f32 %v1050_v7, %v981_v31  ;;  %v1057_v53 = vpop.f32.mrf.mxu0 }
 0x131   : > { %v1083_v34 = vadd.f32 %v1769_v49, %v1069_v16 }
 0x132   : > { %v854_v35 = vpop.f32.mrf.mxu2 }
 0x133   : > { %v1093_v18 = vpack.c.bf16 %v1083_v34, %v1083_v34  ;;  %v872_v36 = vadd.f32 %v854_v35, %v781_v33 }
 0x134   : > { %v771_v8 = vpop.f32.mrf.mxu1 }
 0x135   : > { %1104 = vst.msk [vmem:[%s1777_s7 + $0x10] sm:$0xf] %vm1099_vm7, %v1093_v18  ;;  %v982_v48 = vadd.f32 %v964_v28, %v872_v36  ;;  %v969_v44 = vpop.f32.mrf.mxu3  ;;  %v784_v43 = vadd.f32 %v771_v8, %v1761_v17 }
 0x137   : > { %v1070_v13 = vadd.f32 %v1052_v0, %v982_v48  ;;  %v1060_v14 = vpop.f32.mrf.mxu0 }
 0x139   : > { %v1084_v39 = vadd.f32 %v1769_v49, %v1070_v13 }
 0x13a   : > { %v857_v42 = vpop.f32.mrf.mxu2 }
 0x13b   : > { %v1094_v6 = vpack.c.bf16 %v1084_v39, %v1084_v39  ;;  %v873_v30 = vadd.f32 %v857_v42, %v782_v38 }
 0x13c   : > { %v773_v45 = vpop.f32.mrf.mxu1 }
 0x13d   : > { %1105 = vst.msk [vmem:[%s1777_s7 + $0x14] sm:$0xf] %vm1099_vm7, %v1094_v6  ;;  %v983_v29 = vadd.f32 %v967_v9, %v873_v30  ;;  %v972_v59 = vpop.f32.mrf.mxu3  ;;  %v785_v47 = vadd.f32 %v773_v45, %v1763_v41 }
 0x13f   : > { %v1071_v10 = vadd.f32 %v1055_v37, %v983_v29  ;;  %v1062_v11 = vpop.f32.mrf.mxu0 }
 0x141   : > { %v1085_v52 = vadd.f32 %v1769_v49, %v1071_v10 }
 0x142   : > { %v859_v55 = vpop.f32.mrf.mxu2 }
 0x143   : > { %v1095_v25 = vpack.c.bf16 %v1085_v52, %v1085_v52  ;;  %v874_v26 = vadd.f32 %v859_v55, %v783_v51 }
 0x145   : > { %1106 = vst.msk [vmem:[%s1777_s7 + $0x18] sm:$0xf] %vm1099_vm7, %v1095_v25  ;;  %v984_v56 = vadd.f32 %v969_v44, %v874_v26  ;;  %v974_v3 = vpop.f32.mrf.mxu3 }
 0x147   : > { %v1072_v57 = vadd.f32 %v1057_v53, %v984_v56 }
 0x149   : > { %v1086_v58 = vadd.f32 %v1769_v49, %v1072_v57 }
 0x14a   : > { %v862_v61 = vpop.f32.mrf.mxu2 }
 0x14b   : > { %v1096_v50 = vpack.c.bf16 %v1086_v58, %v1086_v58  ;;  %v875_v19 = vadd.f32 %v862_v61, %v784_v43 }
 0x14d   : > { %1107 = vst.msk [vmem:[%s1777_s7 + $0x1c] sm:$0xf] %vm1099_vm7, %v1096_v50  ;;  %v985_v15 = vadd.f32 %v972_v59, %v875_v19 }
 0x14f   : > { %v1073_v46 = vadd.f32 %v1060_v14, %v985_v15 }
 0x151   : > { %v1087_v62 = vadd.f32 %v1769_v49, %v1073_v46 }
 0x152   : > { %v864_v63 = vpop.f32.mrf.mxu2 }
 0x153   : > { %v1097_v17 = vpack.c.bf16 %v1087_v62, %v1087_v62  ;;  %v876_v2 = vadd.f32 %v864_v63, %v785_v47 }
 0x155   : > { %1108 = vst.msk [vmem:[%s1777_s7 + $0x20] sm:$0xf] %vm1099_vm7, %v1097_v17  ;;  %v986_v4 = vadd.f32 %v974_v3, %v876_v2 }
 0x157   : > { %v1074_v5 = vadd.f32 %v1062_v11, %v986_v4 }
 0x159   : > { %v1088_v54 = vadd.f32 %v1769_v49, %v1074_v5 }
 0x15b   : > { %v1098_v12 = vpack.c.bf16 %v1088_v54, %v1088_v54 }
 0x15d   : > { %1109 = vst.msk [vmem:[%s1777_s7 + $0x24] sm:$0xf] %vm1099_vm7, %v1098_v12 }
 0x15e PF: > { %s13_s12 = sadd.s32 1, %s1421_s12  }
 0x15f   : > { %p10_p4 = scmp.ge.s32.totalorder %s13_s12, 4  }
 0x161   :  { %12 = sbr.rel (!%p10_p4) target bundleno = 1 (0x1), region = 70 }

</bundles_post_ra>
